<compile_context>
chip_gen: v5e
topology: v5e:2x2
jax: 0.10.0
libtpu: 0.0.40
codegen_flags: <defaults>
</compile_context>

<pallas_src>
import functools

import jax
import jax.numpy as jnp
from jax.experimental import pallas as pl
from jax.experimental.pallas import tpu as pltpu

LN_EPS = 1e-5       # torch.nn.LayerNorm default
ADD_EPS = 1e-12     # Add module epsilon


def ba_ffn_kernel(
    x_ref,                       # (Bb, dim, N)  NCL input block
    g1_ref, b1_ref,              # (1, dim)      LayerNorm1 gamma / beta
    wq_ref,                      # (1, dim)      query projection row (VPU reduce form)
    wkv_ref, bkv_ref,            # (dim, 2*dim) bf16, (1, 2*dim) f32  fused key/value proj
    wp_ref, bp_ref,              # (dim, dim)   bf16, (1, dim)   f32  attention out proj
    g2_ref, b2_ref,              # (1, dim)      LayerNorm2 gamma / beta
    w1_ref, bb1_ref,             # (dim, ffn)   bf16, (1, ffn)   f32  FFN in
    w2_ref, bb2_ref,             # (ffn, dim)   bf16, (1, dim)   f32  FFN out
    sc_ref,                      # (5,) f32 SMEM: [bq, add1_w0, add1_w1, add2_w0, add2_w1]
    o_ref,                       # (Bb, dim, N)  NCL output block
    xnd_ref,                     # (Bb*N, dim) f32 scratch: transposed pre-norm input
    kbuf_ref,                    # (Bb*N, dim) f32 scratch: key projection
    vbuf_ref,                    # (Bb*N, dim) f32 scratch: relu(value) (later *ctx)
    qbuf_ref,                    # (Bb*N, 1)   f32 scratch: query logits
    *, bb, seq_n, tr_head, tr_tail,
):
    dim = x_ref.shape[1]
    n = seq_n
    rows_total = bb * n
    n_head_tiles = n // tr_head            # column tiles per batch element (static)
    n_tail_tiles = rows_total // tr_tail   # row tiles over the stacked rows (static)

    # ---- scalars / small params, read once ----
    bq = sc_ref[0]
    w10 = jnp.maximum(sc_ref[1], 0.0)
    w11 = jnp.maximum(sc_ref[2], 0.0)
    s1 = w10 + w11 + ADD_EPS
    add1_a, add1_b = w10 / s1, w11 / s1
    w20 = jnp.maximum(sc_ref[3], 0.0)
    w21 = jnp.maximum(sc_ref[4], 0.0)
    s2 = w20 + w21 + ADD_EPS
    add2_a, add2_b = w20 / s2, w21 / s2

    gamma1, beta1 = g1_ref[...], b1_ref[...]
    gamma2, beta2 = g2_ref[...], b2_ref[...]
    wq = wq_ref[...]

    # ================= head: per (batch element, column tile) =================
    # Python-unrolled (static trip counts): the per-tile XLU transpose / LN / EUP work can be
    # scheduled against the next tile's MXU kv pushes.
    for b in range(bb):
        for ct in range(n_head_tiles):
            c0 = ct * tr_head
            r0 = b * n + c0
            rows = pl.ds(r0, tr_head)

            # single in-kernel transpose of this NCL chunk: (dim, T) -> (T, dim)
            x_t = jnp.transpose(x_ref[b, :, pl.ds(c0, tr_head)], (1, 0))
            xnd_ref[rows, :] = x_t

            # LayerNorm1 over channels
            mu = jnp.mean(x_t, axis=-1, keepdims=True)
            var = jnp.mean(jnp.square(x_t - mu), axis=-1, keepdims=True)
            xn_t = (x_t - mu) * jax.lax.rsqrt(var + LN_EPS) * gamma1 + beta1

            # query projection: (dim -> 1) as a cheap VPU lane-reduce, staged to scratch
            qbuf_ref[rows, :] = jnp.sum(xn_t * wq, axis=-1, keepdims=True) + bq

            # fused key/value projection on the MXU (bf16 in, f32 acc); stage straight to
            # VMEM scratch so the (T, 2*dim) result is never live past this tile.
            kv_t = jnp.dot(xn_t.astype(jnp.bfloat16), wkv_ref[...],
                           preferred_element_type=jnp.float32) + bkv_ref[...]
            kbuf_ref[rows, :] = kv_t[:, :dim]
            vbuf_ref[rows, :] = jnp.maximum(kv_t[:, dim:], 0.0)      # relu(value)

        # ---- per-batch softmax over the sequence + broadcast context vector ----
        # TODO(synk): this stage is not column-tiled; fine for moderate N, revisit for N >> 1k.
        rows_b = pl.ds(b * n, n)
        qb = qbuf_ref[rows_b, :]                                             # (N, 1)
        e = jnp.exp(qb - jnp.max(qb, axis=0, keepdims=True))
        scores = e * pl.reciprocal(jnp.sum(e, axis=0, keepdims=True), approx=True)
        ctx = jnp.sum(kbuf_ref[rows_b, :] * scores, axis=0, keepdims=True)   # (1, dim)

        # fold relu(value) * ctx into the value scratch (tiled, bounded live state)
        for ct in range(n_head_tiles):
            rows = pl.ds(b * n + ct * tr_head, tr_head)
            vbuf_ref[rows, :] = vbuf_ref[rows, :] * ctx

    # ================= tail: row-tiled over all Bb*N stacked rows =================
    # relu(v)*ctx -> Wp -> Add1 -> LN2 -> FFN -> Add2 -> per-tile transpose back to NCL.
    for ti in range(n_tail_tiles):
        r0 = ti * tr_tail
        rows = pl.ds(r0, tr_tail)

        a_t = vbuf_ref[rows, :]                                              # relu(v) * ctx
        attn_t = jnp.dot(a_t.astype(jnp.bfloat16), wp_ref[...],
                         preferred_element_type=jnp.float32) + bp_ref[...]
        x_t = xnd_ref[rows, :]
        x1_t = add1_a * attn_t + add1_b * x_t                                # Add1

        mu2 = jnp.mean(x1_t, axis=-1, keepdims=True)
        var2 = jnp.mean(jnp.square(x1_t - mu2), axis=-1, keepdims=True)
        xn2_t = (x1_t - mu2) * jax.lax.rsqrt(var2 + LN_EPS) * gamma2 + beta2

        h_t = jnp.dot(xn2_t.astype(jnp.bfloat16), w1_ref[...],
                      preferred_element_type=jnp.float32) + bb1_ref[...]     # (TR, ffn)
        h_t = jax.nn.gelu(h_t, approximate=True)    # tanh GELU on the EUP (~3e-4 vs erf)
        f_t = jnp.dot(h_t.astype(jnp.bfloat16), w2_ref[...],
                      preferred_element_type=jnp.float32) + bb2_ref[...]     # (TR, dim)
        x2_t = add2_a * f_t + add2_b * x1_t                                  # Add2

        # lane-dense NCL store, transpose folded per tile (overlaps next tile's MXU work)
        if tr_tail <= n:            # tile lies inside a single batch element
            bi = r0 // n
            col0 = r0 - bi * n
            o_ref[bi, :, pl.ds(col0, tr_tail)] = jnp.transpose(x2_t, (1, 0))
        else:                       # tile covers whole batch elements
            bi0 = r0 // n
            for j in range(tr_tail // n):
                o_ref[bi0 + j, :, :] = jnp.transpose(x2_t[j * n:(j + 1) * n, :], (1, 0))


# --------------------------- tiling / blocking heuristics ---------------------------

def _round_down_128(v):
    return max(128, (v // 128) * 128)


def _head_tile(n, dim):
    """Column tile for the head: multiple of 128 dividing N, with the (tile, 2*dim) f32 kv
    intermediate bounded to ~1 MiB."""
    cap = _round_down_128((1 << 20) // (8 * dim))
    best, t = 0, 128
    while t <= min(n, cap):
        if n % t == 0:
            best = t
        t += 128
    if best:
        return best
    # TODO(synk): pad/mask non-128-aligned sequence lengths instead of a monolithic tile.
    return n


def _tail_tile(n, bb, ffn_dim):
    """Row tile over the stacked Bb*N rows: multiple of 128 that either divides N or spans
    whole batch elements; (tile, ffn) f32 GELU intermediate bounded to ~1 MiB."""
    rows = bb * n
    cap = _round_down_128((1 << 20) // (4 * ffn_dim))
    best, t = 0, 128
    while t <= min(rows, cap):
        if (n % t == 0) or (t % n == 0 and rows % t == 0):
            best = t
        t += 128
    return best if best else n


def _batch_block(batch, n):
    """Batch elements per grid step: raise matmul M toward >=256 rows (v6e/v7x MXU fill)
    while keeping >=2 grid steps so both v7x TensorCores get work."""
    for bb in (4, 2):
        if batch % bb == 0 and batch // bb >= 2 and bb * n <= 1024:
            return bb
    return 1


# --------------------------------- wrapper ---------------------------------

def ba_ffn_block(x_ncl, params):
    """x_ncl: (B, dim, N) float32 (PyTorch Conv1d NCL layout). Returns the same layout."""
    B, dim, N = x_ncl.shape
    ffn_dim = params["w1"].shape[1]

    bb = _batch_block(B, N)
    grid_steps = B // bb
    rows = bb * N
    tr_h = _head_tile(N, dim)
    tr_t = _tail_tile(N, bb, ffn_dim)

    # scalar bundle for SMEM: [bq, add1_w0, add1_w1, add2_w0, add2_w1]
    scalars = jnp.concatenate(
        [params["bq"].reshape(-1), params["wadd1"].reshape(-1),
         params["wadd2"].reshape(-1)]).astype(jnp.float32)

    def wspec(shape):
        nd = len(shape)
        # constant across the batch grid -> single-buffered (halves resident weight VMEM)
        return pl.BlockSpec(shape, lambda g, _nd=nd: (0,) * _nd,
                            pipeline_mode=pl.Buffered(1))

    in_specs = [
        pl.BlockSpec((bb, dim, N), lambda g: (g, 0, 0)),     # x (NCL block)
        wspec((1, dim)), wspec((1, dim)),                    # gamma1, beta1
        wspec((1, dim)),                                     # wq
        wspec((dim, 2 * dim)), wspec((1, 2 * dim)),          # wkv, bkv
        wspec((dim, dim)), wspec((1, dim)),                  # wp, bp
        wspec((1, dim)), wspec((1, dim)),                    # gamma2, beta2
        wspec((dim, ffn_dim)), wspec((1, ffn_dim)),          # w1, b1
        wspec((ffn_dim, dim)), wspec((1, dim)),              # w2, b2
        pl.BlockSpec(memory_space=pltpu.SMEM),               # scalar bundle
    ]

    # scoped-VMEM budget: bf16 single-buffered weights + f32 small params + double-buffered
    # NCL in/out blocks + scratch slabs + bounded per-tile intermediates + margin.
    wbytes = 2 * (2 * dim * dim + dim * dim + 2 * dim * ffn_dim) \
        + 4 * (11 * dim + ffn_dim)
    io_bytes = 2 * 2 * (bb * dim * N * 4)
    scratch_bytes = (3 * rows * dim + rows * 128) * 4
    interm_bytes = (5 * tr_h * dim + 2 * tr_t * ffn_dim + 6 * tr_t * dim) * 4
    budget = wbytes + io_bytes + scratch_bytes + interm_bytes + (4 << 20)

    vmem_cap = 64 << 20
    try:
        vmem_cap = int(getattr(pltpu.get_tpu_info(), "vmem_capacity_bytes", vmem_cap))
    except Exception:
        pass
    vmem_limit = int(min(max(budget, 16 << 20), max(int(0.75 * vmem_cap), 32 << 20)))

    kernel = functools.partial(ba_ffn_kernel, bb=bb, seq_n=N,
                               tr_head=tr_h, tr_tail=tr_t)
    return pl.pallas_call(
        kernel,
        out_shape=jax.ShapeDtypeStruct((B, dim, N), jnp.float32),
        grid=(grid_steps,),
        in_specs=in_specs,
        out_specs=pl.BlockSpec((bb, dim, N), lambda g: (g, 0, 0)),
        scratch_shapes=[pltpu.VMEM((rows, dim), jnp.float32),   # transposed input
                        pltpu.VMEM((rows, dim), jnp.float32),   # keys
                        pltpu.VMEM((rows, dim), jnp.float32),   # relu(values) (*ctx)
                        pltpu.VMEM((rows, 1), jnp.float32)],    # query logits
        compiler_params=pltpu.CompilerParams(
            dimension_semantics=("parallel",),
            vmem_limit_bytes=vmem_limit),
    )(
        x_ncl,
        params["gamma1"], params["beta1"],
        params["wq"],
        params["wkv"], params["bkv"],
        params["wp"], params["bp"],
        params["gamma2"], params["beta2"],
        params["w1"], params["b1"],
        params["w2"], params["b2"],
        scalars,
    )


# --------------------------- params / reference / test ---------------------------

def init_params(key, dim, ffn_dim):
    ks = jax.random.split(key, 8)
    scale = 0.1
    # qkv_proj weight is (1 + 2*dim, dim) in torch; row 0 is the query, the rest is key/value.
    wqkv = scale * jax.random.normal(ks[0], (1 + 2 * dim, dim), jnp.float32)
    bqkv = scale * jax.random.normal(ks[1], (1 + 2 * dim,), jnp.float32)
    wp = scale * jax.random.normal(ks[2], (dim, dim), jnp.float32)
    bp = scale * jax.random.normal(ks[3], (dim,), jnp.float32)
    w1 = scale * jax.random.normal(ks[4], (ffn_dim, dim), jnp.float32)
    b1 = scale * jax.random.normal(ks[5], (ffn_dim,), jnp.float32)
    w2 = scale * jax.random.normal(ks[6], (dim, ffn_dim), jnp.float32)
    b2 = scale * jax.random.normal(ks[7], (dim,), jnp.float32)
    return dict(
        gamma1=jnp.ones((1, dim), jnp.float32),
        beta1=jnp.zeros((1, dim), jnp.float32),
        # kernel computes x @ W_in_out, so torch (out,in) weights are stored transposed.
        wq=wqkv[0:1, :],                                        # (1, dim)  f32 (VPU reduce)
        bq=bqkv[0:1],                                           # (1,)      f32 (SMEM)
        wkv=wqkv[1:, :].T.astype(jnp.bfloat16),                 # (dim, 2*dim) bf16 (fused k|v)
        bkv=bqkv[1:].reshape(1, 2 * dim),
        wp=wp.T.astype(jnp.bfloat16), bp=bp.reshape(1, dim),
        wadd1=jnp.ones((2,), jnp.float32),                      # Add() init: torch.ones(2)
        gamma2=jnp.ones((1, dim), jnp.float32),
        beta2=jnp.zeros((1, dim), jnp.float32),
        w1=w1.T.astype(jnp.bfloat16), b1=b1.reshape(1, ffn_dim),
        w2=w2.T.astype(jnp.bfloat16), b2=b2.reshape(1, dim),
        wadd2=jnp.ones((2,), jnp.float32),
    )


def reference(x_ncl, p):
    """Pure-JAX f32 reference mirroring the PyTorch forward (dropout = identity)."""
    x = jnp.transpose(x_ncl, (0, 2, 1))                       # (B, N, dim)
    dim = x.shape[-1]

    def layernorm(z, g, b):
        mu = jnp.mean(z, axis=-1, keepdims=True)
        var = jnp.mean((z - mu) ** 2, axis=-1, keepdims=True)
        return (z - mu) / jnp.sqrt(var + LN_EPS) * g + b

    def add(w, a, b):
        w = jnp.maximum(w, 0.0)
        w = w / (jnp.sum(w) + ADD_EPS)
        return w[0] * a + w[1] * b

    xn = layernorm(x, p["gamma1"], p["beta1"])
    q = jnp.sum(xn * p["wq"], axis=-1, keepdims=True) + p["bq"]            # (B, N, 1)
    kv = xn @ p["wkv"].astype(jnp.float32) + p["bkv"]                      # (B, N, 2*dim)
    k, v = kv[..., :dim], kv[..., dim:]
    scores = jax.nn.softmax(q, axis=1)                                     # over sequence
    ctx = jnp.sum(k * scores, axis=1, keepdims=True)
    attn = (jax.nn.relu(v) * ctx) @ p["wp"].astype(jnp.float32) + p["bp"]
    x1 = add(p["wadd1"], attn, x)

    xn2 = layernorm(x1, p["gamma2"], p["beta2"])
    h = jax.nn.gelu(xn2 @ p["w1"].astype(jnp.float32) + p["b1"], approximate=False)
    f = h @ p["w2"].astype(jnp.float32) + p["b2"]
    x2 = add(p["wadd2"], f, x1)
    return jnp.transpose(x2, (0, 2, 1))


if __name__ == "__main__":
    # Small, lane-aligned shapes; B=4 exercises the batch-stacked (Bb=2) grid path.
    B, dim, N, ffn_dim = 4, 128, 128, 256
    key = jax.random.PRNGKey(0)
    kx, kp = jax.random.split(key)
    x = jax.random.normal(kx, (B, dim, N), jnp.float32)       # PyTorch NCL layout
    params = init_params(kp, dim, ffn_dim)

    out = jax.block_until_ready(ba_ffn_block(x, params))
    ref = jax.block_until_ready(reference(x, params))

    assert out.shape == (B, dim, N)
    err = float(jnp.max(jnp.abs(out - ref)))
    # tolerance accounts for bf16 MXU inputs, approx reciprocal softmax, tanh GELU.
    assert jnp.allclose(out, ref, atol=3e-2, rtol=3e-2), err
    print("KERNEL_OK")
</pallas_src>

<mosaic_0001>
module attributes {stable_mosaic.version = 11 : i64} {
  func.func @ba_ffn_kernel(%arg0: i32, %arg1: memref<2x128x128xf32, #tpu.memory_space<vmem>>, %arg2: memref<1x128xf32, #tpu.memory_space<vmem>>, %arg3: memref<1x128xf32, #tpu.memory_space<vmem>>, %arg4: memref<1x128xf32, #tpu.memory_space<vmem>>, %arg5: memref<128x256xbf16, #tpu.memory_space<vmem>>, %arg6: memref<1x256xf32, #tpu.memory_space<vmem>>, %arg7: memref<128x128xbf16, #tpu.memory_space<vmem>>, %arg8: memref<1x128xf32, #tpu.memory_space<vmem>>, %arg9: memref<1x128xf32, #tpu.memory_space<vmem>>, %arg10: memref<1x128xf32, #tpu.memory_space<vmem>>, %arg11: memref<128x256xbf16, #tpu.memory_space<vmem>>, %arg12: memref<1x256xf32, #tpu.memory_space<vmem>>, %arg13: memref<256x128xbf16, #tpu.memory_space<vmem>>, %arg14: memref<1x128xf32, #tpu.memory_space<vmem>>, %arg15: memref<5xf32, #tpu.memory_space<smem>>, %arg16: memref<2x128x128xf32, #tpu.memory_space<vmem>>, %arg17: memref<256x128xf32, #tpu.memory_space<vmem>>, %arg18: memref<256x128xf32, #tpu.memory_space<vmem>>, %arg19: memref<256x128xf32, #tpu.memory_space<vmem>>, %arg20: memref<256x1xf32, #tpu.memory_space<vmem>>) attributes {dimension_semantics = [#tpu.dimension_semantics<parallel>], iteration_bounds = array<i64: 2>, scalar_prefetch = 0 : i64, scratch_operands = 4 : i64, tpu.core_type = #tpu.core_type<tc>, window_params = [{transform_indices = @transform_0, window_bounds = array<i64: 2, 128, 128>}, {pipeline_mode = #tpu.pipeline_mode<synchronous>, transform_indices = @transform_1, window_bounds = array<i64: 1, 128>}, {pipeline_mode = #tpu.pipeline_mode<synchronous>, transform_indices = @transform_2, window_bounds = array<i64: 1, 128>}, {pipeline_mode = #tpu.pipeline_mode<synchronous>, transform_indices = @transform_3, window_bounds = array<i64: 1, 128>}, {pipeline_mode = #tpu.pipeline_mode<synchronous>, transform_indices = @transform_4, window_bounds = array<i64: 128, 256>}, {pipeline_mode = #tpu.pipeline_mode<synchronous>, transform_indices = @transform_5, window_bounds = array<i64: 1, 256>}, {pipeline_mode = #tpu.pipeline_mode<synchronous>, transform_indices = @transform_6, window_bounds = array<i64: 128, 128>}, {pipeline_mode = #tpu.pipeline_mode<synchronous>, transform_indices = @transform_7, window_bounds = array<i64: 1, 128>}, {pipeline_mode = #tpu.pipeline_mode<synchronous>, transform_indices = @transform_8, window_bounds = array<i64: 1, 128>}, {pipeline_mode = #tpu.pipeline_mode<synchronous>, transform_indices = @transform_9, window_bounds = array<i64: 1, 128>}, {pipeline_mode = #tpu.pipeline_mode<synchronous>, transform_indices = @transform_10, window_bounds = array<i64: 128, 256>}, {pipeline_mode = #tpu.pipeline_mode<synchronous>, transform_indices = @transform_11, window_bounds = array<i64: 1, 256>}, {pipeline_mode = #tpu.pipeline_mode<synchronous>, transform_indices = @transform_12, window_bounds = array<i64: 256, 128>}, {pipeline_mode = #tpu.pipeline_mode<synchronous>, transform_indices = @transform_13, window_bounds = array<i64: 1, 128>}, {transform_indices = @transform_14, window_bounds = array<i64: 5>}, {transform_indices = @transform_15, window_bounds = array<i64: 2, 128, 128>}]} {
    %c0 = arith.constant 0 : index
    %0 = memref.load %arg15[%c0] : memref<5xf32, #tpu.memory_space<smem>>
    %c1 = arith.constant 1 : index
    %1 = memref.load %arg15[%c1] : memref<5xf32, #tpu.memory_space<smem>>
    %cst = arith.constant 0.000000e+00 : f32
    %2 = arith.maximumf %1, %cst : f32
    %c2 = arith.constant 2 : index
    %3 = memref.load %arg15[%c2] : memref<5xf32, #tpu.memory_space<smem>>
    %cst_0 = arith.constant 0.000000e+00 : f32
    %4 = arith.maximumf %3, %cst_0 : f32
    %5 = arith.addf %2, %4 : f32
    %cst_1 = arith.constant 9.99999996E-13 : f32
    %6 = arith.addf %5, %cst_1 : f32
    %7 = arith.divf %2, %6 : f32
    %8 = arith.divf %4, %6 : f32
    %c3 = arith.constant 3 : index
    %9 = memref.load %arg15[%c3] : memref<5xf32, #tpu.memory_space<smem>>
    %cst_2 = arith.constant 0.000000e+00 : f32
    %10 = arith.maximumf %9, %cst_2 : f32
    %c4 = arith.constant 4 : index
    %11 = memref.load %arg15[%c4] : memref<5xf32, #tpu.memory_space<smem>>
    %cst_3 = arith.constant 0.000000e+00 : f32
    %12 = arith.maximumf %11, %cst_3 : f32
    %13 = arith.addf %10, %12 : f32
    %cst_4 = arith.constant 9.99999996E-13 : f32
    %14 = arith.addf %13, %cst_4 : f32
    %15 = arith.divf %10, %14 : f32
    %16 = arith.divf %12, %14 : f32
    %c0_5 = arith.constant 0 : index
    %c0_6 = arith.constant 0 : index
    %17 = vector.load %arg2[%c0_5, %c0_6] : memref<1x128xf32, #tpu.memory_space<vmem>>, vector<1x128xf32>
    %c0_7 = arith.constant 0 : index
    %c0_8 = arith.constant 0 : index
    %18 = vector.load %arg3[%c0_7, %c0_8] : memref<1x128xf32, #tpu.memory_space<vmem>>, vector<1x128xf32>
    %c0_9 = arith.constant 0 : index
    %c0_10 = arith.constant 0 : index
    %19 = vector.load %arg9[%c0_9, %c0_10] : memref<1x128xf32, #tpu.memory_space<vmem>>, vector<1x128xf32>
    %c0_11 = arith.constant 0 : index
    %c0_12 = arith.constant 0 : index
    %20 = vector.load %arg10[%c0_11, %c0_12] : memref<1x128xf32, #tpu.memory_space<vmem>>, vector<1x128xf32>
    %c0_13 = arith.constant 0 : index
    %c0_14 = arith.constant 0 : index
    %21 = vector.load %arg4[%c0_13, %c0_14] : memref<1x128xf32, #tpu.memory_space<vmem>>, vector<1x128xf32>
    %c0_15 = arith.constant 0 : index
    %c0_16 = arith.constant 0 : index
    %c0_17 = arith.constant 0 : index
    %22 = vector.load %arg1[%c0_15, %c0_16, %c0_17] : memref<2x128x128xf32, #tpu.memory_space<vmem>>, vector<1x128x128xf32>
    %23 = vector.shape_cast %22 : vector<1x128x128xf32> to vector<128x128xf32>
    %24 = tpu.transpose %23, [1, 0] : vector<128x128xf32> -> vector<128x128xf32>
    %c0_18 = arith.constant 0 : index
    %c0_19 = arith.constant 0 : index
    %25 = vector.load %arg17[%c0_18, %c0_19] : memref<256x128xf32, #tpu.memory_space<vmem>>, vector<128x128xf32>
    tpu.vector_store %arg17[%c0_18, %c0_19], %24 {strides = array<i32>} : memref<256x128xf32, #tpu.memory_space<vmem>>, vector<128x128xf32>,
    %cst_20 = arith.constant dense<0.000000e+00> : vector<128xf32>
    %26 = vector.multi_reduction <add>, %24, %cst_20 [1] : vector<128x128xf32> to vector<128xf32>
    %27 = vector.shape_cast %26 : vector<128xf32> to vector<128x1xf32>
    %cst_21 = arith.constant 1.280000e+02 : f32
    %28 = vector.broadcast %cst_21 : f32 to vector<128x1xf32>
    %29 = arith.divf %27, %28 : vector<128x1xf32>
    %30 = vector.broadcast %29 : vector<128x1xf32> to vector<128x128xf32>
    %31 = arith.subf %24, %30 : vector<128x128xf32>
    %32 = arith.mulf %31, %31 : vector<128x128xf32>
    %cst_22 = arith.constant dense<0.000000e+00> : vector<128xf32>
    %33 = vector.multi_reduction <add>, %32, %cst_22 [1] : vector<128x128xf32> to vector<128xf32>
    %34 = vector.shape_cast %33 : vector<128xf32> to vector<128x1xf32>
    %cst_23 = arith.constant 1.280000e+02 : f32
    %35 = vector.broadcast %cst_23 : f32 to vector<128x1xf32>
    %36 = arith.divf %34, %35 : vector<128x1xf32>
    %37 = vector.broadcast %29 : vector<128x1xf32> to vector<128x128xf32>
    %38 = arith.subf %24, %37 : vector<128x128xf32>
    %cst_24 = arith.constant 9.99999974E-6 : f32
    %39 = vector.broadcast %cst_24 : f32 to vector<128x1xf32>
    %40 = arith.addf %36, %39 : vector<128x1xf32>
    %41 = math.rsqrt %40 : vector<128x1xf32>
    %42 = vector.broadcast %41 : vector<128x1xf32> to vector<128x128xf32>
    %43 = arith.mulf %38, %42 : vector<128x128xf32>
    %44 = vector.broadcast %17 : vector<1x128xf32> to vector<128x128xf32>
    %45 = arith.mulf %43, %44 : vector<128x128xf32>
    %46 = vector.broadcast %18 : vector<1x128xf32> to vector<128x128xf32>
    %47 = arith.addf %45, %46 : vector<128x128xf32>
    %48 = vector.broadcast %21 : vector<1x128xf32> to vector<128x128xf32>
    %49 = arith.mulf %47, %48 : vector<128x128xf32>
    %cst_25 = arith.constant dense<0.000000e+00> : vector<128xf32>
    %50 = vector.multi_reduction <add>, %49, %cst_25 [1] : vector<128x128xf32> to vector<128xf32>
    %51 = vector.shape_cast %50 : vector<128xf32> to vector<128x1xf32>
    %52 = vector.broadcast %0 : f32 to vector<128x1xf32>
    %53 = arith.addf %51, %52 : vector<128x1xf32>
    %c0_26 = arith.constant 0 : index
    %c0_27 = arith.constant 0 : index
    %54 = vector.load %arg20[%c0_26, %c0_27] : memref<256x1xf32, #tpu.memory_space<vmem>>, vector<128x1xf32>
    tpu.vector_store %arg20[%c0_26, %c0_27], %53 {strides = array<i32>} : memref<256x1xf32, #tpu.memory_space<vmem>>, vector<128x1xf32>,
    %55 = arith.truncf %47 : vector<128x128xf32> to vector<128x128xbf16>
    %c0_28 = arith.constant 0 : index
    %c0_29 = arith.constant 0 : index
    %56 = vector.load %arg5[%c0_28, %c0_29] : memref<128x256xbf16, #tpu.memory_space<vmem>>, vector<128x256xbf16>
    %cst_30 = arith.constant dense<0.000000e+00> : vector<128x256xf32>
    %57 = tpu.matmul %55, %56, %cst_30 {dimension_numbers = #tpu.dot_dimension_numbers<[1], [0], [0], [1], [0, 0, 1, 1], [], []>} : vector<128x128xbf16>, vector<128x256xbf16>, vector<128x256xf32> -> vector<128x256xf32>
    %c0_31 = arith.constant 0 : index
    %c0_32 = arith.constant 0 : index
    %58 = vector.load %arg6[%c0_31, %c0_32] : memref<1x256xf32, #tpu.memory_space<vmem>>, vector<1x256xf32>
    %59 = vector.broadcast %58 : vector<1x256xf32> to vector<128x256xf32>
    %60 = arith.addf %57, %59 : vector<128x256xf32>
    %61 = vector.extract_strided_slice %60 {offsets = [0, 0], sizes = [128, 128], strides = [1, 1]} : vector<128x256xf32> to vector<128x128xf32>
    %c0_33 = arith.constant 0 : index
    %c0_34 = arith.constant 0 : index
    %62 = vector.load %arg18[%c0_33, %c0_34] : memref<256x128xf32, #tpu.memory_space<vmem>>, vector<128x128xf32>
    tpu.vector_store %arg18[%c0_33, %c0_34], %61 {strides = array<i32>} : memref<256x128xf32, #tpu.memory_space<vmem>>, vector<128x128xf32>,
    %63 = vector.extract_strided_slice %60 {offsets = [0, 128], sizes = [128, 128], strides = [1, 1]} : vector<128x256xf32> to vector<128x128xf32>
    %cst_35 = arith.constant 0.000000e+00 : f32
    %64 = vector.broadcast %cst_35 : f32 to vector<128x128xf32>
    %65 = arith.maximumf %63, %64 : vector<128x128xf32>
    %c0_36 = arith.constant 0 : index
    %c0_37 = arith.constant 0 : index
    %66 = vector.load %arg19[%c0_36, %c0_37] : memref<256x128xf32, #tpu.memory_space<vmem>>, vector<128x128xf32>
    tpu.vector_store %arg19[%c0_36, %c0_37], %65 {strides = array<i32>} : memref<256x128xf32, #tpu.memory_space<vmem>>, vector<128x128xf32>,
    %c0_38 = arith.constant 0 : index
    %c0_39 = arith.constant 0 : index
    %67 = vector.load %arg20[%c0_38, %c0_39] : memref<256x1xf32, #tpu.memory_space<vmem>>, vector<128x1xf32>
    %cst_40 = arith.constant dense<0xFF800000> : vector<1xf32>
    %68 = vector.multi_reduction <maximumf>, %67, %cst_40 [0] : vector<128x1xf32> to vector<1xf32>
    %69 = vector.shape_cast %68 : vector<1xf32> to vector<1x1xf32>
    %70 = vector.broadcast %69 : vector<1x1xf32> to vector<128x1xf32>
    %71 = arith.subf %67, %70 : vector<128x1xf32>
    %72 = math.exp %71 : vector<128x1xf32>
    %cst_41 = arith.constant dense<0.000000e+00> : vector<1xf32>
    %73 = vector.multi_reduction <add>, %72, %cst_41 [0] : vector<128x1xf32> to vector<1xf32>
    %74 = vector.shape_cast %73 : vector<1xf32> to vector<1x1xf32>
    %75 = tpu.reciprocal %74 {approx = true} : vector<1x1xf32> -> vector<1x1xf32>
    %76 = vector.broadcast %75 : vector<1x1xf32> to vector<128x1xf32>
    %77 = arith.mulf %72, %76 : vector<128x1xf32>
    %c0_42 = arith.constant 0 : index
    %c0_43 = arith.constant 0 : index
    %78 = vector.load %arg18[%c0_42, %c0_43] : memref<256x128xf32, #tpu.memory_space<vmem>>, vector<128x128xf32>
    %79 = vector.broadcast %77 : vector<128x1xf32> to vector<128x128xf32>
    %80 = arith.mulf %78, %79 : vector<128x128xf32>
    %cst_44 = arith.constant dense<0.000000e+00> : vector<128xf32>
    %81 = vector.multi_reduction <add>, %80, %cst_44 [0] : vector<128x128xf32> to vector<128xf32>
    %82 = vector.shape_cast %81 : vector<128xf32> to vector<1x128xf32>
    %c0_45 = arith.constant 0 : index
    %c0_46 = arith.constant 0 : index
    %83 = vector.load %arg19[%c0_45, %c0_46] : memref<256x128xf32, #tpu.memory_space<vmem>>, vector<128x128xf32>
    %84 = vector.broadcast %82 : vector<1x128xf32> to vector<128x128xf32>
    %85 = arith.mulf %83, %84 : vector<128x128xf32>
    %c0_47 = arith.constant 0 : index
    %c0_48 = arith.constant 0 : index
    %86 = vector.load %arg19[%c0_47, %c0_48] : memref<256x128xf32, #tpu.memory_space<vmem>>, vector<128x128xf32>
    tpu.vector_store %arg19[%c0_47, %c0_48], %85 {strides = array<i32>} : memref<256x128xf32, #tpu.memory_space<vmem>>, vector<128x128xf32>,
    %c1_49 = arith.constant 1 : index
    %c0_50 = arith.constant 0 : index
    %c0_51 = arith.constant 0 : index
    %87 = vector.load %arg1[%c1_49, %c0_50, %c0_51] : memref<2x128x128xf32, #tpu.memory_space<vmem>>, vector<1x128x128xf32>
    %88 = vector.shape_cast %87 : vector<1x128x128xf32> to vector<128x128xf32>
    %89 = tpu.transpose %88, [1, 0] : vector<128x128xf32> -> vector<128x128xf32>
    %c128 = arith.constant 128 : index
    %c0_52 = arith.constant 0 : index
    %90 = vector.load %arg17[%c128, %c0_52] : memref<256x128xf32, #tpu.memory_space<vmem>>, vector<128x128xf32>
    tpu.vector_store %arg17[%c128, %c0_52], %89 {strides = array<i32>} : memref<256x128xf32, #tpu.memory_space<vmem>>, vector<128x128xf32>,
    %cst_53 = arith.constant dense<0.000000e+00> : vector<128xf32>
    %91 = vector.multi_reduction <add>, %89, %cst_53 [1] : vector<128x128xf32> to vector<128xf32>
    %92 = vector.shape_cast %91 : vector<128xf32> to vector<128x1xf32>
    %cst_54 = arith.constant 1.280000e+02 : f32
    %93 = vector.broadcast %cst_54 : f32 to vector<128x1xf32>
    %94 = arith.divf %92, %93 : vector<128x1xf32>
    %95 = vector.broadcast %94 : vector<128x1xf32> to vector<128x128xf32>
    %96 = arith.subf %89, %95 : vector<128x128xf32>
    %97 = arith.mulf %96, %96 : vector<128x128xf32>
    %cst_55 = arith.constant dense<0.000000e+00> : vector<128xf32>
    %98 = vector.multi_reduction <add>, %97, %cst_55 [1] : vector<128x128xf32> to vector<128xf32>
    %99 = vector.shape_cast %98 : vector<128xf32> to vector<128x1xf32>
    %cst_56 = arith.constant 1.280000e+02 : f32
    %100 = vector.broadcast %cst_56 : f32 to vector<128x1xf32>
    %101 = arith.divf %99, %100 : vector<128x1xf32>
    %102 = vector.broadcast %94 : vector<128x1xf32> to vector<128x128xf32>
    %103 = arith.subf %89, %102 : vector<128x128xf32>
    %cst_57 = arith.constant 9.99999974E-6 : f32
    %104 = vector.broadcast %cst_57 : f32 to vector<128x1xf32>
    %105 = arith.addf %101, %104 : vector<128x1xf32>
    %106 = math.rsqrt %105 : vector<128x1xf32>
    %107 = vector.broadcast %106 : vector<128x1xf32> to vector<128x128xf32>
    %108 = arith.mulf %103, %107 : vector<128x128xf32>
    %109 = vector.broadcast %17 : vector<1x128xf32> to vector<128x128xf32>
    %110 = arith.mulf %108, %109 : vector<128x128xf32>
    %111 = vector.broadcast %18 : vector<1x128xf32> to vector<128x128xf32>
    %112 = arith.addf %110, %111 : vector<128x128xf32>
    %113 = vector.broadcast %21 : vector<1x128xf32> to vector<128x128xf32>
    %114 = arith.mulf %112, %113 : vector<128x128xf32>
    %cst_58 = arith.constant dense<0.000000e+00> : vector<128xf32>
    %115 = vector.multi_reduction <add>, %114, %cst_58 [1] : vector<128x128xf32> to vector<128xf32>
    %116 = vector.shape_cast %115 : vector<128xf32> to vector<128x1xf32>
    %117 = vector.broadcast %0 : f32 to vector<128x1xf32>
    %118 = arith.addf %116, %117 : vector<128x1xf32>
    %c128_59 = arith.constant 128 : index
    %c0_60 = arith.constant 0 : index
    %119 = vector.load %arg20[%c128_59, %c0_60] : memref<256x1xf32, #tpu.memory_space<vmem>>, vector<128x1xf32>
    tpu.vector_store %arg20[%c128_59, %c0_60], %118 {strides = array<i32>} : memref<256x1xf32, #tpu.memory_space<vmem>>, vector<128x1xf32>,
    %120 = arith.truncf %112 : vector<128x128xf32> to vector<128x128xbf16>
    %c0_61 = arith.constant 0 : index
    %c0_62 = arith.constant 0 : index
    %121 = vector.load %arg5[%c0_61, %c0_62] : memref<128x256xbf16, #tpu.memory_space<vmem>>, vector<128x256xbf16>
    %cst_63 = arith.constant dense<0.000000e+00> : vector<128x256xf32>
    %122 = tpu.matmul %120, %121, %cst_63 {dimension_numbers = #tpu.dot_dimension_numbers<[1], [0], [0], [1], [0, 0, 1, 1], [], []>} : vector<128x128xbf16>, vector<128x256xbf16>, vector<128x256xf32> -> vector<128x256xf32>
    %c0_64 = arith.constant 0 : index
    %c0_65 = arith.constant 0 : index
    %123 = vector.load %arg6[%c0_64, %c0_65] : memref<1x256xf32, #tpu.memory_space<vmem>>, vector<1x256xf32>
    %124 = vector.broadcast %123 : vector<1x256xf32> to vector<128x256xf32>
    %125 = arith.addf %122, %124 : vector<128x256xf32>
    %126 = vector.extract_strided_slice %125 {offsets = [0, 0], sizes = [128, 128], strides = [1, 1]} : vector<128x256xf32> to vector<128x128xf32>
    %c128_66 = arith.constant 128 : index
    %c0_67 = arith.constant 0 : index
    %127 = vector.load %arg18[%c128_66, %c0_67] : memref<256x128xf32, #tpu.memory_space<vmem>>, vector<128x128xf32>
    tpu.vector_store %arg18[%c128_66, %c0_67], %126 {strides = array<i32>} : memref<256x128xf32, #tpu.memory_space<vmem>>, vector<128x128xf32>,
    %128 = vector.extract_strided_slice %125 {offsets = [0, 128], sizes = [128, 128], strides = [1, 1]} : vector<128x256xf32> to vector<128x128xf32>
    %cst_68 = arith.constant 0.000000e+00 : f32
    %129 = vector.broadcast %cst_68 : f32 to vector<128x128xf32>
    %130 = arith.maximumf %128, %129 : vector<128x128xf32>
    %c128_69 = arith.constant 128 : index
    %c0_70 = arith.constant 0 : index
    %131 = vector.load %arg19[%c128_69, %c0_70] : memref<256x128xf32, #tpu.memory_space<vmem>>, vector<128x128xf32>
    tpu.vector_store %arg19[%c128_69, %c0_70], %130 {strides = array<i32>} : memref<256x128xf32, #tpu.memory_space<vmem>>, vector<128x128xf32>,
    %c128_71 = arith.constant 128 : index
    %c0_72 = arith.constant 0 : index
    %132 = vector.load %arg20[%c128_71, %c0_72] : memref<256x1xf32, #tpu.memory_space<vmem>>, vector<128x1xf32>
    %cst_73 = arith.constant dense<0xFF800000> : vector<1xf32>
    %133 = vector.multi_reduction <maximumf>, %132, %cst_73 [0] : vector<128x1xf32> to vector<1xf32>
    %134 = vector.shape_cast %133 : vector<1xf32> to vector<1x1xf32>
    %135 = vector.broadcast %134 : vector<1x1xf32> to vector<128x1xf32>
    %136 = arith.subf %132, %135 : vector<128x1xf32>
    %137 = math.exp %136 : vector<128x1xf32>
    %cst_74 = arith.constant dense<0.000000e+00> : vector<1xf32>
    %138 = vector.multi_reduction <add>, %137, %cst_74 [0] : vector<128x1xf32> to vector<1xf32>
    %139 = vector.shape_cast %138 : vector<1xf32> to vector<1x1xf32>
    %140 = tpu.reciprocal %139 {approx = true} : vector<1x1xf32> -> vector<1x1xf32>
    %141 = vector.broadcast %140 : vector<1x1xf32> to vector<128x1xf32>
    %142 = arith.mulf %137, %141 : vector<128x1xf32>
    %c128_75 = arith.constant 128 : index
    %c0_76 = arith.constant 0 : index
    %143 = vector.load %arg18[%c128_75, %c0_76] : memref<256x128xf32, #tpu.memory_space<vmem>>, vector<128x128xf32>
    %144 = vector.broadcast %142 : vector<128x1xf32> to vector<128x128xf32>
    %145 = arith.mulf %143, %144 : vector<128x128xf32>
    %cst_77 = arith.constant dense<0.000000e+00> : vector<128xf32>
    %146 = vector.multi_reduction <add>, %145, %cst_77 [0] : vector<128x128xf32> to vector<128xf32>
    %147 = vector.shape_cast %146 : vector<128xf32> to vector<1x128xf32>
    %c128_78 = arith.constant 128 : index
    %c0_79 = arith.constant 0 : index
    %148 = vector.load %arg19[%c128_78, %c0_79] : memref<256x128xf32, #tpu.memory_space<vmem>>, vector<128x128xf32>
    %149 = vector.broadcast %147 : vector<1x128xf32> to vector<128x128xf32>
    %150 = arith.mulf %148, %149 : vector<128x128xf32>
    %c128_80 = arith.constant 128 : index
    %c0_81 = arith.constant 0 : index
    %151 = vector.load %arg19[%c128_80, %c0_81] : memref<256x128xf32, #tpu.memory_space<vmem>>, vector<128x128xf32>
    tpu.vector_store %arg19[%c128_80, %c0_81], %150 {strides = array<i32>} : memref<256x128xf32, #tpu.memory_space<vmem>>, vector<128x128xf32>,
    %c0_82 = arith.constant 0 : index
    %c0_83 = arith.constant 0 : index
    %152 = vector.load %arg19[%c0_82, %c0_83] : memref<256x128xf32, #tpu.memory_space<vmem>>, vector<256x128xf32>
    %153 = arith.truncf %152 : vector<256x128xf32> to vector<256x128xbf16>
    %c0_84 = arith.constant 0 : index
    %c0_85 = arith.constant 0 : index
    %154 = vector.load %arg7[%c0_84, %c0_85] : memref<128x128xbf16, #tpu.memory_space<vmem>>, vector<128x128xbf16>
    %cst_86 = arith.constant dense<0.000000e+00> : vector<256x128xf32>
    %155 = tpu.matmul %153, %154, %cst_86 {dimension_numbers = #tpu.dot_dimension_numbers<[1], [0], [0], [1], [0, 0, 1, 1], [], []>} : vector<256x128xbf16>, vector<128x128xbf16>, vector<256x128xf32> -> vector<256x128xf32>
    %c0_87 = arith.constant 0 : index
    %c0_88 = arith.constant 0 : index
    %156 = vector.load %arg8[%c0_87, %c0_88] : memref<1x128xf32, #tpu.memory_space<vmem>>, vector<1x128xf32>
    %157 = vector.broadcast %156 : vector<1x128xf32> to vector<256x128xf32>
    %158 = arith.addf %155, %157 : vector<256x128xf32>
    %c0_89 = arith.constant 0 : index
    %c0_90 = arith.constant 0 : index
    %159 = vector.load %arg17[%c0_89, %c0_90] : memref<256x128xf32, #tpu.memory_space<vmem>>, vector<256x128xf32>
    %160 = vector.broadcast %7 : f32 to vector<256x128xf32>
    %161 = arith.mulf %160, %158 : vector<256x128xf32>
    %162 = vector.broadcast %8 : f32 to vector<256x128xf32>
    %163 = arith.mulf %162, %159 : vector<256x128xf32>
    %164 = arith.addf %161, %163 : vector<256x128xf32>
    %cst_91 = arith.constant dense<0.000000e+00> : vector<256xf32>
    %165 = vector.multi_reduction <add>, %164, %cst_91 [1] : vector<256x128xf32> to vector<256xf32>
    %166 = vector.shape_cast %165 : vector<256xf32> to vector<256x1xf32>
    %cst_92 = arith.constant 1.280000e+02 : f32
    %167 = vector.broadcast %cst_92 : f32 to vector<256x1xf32>
    %168 = arith.divf %166, %167 : vector<256x1xf32>
    %169 = vector.broadcast %168 : vector<256x1xf32> to vector<256x128xf32>
    %170 = arith.subf %164, %169 : vector<256x128xf32>
    %171 = arith.mulf %170, %170 : vector<256x128xf32>
    %cst_93 = arith.constant dense<0.000000e+00> : vector<256xf32>
    %172 = vector.multi_reduction <add>, %171, %cst_93 [1] : vector<256x128xf32> to vector<256xf32>
    %173 = vector.shape_cast %172 : vector<256xf32> to vector<256x1xf32>
    %cst_94 = arith.constant 1.280000e+02 : f32
    %174 = vector.broadcast %cst_94 : f32 to vector<256x1xf32>
    %175 = arith.divf %173, %174 : vector<256x1xf32>
    %176 = vector.broadcast %168 : vector<256x1xf32> to vector<256x128xf32>
    %177 = arith.subf %164, %176 : vector<256x128xf32>
    %cst_95 = arith.constant 9.99999974E-6 : f32
    %178 = vector.broadcast %cst_95 : f32 to vector<256x1xf32>
    %179 = arith.addf %175, %178 : vector<256x1xf32>
    %180 = math.rsqrt %179 : vector<256x1xf32>
    %181 = vector.broadcast %180 : vector<256x1xf32> to vector<256x128xf32>
    %182 = arith.mulf %177, %181 : vector<256x128xf32>
    %183 = vector.broadcast %19 : vector<1x128xf32> to vector<256x128xf32>
    %184 = arith.mulf %182, %183 : vector<256x128xf32>
    %185 = vector.broadcast %20 : vector<1x128xf32> to vector<256x128xf32>
    %186 = arith.addf %184, %185 : vector<256x128xf32>
    %187 = arith.truncf %186 : vector<256x128xf32> to vector<256x128xbf16>
    %c0_96 = arith.constant 0 : index
    %c0_97 = arith.constant 0 : index
    %188 = vector.load %arg11[%c0_96, %c0_97] : memref<128x256xbf16, #tpu.memory_space<vmem>>, vector<128x256xbf16>
    %cst_98 = arith.constant dense<0.000000e+00> : vector<256x256xf32>
    %189 = tpu.matmul %187, %188, %cst_98 {dimension_numbers = #tpu.dot_dimension_numbers<[1], [0], [0], [1], [0, 0, 1, 1], [], []>} : vector<256x128xbf16>, vector<128x256xbf16>, vector<256x256xf32> -> vector<256x256xf32>
    %c0_99 = arith.constant 0 : index
    %c0_100 = arith.constant 0 : index
    %190 = vector.load %arg12[%c0_99, %c0_100] : memref<1x256xf32, #tpu.memory_space<vmem>>, vector<1x256xf32>
    %191 = vector.broadcast %190 : vector<1x256xf32> to vector<256x256xf32>
    %192 = arith.addf %189, %191 : vector<256x256xf32>
    %193 = arith.mulf %192, %192 : vector<256x256xf32>
    %194 = arith.mulf %192, %193 : vector<256x256xf32>
    %cst_101 = arith.constant 4.471500e-02 : f32
    %195 = vector.broadcast %cst_101 : f32 to vector<256x256xf32>
    %196 = arith.mulf %195, %194 : vector<256x256xf32>
    %197 = arith.addf %192, %196 : vector<256x256xf32>
    %cst_102 = arith.constant 0.797884583 : f32
    %198 = vector.broadcast %cst_102 : f32 to vector<256x256xf32>
    %199 = arith.mulf %198, %197 : vector<256x256xf32>
    %200 = math.tanh %199 : vector<256x256xf32>
    %cst_103 = arith.constant 1.000000e+00 : f32
    %201 = vector.broadcast %cst_103 : f32 to vector<256x256xf32>
    %202 = arith.addf %201, %200 : vector<256x256xf32>
    %cst_104 = arith.constant 5.000000e-01 : f32
    %203 = vector.broadcast %cst_104 : f32 to vector<256x256xf32>
    %204 = arith.mulf %203, %202 : vector<256x256xf32>
    %205 = arith.mulf %192, %204 : vector<256x256xf32>
    %206 = arith.truncf %205 : vector<256x256xf32> to vector<256x256xbf16>
    %c0_105 = arith.constant 0 : index
    %c0_106 = arith.constant 0 : index
    %207 = vector.load %arg13[%c0_105, %c0_106] : memref<256x128xbf16, #tpu.memory_space<vmem>>, vector<256x128xbf16>
    %cst_107 = arith.constant dense<0.000000e+00> : vector<256x128xf32>
    %208 = tpu.matmul %206, %207, %cst_107 {dimension_numbers = #tpu.dot_dimension_numbers<[1], [0], [0], [1], [0, 0, 1, 1], [], []>} : vector<256x256xbf16>, vector<256x128xbf16>, vector<256x128xf32> -> vector<256x128xf32>
    %c0_108 = arith.constant 0 : index
    %c0_109 = arith.constant 0 : index
    %209 = vector.load %arg14[%c0_108, %c0_109] : memref<1x128xf32, #tpu.memory_space<vmem>>, vector<1x128xf32>
    %210 = vector.broadcast %209 : vector<1x128xf32> to vector<256x128xf32>
    %211 = arith.addf %208, %210 : vector<256x128xf32>
    %212 = vector.broadcast %15 : f32 to vector<256x128xf32>
    %213 = arith.mulf %212, %211 : vector<256x128xf32>
    %214 = vector.broadcast %16 : f32 to vector<256x128xf32>
    %215 = arith.mulf %214, %164 : vector<256x128xf32>
    %216 = arith.addf %213, %215 : vector<256x128xf32>
    %217 = vector.extract_strided_slice %216 {offsets = [0, 0], sizes = [128, 128], strides = [1, 1]} : vector<256x128xf32> to vector<128x128xf32>
    %218 = tpu.transpose %217, [1, 0] : vector<128x128xf32> -> vector<128x128xf32>
    %c0_110 = arith.constant 0 : index
    %c0_111 = arith.constant 0 : index
    %c0_112 = arith.constant 0 : index
    %219 = vector.load %arg16[%c0_110, %c0_111, %c0_112] : memref<2x128x128xf32, #tpu.memory_space<vmem>>, vector<1x128x128xf32>
    %220 = vector.shape_cast %219 : vector<1x128x128xf32> to vector<128x128xf32>
    %221 = vector.shape_cast %218 : vector<128x128xf32> to vector<1x128x128xf32>
    tpu.vector_store %arg16[%c0_110, %c0_111, %c0_112], %221 {strides = array<i32>} : memref<2x128x128xf32, #tpu.memory_space<vmem>>, vector<1x128x128xf32>,
    %222 = vector.extract_strided_slice %216 {offsets = [128, 0], sizes = [128, 128], strides = [1, 1]} : vector<256x128xf32> to vector<128x128xf32>
    %223 = tpu.transpose %222, [1, 0] : vector<128x128xf32> -> vector<128x128xf32>
    %c1_113 = arith.constant 1 : index
    %c0_114 = arith.constant 0 : index
    %c0_115 = arith.constant 0 : index
    %224 = vector.load %arg16[%c1_113, %c0_114, %c0_115] : memref<2x128x128xf32, #tpu.memory_space<vmem>>, vector<1x128x128xf32>
    %225 = vector.shape_cast %224 : vector<1x128x128xf32> to vector<128x128xf32>
    %226 = vector.shape_cast %223 : vector<128x128xf32> to vector<1x128x128xf32>
    tpu.vector_store %arg16[%c1_113, %c0_114, %c0_115], %226 {strides = array<i32>} : memref<2x128x128xf32, #tpu.memory_space<vmem>>, vector<1x128x128xf32>,
    return
  }
  func.func @transform_0(%arg0: i32) -> (i32, i32, i32) {
    %c0_i32 = arith.constant 0 : i32
    %c0_i32_0 = arith.constant 0 : i32
    %c0_i32_1 = arith.constant 0 : i32
    return %arg0, %c0_i32, %c0_i32_0 : i32, i32, i32
  }
  func.func @transform_1(%arg0: i32) -> (i32, i32) {
    %c0_i32 = arith.constant 0 : i32
    %c0_i32_0 = arith.constant 0 : i32
    %c0_i32_1 = arith.constant 0 : i32
    return %c0_i32, %c0_i32_0 : i32, i32
  }
  func.func @transform_2(%arg0: i32) -> (i32, i32) {
    %c0_i32 = arith.constant 0 : i32
    %c0_i32_0 = arith.constant 0 : i32
    %c0_i32_1 = arith.constant 0 : i32
    return %c0_i32, %c0_i32_0 : i32, i32
  }
  func.func @transform_3(%arg0: i32) -> (i32, i32) {
    %c0_i32 = arith.constant 0 : i32
    %c0_i32_0 = arith.constant 0 : i32
    %c0_i32_1 = arith.constant 0 : i32
    return %c0_i32, %c0_i32_0 : i32, i32
  }
  func.func @transform_4(%arg0: i32) -> (i32, i32) {
    %c0_i32 = arith.constant 0 : i32
    %c0_i32_0 = arith.constant 0 : i32
    %c0_i32_1 = arith.constant 0 : i32
    return %c0_i32, %c0_i32_0 : i32, i32
  }
  func.func @transform_5(%arg0: i32) -> (i32, i32) {
    %c0_i32 = arith.constant 0 : i32
    %c0_i32_0 = arith.constant 0 : i32
    %c0_i32_1 = arith.constant 0 : i32
    return %c0_i32, %c0_i32_0 : i32, i32
  }
  func.func @transform_6(%arg0: i32) -> (i32, i32) {
    %c0_i32 = arith.constant 0 : i32
    %c0_i32_0 = arith.constant 0 : i32
    %c0_i32_1 = arith.constant 0 : i32
    return %c0_i32, %c0_i32_0 : i32, i32
  }
  func.func @transform_7(%arg0: i32) -> (i32, i32) {
    %c0_i32 = arith.constant 0 : i32
    %c0_i32_0 = arith.constant 0 : i32
    %c0_i32_1 = arith.constant 0 : i32
    return %c0_i32, %c0_i32_0 : i32, i32
  }
  func.func @transform_8(%arg0: i32) -> (i32, i32) {
    %c0_i32 = arith.constant 0 : i32
    %c0_i32_0 = arith.constant 0 : i32
    %c0_i32_1 = arith.constant 0 : i32
    return %c0_i32, %c0_i32_0 : i32, i32
  }
  func.func @transform_9(%arg0: i32) -> (i32, i32) {
    %c0_i32 = arith.constant 0 : i32
    %c0_i32_0 = arith.constant 0 : i32
    %c0_i32_1 = arith.constant 0 : i32
    return %c0_i32, %c0_i32_0 : i32, i32
  }
  func.func @transform_10(%arg0: i32) -> (i32, i32) {
    %c0_i32 = arith.constant 0 : i32
    %c0_i32_0 = arith.constant 0 : i32
    %c0_i32_1 = arith.constant 0 : i32
    return %c0_i32, %c0_i32_0 : i32, i32
  }
  func.func @transform_11(%arg0: i32) -> (i32, i32) {
    %c0_i32 = arith.constant 0 : i32
    %c0_i32_0 = arith.constant 0 : i32
    %c0_i32_1 = arith.constant 0 : i32
    return %c0_i32, %c0_i32_0 : i32, i32
  }
  func.func @transform_12(%arg0: i32) -> (i32, i32) {
    %c0_i32 = arith.constant 0 : i32
    %c0_i32_0 = arith.constant 0 : i32
    %c0_i32_1 = arith.constant 0 : i32
    return %c0_i32, %c0_i32_0 : i32, i32
  }
  func.func @transform_13(%arg0: i32) -> (i32, i32) {
    %c0_i32 = arith.constant 0 : i32
    %c0_i32_0 = arith.constant 0 : i32
    %c0_i32_1 = arith.constant 0 : i32
    return %c0_i32, %c0_i32_0 : i32, i32
  }
  func.func @transform_14(%arg0: i32) -> i32 {
    %c0_i32 = arith.constant 0 : i32
    %c0_i32_0 = arith.constant 0 : i32
    return %c0_i32 : i32
  }
  func.func @transform_15(%arg0: i32) -> (i32, i32, i32) {
    %c0_i32 = arith.constant 0 : i32
    %c0_i32_0 = arith.constant 0 : i32
    %c0_i32_1 = arith.constant 0 : i32
    return %arg0, %c0_i32, %c0_i32_0 : i32, i32, i32
  }
}

</mosaic_0001>

<bundles_post_ra>
// kernel: tpu_custom_call.1
= control target key start
LH: loop header
LB: loop body
LE: loop exit
PB: predicated region body
PF: predicated region fallthrough
CT: control target
= control target key end

     0   :  { %s10293_s0 = inlined_call_operand.hbm [shape: f32[4,128,128], index: 0, kind: input, shape index: {}]   ;;  %s10294_s1 = inlined_call_operand.hbm [shape: f32[1,128], index: 1, kind: input, shape index: {}]   ;;  %s10295_s2 = inlined_call_operand.hbm [shape: f32[1,128], index: 2, kind: input, shape index: {}]   ;;  %s10296_s3 = inlined_call_operand.hbm [shape: f32[1,128], index: 3, kind: input, shape index: {}]   ;;  %s10297_s4 = inlined_call_operand.hbm [shape: bf16[128,256], index: 4, kind: input, shape index: {}]   ;;  %s10298_s5 = inlined_call_operand.vmem [shape: f32[1,256], index: 5, kind: input, shape index: {}]   ;;  %s10299_s6 = inlined_call_operand.hbm [shape: bf16[128,128], index: 6, kind: input, shape index: {}]   ;;  %s10300_s7 = inlined_call_operand.vmem [shape: f32[1,128], index: 7, kind: input, shape index: {}]   ;;  %s10301_s8 = inlined_call_operand.vmem [shape: f32[1,128], index: 8, kind: input, shape index: {}]   ;;  %s10302_s9 = inlined_call_operand.vmem [shape: f32[1,128], index: 9, kind: input, shape index: {}]   ;;  %s10303_s10 = inlined_call_operand.hbm [shape: bf16[128,256], index: 10, kind: input, shape index: {}]   ;;  %s10304_s11 = inlined_call_operand.vmem [shape: f32[1,256], index: 11, kind: input, shape index: {}]   ;;  %s10305_s12 = inlined_call_operand.hbm [shape: bf16[256,128], index: 12, kind: input, shape index: {}]   ;;  %s10306_s13 = inlined_call_operand.vmem [shape: f32[1,128], index: 13, kind: input, shape index: {}]   ;;  %s10307_s14 = inlined_call_operand.vmem [shape: f32[5], index: 14, kind: input, shape index: {}]   ;;  %s10308_s15 = inlined_call_operand.hbm [shape: f32[4,128,128], index: 15, kind: output, shape index: {}]  }
   0x1   :  { %10370 = sst [smem:[#allocation62_spill]] %s10294_s1 }
   0x2   :  { %10371 = sst [smem:[#allocation63_spill]] %s10295_s2 }
   0x3   :  { %10372 = sst [smem:[#allocation64_spill]] %s10296_s3 }
   0x4   :  { %10373 = sst [smem:[#allocation65_spill]] %s10297_s4 }
   0x5   :  { %10374 = sst [smem:[#allocation66_spill]] %s10299_s6 }
   0x6   :  { %10375 = sst [smem:[#allocation67_spill]] %s10302_s9 }
   0x7   :  { %10376 = sst [smem:[#allocation68_spill]] %s10303_s10 }
   0x8   :  { %10377 = sst [smem:[#allocation69_spill]] %s10304_s11 }
   0x9   :  { %10378 = sst [smem:[#allocation70_spill]] %s10306_s13 }
   0xa   :  { %10379 = sst [smem:[#allocation71_spill]] %s10308_s15 }
   0xb   :  { %20 = vsyncpa [#allocation7], 0 }
   0xc   :  { %22 = vsyncpa [#allocation7 + $0x1], 0 }
   0xd   :  { %23 = vsyncpa [#allocation11], 0 }
   0xe   :  { %24 = vsyncpa [#allocation14], 0 }
   0xf   :  { %25 = vsyncpa [#allocation17], 0 }
  0x10   :  { %26 = vsyncpa [#allocation20], 0 }
  0x11   :  { %27 = vsyncpa [#allocation9], 0 }
  0x12   :  { %28 = vsyncpa [#allocation8], 0 }
  0x13   :  { %30 = vsyncpa [#allocation8 + $0x1], 0  ;;  %s6923_s18 = smov 0   ;;  %s6925_s19 = smov 0  }
  0x14   :  { %s6927_s20 = smov 0   ;;  %s6929_s21 = smov 0  }
  0x15 LB: > { %s10380_s1 = sld [smem:[#allocation62_spill]]  ;;  %s6947_s25 = sadd.s32 4294967295, %s6824_s21   ;;  %s6824_s21 = sphi %s6929_s21, %s10551_s21   ;;  %s6820_s20 = sphi %s6927_s20, %s10550_s20   ;;  %s6816_s19 = sphi %s6925_s19, %s10549_s19   ;;  %s6812_s18 = sphi %s6923_s18, %s10548_s18  }
  0x16   : > { %p5547_p0 = scmp.ge.s32.totalorder %s6824_s21, 1  ;;  %p57_p1 = scmp.eq.s32.totalorder %s6947_s25, 0 }
  0x17   : > { %p387_p2 = scmp.lt.s32.totalorder %s6824_s21, 3  ;;  %s6826_s27 = smov [#allocation10]  }
  0x18   : > { %s401_s28 = sshll.u32 %s6826_s27, 4  ;;  %s10382_s3 = sld [smem:[#allocation64_spill]]  ;;  %s402_s28 = int_to_ptr.vmem [resolvable:$true] %s401_s28 }
  0x19   : > { %p6952_p3 = pnand %p5547_p0, %p387_p2  ;;  %s6827_s22 = smov [#allocation13]  }
  0x1a   : > { %s425_s23 = sshll.u32 %s6827_s22, 4  ;;  %s10384_s6 = sld [smem:[#allocation66_spill]]  ;;  %s426_s23 = int_to_ptr.vmem [resolvable:$true] %s425_s23 }
  0x1b   : > { %s399_s24 = sshll.u32 %s10380_s1, 4  ;;  %p6034_p5 = pneg %p6952_p3  ;;  %s400_s24 = int_to_ptr.hbm [resolvable:$true] %s399_s24 }
  0x1c   : > { %s6828_s29 = smov [#allocation16]   ;;  %s10385_s2 = sld [smem:[#allocation63_spill]] }
  0x1d   : > { %p6964_p6 = pnand %p6034_p5, %p57_p1  ;;  %s453_s30 = sshll.u32 %s6828_s29, 4  ;;  %s454_s30 = int_to_ptr.vmem [resolvable:$true] %s453_s30 }
  0x1e   : > { %s423_s16 = sshll.u32 %s10382_s3, 4  ;;  %s6829_s9 = smov 64   ;;  %s424_s16 = int_to_ptr.hbm [resolvable:$true] %s423_s16 }
  0x1f   : > { %6037 = dma.hbm_to_vmem [thread:$0]  (!%p6964_p6), %s400_s24, 16, %s402_s28, [#allocation11]  }
  0x20   : > { %s451_s15 = sshll.u32 %s10384_s6, 4  ;;  %s6830_s22 = smov 4   ;;  %s452_s15 = int_to_ptr.hbm [resolvable:$true] %s451_s15 }
  0x21   : > { %6043 = dma.hbm_to_vmem [thread:$0]  (!%p6964_p6), %s424_s16, 16, %s426_s23, [#allocation14]  }
  0x22   : > { %s411_s11 = sshll.u32 %s10385_s2, 4  ;;  %s6831_s1 = smov [#allocation12]   ;;  %s412_s11 = int_to_ptr.hbm [resolvable:$true] %s411_s11 }
  0x23   : > { %6049 = dma.hbm_to_vmem [thread:$0]  (!%p6964_p6), %s452_s15, 1024, %s454_s30, [#allocation17], %s6829_s9, %s6829_s9, %s6830_s22  }
  0x24   : > { %s413_s24 = sshll.u32 %s6831_s1, 4  ;;  %s10386_s4 = sld [smem:[#allocation65_spill]]  ;;  %s414_s24 = int_to_ptr.vmem [resolvable:$true] %s413_s24 }
  0x25   : > { %6040 = dma.hbm_to_vmem [thread:$0]  (!%p6964_p6), %s412_s11, 16, %s414_s24, [#allocation11]  }
  0x26   : > { %s6832_s3 = smov [#allocation15]   ;;  %s10387_s10 = sld [smem:[#allocation68_spill]] }
  0x27   : > { %s436_s13 = sshll.u32 %s6832_s3, 4  ;;  %s10312_s15 = smov 128   ;;  %s437_s13 = int_to_ptr.vmem [resolvable:$true] %s436_s13 }
  0x28   : > { %s10313_s30 = smov 8   ;;  %s6835_s11 = smov [#allocation18]  }
  0x29   : > { %s476_s1 = sshll.u32 %s6835_s11, 4  ;;  %s491_s16 = sshll.u32 %s10305_s12, 4  ;;  %s477_s1 = int_to_ptr.vmem [resolvable:$true] %s476_s1  ;;  %s492_s16 = int_to_ptr.hbm [resolvable:$true] %s491_s16 }
  0x2a   : > { %s434_s23 = sshll.u32 %s10386_s4, 4  ;;  %s6836_s27 = smov [#allocation19]   ;;  %s435_s23 = int_to_ptr.hbm [resolvable:$true] %s434_s23 }
  0x2b   : > { %6046 = dma.hbm_to_vmem [thread:$0]  (!%p6964_p6), %s435_s23, 2048, %s437_s13, [#allocation14], %s10312_s15, %s10312_s15, %s10313_s30  }
  0x2c   : > { %s474_s2 = sshll.u32 %s10387_s10, 4  ;;  %s509_s13 = sshll.u32 %s10307_s14, 4  ;;  %s475_s2 = int_to_ptr.hbm [resolvable:$true] %s474_s2  ;;  %s510_s13 = int_to_ptr.vmem [resolvable:$true] %s509_s13 }
  0x2d   : > { %6052 = dma.hbm_to_vmem [thread:$0]  (!%p6964_p6), %s475_s2, 2048, %s477_s1, [#allocation17], %s10312_s15, %s10312_s15, %s10313_s30  }
  0x2e   : > { %s493_s29 = sshll.u32 %s6836_s27, 4  ;;  %s6837_s2 = smov [#allocation21]   ;;  %s494_s29 = int_to_ptr.vmem [resolvable:$true] %s493_s29 }
  0x2f   : > { %6055 = dma.hbm_to_vmem [thread:$0]  (!%p6964_p6), %s492_s16, 2048, %s494_s29, [#allocation20], %s6829_s9, %s6829_s9, %s6830_s22  }
  0x30   : > { %6058 = dma.vmem_to_smem (!%p6964_p6), %s510_s13, 16, %s6837_s2, [#allocation9]  }
  0x31   : > { %s5546_s11 = sadd.s32 4294967294, %s6824_s21   ;;  %s7016_s1 = sadd.s32 1, %s6824_s21  }
  0x32   : > { %s40_s24 = ssub.s32 %s6824_s21, %s7016_s1  ;;  %s43_s28 = sadd.s32 1, %s6820_s20 }
  0x33   : > { %p41_p7 = scmp.eq.s32.totalorder %s40_s24, 0  ;;  %p50_p8 = scmp.ne.s32.totalorder %s6820_s20, %s6816_s19 }
  0x34   : > { %p51_p9 = scmp.eq.s32.totalorder %s6824_s21, 0  ;;  %p56_p10 = scmp.ne.s32.totalorder %s6816_s19, %s6812_s18 }
  0x35   : > { %s7027_s23 = scalar_select %p41_p7, %s6820_s20, %s43_s28  }
  0x36   : > { %p7029_p11 = por %p51_p9, %p50_p8  ;;  %p7035_p12 = por %p57_p1, %p56_p10 }
  0x37   : > { %p374_p13 = scmp.eq.s32.totalorder %s6947_s25, 1  ;;  %p380_p0 = scmp.eq.s32.totalorder %s5546_s11, 1 }
  0x38   : > { %p6075_p2 = scmp.lt.s32.totalorder %s6824_s21, 2  ;;  %s520_s22 = sand.u32 1, %s6820_s20  }
  0x39   : > { %p7042_p5 = por %p374_p13, %p50_p8  ;;  %p7046_p6 = por %p380_p0, %p56_p10 }
  0x3a   : > { %s5557_s13 = sshll.u32 %s520_s22, 8  ;;  %s5903_s27 = sshll.u32 %s6824_s21, 8 }
  0x3b   : > { %s530_s24 = scalar_lea.hbm %s10293_s0, %s5903_s27  ;;  %s524_s28 = scalar_lea.vmem [#allocation6], %s5557_s13 }
  0x3c   : > { %s533_s15 = sshll.u32 %s524_s28, 4  ;;  %s531_s30 = sshll.u32 %s530_s24, 4  ;;  %s534_s15 = int_to_ptr.vmem [resolvable:$true] %s533_s15  ;;  %s532_s30 = int_to_ptr.hbm [resolvable:$true] %s531_s30 }
  0x3d   : > { %p7056_p7 = pnand %p6075_p2, %p7029_p11  ;;  %s521_s4 = scalar_lea.sflag [#allocation7], %s520_s22 }
  0x3e   : > { %s6708_s6 = sshra.s32 %s532_s30, 4  ;;  %s6715_s29 = scalar_lea.hbm %s10293_s0, 512  ;;  %s6709_s6 = int_to_ptr.hbm [resolvable:$true] %s6708_s6 }
  0x3f   : > { %s6710_s10 = scalar_lea.hbm %s6709_s6, 256  ;;  %p6712_p9 = pneg %p7056_p7 }
  0x40   : > { %p6711_p8 = scmp.ne.s32.totalorder %s6709_s6, %s6710_s10  ;;  %p6716_p11 = scmp.lt.s32.totalorder %s6709_s6, %s10293_s0 }
  0x41   : > { %p6717_p0 = scmp.lt.s32.totalorder %s6715_s29, %s6710_s10 }
  0x42   : > { %p6713_p10 = pnand %p6712_p9, %p6711_p8 }
  0x43   : > { %p6718_p2 = por %p6717_p0, %p6716_p11 }
  0x44   : > { %p6714_p13 = pneg %p6713_p10 }
  0x46   : > { %p6719_p4 = pnand %p6718_p2, %p6714_p13 }
  0x48   : > { %6722 = shalt.err (!%p6719_p4)
}
  0x49   : > { %s10393_s22 = smov 8   ;;  %s10394_s24 = smov 128  }
  0x4a   : > { %6062 = dma.hbm_to_vmem [thread:$0]  (!%p7056_p7), %s532_s30, 4096, %s534_s15, %s521_s4, %s10394_s24, %s10394_s24, %s10393_s22  }
  0x4b   : > { %545 = sbr.rel (%p6952_p3) target bundleno = 2579 (0xa13), region = 80 }
  0x50   : > { %s7076_s28 = sand.u32 1, %s6816_s19  }
  0x51   : > { %s5562_s6 = sshll.u32 %s7076_s28, 8  ;;  %s548_s10 = scalar_lea.sflag [#allocation7], %s7076_s28 }
  0x52   : > { %s7082_s13 = scalar_lea.vmem [#allocation6], %s5562_s6 }
  0x53   : > { %6783 = dma.done.wait (%p7035_p12), %s548_s10, 4096  }
  0x54   : > { %6785 = vsyncadd (%p7035_p12), %s548_s10, 4294963200 }
  0x55   : > { %6787 = dma.done.wait (%p57_p1), [#allocation11], 32  }
  0x56   : > { %6789 = vsyncadd (%p57_p1), [#allocation11], 4294967264 }
  0x57   : > { %6791 = dma.done.wait (%p57_p1), [#allocation14], 2064  }
  0x58   : > { %6793 = vsyncadd (%p57_p1), [#allocation14], 4294965232 }
  0x59   : > { %6795 = dma.done.wait (%p57_p1), [#allocation17], 3072  }
  0x5a   : > { %6797 = vsyncadd (%p57_p1), [#allocation17], 4294964224 }
  0x5b   : > { %6799 = dma.done.wait (%p57_p1), [#allocation20], 2048  }
  0x5c   : > { %6801 = vsyncadd (%p57_p1), [#allocation20], 4294965248 }
  0x5d   : > { %6803 = dma.done.wait (%p57_p1), [#allocation9], 16  }
  0x5e   : > { %6805 = vsyncadd (%p57_p1), [#allocation9], 4294967280 }
  0x5f   : > { %597 = sfence }
  0x60   : > { %v728_v0 = vld [vmem:[%s7082_s13] sm:$0xff]  ;;  %v729_v1 = vld [vmem:[%s7082_s13 + $0x8] sm:$0xff]  ;;  %v730_v2 = vld [vmem:[%s7082_s13 + $0x10] sm:$0xff]  ;;  %s5572_s4 = sld [smem:[#allocation21 + $0x1]]  ;;  %s6838_s15 = smov 0.0  }
  0x61   : > { %744 = vxpose.xlu0.b32.start [1/16] %v728_v0, 128  ;;  %v731_v3 = vld [vmem:[%s7082_s13 + $0x18] sm:$0xff]  ;;  %v732_v4 = vld [vmem:[%s7082_s13 + $0x20] sm:$0xff]  ;;  %v733_v5 = vld [vmem:[%s7082_s13 + $0x28] sm:$0xff]  ;;  %s5573_s26 = sld [smem:[#allocation21 + $0x2]] }
  0x62   : > { %v734_v6 = vld [vmem:[%s7082_s13 + $0x30] sm:$0xff]  ;;  %v735_v7 = vld [vmem:[%s7082_s13 + $0x38] sm:$0xff]  ;;  %v736_v8 = vld [vmem:[%s7082_s13 + $0x40] sm:$0xff]  ;;  %s642_s29 = sld [smem:[#allocation21]] }
  0x63   : > { %v737_v11 = vld [vmem:[%s7082_s13 + $0x48] sm:$0xff]  ;;  %v738_v18 = vld [vmem:[%s7082_s13 + $0x50] sm:$0xff]  ;;  %v739_v22 = vld [vmem:[%s7082_s13 + $0x58] sm:$0xff]  ;;  %s5574_s22 = sld [smem:[#allocation21 + $0x3]] }
  0x64   : > { %v740_v23 = vld [vmem:[%s7082_s13 + $0x60] sm:$0xff]  ;;  %v741_v24 = vld [vmem:[%s7082_s13 + $0x68] sm:$0xff]  ;;  %v742_v25 = vld [vmem:[%s7082_s13 + $0x70] sm:$0xff]  ;;  %s5575_s24 = sld [smem:[#allocation21 + $0x4]] }
  0x65   : > { %v743_v26 = vld [vmem:[%s7082_s13 + $0x78] sm:$0xff]  ;;  %v5640_v27 = vld [vmem:[%s7082_s13 + $0x80] sm:$0xff]  ;;  %v5641_v28 = vld [vmem:[%s7082_s13 + $0x88] sm:$0xff] }
  0x66   : > { %s7116_s30 = smax.f32 %s6838_s15, %s5572_s4  ;;  %v5642_v29 = vld [vmem:[%s7082_s13 + $0x90] sm:$0xff]  ;;  %v5643_v30 = vld [vmem:[%s7082_s13 + $0x98] sm:$0xff]  ;;  %v5644_v31 = vld [vmem:[%s7082_s13 + $0xa0] sm:$0xff] }
  0x67   : > { %s7119_s17 = smax.f32 %s6838_s15, %s5573_s26  ;;  %v5645_v33 = vld [vmem:[%s7082_s13 + $0xa8] sm:$0xff]  ;;  %v5646_v35 = vld [vmem:[%s7082_s13 + $0xb0] sm:$0xff]  ;;  %v5647_v37 = vld [vmem:[%s7082_s13 + $0xb8] sm:$0xff] }
  0x68   : > { %s647_s11 = sadd.f32 %s7119_s17, %s7116_s30  ;;  %v5648_v39 = vld [vmem:[%s7082_s13 + $0xc0] sm:$0xff]  ;;  %v5649_v41 = vld [vmem:[%s7082_s13 + $0xc8] sm:$0xff]  ;;  %v5650_v43 = vld [vmem:[%s7082_s13 + $0xd0] sm:$0xff] }
  0x69   : > { %745 = vxpose.xlu0.b32.cont [2/16] %v729_v1, 128  ;;  %v5651_v45 = vld [vmem:[%s7082_s13 + $0xd8] sm:$0xff]  ;;  %v5652_v47 = vld [vmem:[%s7082_s13 + $0xe0] sm:$0xff]  ;;  %v5653_v49 = vld [vmem:[%s7082_s13 + $0xe8] sm:$0xff]  ;;  %s8561_s10 = smax.f32 %s6838_s15, %s5574_s22 }
  0x6a   : > { %s648_s27 = sadd.f32 1e-12, %s647_s11  ;;  %v5654_v51 = vld [vmem:[%s7082_s13 + $0xf0] sm:$0xff]  ;;  %v5655_v53 = vld [vmem:[%s7082_s13 + $0xf8] sm:$0xff]  ;;  %s8564_s13 = smax.f32 %s6838_s15, %s5575_s24 }
  0x6b   : > { %s687_s4 = sadd.f32 %s8564_s13, %s8561_s10 }
  0x6c   : > { %v649_v9 = vstv %s648_s27  ;;  %s10518_s15 = sld [smem:[#allocation70_spill]] }
  0x6d   : > { %6144 = vrcp.f32 %v649_v9  ;;  %v661_v15 = vand.u32 2147483648, %v649_v9  ;;  %vm655_vm0 = vweird.f32 %v649_v9  ;;  %v659_v17 = vand.u32 2147483647, %v649_v9  ;;  %s688_s26 = sadd.f32 1e-12, %s687_s4 }
  0x6f   : > { %v662_v19 = vor.u32 1.1754944e-38, %v661_v15  ;;  %vm660_vm3 = vcmp.eq.f32.partialorder %v659_v17, 8.507059e+37 }
  0x71   : > { %746 = vxpose.xlu0.b32.cont [3/16] %v730_v2, 128 }
  0x73   : > { %v6145_v10 = vpop.eup %6144 }
  0x74   : > { %v651_v12 = vmul.f32 %v6145_v10, %v649_v9  ;;  %vm656_vm1 = vweird.f32 %v6145_v10 }
  0x75   : > { %vm657_vm2 = vmor %vm655_vm0, %vm656_vm1 }
  0x76   : > { %v652_v13 = vsub.f32 1.0, %v651_v12 }
  0x78   : > { %v653_v14 = vmul.f32 %v6145_v10, %v652_v13 }
  0x79   : > { %747 = vxpose.xlu0.b32.cont [4/16] %v731_v3, 128 }
  0x7a   : > { %v654_v16 = vadd.f32 %v6145_v10, %v653_v14 }
  0x7c   : > { %v658_v20 = vsel %vm657_vm2, %v6145_v10, %v654_v16 }
  0x7d   : > { %v663_v21 = vsel %vm660_vm3, %v662_v19, %v658_v20 }
  0x7e   : > { %5994 = vpush %v663_v21 }
  0x81   : > { %748 = vxpose.xlu0.b32.cont [5/16] %v732_v4, 128 }
  0x89   : > { %749 = vxpose.xlu0.b32.cont [6/16] %v733_v5, 128 }
  0x91   : > { %750 = vxpose.xlu0.b32.cont [7/16] %v734_v6, 128 }
  0x99   : > { %751 = vxpose.xlu0.b32.cont [8/16] %v735_v7, 128  ;;  %v6839_v7 = vmov 128.0  }
  0x9a   : > { %6146 = vrcp.f32 %v6839_v7 }
  0xa0   : > { %v6147_v9 = vpop.eup %6146 }
  0xa1   : > { %752 = vxpose.xlu0.b32.cont [9/16] %v736_v8, 128  ;;  %v825_v10 = vmul.f32 128.0, %v6147_v9  ;;  %vm829_vm4 = vweird.f32 %v6147_v9 }
  0xa9   : > { %753 = vxpose.xlu0.b32.cont [10/16] %v737_v11, 128  ;;  %v826_v11 = vsub.f32 1.0, %v825_v10 }
  0xab   : > { %v827_v13 = vmul.f32 %v6147_v9, %v826_v11 }
  0xad   : > { %v828_v15 = vadd.f32 %v6147_v9, %v827_v13 }
  0xaf   : > { %v7240_v17 = vsel %vm829_vm4, %v6147_v9, %v828_v15  ;;  %s5995_s27 = spop %5994 }
  0xb0   : > { %s682_s2 = smul.f32 %s5995_s27, %s7119_s17  ;;  %s10225_s17 = scalar_lea.vmem [#allocation22], %s5562_s6 }
  0xb1   : > { %754 = vxpose.xlu0.b32.cont [11/16] %v738_v18, 128  ;;  %s5977_s6 = sshll.u32 %s6947_s25, 8 }
  0xb9   : > { %755 = vxpose.xlu0.b32.cont [12/16] %v739_v22, 128 }
  0xc1   : > { %756 = vxpose.xlu0.b32.cont [13/16] %v740_v23, 128 }
  0xc9   : > { %757 = vxpose.xlu0.b32.cont [14/16] %v741_v24, 128 }
  0xd1   : > { %758 = vxpose.xlu0.b32.cont [15/16] %v742_v25, 128 }
  0xd9   : > { %759 = vxpose.xlu0.b32.end [16/16] %v743_v26, 128 }
  0xe1   : > { %1851 = vxpose.xlu0.b32.start [1/16] %v5640_v27, 128 }
  0xe9   : > { %1852 = vxpose.xlu0.b32.cont [2/16] %v5641_v28, 128 }
  0xf1   : > { %1853 = vxpose.xlu0.b32.cont [3/16] %v5642_v29, 128 }
  0xf9   : > { %1854 = vxpose.xlu0.b32.cont [4/16] %v5643_v30, 128 }
 0x101   : > { %1855 = vxpose.xlu0.b32.cont [5/16] %v5644_v31, 128 }
 0x105   : > { %v7137_v32 = vpop.trf.xlu0 }
 0x106   : > { %10395 = vst [vmem:[#allocation30_spill] sm:$0xff] %v7137_v32  ;;  %792 = vadd.xlane.f32.xlu1 %v7137_v32 }
 0x109   : > { %1856 = vxpose.xlu0.b32.cont [6/16] %v5645_v33, 128 }
 0x10d   : > { %v7141_v34 = vpop.trf.xlu0 }
 0x10e   : > { %10396 = vst [vmem:[#allocation31_spill] sm:$0xff] %v7141_v34 }
 0x111   : > { %1857 = vxpose.xlu0.b32.cont [7/16] %v5646_v35, 128 }
 0x115   : > { %v7144_v36 = vpop.trf.xlu0 }
 0x116   : > { %10397 = vst [vmem:[#allocation32_spill] sm:$0xff] %v7144_v36 }
 0x119   : > { %1858 = vxpose.xlu0.b32.cont [8/16] %v5647_v37, 128 }
 0x11d   : > { %v7147_v38 = vpop.trf.xlu0 }
 0x11e   : > { %10398 = vst [vmem:[#allocation33_spill] sm:$0xff] %v7147_v38 }
 0x121   : > { %1859 = vxpose.xlu0.b32.cont [9/16] %v5648_v39, 128 }
 0x125   : > { %v7150_v40 = vpop.trf.xlu0 }
 0x126   : > { %10399 = vst [vmem:[#allocation34_spill] sm:$0xff] %v7150_v40 }
 0x129   : > { %1860 = vxpose.xlu0.b32.cont [10/16] %v5649_v41, 128 }
 0x12d   : > { %v7153_v42 = vpop.trf.xlu0 }
 0x12e   : > { %10400 = vst [vmem:[#allocation35_spill] sm:$0xff] %v7153_v42 }
 0x131   : > { %1861 = vxpose.xlu0.b32.cont [11/16] %v5650_v43, 128 }
 0x135   : > { %v7156_v44 = vpop.trf.xlu0 }
 0x136   : > { %10401 = vst [vmem:[#allocation36_spill] sm:$0xff] %v7156_v44 }
 0x139   : > { %1862 = vxpose.xlu0.b32.cont [12/16] %v5651_v45, 128 }
 0x13d   : > { %v7159_v46 = vpop.trf.xlu0 }
 0x13e   : > { %10402 = vst [vmem:[#allocation37_spill] sm:$0xff] %v7159_v46 }
 0x141   : > { %1863 = vxpose.xlu0.b32.cont [13/16] %v5652_v47, 128 }
 0x145   : > { %v7162_v48 = vpop.trf.xlu0 }
 0x146   : > { %10403 = vst [vmem:[#allocation38_spill] sm:$0xff] %v7162_v48 }
 0x149   : > { %1864 = vxpose.xlu0.b32.cont [14/16] %v5653_v49, 128 }
 0x14d   : > { %v7165_v50 = vpop.trf.xlu0 }
 0x14e   : > { %10404 = vst [vmem:[#allocation39_spill] sm:$0xff] %v7165_v50 }
 0x151   : > { %1865 = vxpose.xlu0.b32.cont [15/16] %v5654_v51, 128 }
 0x155   : > { %v7168_v52 = vpop.trf.xlu0 }
 0x156   : > { %10405 = vst [vmem:[#allocation40_spill] sm:$0xff] %v7168_v52 }
 0x159   : > { %1866 = vxpose.xlu0.b32.end [16/16] %v5655_v53, 128 }
 0x15d   : > { %v7171_v54 = vpop.trf.xlu0 }
 0x15e   : > { %10406 = vst [vmem:[#allocation41_spill] sm:$0xff] %v7171_v54 }
 0x165   : > { %v7173_v55 = vpop.trf.xlu0 }
 0x166   : > { %10407 = vst [vmem:[#allocation42_spill] sm:$0xff] %v7173_v55 }
 0x16d   : > { %v7175_v56 = vpop.trf.xlu0 }
 0x16e   : > { %10408 = vst [vmem:[#allocation43_spill] sm:$0xff] %v7175_v56 }
 0x175   : > { %v7177_v57 = vpop.trf.xlu0 }
 0x176   : > { %10409 = vst [vmem:[#allocation44_spill] sm:$0xff] %v7177_v57 }
 0x179   : > { %v793_v14 = vpop.xlane.xlu1 %792 }
 0x17a   : > { %v831_v19 = vmul.f32 %v7240_v17, %v793_v14 }
 0x17c   : > { %v7248_v21 = vsub.f32 %v7137_v32, %v831_v19 }
 0x17d   : > { %v7179_v58 = vpop.trf.xlu0 }
 0x17e   : > { %10410 = vst [vmem:[#allocation45_spill] sm:$0xff] %v7179_v58  ;;  %v863_v26 = vmul.f32 %v7248_v21, %v7248_v21 }
 0x185   : > { %v7181_v59 = vpop.trf.xlu0 }
 0x186   : > { %10411 = vst [vmem:[#allocation46_spill] sm:$0xff] %v7181_v59  ;;  %1899 = vadd.xlane.f32.xlu1 %v7181_v59 }
 0x18d   : > { %v7184_v60 = vpop.trf.xlu0 }
 0x18e   : > { %10412 = vst [vmem:[#allocation47_spill] sm:$0xff] %v7184_v60  ;;  %794 = vadd.xlane.f32.xlu1 %v7141_v34  ;;  %1901 = vadd.xlane.f32.xlu2 %v7184_v60 }
 0x195   : > { %v7188_v61 = vpop.trf.xlu0 }
 0x196   : > { %10413 = vst [vmem:[#allocation48_spill] sm:$0xff] %v7188_v61  ;;  %796 = vadd.xlane.f32.xlu2 %v7144_v36  ;;  %1903 = vadd.xlane.f32.xlu1 %v7188_v61 }
 0x19d   : > { %v7192_v62 = vpop.trf.xlu0 }
 0x19e   : > { %10414 = vst [vmem:[#allocation49_spill] sm:$0xff] %v7192_v62  ;;  %798 = vadd.xlane.f32.xlu2 %v7147_v38  ;;  %800 = vadd.xlane.f32.xlu1 %v7150_v40 }
 0x1a5   : > { %v7196_v63 = vpop.trf.xlu0 }
 0x1a6   : > { %10415 = vst [vmem:[#allocation50_spill] sm:$0xff] %v7196_v63  ;;  %1905 = vadd.xlane.f32.xlu2 %v7192_v62  ;;  %1907 = vadd.xlane.f32.xlu1 %v7196_v63 }
 0x1ad   : > { %v7200_v0 = vpop.trf.xlu0 }
 0x1ae   : > { %10416 = vst [vmem:[#allocation51_spill] sm:$0xff] %v7200_v0  ;;  %802 = vadd.xlane.f32.xlu2 %v7153_v42  ;;  %804 = vadd.xlane.f32.xlu1 %v7156_v44 }
 0x1b5   : > { %v7204_v1 = vpop.trf.xlu0 }
 0x1b6   : > { %10417 = vst [vmem:[#allocation52_spill] sm:$0xff] %v7204_v1  ;;  %1909 = vadd.xlane.f32.xlu2 %v7200_v0  ;;  %1911 = vadd.xlane.f32.xlu1 %v7204_v1 }
 0x1bd   : > { %v7208_v2 = vpop.trf.xlu0 }
 0x1be   : > { %10418 = vst [vmem:[#allocation53_spill] sm:$0xff] %v7208_v2  ;;  %806 = vadd.xlane.f32.xlu2 %v7159_v46  ;;  %808 = vadd.xlane.f32.xlu1 %v7162_v48 }
 0x1c5   : > { %v7212_v3 = vpop.trf.xlu0 }
 0x1c6   : > { %10419 = vst [vmem:[#allocation54_spill] sm:$0xff] %v7212_v3  ;;  %1913 = vadd.xlane.f32.xlu2 %v7208_v2  ;;  %1915 = vadd.xlane.f32.xlu1 %v7212_v3 }
 0x1cd   : > { %v7216_v4 = vpop.trf.xlu0 }
 0x1ce   : > { %10420 = vst [vmem:[#allocation55_spill] sm:$0xff] %v7216_v4  ;;  %810 = vadd.xlane.f32.xlu2 %v7165_v50  ;;  %812 = vadd.xlane.f32.xlu1 %v7168_v52 }
 0x1d5   : > { %v7220_v5 = vpop.trf.xlu0 }
 0x1d6   : > { %10421 = vst [vmem:[#allocation56_spill] sm:$0xff] %v7220_v5  ;;  %1917 = vadd.xlane.f32.xlu2 %v7216_v4  ;;  %1919 = vadd.xlane.f32.xlu1 %v7220_v5 }
 0x1dd   : > { %v7224_v6 = vpop.trf.xlu0 }
 0x1de   : > { %814 = vadd.xlane.f32.xlu2 %v7171_v54  ;;  %816 = vadd.xlane.f32.xlu1 %v7173_v55 }
 0x1e5   : > { %v7228_v8 = vpop.trf.xlu0 }
 0x1e6   : > { %1921 = vadd.xlane.f32.xlu2 %v7224_v6  ;;  %1923 = vadd.xlane.f32.xlu1 %v7228_v8 }
 0x1ed   : > { %v7232_v12 = vpop.trf.xlu0 }
 0x1ee   : > { %818 = vadd.xlane.f32.xlu2 %v7175_v56  ;;  %820 = vadd.xlane.f32.xlu1 %v7177_v57 }
 0x1f5   : > { %v7236_v16 = vpop.trf.xlu0 }
 0x1f6   : > { %1925 = vadd.xlane.f32.xlu2 %v7232_v12  ;;  %1927 = vadd.xlane.f32.xlu0 %v7236_v16 }
 0x1f9   : > { %v1900_v18 = vpop.xlane.xlu1 %1899 }
 0x1fa   : > { %v1931_v25 = vmul.f32 %v1900_v18, %v7240_v17 }
 0x1fc   : > { %v7261_v30 = vsub.f32 %v7181_v59, %v1931_v25 }
 0x1fd   : > { %v7243_v20 = vpop.trf.xlu0 }
 0x1fe   : > { %822 = vadd.xlane.f32.xlu2 %v7179_v58  ;;  %1929 = vadd.xlane.f32.xlu1 %v7243_v20  ;;  %v1963_v39 = vmul.f32 %v7261_v30, %v7261_v30 }
 0x201   : > { %v795_v22 = vpop.xlane.xlu1 %794  ;;  %v1902_v23 = vpop.xlane.xlu2 %1901 }
 0x202   : > { %v832_v24 = vmul.f32 %v7240_v17, %v795_v22  ;;  %v1932_v28 = vmul.f32 %v1902_v23, %v7240_v17 }
 0x204   : > { %v7255_v27 = vsub.f32 %v7141_v34, %v832_v24  ;;  %v7264_v35 = vsub.f32 %v7184_v60, %v1932_v28  ;;  %v5935_v60 = vld [vmem:[#allocation15 + $0x74] sm:$0xf0] }
 0x206   : > { %879 = vadd.xlane.f32.xlu1 %v863_v26  ;;  %v864_v29 = vmul.f32 %v7255_v27, %v7255_v27  ;;  %v1964_v43 = vmul.f32 %v7264_v35, %v7264_v35 }
 0x208   : > { %881 = vadd.xlane.f32.xlu2 %v864_v29 }
 0x209   : > { %v797_v31 = vpop.xlane.xlu2 %796  ;;  %v1904_v33 = vpop.xlane.xlu1 %1903 }
 0x20a   : > { %v833_v37 = vmul.f32 %v7240_v17, %v797_v31  ;;  %v1933_v41 = vmul.f32 %v1904_v33, %v7240_v17 }
 0x20c   : > { %v7273_v45 = vsub.f32 %v7144_v36, %v833_v37  ;;  %v7276_v51 = vsub.f32 %v7188_v61, %v1933_v41 }
 0x20e   : > { %1979 = vadd.xlane.f32.xlu1 %v1963_v39  ;;  %v865_v53 = vmul.f32 %v7273_v45, %v7273_v45  ;;  %v1965_v9 = vmul.f32 %v7276_v51, %v7276_v51 }
 0x210   : > { %1981 = vadd.xlane.f32.xlu2 %v1964_v43 }
 0x211   : > { %v799_v47 = vpop.xlane.xlu2 %798  ;;  %v801_v49 = vpop.xlane.xlu1 %800 }
 0x212   : > { %v834_v7 = vmul.f32 %v7240_v17, %v799_v47  ;;  %v835_v18 = vmul.f32 %v7240_v17, %v801_v49 }
 0x214   : > { %v7285_v14 = vsub.f32 %v7147_v38, %v834_v7  ;;  %v7300_v28 = vsub.f32 %v7150_v40, %v835_v18 }
 0x216   : > { %883 = vadd.xlane.f32.xlu1 %v865_v53  ;;  %v866_v22 = vmul.f32 %v7285_v14, %v7285_v14  ;;  %v867_v33 = vmul.f32 %v7300_v28, %v7300_v28 }
 0x218   : > { %1983 = vadd.xlane.f32.xlu2 %v1965_v9 }
 0x219   : > { %v1906_v10 = vpop.xlane.xlu2 %1905  ;;  %v1908_v11 = vpop.xlane.xlu1 %1907 }
 0x21a   : > { %v1934_v13 = vmul.f32 %v1906_v10, %v7240_v17  ;;  %v1935_v19 = vmul.f32 %v1908_v11, %v7240_v17 }
 0x21c   : > { %v7288_v15 = vsub.f32 %v7192_v62, %v1934_v13  ;;  %v7297_v26 = vsub.f32 %v7196_v63, %v1935_v19  ;;  %v5915_v63 = vld [vmem:[#allocation15 + $0x54] sm:$0xf0]  ;;  %v5714_v62 = vld [vmem:[#allocation15 + $0x70] sm:$0xf] }
 0x21e   : > { %v1966_v23 = vmul.f32 %v7288_v15, %v7288_v15  ;;  %v1967_v31 = vmul.f32 %v7297_v26, %v7297_v26 }
 0x220   : > { %885 = vadd.xlane.f32.xlu2 %v866_v22  ;;  %1985 = vadd.xlane.f32.xlu1 %v1966_v23 }
 0x221   : > { %v803_v24 = vpop.xlane.xlu2 %802  ;;  %v805_v25 = vpop.xlane.xlu1 %804 }
 0x222   : > { %v836_v29 = vmul.f32 %v7240_v17, %v803_v24  ;;  %v837_v49 = vmul.f32 %v7240_v17, %v805_v25 }
 0x224   : > { %v7309_v43 = vsub.f32 %v7153_v42, %v836_v29  ;;  %v7324_v18 = vsub.f32 %v7156_v44, %v837_v49  ;;  %v7450_v42 = vld [vmem:[#allocation12] ss:$0 sm:$0xff] }
 0x226   : > { %v868_v7 = vmul.f32 %v7309_v43, %v7309_v43  ;;  %v869_v23 = vmul.f32 %v7324_v18, %v7324_v18 }
 0x228   : > { %1987 = vadd.xlane.f32.xlu2 %v1967_v31  ;;  %887 = vadd.xlane.f32.xlu1 %v867_v33 }
 0x229   : > { %v1910_v37 = vpop.xlane.xlu2 %1909  ;;  %v1912_v39 = vpop.xlane.xlu1 %1911 }
 0x22a   : > { %v1936_v41 = vmul.f32 %v1910_v37, %v7240_v17  ;;  %v1937_v53 = vmul.f32 %v1912_v39, %v7240_v17 }
 0x22c   : > { %v7312_v47 = vsub.f32 %v7200_v0, %v1936_v41  ;;  %v7321_v13 = vsub.f32 %v7204_v1, %v1937_v53  ;;  %v5618_v0 = vld [vmem:[#allocation15 + $0x50] sm:$0xf] }
 0x22e   : > { %v1968_v9 = vmul.f32 %v7312_v47, %v7312_v47  ;;  %v1969_v22 = vmul.f32 %v7321_v13, %v7321_v13 }
 0x230   : > { %889 = vadd.xlane.f32.xlu2 %v868_v7  ;;  %1989 = vadd.xlane.f32.xlu1 %v1968_v9 }
 0x231   : > { %v807_v10 = vpop.xlane.xlu2 %806  ;;  %v809_v11 = vpop.xlane.xlu1 %808 }
 0x232   : > { %v838_v19 = vmul.f32 %v7240_v17, %v807_v10  ;;  %v839_v37 = vmul.f32 %v7240_v17, %v809_v11 }
 0x234   : > { %v7333_v31 = vsub.f32 %v7159_v46, %v838_v19  ;;  %v7348_v10 = vsub.f32 %v7162_v48, %v839_v37 }
 0x236   : > { %v870_v41 = vmul.f32 %v7333_v31, %v7333_v31 }
 0x238   : > { %1991 = vadd.xlane.f32.xlu2 %v1969_v22  ;;  %891 = vadd.xlane.f32.xlu1 %v869_v23  ;;  %v871_v23 = vmul.f32 %v7348_v10, %v7348_v10 }
 0x239   : > { %v1914_v24 = vpop.xlane.xlu2 %1913  ;;  %v1916_v25 = vpop.xlane.xlu1 %1915 }
 0x23a   : > { %v1938_v29 = vmul.f32 %v1914_v24, %v7240_v17  ;;  %v1939_v39 = vmul.f32 %v1916_v25, %v7240_v17 }
 0x23c   : > { %v7336_v33 = vsub.f32 %v7208_v2, %v1938_v29  ;;  %v7345_v9 = vsub.f32 %v7212_v3, %v1939_v39 }
 0x23e   : > { %v1970_v49 = vmul.f32 %v7336_v33, %v7336_v33  ;;  %v1971_v22 = vmul.f32 %v7345_v9, %v7345_v9 }
 0x240   : > { %893 = vadd.xlane.f32.xlu2 %v870_v41  ;;  %1993 = vadd.xlane.f32.xlu1 %v1970_v49 }
 0x241   : > { %v811_v53 = vpop.xlane.xlu2 %810  ;;  %v813_v7 = vpop.xlane.xlu1 %812 }
 0x242   : > { %v840_v11 = vmul.f32 %v7240_v17, %v811_v53  ;;  %v841_v19 = vmul.f32 %v7240_v17, %v813_v7 }
 0x244   : > { %v7359_v29 = vsub.f32 %v7165_v50, %v840_v11  ;;  %v7362_v37 = vsub.f32 %v7168_v52, %v841_v19 }
 0x246   : > { %v872_v39 = vmul.f32 %v7359_v29, %v7359_v29  ;;  %v873_v41 = vmul.f32 %v7362_v37, %v7362_v37 }
 0x248   : > { %1995 = vadd.xlane.f32.xlu2 %v1971_v22  ;;  %895 = vadd.xlane.f32.xlu1 %v871_v23 }
 0x249   : > { %v1918_v24 = vpop.xlane.xlu2 %1917  ;;  %v7356_v25 = vpop.xlane.xlu1 %1919 }
 0x250   : > { %897 = vadd.xlane.f32.xlu2 %v872_v39  ;;  %899 = vadd.xlane.f32.xlu1 %v873_v41  ;;  %v5634_v39 = vld [vmem:[#allocation15 + $0x70] sm:$0xf]  ;;  %v5919_v41 = vld [vmem:[#allocation15 + $0x74] sm:$0xf0] }
 0x251   : > { %v815_v49 = vpop.xlane.xlu2 %814  ;;  %v817_v53 = vpop.xlane.xlu1 %816 }
 0x252   : > { %v842_v7 = vmul.f32 %v7240_v17, %v815_v49  ;;  %v843_v22 = vmul.f32 %v7240_v17, %v817_v53  ;;  %v5635_v53 = vor.u32 %v5919_v41, %v5634_v39 }
 0x254   : > { %v7371_v11 = vsub.f32 %v7171_v54, %v842_v7  ;;  %v7374_v19 = vsub.f32 %v7173_v55, %v843_v22  ;;  %1352 = vmatpush.bf16.msra.mxu1 %v5635_v53  ;;  %5978 = vmatpush.bf16.msra.mxu3 %v5635_v53  ;;  %v5626_v7 = vld [vmem:[#allocation15 + $0x60] sm:$0xf]  ;;  %v5917_v22 = vld [vmem:[#allocation15 + $0x64] sm:$0xf0]  ;;  %v5715_v54 = vor.u32 %v5935_v60, %v5714_v62 }
 0x255   : > { %v5627_v1 = vor.u32 %v5917_v22, %v5626_v7  ;;  %v5913_v53 = vld [vmem:[#allocation15 + $0x44] sm:$0xf0]  ;;  %v5706_v7 = vld [vmem:[#allocation15 + $0x60] sm:$0xf] }
 0x256   : > { %v874_v23 = vmul.f32 %v7371_v11, %v7371_v11  ;;  %v875_v3 = vmul.f32 %v7374_v19, %v7374_v19  ;;  %2441 = vmatpush.bf16.msra.mxu2 %v5715_v54  ;;  %v5911_v54 = vld [vmem:[#allocation15 + $0x34] sm:$0xf0] }
 0x258   : > { %901 = vadd.xlane.f32.xlu2 %v874_v23  ;;  %903 = vadd.xlane.f32.xlu1 %v875_v3  ;;  %v5619_v3 = vor.u32 %v5915_v63, %v5618_v0  ;;  %v5933_v63 = vld [vmem:[#allocation15 + $0x64] sm:$0xf0]  ;;  %v1940_v0 = vmul.f32 %v1918_v24, %v7240_v17 }
 0x259   : > { %v7380_v2 = vpop.xlane.xlu2 %1921  ;;  %v7382_v49 = vpop.xlane.xlu1 %1923  ;;  %1353 = vmatpush.bf16.msra.mxu1 %v5627_v1  ;;  %5979 = vmatpush.bf16.msra.mxu3 %v5627_v1  ;;  %v5610_v1 = vld [vmem:[#allocation15 + $0x40] sm:$0xf]  ;;  %v5707_v62 = vor.u32 %v5933_v63, %v5706_v7  ;;  %v5909_v7 = vld [vmem:[#allocation15 + $0x24] sm:$0xf0] }
 0x25a   : > { %v5611_v22 = vor.u32 %v5913_v53, %v5610_v1  ;;  %v5931_v1 = vld [vmem:[#allocation15 + $0x54] sm:$0xf0]  ;;  %v7400_v24 = vsub.f32 %v7216_v4, %v1940_v0  ;;  %v5690_v63 = vld [vmem:[#allocation15 + $0x40] sm:$0xf]  ;;  %v5682_v0 = vld [vmem:[#allocation15 + $0x30] sm:$0xf] }
 0x25b   : > { %2442 = vmatpush.bf16.msra.mxu2 %v5707_v62  ;;  %v5586_v62 = vld [vmem:[#allocation15 + $0x10] sm:$0xf] }
 0x25d   : > { %1354 = vmatpush.bf16.msra.mxu1 %v5619_v3  ;;  %5980 = vmatpush.bf16.msra.mxu3 %v5619_v3 }
 0x261   : > { %v819_v61 = vpop.xlane.xlu2 %818  ;;  %v821_v23 = vpop.xlane.xlu1 %820  ;;  %1355 = vmatpush.bf16.msra.mxu1 %v5611_v22  ;;  %5981 = vmatpush.bf16.msra.mxu3 %v5611_v22 }
 0x262   : > { %v844_v59 = vmul.f32 %v7240_v17, %v819_v61  ;;  %v845_v55 = vmul.f32 %v7240_v17, %v821_v23 }
 0x264   : > { %v7387_v39 = vsub.f32 %v7175_v56, %v844_v59  ;;  %v7390_v41 = vsub.f32 %v7177_v57, %v845_v55  ;;  %v5602_v55 = vld [vmem:[#allocation15 + $0x30] sm:$0xf]  ;;  %v5594_v57 = vld [vmem:[#allocation15 + $0x20] sm:$0xf] }
 0x265   : > { %v5698_v59 = vld [vmem:[#allocation15 + $0x50] sm:$0xf]  ;;  %v5603_v3 = vor.u32 %v5911_v54, %v5602_v55  ;;  %v5595_v22 = vor.u32 %v5909_v7, %v5594_v57  ;;  %v5907_v55 = vld [vmem:[#allocation15 + $0x14] sm:$0xf0] }
 0x266   : > { %v876_v61 = vmul.f32 %v7387_v39, %v7387_v39  ;;  %v877_v60 = vmul.f32 %v7390_v41, %v7390_v41  ;;  %v5699_v53 = vor.u32 %v5931_v1, %v5698_v59  ;;  %v5927_v1 = vld [vmem:[#allocation15 + $0x34] sm:$0xf0] }
 0x267   : > { %1356 = vmatpush.bf16.msra.mxu1 %v5603_v3  ;;  %5982 = vmatpush.bf16.msra.mxu3 %v5603_v3  ;;  %v5587_v3 = vor.u32 %v5907_v55, %v5586_v62  ;;  %v5683_v57 = vor.u32 %v5927_v1, %v5682_v0  ;;  %v5925_v55 = vld [vmem:[#allocation15 + $0x24] sm:$0xf0]  ;;  %v5666_v1 = vld [vmem:[#allocation15 + $0x10] sm:$0xf] }
 0x268   : > { %905 = vadd.xlane.f32.xlu2 %v876_v61  ;;  %907 = vadd.xlane.f32.xlu1 %v877_v60  ;;  %v5929_v61 = vld [vmem:[#allocation15 + $0x44] sm:$0xf0]  ;;  %v1972_v60 = vmul.f32 %v7400_v24, %v7400_v24 }
 0x269   : > { %v7397_v23 = vpop.xlane.xlu2 %1925  ;;  %2443 = vmatpush.bf16.msra.mxu2 %v5699_v53  ;;  %v5691_v56 = vor.u32 %v5929_v61, %v5690_v63  ;;  %v5578_v63 = vld [vmem:[#allocation15] sm:$0xf] }
 0x26a   : > { %v5674_v61 = vld [vmem:[#allocation15 + $0x20] sm:$0xf] }
 0x26b   : > { %1357 = vmatpush.bf16.msra.mxu1 %v5595_v22  ;;  %5983 = vmatpush.bf16.msra.mxu3 %v5595_v22  ;;  %v5905_v22 = vld [vmem:[#allocation15 + $0x4] sm:$0xf0]  ;;  %v5675_v4 = vor.u32 %v5925_v55, %v5674_v61 }
 0x26c   : > { %v5579_v62 = vor.u32 %v5905_v22, %v5578_v63  ;;  %v5921_v61 = vld [vmem:[#allocation15 + $0x4] sm:$0xf0] }
 0x26d   : > { %2444 = vmatpush.bf16.msra.mxu2 %v5691_v56 }
 0x26f   : > { %1358 = vmatpush.bf16.msra.mxu1 %v5587_v3  ;;  %5984 = vmatpush.bf16.msra.mxu3 %v5587_v3 }
 0x270   : > { %1997 = vadd.xlane.f32.xlu1 %v1972_v60  ;;  %v1941_v60 = vmul.f32 %v7356_v25, %v7240_v17 }
 0x271   : > { %v823_v54 = vpop.xlane.xlu2 %822  ;;  %v7404_v59 = vpop.xlane.xlu1 %1929  ;;  %2445 = vmatpush.bf16.msra.mxu2 %v5683_v57 }
 0x272   : > { %v846_v53 = vmul.f32 %v7240_v17, %v823_v54  ;;  %v7416_v3 = vsub.f32 %v7220_v5, %v1941_v60 }
 0x273   : > { %1359 = vmatpush.bf16.msra.mxu1 %v5579_v62  ;;  %5985 = vmatpush.bf16.msra.mxu3 %v5579_v62 }
 0x274   : > { %v7408_v7 = vsub.f32 %v7179_v58, %v846_v53  ;;  %10422 = vst [vmem:[#allocation57_spill] sm:$0xff] %v7416_v3  ;;  %v5923_v53 = vld [vmem:[#allocation15 + $0x14] sm:$0xf0]  ;;  %v1973_v22 = vmul.f32 %v7416_v3, %v7416_v3 }
 0x275   : > { %2446 = vmatpush.bf16.msra.mxu2 %v5675_v4  ;;  %v5667_v25 = vor.u32 %v5923_v53, %v5666_v1  ;;  %v5658_v4 = vld [vmem:[#allocation15] sm:$0xf] }
 0x276   : > { %v878_v56 = vmul.f32 %v7408_v7, %v7408_v7 }
 0x278   : > { %909 = vadd.xlane.f32.xlu2 %v878_v56  ;;  %v5659_v56 = vor.u32 %v5921_v61, %v5658_v4 }
 0x279   : > { %v880_v0 = vpop.xlane.xlu1 %879  ;;  %2447 = vmatpush.bf16.msra.mxu2 %v5667_v25 }
 0x27a   : > { %v911_v54 = vmul.f32 %v880_v0, %v7240_v17 }
 0x27b   : > { %v882_v57 = vpop.xlane.xlu2 %881 }
 0x27c   : > { %v927_v58 = vadd.f32 1e-05, %v911_v54  ;;  %v912_v52 = vmul.f32 %v882_v57, %v7240_v17 }
 0x27d   : > { %2448 = vmatpush.bf16.msra.mxu2 %v5659_v56 }
 0x27e   : > { %6148 = vrsqrt.f32 %v927_v58  ;;  %v928_v63 = vadd.f32 1e-05, %v912_v52  ;;  %vm949_vm7 = vweird.f32 %v927_v58 }
 0x280   : > { %6150 = vrsqrt.f32 %v928_v63  ;;  %1999 = vadd.xlane.f32.xlu2 %v1973_v22  ;;  %vm959_vm9 = vweird.f32 %v928_v63 }
 0x281   : > { %v1980_v60 = vpop.xlane.xlu1 %1979 }
 0x282   : > { %v2011_v62 = vmul.f32 %v1980_v60, %v7240_v17 }
 0x283   : > { %v1982_v55 = vpop.xlane.xlu2 %1981 }
 0x284   : > { %v6149_v0 = vpop.eup %6148  ;;  %v7422_v54 = vadd.f32 1e-05, %v2011_v62  ;;  %v2012_v1 = vmul.f32 %v1982_v55, %v7240_v17 }
 0x285   : > { %v944_v53 = vmul.f32 %v6149_v0, %v927_v58  ;;  %vm950_vm5 = vweird.f32 %v6149_v0 }
 0x286   : > { %v6151_v52 = vpop.eup %6150  ;;  %6152 = vrsqrt.f32 %v7422_v54  ;;  %v7426_v57 = vadd.f32 1e-05, %v2012_v1  ;;  %vm951_vm8 = vmor %vm949_vm7, %vm950_vm5  ;;  %vm2049_vm13 = vweird.f32 %v7422_v54 }
 0x287   : > { %v945_v25 = vmul.f32 %v6149_v0, %v944_v53  ;;  %v954_v4 = vmul.f32 %v6151_v52, %v928_v63  ;;  %vm960_vm6 = vweird.f32 %v6151_v52 }
 0x288   : > { %6154 = vrsqrt.f32 %v7426_v57  ;;  %vm961_vm10 = vmor %vm959_vm9, %vm960_vm6  ;;  %vm2059_vm15 = vweird.f32 %v7426_v57 }
 0x289   : > { %v946_v22 = vmul.f32 0.5, %v945_v25  ;;  %v955_v61 = vmul.f32 %v6151_v52, %v954_v4  ;;  %v884_v56 = vpop.xlane.xlu1 %883 }
 0x28a   : > { %v913_v60 = vmul.f32 %v884_v56, %v7240_v17 }
 0x28b   : > { %v947_v5 = vsub.f32 1.5, %v946_v22  ;;  %v956_v62 = vmul.f32 0.5, %v955_v61  ;;  %v1984_v50 = vpop.xlane.xlu2 %1983 }
 0x28c   : > { %v7430_v48 = vpop.eup %6152  ;;  %v7432_v55 = vadd.f32 1e-05, %v913_v60  ;;  %v2013_v1 = vmul.f32 %v1984_v50, %v7240_v17 }
 0x28d   : > { %v948_v46 = vmul.f32 %v6149_v0, %v947_v5  ;;  %v957_v53 = vsub.f32 1.5, %v956_v62  ;;  %v2044_v25 = vmul.f32 %v7430_v48, %v7422_v54  ;;  %v7445_v5 = vld [vmem:[#allocation10] ss:$0 sm:$0xff]  ;;  %vm2050_vm11 = vweird.f32 %v7430_v48 }
 0x28e   : > { %v7437_v4 = vpop.eup %6154  ;;  %6156 = vrsqrt.f32 %v7432_v55  ;;  %v7440_v22 = vadd.f32 1e-05, %v2013_v1  ;;  %vm7481_vm14 = vmor %vm2049_vm13, %vm2050_vm11  ;;  %vm969_vm3 = vweird.f32 %v7432_v55 }
 0x28f   : > { %v958_v61 = vmul.f32 %v6151_v52, %v957_v53  ;;  %v2045_v56 = vmul.f32 %v7430_v48, %v2044_v25  ;;  %v2054_v50 = vmul.f32 %v7437_v4, %v7426_v57  ;;  %v952_v60 = vsel %vm951_vm8, %v6149_v0, %v948_v46 }
 0x290   : > { %6158 = vrsqrt.f32 %v7440_v22  ;;  %v1103_v1 = vmul.f32 %v952_v60, %v7248_v21  ;;  %v7459_v21 = vld [vmem:[#allocation13] ss:$0 sm:$0xff]  ;;  %vm2060_vm12 = vweird.f32 %v7437_v4  ;;  %vm2069_vm4 = vweird.f32 %v7440_v22 }
 0x291   : > { %v2046_v62 = vmul.f32 0.5, %v2045_v56  ;;  %v2055_v58 = vmul.f32 %v7437_v4, %v2054_v50  ;;  %v962_v44 = vsel %vm961_vm10, %v6151_v52, %v958_v61  ;;  %vm2061_vm0 = vmor %vm2059_vm15, %vm2060_vm12 }
 0x292   : > { %v1104_v63 = vmul.f32 %v962_v44, %v7255_v27  ;;  %v1122_v36 = vmul.f32 %v7445_v5, %v1103_v1 }
 0x293   : > { %v2047_v53 = vsub.f32 1.5, %v2046_v62  ;;  %v2056_v25 = vmul.f32 0.5, %v2055_v58  ;;  %v886_v40 = vpop.xlane.xlu2 %885  ;;  %v1986_v38 = vpop.xlane.xlu1 %1985 }
 0x294   : > { %v7454_v34 = vpop.eup %6156  ;;  %v914_v46 = vmul.f32 %v886_v40, %v7240_v17  ;;  %v2014_v0 = vmul.f32 %v1986_v38, %v7240_v17  ;;  %v1123_v52 = vmul.f32 %v7445_v5, %v1104_v63  ;;  %v1141_v38 = vadd.f32 %v7450_v42, %v1122_v36 }
 0x295   : > { %v2048_v44 = vmul.f32 %v7430_v48, %v2047_v53  ;;  %v2057_v27 = vsub.f32 1.5, %v2056_v25  ;;  %v964_v61 = vmul.f32 %v7454_v34, %v7432_v55  ;;  %vm970_vm1 = vweird.f32 %v7454_v34 }
 0x296   : > { %v7466_v56 = vpop.eup %6158  ;;  %v7468_v50 = vadd.f32 1e-05, %v914_v46  ;;  %v7470_v60 = vadd.f32 1e-05, %v2014_v0  ;;  %v1142_v40 = vadd.f32 %v7450_v42, %v1123_v52  ;;  %v1160_v36 = vmul.f32 %v7459_v21, %v1141_v38  ;;  %vm971_vm5 = vmor %vm969_vm3, %vm970_vm1 }
 0x297   : > { %v2058_v62 = vmul.f32 %v7437_v4, %v2057_v27  ;;  %v965_v58 = vmul.f32 %v7454_v34, %v964_v61  ;;  %v2064_v1 = vmul.f32 %v7466_v56, %v7440_v22  ;;  %v2052_v57 = vsel %vm7481_vm14, %v7430_v48, %v2048_v44 }
 0x298   : > { %6160 = vrsqrt.f32 %v7468_v50  ;;  %v1161_v25 = vmul.f32 %v7459_v21, %v1142_v40  ;;  %1176 = vadd.xlane.f32.xlu1 %v1160_v36  ;;  %v7493_v46 = vpack.c.bf16 %v1142_v40, %v1141_v38  ;;  %vm2070_vm2 = vweird.f32 %v7466_v56 }
 0x299   : > { %v966_v54 = vmul.f32 0.5, %v965_v58  ;;  %v2065_v53 = vmul.f32 %v7466_v56, %v2064_v1  ;;  %6162 = vrsqrt.f32 %v7470_v60  ;;  %v2062_v0 = vsel %vm2061_vm0, %v7437_v4, %v2058_v62  ;;  %vm7530_vm6 = vmor %vm2069_vm4, %vm2070_vm2 }
 0x29a   : > { %1178 = vadd.xlane.f32.xlu2 %v1161_v25  ;;  %v2203_v1 = vmul.f32 %v2052_v57, %v7261_v30  ;;  %v2204_v32 = vmul.f32 %v2062_v0, %v7264_v35  ;;  %1360 = vmatmul.bf16.vlgmr.msra.gmra.mxu1 %v7493_v46  ;;  %vm2079_vm9 = vweird.f32 %v7470_v60  ;;  %vm979_vm10 = vweird.f32 %v7468_v50 }
 0x29b   : > { %v967_v52 = vsub.f32 1.5, %v966_v54  ;;  %v2066_v27 = vmul.f32 0.5, %v2065_v53  ;;  %v1988_v61 = vpop.xlane.xlu2 %1987  ;;  %v888_v58 = vpop.xlane.xlu1 %887 }
 0x29c   : > { %v2015_v38 = vmul.f32 %v1988_v61, %v7240_v17  ;;  %v915_v40 = vmul.f32 %v888_v58, %v7240_v17  ;;  %v2219_v48 = vmul.f32 %v7445_v5, %v2203_v1  ;;  %v2220_v4 = vmul.f32 %v7445_v5, %v2204_v32 }
 0x29d   : > { %v2067_v36 = vsub.f32 1.5, %v2066_v27  ;;  %v968_v62 = vmul.f32 %v7454_v34, %v967_v52 }
 0x29e   : > { %v7506_v44 = vpop.eup %6160  ;;  %v7510_v30 = vadd.f32 1e-05, %v2015_v38  ;;  %v7512_v35 = vadd.f32 1e-05, %v915_v40  ;;  %v7525_v57 = vadd.f32 %v7450_v42, %v2219_v48  ;;  %v7528_v0 = vadd.f32 %v7450_v42, %v2220_v4 }
 0x29f   : > { %v6163_v63 = vpop.eup %6162  ;;  %v2068_v54 = vmul.f32 %v7466_v56, %v2067_v36  ;;  %v974_v53 = vmul.f32 %v7506_v44, %v7468_v50  ;;  %v972_v22 = vsel %vm971_vm5, %v7454_v34, %v968_v62  ;;  %vm980_vm8 = vweird.f32 %v7506_v44 }
 0x2a0   : > { %v2074_v32 = vmul.f32 %v6163_v63, %v7470_v60  ;;  %6164 = vrsqrt.f32 %v7510_v30  ;;  %10425 = vst [vmem:[#allocation58_spill] sm:$0xff] %v7525_v57  ;;  %v7537_v61 = vpack.c.bf16 %v7528_v0, %v7525_v57  ;;  %v1105_v38 = vmul.f32 %v972_v22, %v7273_v45  ;;  %vm7571_vm12 = vmor %vm979_vm10, %vm980_vm8  ;;  %v5628_v57 = vld [vmem:[#allocation15 + $0x68] sm:$0xf0] }
 0x2a1   : > { %v975_v25 = vmul.f32 %v7506_v44, %v974_v53  ;;  %6166 = vrsqrt.f32 %v7512_v35  ;;  %10426 = vst [vmem:[#allocation59_spill] sm:$0xff] %v7528_v0  ;;  %v2072_v40 = vsel %vm7530_vm6, %v7466_v56, %v2068_v54  ;;  %vm2080_vm7 = vweird.f32 %v6163_v63 }
 0x2a2   : > { %v2075_v55 = vmul.f32 %v6163_v63, %v2074_v32  ;;  %10429 = vst [vmem:[#allocation60_spill] sm:$0xff] %v7537_v61  ;;  %2449 = vmatmul.bf16.vlgmr.msra.gmra.mxu2 %v7537_v61  ;;  %v1124_v34 = vmul.f32 %v7445_v5, %v1105_v38  ;;  %v2205_v56 = vmul.f32 %v2072_v40, %v7276_v51  ;;  %v5918_v51 = vld [vmem:[#allocation15 + $0x74] sm:$0xf]  ;;  %vm2081_vm11 = vmor %vm2079_vm9, %vm2080_vm7  ;;  %v5916_v61 = vld [vmem:[#allocation15 + $0x64] sm:$0xf]  ;;  %vm2089_vm14 = vweird.f32 %v7510_v30 }
 0x2a3   : > { %v976_v27 = vmul.f32 0.5, %v975_v25  ;;  %v890_v58 = vpop.xlane.xlu2 %889  ;;  %v1990_v1 = vpop.xlane.xlu1 %1989  ;;  %vm989_vm15 = vweird.f32 %v7512_v35 }
 0x2a4   : > { %v2076_v36 = vmul.f32 0.5, %v2075_v55  ;;  %v916_v48 = vmul.f32 %v890_v58, %v7240_v17  ;;  %v2016_v4 = vmul.f32 %v1990_v1, %v7240_v17  ;;  %v7561_v22 = vadd.f32 %v7450_v42, %v1124_v34  ;;  %v5636_v1 = vld [vmem:[#allocation15 + $0x78] sm:$0xf0] }
 0x2a5   : > { %v977_v53 = vsub.f32 1.5, %v976_v27  ;;  %v5639_v3 = vor.u32 %v5918_v51, %v5636_v1 }
 0x2a6   : > { %v7547_v62 = vpop.eup %6164  ;;  %v2077_v32 = vsub.f32 1.5, %v2076_v36  ;;  %v7549_v25 = vadd.f32 1e-05, %v916_v48  ;;  %v7551_v45 = vadd.f32 1e-05, %v2016_v4  ;;  %v1162_v36 = vmul.f32 %v7459_v21, %v7561_v22 }
 0x2a7   : > { %v7554_v54 = vpop.eup %6166  ;;  %v978_v52 = vmul.f32 %v7506_v44, %v977_v53  ;;  %v2084_v55 = vmul.f32 %v7547_v62, %v7510_v30  ;;  %v2221_v4 = vmul.f32 %v7445_v5, %v2205_v56  ;;  %1401 = vmatpush.bf16.msrb.mxu1 %v5639_v3  ;;  %vm2090_vm0 = vweird.f32 %v7547_v62 }
 0x2a8   : > { %v2078_v27 = vmul.f32 %v6163_v63, %v2077_v32  ;;  %v984_v58 = vmul.f32 %v7554_v54, %v7512_v35  ;;  %6168 = vrsqrt.f32 %v7549_v25  ;;  %1180 = vadd.xlane.f32.xlu1 %v1162_v36  ;;  %vm990_vm13 = vweird.f32 %v7554_v54  ;;  %v5914_v36 = vld [vmem:[#allocation15 + $0x54] sm:$0xf]  ;;  %vm7630_vm3 = vmor %vm2089_vm14, %vm2090_vm0 }
 0x2a9   : > { %v2085_v38 = vmul.f32 %v7547_v62, %v2084_v55  ;;  %6170 = vrsqrt.f32 %v7551_v45  ;;  %v982_v55 = vsel %vm7571_vm12, %v7506_v44, %v978_v52  ;;  %vm991_vm1 = vmor %vm989_vm15, %vm990_vm13  ;;  %vm2099_vm2 = vweird.f32 %v7551_v45 }
 0x2aa   : > { %v985_v60 = vmul.f32 %v7554_v54, %v984_v58  ;;  %v2082_v48 = vsel %vm2081_vm11, %v6163_v63, %v2078_v27  ;;  %v1106_v56 = vmul.f32 %v982_v55, %v7285_v14  ;;  %vm999_vm6 = vweird.f32 %v7549_v25 }
 0x2ab   : > { %v2086_v53 = vmul.f32 0.5, %v2085_v38  ;;  %v1992_v50 = vpop.xlane.xlu2 %1991  ;;  %v892_v34 = vpop.xlane.xlu1 %891  ;;  %v2206_v32 = vmul.f32 %v2082_v48, %v7288_v15  ;;  %v5631_v38 = vor.u32 %v5916_v61, %v5628_v57  ;;  %v7609_v61 = vadd.f32 %v7450_v42, %v2221_v4  ;;  %v5620_v48 = vld [vmem:[#allocation15 + $0x58] sm:$0xf0] }
 0x2ac   : > { %v986_v0 = vmul.f32 0.5, %v985_v60  ;;  %v2017_v58 = vmul.f32 %v1992_v50, %v7240_v17  ;;  %v917_v63 = vmul.f32 %v892_v34, %v7240_v17  ;;  %v1125_v1 = vmul.f32 %v7445_v5, %v1106_v56 }
 0x2ad   : > { %v2087_v27 = vsub.f32 1.5, %v2086_v53  ;;  %v2222_v15 = vmul.f32 %v7445_v5, %v2206_v32  ;;  %1402 = vmatpush.bf16.msrb.mxu1 %v5631_v38  ;;  %v5612_v38 = vld [vmem:[#allocation15 + $0x48] sm:$0xf0] }
 0x2ae   : > { %v7588_v40 = vpop.eup %6168  ;;  %v987_v44 = vsub.f32 1.5, %v986_v0  ;;  %v7590_v52 = vadd.f32 1e-05, %v2017_v58  ;;  %v7592_v51 = vadd.f32 1e-05, %v917_v63  ;;  %v1144_v34 = vadd.f32 %v7450_v42, %v1125_v1 }
 0x2af   : > { %v7595_v60 = vpop.eup %6170  ;;  %v994_v14 = vmul.f32 %v7588_v40, %v7549_v25  ;;  %v7602_v3 = vadd.f32 %v7450_v42, %v2222_v15  ;;  %v2088_v35 = vmul.f32 %v7547_v62, %v2087_v27  ;;  %v5623_v27 = vor.u32 %v5914_v36, %v5620_v48  ;;  %v5912_v15 = vld [vmem:[#allocation15 + $0x44] sm:$0xf] }
 0x2b0   : > { %v988_v57 = vmul.f32 %v7554_v54, %v987_v44  ;;  %v2094_v0 = vmul.f32 %v7595_v60, %v7551_v45  ;;  %6172 = vrsqrt.f32 %v7590_v52  ;;  %vm2100_vm4 = vweird.f32 %v7595_v60 }
 0x2b1   : > { %v995_v53 = vmul.f32 %v7588_v40, %v994_v14  ;;  %6174 = vrsqrt.f32 %v7592_v51  ;;  %v7620_v4 = vpack.c.bf16 %v7602_v3, %v7609_v61  ;;  %v7636_v14 = vpack.c.bf16 %v1144_v34, %v7561_v22  ;;  %1403 = vmatpush.bf16.msrb.mxu1 %v5623_v27  ;;  %v5604_v27 = vld [vmem:[#allocation15 + $0x38] sm:$0xf0]  ;;  %vm2101_vm7 = vmor %vm2099_vm2, %vm2100_vm4 }
 0x2b2   : > { %v2095_v50 = vmul.f32 %v7595_v60, %v2094_v0  ;;  %v992_v32 = vsel %vm991_vm1, %v7554_v54, %v988_v57  ;;  %v1163_v54 = vmul.f32 %v7459_v21, %v1144_v34  ;;  %v2092_v30 = vsel %vm7630_vm3, %v7547_v62, %v2088_v35 }
 0x2b3   : > { %10432 = vst [vmem:[#allocation61_spill] sm:$0xff] %v7620_v4  ;;  %v996_v55 = vmul.f32 0.5, %v995_v53  ;;  %v894_v58 = vpop.xlane.xlu2 %893  ;;  %v1994_v63 = vpop.xlane.xlu1 %1993  ;;  %v1107_v56 = vmul.f32 %v992_v32, %v7300_v28  ;;  %2454 = vmatmul.bf16.gmra.mxu2 %v7620_v4  ;;  %1365 = vmatmul.bf16.gmra.mxu1 %v7636_v14  ;;  %vm1000_vm5 = vweird.f32 %v7588_v40  ;;  %vm1009_vm11 = vweird.f32 %v7592_v51 }
 0x2b4   : > { %v2096_v1 = vmul.f32 0.5, %v2095_v50  ;;  %v918_v57 = vmul.f32 %v894_v58, %v7240_v17  ;;  %v2018_v0 = vmul.f32 %v1994_v63, %v7240_v17  ;;  %1182 = vadd.xlane.f32.xlu2 %v1163_v54  ;;  %v5615_v50 = vor.u32 %v5912_v15, %v5612_v38  ;;  %vm7671_vm8 = vmor %vm999_vm6, %vm1000_vm5 }
 0x2b5   : > { %v997_v28 = vsub.f32 1.5, %v996_v55  ;;  %v1126_v53 = vmul.f32 %v7445_v5, %v1107_v56  ;;  %v2207_v63 = vmul.f32 %v2092_v30, %v7297_v26  ;;  %v5910_v56 = vld [vmem:[#allocation15 + $0x34] sm:$0xf]  ;;  %v5908_v30 = vld [vmem:[#allocation15 + $0x24] sm:$0xf]  ;;  %vm2109_vm12 = vweird.f32 %v7590_v52 }
 0x2b6   : > { %v7645_v36 = vpop.eup %6172  ;;  %v2097_v48 = vsub.f32 1.5, %v2096_v1  ;;  %v7648_v22 = vadd.f32 1e-05, %v918_v57  ;;  %v7657_v35 = vadd.f32 1e-05, %v2018_v0  ;;  %1404 = vmatpush.bf16.msrb.mxu1 %v5615_v50  ;;  %v5607_v0 = vor.u32 %v5910_v56, %v5604_v27 }
 0x2b7   : > { %v7651_v34 = vpop.eup %6174  ;;  %v998_v32 = vmul.f32 %v7588_v40, %v997_v28  ;;  %v2104_v62 = vmul.f32 %v7645_v36, %v7590_v52  ;;  %v7677_v44 = vadd.f32 %v7450_v42, %v1126_v53  ;;  %vm2110_vm10 = vweird.f32 %v7645_v36 }
 0x2b8   : > { %v2098_v55 = vmul.f32 %v7595_v60, %v2097_v48  ;;  %v1004_v58 = vmul.f32 %v7651_v34, %v7592_v51  ;;  %6176 = vrsqrt.f32 %v7648_v22  ;;  %v5596_v48 = vld [vmem:[#allocation15 + $0x28] sm:$0xf0]  ;;  %vm1010_vm9 = vweird.f32 %v7651_v34  ;;  %vm7718_vm14 = vmor %vm2109_vm12, %vm2110_vm10 }
 0x2b9   : > { %v2105_v15 = vmul.f32 %v7645_v36, %v2104_v62  ;;  %6178 = vrsqrt.f32 %v7657_v35  ;;  %v1002_v28 = vsel %vm7671_vm8, %v7588_v40, %v998_v32  ;;  %v1164_v53 = vmul.f32 %v7459_v21, %v7677_v44  ;;  %vm1011_vm13 = vmor %vm1009_vm11, %vm1010_vm9 }
 0x2ba   : > { %v1005_v26 = vmul.f32 %v7651_v34, %v1004_v58  ;;  %v2102_v25 = vsel %vm2101_vm7, %v7595_v60, %v2098_v55  ;;  %v2223_v60 = vmul.f32 %v7445_v5, %v2207_v63  ;;  %1405 = vmatpush.bf16.msrb.mxu1 %v5607_v0  ;;  %v1108_v56 = vmul.f32 %v1002_v28, %v7309_v43 }
 0x2bb   : > { %v2106_v1 = vmul.f32 0.5, %v2105_v15  ;;  %v7680_v54 = vpop.xlane.xlu2 %1995  ;;  %v896_v45 = vpop.xlane.xlu1 %895  ;;  %v2208_v57 = vmul.f32 %v2102_v25, %v7312_v47  ;;  %1184 = vadd.xlane.f32.xlu1 %v1164_v53  ;;  %v5599_v27 = vor.u32 %v5908_v30, %v5596_v48  ;;  %vm2119_vm1 = vweird.f32 %v7657_v35 }
 0x2bc   : > { %v1006_v50 = vmul.f32 0.5, %v1005_v26  ;;  %v919_v62 = vmul.f32 %v896_v45, %v7240_v17  ;;  %v5906_v45 = vld [vmem:[#allocation15 + $0x14] sm:$0xf]  ;;  %v1127_v52 = vmul.f32 %v7445_v5, %v1108_v56  ;;  %vm1019_vm2 = vweird.f32 %v7648_v22 }
 0x2bd   : > { %v2107_v55 = vsub.f32 1.5, %v2106_v1  ;;  %v2224_v47 = vmul.f32 %v7445_v5, %v2208_v57  ;;  %v7711_v1 = vadd.f32 %v7450_v42, %v2223_v60  ;;  %v5588_v57 = vld [vmem:[#allocation15 + $0x18] sm:$0xf0] }
 0x2be   : > { %v7692_v58 = vpop.eup %6176  ;;  %v1007_v40 = vsub.f32 1.5, %v1006_v50  ;;  %v7694_v32 = vadd.f32 1e-05, %v919_v62  ;;  %1406 = vmatpush.bf16.msrb.mxu1 %v5599_v27  ;;  %v5580_v27 = vld [vmem:[#allocation15 + $0x8] sm:$0xf0] }
 0x2bf   : > { %v7697_v15 = vpop.eup %6178  ;;  %v2108_v38 = vmul.f32 %v7645_v36, %v2107_v55  ;;  %v1014_v63 = vmul.f32 %v7692_v58, %v7648_v22  ;;  %v7704_v26 = vadd.f32 %v7450_v42, %v2224_v47  ;;  %v5591_v47 = vor.u32 %v5906_v45, %v5588_v57 }
 0x2c0   : > { %v1008_v25 = vmul.f32 %v7651_v34, %v1007_v40  ;;  %v2114_v43 = vmul.f32 %v7697_v15, %v7657_v35  ;;  %6180 = vrsqrt.f32 %v7694_v32  ;;  %v5904_v40 = vld [vmem:[#allocation15 + $0x4] sm:$0xf]  ;;  %vm2120_vm15 = vweird.f32 %v7697_v15 }
 0x2c1   : > { %v1015_v28 = vmul.f32 %v7692_v58, %v1014_v63  ;;  %v7725_v30 = vpack.c.bf16 %v7704_v26, %v7711_v1  ;;  %v2112_v55 = vsel %vm7718_vm14, %v7645_v36, %v2108_v38  ;;  %vm1020_vm0 = vweird.f32 %v7692_v58  ;;  %vm2121_vm3 = vmor %vm2119_vm1, %vm2120_vm15 }
 0x2c2   : > { %v2115_v0 = vmul.f32 %v7697_v15, %v2114_v43  ;;  %v1012_v48 = vsel %vm1011_vm13, %v7651_v34, %v1008_v25  ;;  %v1146_v43 = vadd.f32 %v7450_v42, %v1127_v52  ;;  %1407 = vmatpush.bf16.msrb.mxu1 %v5591_v47  ;;  %v5583_v25 = vor.u32 %v5904_v40, %v5580_v27  ;;  %vm7759_vm4 = vmor %vm1019_vm2, %vm1020_vm0 }
 0x2c3   : > { %v1016_v50 = vmul.f32 0.5, %v1015_v28  ;;  %v898_v53 = vpop.xlane.xlu2 %897  ;;  %v900_v62 = vpop.xlane.xlu1 %899  ;;  %v1109_v60 = vmul.f32 %v1012_v48, %v7324_v18  ;;  %2459 = vmatmul.bf16.gmra.mxu2 %v7725_v30  ;;  %v2209_v52 = vmul.f32 %v2112_v55, %v7321_v13  ;;  %vm1029_vm6 = vweird.f32 %v7694_v32 }
 0x2c4   : > { %v2116_v63 = vmul.f32 0.5, %v2115_v0  ;;  %v920_v4 = vmul.f32 %v898_v53, %v7240_v17  ;;  %v921_v56 = vmul.f32 %v900_v62, %v7240_v17  ;;  %v1165_v38 = vmul.f32 %v7459_v21, %v1146_v43 }
 0x2c5   : > { %v1017_v34 = vsub.f32 1.5, %v1016_v50  ;;  %v1128_v18 = vmul.f32 %v7445_v5, %v1109_v60  ;;  %v7741_v45 = vpack.c.bf16 %v1146_v43, %v7677_v44  ;;  %v2225_v22 = vmul.f32 %v7445_v5, %v2209_v52 }
 0x2c6   : > { %v2117_v36 = vsub.f32 1.5, %v2116_v63  ;;  %v7743_v57 = vadd.f32 1e-05, %v920_v4  ;;  %v6181_v28 = vpop.eup %6180  ;;  %v7747_v0 = vadd.f32 1e-05, %v921_v56  ;;  %1186 = vadd.xlane.f32.xlu2 %v1165_v38  ;;  %1408 = vmatpush.bf16.msrb.mxu1 %v5583_v25 }
 0x2c7   : > { %v1018_v51 = vmul.f32 %v7692_v58, %v1017_v34  ;;  %v1024_v50 = vmul.f32 %v6181_v28, %v7694_v32  ;;  %1370 = vmatmul.bf16.gmra.mxu1 %v7741_v45  ;;  %v1147_v35 = vadd.f32 %v7450_v42, %v1128_v18  ;;  %vm1030_vm5 = vweird.f32 %v6181_v28 }
 0x2c8   : > { %v2118_v48 = vmul.f32 %v7697_v15, %v2117_v36  ;;  %6182 = vrsqrt.f32 %v7743_v57  ;;  %v7789_v52 = vadd.f32 %v7450_v42, %v2225_v22  ;;  %vm1031_vm7 = vmor %vm1029_vm6, %vm1030_vm5  ;;  %vm1039_vm10 = vweird.f32 %v7743_v57 }
 0x2c9   : > { %6184 = vrsqrt.f32 %v7747_v0  ;;  %v1025_v4 = vmul.f32 %v6181_v28, %v1024_v50  ;;  %v1022_v55 = vsel %vm7759_vm4, %v7692_v58, %v1018_v51  ;;  %v1166_v40 = vmul.f32 %v7459_v21, %v1147_v35 }
 0x2ca   : > { %v2122_v44 = vsel %vm2121_vm3, %v7697_v15, %v2118_v48  ;;  %v2019_v15 = vmul.f32 %v7680_v54, %v7240_v17  ;;  %v1110_v58 = vmul.f32 %v1022_v55, %v7333_v31  ;;  %vm1049_vm12 = vweird.f32 %v7747_v0 }
 0x2cb   : > { %v902_v53 = vpop.xlane.xlu2 %901  ;;  %v904_v62 = vpop.xlane.xlu1 %903  ;;  %v2210_v60 = vmul.f32 %v2122_v44, %v7336_v33  ;;  %v1026_v47 = vmul.f32 0.5, %v1025_v4  ;;  %1188 = vadd.xlane.f32.xlu1 %v1166_v40 }
 0x2cc   : > { %v922_v27 = vmul.f32 %v902_v53, %v7240_v17  ;;  %v923_v63 = vmul.f32 %v904_v62, %v7240_v17  ;;  %v7791_v48 = vadd.f32 1e-05, %v2019_v15  ;;  %v1129_v13 = vmul.f32 %v7445_v5, %v1110_v58 }
 0x2cd   : > { %v2226_v43 = vmul.f32 %v7445_v5, %v2210_v60  ;;  %v1027_v56 = vsub.f32 1.5, %v1026_v47 }
 0x2ce   : > { %v6183_v33 = vpop.eup %6182  ;;  %v7776_v34 = vadd.f32 1e-05, %v922_v27  ;;  %v7778_v18 = vadd.f32 1e-05, %v923_v63  ;;  %v1148_v60 = vadd.f32 %v7450_v42, %v1129_v13 }
 0x2cf   : > { %v6185_v25 = vpop.eup %6184  ;;  %v1034_v36 = vmul.f32 %v6183_v33, %v7743_v57  ;;  %v7784_v38 = vadd.f32 %v7450_v42, %v2226_v43  ;;  %v1028_v54 = vmul.f32 %v6181_v28, %v1027_v56  ;;  %vm1040_vm8 = vweird.f32 %v6183_v33 }
 0x2d0   : > { %v1044_v51 = vmul.f32 %v6185_v25, %v7747_v0  ;;  %6186 = vrsqrt.f32 %v7776_v34  ;;  %vm1050_vm9 = vweird.f32 %v6185_v25  ;;  %v1167_v27 = vmul.f32 %v7459_v21, %v1148_v60  ;;  %vm1041_vm11 = vmor %vm1039_vm10, %vm1040_vm8 }
 0x2d1   : > { %v1035_v31 = vmul.f32 %v6183_v33, %v1034_v36  ;;  %6188 = vrsqrt.f32 %v7778_v18  ;;  %v7797_v50 = vpack.c.bf16 %v7784_v38, %v7789_v52  ;;  %v1032_v4 = vsel %vm1031_vm7, %v6181_v28, %v1028_v54  ;;  %vm1051_vm13 = vmor %vm1049_vm12, %vm1050_vm9 }
 0x2d2   : > { %v1045_v32 = vmul.f32 %v6185_v25, %v1044_v51  ;;  %v1111_v53 = vmul.f32 %v1032_v4, %v7348_v10  ;;  %6190 = vrsqrt.f32 %v7791_v48  ;;  %v7806_v28 = vpack.c.bf16 %v1148_v60, %v1147_v35  ;;  %1190 = vadd.xlane.f32.xlu2 %v1167_v27 }
 0x2d3   : > { %v1036_v44 = vmul.f32 0.5, %v1035_v31  ;;  %2464 = vmatmul.bf16.gmra.mxu2 %v7797_v50  ;;  %vm1059_vm0 = vweird.f32 %v7776_v34  ;;  %vm1069_vm2 = vweird.f32 %v7778_v18  ;;  %vm2129_vm10 = vweird.f32 %v7791_v48 }
 0x2d4   : > { %v1046_v62 = vmul.f32 0.5, %v1045_v32  ;;  %v1130_v55 = vmul.f32 %v7445_v5, %v1111_v53 }
 0x2d5   : > { %v1037_v22 = vsub.f32 1.5, %v1036_v44 }
 0x2d6   : > { %v6187_v47 = vpop.eup %6186  ;;  %v1047_v40 = vsub.f32 1.5, %v1046_v62  ;;  %v1149_v43 = vadd.f32 %v7450_v42, %v1130_v55 }
 0x2d7   : > { %v6189_v63 = vpop.eup %6188  ;;  %v1038_v10 = vmul.f32 %v6183_v33, %v1037_v22  ;;  %v1054_v15 = vmul.f32 %v6187_v47, %v7776_v34  ;;  %1375 = vmatmul.bf16.gmra.mxu1 %v7806_v28  ;;  %vm1060_vm14 = vweird.f32 %v6187_v47 }
 0x2d8   : > { %v1048_v56 = vmul.f32 %v6185_v25, %v1047_v40  ;;  %v1064_v58 = vmul.f32 %v6189_v63, %v7778_v18  ;;  %v1168_v36 = vmul.f32 %v7459_v21, %v1149_v43  ;;  %v7816_v32 = vpop.eup %6190  ;;  %vm1070_vm15 = vweird.f32 %v6189_v63  ;;  %vm1061_vm1 = vmor %vm1059_vm0, %vm1060_vm14 }
 0x2d9   : > { %v1055_v35 = vmul.f32 %v6187_v47, %v1054_v15  ;;  %v1042_v54 = vsel %vm1041_vm11, %v6183_v33, %v1038_v10  ;;  %vm1071_vm3 = vmor %vm1069_vm2, %vm1070_vm15  ;;  %vm2130_vm5 = vweird.f32 %v7816_v32 }
 0x2da   : > { %v1065_v51 = vmul.f32 %v6189_v63, %v1064_v58  ;;  %v1112_v57 = vmul.f32 %v1042_v54, %v7359_v29  ;;  %v1052_v31 = vsel %vm1051_vm13, %v6185_v25, %v1048_v56  ;;  %1192 = vadd.xlane.f32.xlu1 %v1168_v36  ;;  %vm2131_vm12 = vmor %vm2129_vm10, %vm2130_vm5 }
 0x2db   : > { %v1056_v13 = vmul.f32 0.5, %v1055_v35  ;;  %v906_v4 = vpop.xlane.xlu2 %905  ;;  %v908_v0 = vpop.xlane.xlu1 %907  ;;  %v1113_v44 = vmul.f32 %v1052_v31, %v7362_v37  ;;  %v2124_v37 = vmul.f32 %v7816_v32, %v7791_v48 }
 0x2dc   : > { %v1066_v53 = vmul.f32 0.5, %v1065_v51  ;;  %v924_v62 = vmul.f32 %v906_v4, %v7240_v17  ;;  %v925_v60 = vmul.f32 %v908_v0, %v7240_v17  ;;  %v1131_v22 = vmul.f32 %v7445_v5, %v1112_v57 }
 0x2dd   : > { %v1057_v33 = vsub.f32 1.5, %v1056_v13  ;;  %v1132_v29 = vmul.f32 %v7445_v5, %v1113_v44  ;;  %v2125_v51 = vmul.f32 %v7816_v32, %v2124_v37  ;;  %v5708_v37 = vld [vmem:[#allocation15 + $0x68] sm:$0xf0] }
 0x2de   : > { %v1067_v25 = vsub.f32 1.5, %v1066_v53  ;;  %v7823_v55 = vadd.f32 1e-05, %v924_v62  ;;  %v7825_v40 = vadd.f32 1e-05, %v925_v60  ;;  %v1150_v27 = vadd.f32 %v7450_v42, %v1131_v22 }
 0x2df   : > { %v1058_v10 = vmul.f32 %v6187_v47, %v1057_v33  ;;  %v7832_v15 = vadd.f32 %v7450_v42, %v1132_v29  ;;  %v2126_v44 = vmul.f32 0.5, %v2125_v51  ;;  %v5716_v60 = vld [vmem:[#allocation15 + $0x78] sm:$0xf0] }
 0x2e0   : > { %v1068_v56 = vmul.f32 %v6189_v63, %v1067_v25  ;;  %6192 = vrsqrt.f32 %v7823_v55  ;;  %v7837_v58 = vpack.c.bf16 %v1150_v27, %v1149_v43  ;;  %v1169_v35 = vmul.f32 %v7459_v21, %v1150_v27  ;;  %v5932_v27 = vld [vmem:[#allocation15 + $0x64] sm:$0xf] }
 0x2e1   : > { %6194 = vrsqrt.f32 %v7825_v40  ;;  %v1170_v36 = vmul.f32 %v7459_v21, %v7832_v15  ;;  %v1062_v34 = vsel %vm1061_vm1, %v6187_v47, %v1058_v10  ;;  %v5711_v51 = vor.u32 %v5932_v27, %v5708_v37  ;;  %v5928_v27 = vld [vmem:[#allocation15 + $0x44] sm:$0xf] }
 0x2e2   : > { %v1072_v54 = vsel %vm1071_vm3, %v6189_v63, %v1068_v56  ;;  %1380 = vmatmul.bf16.vlgmr.msra.gmra.mxu3 %v7837_v58  ;;  %1194 = vadd.xlane.f32.xlu2 %v1169_v35  ;;  %v1114_v57 = vmul.f32 %v1062_v34, %v7371_v11  ;;  %v2127_v35 = vsub.f32 1.5, %v2126_v44  ;;  %vm1079_vm7 = vweird.f32 %v7823_v55 }
 0x2e3   : > { %v1998_v18 = vpop.xlane.xlu1 %1997  ;;  %v1115_v31 = vmul.f32 %v1072_v54, %v7374_v19  ;;  %1196 = vadd.xlane.f32.xlu1 %v1170_v36  ;;  %v5934_v19 = vld [vmem:[#allocation15 + $0x74] sm:$0xf]  ;;  %vm1089_vm9 = vweird.f32 %v7825_v40  ;;  %vm1225_vm3 = vcmask 7168  }
 0x2e4   : > { %v2020_v43 = vmul.f32 %v1998_v18, %v7240_v17  ;;  %v1133_v13 = vmul.f32 %v7445_v5, %v1114_v57  ;;  %v5719_v56 = vor.u32 %v5934_v19, %v5716_v60  ;;  %v5930_v57 = vld [vmem:[#allocation15 + $0x54] sm:$0xf]  ;;  %v2128_v44 = vmul.f32 %v7816_v32, %v2127_v35 }
 0x2e5   : > { %v1134_v4 = vmul.f32 %v7445_v5, %v1115_v31  ;;  %v5700_v31 = vld [vmem:[#allocation15 + $0x58] sm:$0xf0] }
 0x2e6   : > { %v6193_v0 = vpop.eup %6192  ;;  %v7849_v47 = vadd.f32 1e-05, %v2020_v43  ;;  %v1152_v62 = vadd.f32 %v7450_v42, %v1133_v13  ;;  %2490 = vmatpush.bf16.msrb.mxu3 %v5719_v56  ;;  %v2132_v48 = vsel %vm2131_vm12, %v7816_v32, %v2128_v44 }
 0x2e7   : > { %v6195_v63 = vpop.eup %6194  ;;  %v1074_v53 = vmul.f32 %v6193_v0, %v7823_v55  ;;  %v7854_v11 = vadd.f32 %v7450_v42, %v1134_v4  ;;  %1409 = vmatmul.bf16.vlgmr.msrb.gmra.mxu1 %v7493_v46  ;;  %vm1080_vm4 = vweird.f32 %v6193_v0  ;;  %v5692_v55 = vld [vmem:[#allocation15 + $0x48] sm:$0xf0] }
 0x2e8   : > { %v1084_v22 = vmul.f32 %v6195_v63, %v7825_v40  ;;  %6196 = vrsqrt.f32 %v7849_v47  ;;  %v1171_v29 = vmul.f32 %v7459_v21, %v1152_v62  ;;  %vm1090_vm6 = vweird.f32 %v6195_v63  ;;  %vm1081_vm8 = vmor %vm1079_vm7, %vm1080_vm4 }
 0x2e9   : > { %v1075_v33 = vmul.f32 %v6193_v0, %v1074_v53  ;;  %v1172_v25 = vmul.f32 %v7459_v21, %v7854_v11  ;;  %vm1091_vm11 = vmor %vm1089_vm9, %vm1090_vm6  ;;  %vm2139_vm14 = vweird.f32 %v7849_v47 }
 0x2ea   : > { %v1085_v10 = vmul.f32 %v6195_v63, %v1084_v22  ;;  %1198 = vadd.xlane.f32.xlu2 %v1171_v29  ;;  %2491 = vmatpush.bf16.msrb.mxu3 %v5711_v51  ;;  %v5703_v22 = vor.u32 %v5930_v57, %v5700_v31  ;;  %v7873_v29 = vpack.c.bf16 %v1152_v62, %v7832_v15 }
 0x2eb   : > { %v1076_v36 = vmul.f32 0.5, %v1075_v33  ;;  %v910_v34 = vpop.xlane.xlu2 %909  ;;  %1200 = vadd.xlane.f32.xlu1 %v1172_v25  ;;  %v5695_v15 = vor.u32 %v5928_v27, %v5692_v55  ;;  %v1942_v51 = vmul.f32 %v7380_v2, %v7240_v17 }
 0x2ec   : > { %v1086_v54 = vmul.f32 0.5, %v1085_v10  ;;  %v926_v46 = vmul.f32 %v910_v34, %v7240_v17 }
 0x2ed   : > { %v1077_v18 = vsub.f32 1.5, %v1076_v36 }
 0x2ee   : > { %v6197_v43 = vpop.eup %6196  ;;  %v1087_v13 = vsub.f32 1.5, %v1086_v54  ;;  %v7864_v4 = vadd.f32 1e-05, %v926_v46  ;;  %2492 = vmatpush.bf16.msrb.mxu3 %v5703_v22  ;;  %v5926_v54 = vld [vmem:[#allocation15 + $0x34] sm:$0xf] }
 0x2ef   : > { %v1078_v53 = vmul.f32 %v6193_v0, %v1077_v18  ;;  %v2134_v19 = vmul.f32 %v6197_v43, %v7849_v47  ;;  %vm2140_vm13 = vweird.f32 %v6197_v43  ;;  %v5684_v46 = vld [vmem:[#allocation15 + $0x38] sm:$0xf0] }
 0x2f0   : > { %v1088_v60 = vmul.f32 %v6195_v63, %v1087_v13  ;;  %6198 = vrsqrt.f32 %v7864_v4  ;;  %vm2141_vm15 = vmor %vm2139_vm14, %vm2140_vm13  ;;  %v5687_v31 = vor.u32 %v5926_v54, %v5684_v46  ;;  %vm1099_vm1 = vweird.f32 %v7864_v4 }
 0x2f1   : > { %v2135_v33 = vmul.f32 %v6197_v43, %v2134_v19  ;;  %v1082_v25 = vsel %vm1081_vm8, %v6193_v0, %v1078_v53  ;;  %v5924_v53 = vld [vmem:[#allocation15 + $0x24] sm:$0xf]  ;;  %v5676_v19 = vld [vmem:[#allocation15 + $0x28] sm:$0xf0]  ;;  %v7940_v54 = vstv %s642_s29  ;;  %s665_s29 = smul.f32 %s5995_s27, %s7116_s30 }
 0x2f2   : > { %v1116_v37 = vmul.f32 %v1082_v25, %v7387_v39  ;;  %v1092_v40 = vsel %vm1091_vm11, %v6195_v63, %v1088_v60  ;;  %1385 = vmatmul.bf16.gmra.mxu3 %v7873_v29  ;;  %v2211_v39 = vmul.f32 %v2132_v48, %v7345_v9  ;;  %v5679_v60 = vor.u32 %v5924_v53, %v5676_v19  ;;  %v5668_v25 = vld [vmem:[#allocation15 + $0x18] sm:$0xf0]  ;;  %v5920_v48 = vld [vmem:[#allocation15 + $0x4] sm:$0xf] }
 0x2f3   : > { %v2136_v10 = vmul.f32 0.5, %v2135_v33  ;;  %v1117_v56 = vmul.f32 %v1092_v40, %v7390_v41  ;;  %2493 = vmatpush.bf16.msrb.mxu3 %v5695_v15  ;;  %v7900_v33 = vsub.f32 %v7224_v6, %v1942_v51  ;;  %v1944_v40 = vmul.f32 %v7397_v23, %v7240_v17  ;;  %v7923_v15 = vld [vmem:[#allocation10] ss:$0 sm:$0xff]  ;;  %v1928_v51 = vpop.xlane.xlu0 %1927 }
 0x2f4   : > { %v1135_v35 = vmul.f32 %v7445_v5, %v1116_v37  ;;  %v2227_v44 = vmul.f32 %v7445_v5, %v2211_v39 }
 0x2f5   : > { %v2137_v0 = vsub.f32 1.5, %v2136_v10  ;;  %v1136_v62 = vmul.f32 %v7445_v5, %v1117_v56 }
 0x2f6   : > { %v6199_v36 = vpop.eup %6198  ;;  %v1154_v34 = vadd.f32 %v7450_v42, %v1135_v35  ;;  %v7903_v27 = vadd.f32 %v7450_v42, %v2227_v44  ;;  %v5660_v35 = vld [vmem:[#allocation15 + $0x8] sm:$0xf0] }
 0x2f7   : > { %v2138_v63 = vmul.f32 %v6197_v43, %v2137_v0  ;;  %v1094_v41 = vmul.f32 %v6199_v36, %v7864_v4  ;;  %v7888_v32 = vadd.f32 %v7450_v42, %v1136_v62  ;;  %1414 = vmatmul.bf16.gmra.mxu1 %v7636_v14  ;;  %2494 = vmatpush.bf16.msrb.mxu3 %v5687_v31  ;;  %vm1100_vm0 = vweird.f32 %v6199_v36  ;;  %v2000_v62 = vpop.xlane.xlu2 %1999 }
 0x2f8   : > { %v1173_v18 = vmul.f32 %v7459_v21, %v1154_v34  ;;  %vm1101_vm2 = vmor %vm1099_vm1, %vm1100_vm0  ;;  %v7916_v10 = vpack.c.bf16 %v1154_v34, %v7854_v11  ;;  %v5663_v11 = vor.u32 %v5920_v48, %v5660_v35  ;;  %v7927_v0 = vsub.f32 %v7232_v12, %v1944_v40 }
 0x2f9   : > { %v1095_v9 = vmul.f32 %v6199_v36, %v1094_v41  ;;  %v1174_v47 = vmul.f32 %v7459_v21, %v7888_v32  ;;  %v2142_v57 = vsel %vm2141_vm15, %v6197_v43, %v2138_v63  ;;  %v5922_v43 = vld [vmem:[#allocation15 + $0x14] sm:$0xf]  ;;  %v1943_v34 = vmul.f32 %v7382_v49, %v7240_v17 }
 0x2fa   : > { %1202 = vadd.xlane.f32.xlu2 %v1173_v18  ;;  %v2212_v13 = vmul.f32 %v2142_v57, %v7400_v24  ;;  %v5671_v37 = vor.u32 %v5922_v43, %v5668_v25  ;;  %v1946_v63 = vmul.f32 %v7404_v59, %v7240_v17  ;;  %v1976_v41 = vmul.f32 %v7927_v0, %v7927_v0  ;;  %v10442_v43 = vld [vmem:[#allocation58_spill] sm:$0xff] }
 0x2fb   : > { %v1096_v2 = vmul.f32 0.5, %v1095_v9  ;;  %1204 = vadd.xlane.f32.xlu1 %v1174_v47  ;;  %2495 = vmatpush.bf16.msrb.mxu3 %v5679_v60  ;;  %v7943_v46 = vsub.f32 %v7228_v8, %v1943_v34  ;;  %v1945_v9 = vmul.f32 %v1928_v51, %v7240_v17  ;;  %v2021_v44 = vmul.f32 %v2000_v62, %v7240_v17 }
 0x2fc   : > { %v2228_v14 = vmul.f32 %v7445_v5, %v2212_v13 }
 0x2fd   : > { %v1097_v22 = vsub.f32 1.5, %v1096_v2  ;;  %v1975_v47 = vmul.f32 %v7943_v46, %v7943_v46  ;;  %v7962_v13 = vsub.f32 %v7236_v16, %v1945_v9  ;;  %v2037_v53 = vadd.f32 1e-05, %v2021_v44  ;;  %v10441_v2 = vld [vmem:[#allocation59_spill] sm:$0xff] }
 0x2fe   : > { %v7906_v24 = vadd.f32 %v7450_v42, %v2228_v14  ;;  %v1974_v42 = vmul.f32 %v7900_v33, %v7900_v33 }
 0x2ff   : > { %v1098_v55 = vmul.f32 %v6199_v36, %v1097_v22  ;;  %2496 = vmatpush.bf16.msrb.mxu3 %v5671_v37  ;;  %v1977_v19 = vmul.f32 %v7962_v13, %v7962_v13  ;;  %6200 = vrsqrt.f32 %v2037_v53  ;;  %v10443_v37 = vld [vmem:[#allocation60_spill] sm:$0xff]  ;;  %vm2149_vm5 = vweird.f32 %v2037_v53 }
 0x300   : > { %v7911_v5 = vpack.c.bf16 %v7906_v24, %v7903_v27 }
 0x301   : > { %v1102_v56 = vsel %vm1101_vm2, %v6199_v36, %v1098_v55  ;;  %v7929_v36 = vld [vmem:[#allocation12] ss:$0 sm:$0xff] }
 0x302   : > { %2469 = vmatmul.bf16.gmra.mxu2 %v7911_v5  ;;  %v1118_v4 = vmul.f32 %v1102_v56, %v7408_v7  ;;  %1390 = vmatmul.bf16.gmra.mxu3 %v7916_v10 }
 0x303   : > { %2001 = vadd.xlane.f32.xlu1 %v1974_v42  ;;  %2497 = vmatpush.bf16.msrb.mxu3 %v5663_v11 }
 0x304   : > { %v1137_v23 = vmul.f32 %v7923_v15, %v1118_v4 }
 0x305   : > { %v6201_v55 = vpop.eup %6200 }
 0x306   : > { %v1156_v7 = vadd.f32 %v7929_v36, %v1137_v23  ;;  %v2144_v40 = vmul.f32 %v6201_v55, %v2037_v53  ;;  %vm2150_vm4 = vweird.f32 %v6201_v55 }
 0x307   : > { %1419 = vmatmul.bf16.gmra.mxu1 %v7741_v45  ;;  %v7946_v45 = vsub.f32 %v7243_v20, %v1946_v63  ;;  %vm2151_vm6 = vmor %vm2149_vm5, %vm2150_vm4 }
 0x308   : > { %v1175_v39 = vmul.f32 %v7459_v21, %v1156_v7  ;;  %v7956_v57 = vpack.c.bf16 %v1156_v7, %v7888_v32  ;;  %v7968_v32 = vld [vmem:[#allocation13] ss:$0 sm:$0xff]  ;;  %v2145_v56 = vmul.f32 %v6201_v55, %v2144_v40 }
 0x309   : > { %v1978_v31 = vmul.f32 %v7946_v45, %v7946_v45  ;;  %v2252_v14 = vmul.f32 %v7968_v32, %v10441_v2  ;;  %v2251_v25 = vmul.f32 %v7968_v32, %v10442_v43  ;;  %v2253_v42 = vmul.f32 %v7968_v32, %v7609_v61  ;;  %v10444_v7 = vld [vmem:[#allocation61_spill] sm:$0xff] }
 0x30a   : > { %1206 = vadd.xlane.f32.xlu2 %v1175_v39  ;;  %v2256_v48 = vmul.f32 %v7968_v32, %v7704_v26  ;;  %v2146_v35 = vmul.f32 0.5, %v2145_v56  ;;  %v2255_v23 = vmul.f32 %v7968_v32, %v7711_v1  ;;  %v2258_v61 = vmul.f32 %v7968_v32, %v7784_v38 }
 0x30b   : > { %2005 = vadd.xlane.f32.xlu1 %v1976_v41  ;;  %v1177_v49 = vpop.xlane.xlu1 %1176  ;;  %v2257_v1 = vmul.f32 %v7968_v32, %v7789_v52  ;;  %v2260_v38 = vmul.f32 %v7968_v32, %v7906_v24  ;;  %v10445_v41 = vld [vmem:[#allocation57_spill] sm:$0xff] }
 0x30c   : > { %v1209_v21 = vadd.f32 %v7940_v54, %v1177_v49  ;;  %v2147_v11 = vsub.f32 1.5, %v2146_v35  ;;  %v2259_v49 = vmul.f32 %v7968_v32, %v7903_v27 }
 0x30d   : > { %v1179_v18 = vpop.xlane.xlu2 %1178 }
 0x30e   : > { %v1210_v59 = vadd.f32 %v7940_v54, %v1179_v18  ;;  %1226 = vst.msk [vmem:[#allocation5] sm:$0xff] %vm1225_vm3, %v1209_v21  ;;  %v2148_v26 = vmul.f32 %v6201_v55, %v2147_v11 }
 0x310   : > { %1227 = vst.msk [vmem:[#allocation5 + $0x8] sm:$0xff] %vm1225_vm3, %v1210_v59  ;;  %v2152_v34 = vsel %vm2151_vm6, %v6201_v55, %v2148_v26 }
 0x311   : > { %v2213_v51 = vmul.f32 %v2152_v34, %v10445_v41 }
 0x312   : > { %2003 = vadd.xlane.f32.xlu2 %v1975_v47  ;;  %1395 = vmatmul.bf16.gmra.mxu3 %v7956_v57 }
 0x313   : > { %2009 = vadd.xlane.f32.xlu1 %v1978_v31 }
 0x317   : > { %1424 = vmatmul.bf16.gmra.mxu1 %v7806_v28  ;;  %v2254_v28 = vmul.f32 %v7968_v32, %v7602_v3 }
 0x31a   : > { %2007 = vadd.xlane.f32.xlu2 %v1977_v19 }
 0x31b   : > { %2269 = vadd.xlane.f32.xlu1 %v2252_v14  ;;  %v1181_v60 = vpop.xlane.xlu1 %1180 }
 0x31c   : > { %v1211_v22 = vadd.f32 %v7940_v54, %v1181_v60 }
 0x31e   : > { %1228 = vst.msk [vmem:[#allocation5 + $0x10] sm:$0xff] %vm1225_vm3, %v1211_v22 }
 0x322   : > { %2267 = vadd.xlane.f32.xlu2 %v2251_v25  ;;  %2498 = vmatmul.bf16.vlgmr.msrb.gmra.mxu3 %v10443_v37  ;;  %v8036_v37 = vld [vmem:[#allocation5] sm:$0xff] }
 0x323   : > { %2273 = vadd.xlane.f32.xlu1 %v2254_v28 }
 0x327   : > { %1429 = vmatmul.bf16.gmra.mxu1 %v7837_v58  ;;  %v1183_v4 = vpop.xlane.xlu2 %1182 }
 0x328   : > { %v1212_v3 = vadd.f32 %v7940_v54, %v1183_v4 }
 0x32a   : > { %2271 = vadd.xlane.f32.xlu2 %v2253_v42  ;;  %1229 = vst.msk [vmem:[#allocation5 + $0x18] sm:$0xff] %vm1225_vm3, %v1212_v3  ;;  %v8039_v42 = vld [vmem:[#allocation5 + $0x8] sm:$0xff] }
 0x32b   : > { %2277 = vadd.xlane.f32.xlu1 %v2256_v48 }
 0x32e   : > { %v1185_v58 = vpop.xlane.xlu1 %1184 }
 0x32f   : > { %v1213_v62 = vadd.f32 %v7940_v54, %v1185_v58 }
 0x331   : > { %1230 = vst.msk [vmem:[#allocation5 + $0x20] sm:$0xff] %vm1225_vm3, %v1213_v62  ;;  %v8053_v11 = vld [vmem:[#allocation5 + $0x18] sm:$0xff] }
 0x332   : > { %2275 = vadd.xlane.f32.xlu2 %v2255_v23  ;;  %2503 = vmatmul.bf16.gmra.mxu3 %v10444_v7  ;;  %v8051_v23 = vld [vmem:[#allocation5 + $0x10] sm:$0xff] }
 0x333   : > { %2281 = vadd.xlane.f32.xlu1 %v2258_v61  ;;  %v1514_v61 = vsel %vm1225_vm3, %v8036_v37, -inf }
 0x337   : > { %1434 = vmatmul.bf16.gmra.mxu1 %v7873_v29  ;;  %v2229_v29 = vmul.f32 %v7923_v15, %v2213_v51 }
 0x338   : > { %v8041_v56 = vld [vmem:[#allocation5 + $0x20] sm:$0xff] }
 0x339   : > { %v1187_v39 = vpop.xlane.xlu2 %1186  ;;  %v8008_v24 = vadd.f32 %v7929_v36, %v2229_v29  ;;  %v1518_v34 = vsel %vm1225_vm3, %v8041_v56, -inf }
 0x33a   : > { %2279 = vadd.xlane.f32.xlu2 %v2257_v1  ;;  %v1214_v63 = vadd.f32 %v7940_v54, %v1187_v39 }
 0x33b   : > { %2285 = vadd.xlane.f32.xlu1 %v2260_v38  ;;  %v2261_v18 = vmul.f32 %v7968_v32, %v8008_v24  ;;  %v1515_v38 = vsel %vm1225_vm3, %v8039_v42, -inf }
 0x33c   : > { %1231 = vst.msk [vmem:[#allocation5 + $0x28] sm:$0xff] %vm1225_vm3, %v1214_v63 }
 0x33e   : > { %v1189_v21 = vpop.xlane.xlu1 %1188 }
 0x33f   : > { %v1215_v52 = vadd.f32 %v7940_v54, %v1189_v21  ;;  %v1516_v21 = vsel %vm1225_vm3, %v8051_v23, -inf }
 0x341   : > { %1232 = vst.msk [vmem:[#allocation5 + $0x30] sm:$0xff] %vm1225_vm3, %v1215_v52  ;;  %v1517_v52 = vsel %vm1225_vm3, %v8053_v11, -inf }
 0x342   : > { %2283 = vadd.xlane.f32.xlu2 %v2259_v49  ;;  %2508 = vmatmul.bf16.gmra.mxu3 %v7725_v30 }
 0x343   : > { %v8044_v48 = vld [vmem:[#allocation5 + $0x28] sm:$0xff] }
 0x344   : > { %v1520_v63 = vsel %vm1225_vm3, %v8044_v48, -inf }
 0x345   : > { %v1191_v27 = vpop.xlane.xlu2 %1190 }
 0x346   : > { %v1216_v59 = vadd.f32 %v7940_v54, %v1191_v27 }
 0x347   : > { %1439 = vmatmul.bf16.gmra.mxu1 %v7916_v10 }
 0x348   : > { %1233 = vst.msk [vmem:[#allocation5 + $0x38] sm:$0xff] %vm1225_vm3, %v1216_v59  ;;  %v8046_v3 = vld [vmem:[#allocation5 + $0x30] sm:$0xff] }
 0x349   : > { %v1522_v41 = vsel %vm1225_vm3, %v8046_v3, -inf }
 0x34a   : > { %2287 = vadd.xlane.f32.xlu2 %v2261_v18 }
 0x34d   : > { %v1193_v9 = vpop.xlane.xlu1 %1192 }
 0x34e   : > { %v1217_v47 = vadd.f32 %v7940_v54, %v1193_v9  ;;  %v1519_v9 = vmax.f32 %v1514_v61, %v1518_v34 }
 0x34f   : > { %v8048_v35 = vld [vmem:[#allocation5 + $0x38] sm:$0xff] }
 0x350   : > { %1234 = vst.msk [vmem:[#allocation5 + $0x40] sm:$0xff] %vm1225_vm3, %v1217_v47  ;;  %v1524_v51 = vsel %vm1225_vm3, %v8048_v35, -inf }
 0x352   : > { %2513 = vmatmul.bf16.gmra.mxu3 %v7797_v50 }
 0x355   : > { %v1195_v30 = vpop.xlane.xlu2 %1194 }
 0x356   : > { %v1218_v31 = vadd.f32 %v7940_v54, %v1195_v30  ;;  %v1197_v10 = vpop.xlane.xlu1 %1196 }
 0x357   : > { %1444 = vmatmul.bf16.gmra.mxu1 %v7956_v57  ;;  %v1219_v44 = vadd.f32 %v7940_v54, %v1197_v10  ;;  %v8055_v58 = vld [vmem:[#allocation5 + $0x40] sm:$0xff]  ;;  %v1521_v10 = vmax.f32 %v1515_v38, %v1520_v63 }
 0x358   : > { %1235 = vst.msk [vmem:[#allocation5 + $0x48] sm:$0xff] %vm1225_vm3, %v1218_v31  ;;  %v1526_v18 = vsel %vm1225_vm3, %v8055_v58, -inf }
 0x359   : > { %1236 = vst.msk [vmem:[#allocation5 + $0x50] sm:$0xff] %vm1225_vm3, %v1219_v44  ;;  %v1523_v44 = vmax.f32 %v1516_v21, %v1522_v41 }
 0x35d   : > { %v1199_v53 = vpop.xlane.xlu2 %1198 }
 0x35e   : > { %v1220_v19 = vadd.f32 %v7940_v54, %v1199_v53  ;;  %v1201_v2 = vpop.xlane.xlu1 %1200  ;;  %v1525_v53 = vmax.f32 %v1517_v52, %v1524_v51 }
 0x35f   : > { %v1221_v14 = vadd.f32 %v7940_v54, %v1201_v2  ;;  %v8061_v26 = vld [vmem:[#allocation5 + $0x48] sm:$0xff] }
 0x360   : > { %1237 = vst.msk [vmem:[#allocation5 + $0x58] sm:$0xff] %vm1225_vm3, %v1220_v19  ;;  %v8063_v1 = vld [vmem:[#allocation5 + $0x50] sm:$0xff]  ;;  %v1528_v47 = vsel %vm1225_vm3, %v8061_v26, -inf }
 0x361   : > { %1238 = vst.msk [vmem:[#allocation5 + $0x60] sm:$0xff] %vm1225_vm3, %v1221_v14  ;;  %v1530_v30 = vsel %vm1225_vm3, %v8063_v1, -inf  ;;  %v1527_v14 = vmax.f32 %v1519_v9, %v1526_v18 }
 0x362   : > { %2518 = vmatmul.bf16.gmra.mxu3 %v7911_v5 }
 0x367   : > { %v8077_v49 = vld [vmem:[#allocation5 + $0x58] sm:$0xff] }
 0x368   : > { %v8087_v59 = vld [vmem:[#allocation5 + $0x60] sm:$0xff] }
 0x36d   : > { %v1203_v50 = vpop.xlane.xlu2 %1202 }
 0x36e   : > { %v1222_v57 = vadd.f32 %v7940_v54, %v1203_v50  ;;  %v1205_v60 = vpop.xlane.xlu1 %1204  ;;  %v1532_v50 = vsel %vm1225_vm3, %v8077_v49, -inf }
 0x36f   : > { %v1223_v22 = vadd.f32 %v7940_v54, %v1205_v60 }
 0x370   : > { %1239 = vst.msk [vmem:[#allocation5 + $0x68] sm:$0xff] %vm1225_vm3, %v1222_v57 }
 0x371   : > { %1240 = vst.msk [vmem:[#allocation5 + $0x70] sm:$0xff] %vm1225_vm3, %v1223_v22 }
 0x376   : > { %v2002_v43 = vpop.xlane.xlu1 %2001 }
 0x377   : > { %v2022_v25 = vmul.f32 %v2002_v43, %v7240_v17  ;;  %v8079_v29 = vld [vmem:[#allocation5 + $0x68] sm:$0xff] }
 0x378   : > { %v8093_v31 = vld [vmem:[#allocation5 + $0x70] sm:$0xff]  ;;  %v1536_v57 = vsel %vm1225_vm3, %v8079_v29, -inf }
 0x379   : > { %v8033_v28 = vadd.f32 1e-05, %v2022_v25  ;;  %v1529_v25 = vmax.f32 %v1521_v10, %v1528_v47  ;;  %v1538_v61 = vsel %vm1225_vm3, %v8093_v31, -inf }
 0x37b   : > { %6202 = vrsqrt.f32 %v8033_v28  ;;  %v1537_v63 = vmax.f32 %v1529_v25, %v1536_v57  ;;  %vm2159_vm8 = vweird.f32 %v8033_v28 }
 0x37d   : > { %v1207_v55 = vpop.xlane.xlu2 %1206 }
 0x37e   : > { %v1224_v5 = vadd.f32 %v7940_v54, %v1207_v55  ;;  %v2006_v40 = vpop.xlane.xlu1 %2005  ;;  %v1531_v55 = vmax.f32 %v1523_v44, %v1530_v30 }
 0x37f   : > { %v2024_v4 = vmul.f32 %v2006_v40, %v7240_v17 }
 0x380   : > { %1241 = vst.msk [vmem:[#allocation5 + $0x78] sm:$0xff] %vm1225_vm3, %v1224_v5  ;;  %v1534_v5 = vsel %vm1225_vm3, %v8087_v59, -inf }
 0x381   : > { %v6203_v62 = vpop.eup %6202  ;;  %v8059_v7 = vadd.f32 1e-05, %v2024_v4  ;;  %v1535_v18 = vmax.f32 %v1527_v14, %v1534_v5 }
 0x382   : > { %v2154_v39 = vmul.f32 %v6203_v62, %v8033_v28  ;;  %vm2160_vm7 = vweird.f32 %v6203_v62 }
 0x383   : > { %6204 = vrsqrt.f32 %v8059_v7  ;;  %vm2161_vm9 = vmor %vm2159_vm8, %vm2160_vm7  ;;  %v1542_v44 = vmax.f32 %v1535_v18, %v1537_v63  ;;  %vm2179_vm11 = vweird.f32 %v8059_v7 }
 0x384   : > { %v2155_v27 = vmul.f32 %v6203_v62, %v2154_v39  ;;  %v1533_v39 = vmax.f32 %v1525_v53, %v1532_v50 }
 0x385   : > { %v2004_v2 = vpop.xlane.xlu2 %2003 }
 0x386   : > { %v2156_v19 = vmul.f32 0.5, %v2155_v27  ;;  %v2023_v60 = vmul.f32 %v2004_v2, %v7240_v17  ;;  %v2010_v22 = vpop.xlane.xlu1 %2009  ;;  %v1539_v27 = vmax.f32 %v1531_v55, %v1538_v61 }
 0x387   : > { %v8100_v43 = vld [vmem:[#allocation5 + $0x78] sm:$0xff]  ;;  %v2026_v4 = vmul.f32 %v2010_v22, %v7240_v17 }
 0x388   : > { %v2157_v40 = vsub.f32 1.5, %v2156_v19  ;;  %v8107_v34 = vadd.f32 1e-05, %v2023_v60  ;;  %v1540_v41 = vsel %vm1225_vm3, %v8100_v43, -inf }
 0x389   : > { %v6205_v38 = vpop.eup %6204  ;;  %v8113_v52 = vadd.f32 1e-05, %v2026_v4  ;;  %v1541_v9 = vmax.f32 %v1533_v39, %v1540_v41 }
 0x38a   : > { %v2158_v51 = vmul.f32 %v6203_v62, %v2157_v40  ;;  %v2174_v21 = vmul.f32 %v6205_v38, %v8059_v7  ;;  %6206 = vrsqrt.f32 %v8107_v34  ;;  %vm2180_vm10 = vweird.f32 %v6205_v38 }
 0x38b   : > { %6208 = vrsqrt.f32 %v8113_v52  ;;  %v1543_v53 = vmax.f32 %v1539_v27, %v1541_v9  ;;  %vm2181_vm12 = vmor %vm2179_vm11, %vm2180_vm10  ;;  %vm2169_vm15 = vweird.f32 %v8107_v34  ;;  %vm2199_vm1 = vweird.f32 %v8113_v52 }
 0x38c   : > { %v2175_v47 = vmul.f32 %v6205_v38, %v2174_v21  ;;  %v2162_v30 = vsel %vm2161_vm9, %v6203_v62, %v2158_v51 }
 0x38d   : > { %v2214_v10 = vmul.f32 %v2162_v30, %v7900_v33  ;;  %v2008_v28 = vpop.xlane.xlu2 %2007  ;;  %v1544_v60 = vmax.f32 %v1542_v44, %v1543_v53 }
 0x38e   : > { %v2176_v19 = vmul.f32 0.5, %v2175_v47  ;;  %v2025_v2 = vmul.f32 %v2008_v28, %v7240_v17  ;;  %v2270_v50 = vpop.xlane.xlu1 %2269 }
 0x38f   : > { %v2230_v57 = vmul.f32 %v7923_v15, %v2214_v10  ;;  %v2300_v14 = vadd.f32 %v2270_v50, %v7940_v54  ;;  %v1545_v33 = vrot.slane %v1544_v60, 4 }
 0x390   : > { %v2177_v22 = vsub.f32 1.5, %v2176_v19  ;;  %v6207_v25 = vpop.eup %6206  ;;  %v8121_v55 = vadd.f32 1e-05, %v2025_v2 }
 0x391   : > { %v2246_v62 = vadd.f32 %v7929_v36, %v2230_v57  ;;  %v6209_v5 = vpop.eup %6208  ;;  %v2164_v4 = vmul.f32 %v6207_v25, %v8107_v34  ;;  %2316 = vst.msk [vmem:[#allocation5 + $0x88] sm:$0xff] %vm1225_vm3, %v2300_v14  ;;  %v1546_v27 = vmax.f32 %v1544_v60, %v1545_v33  ;;  %vm2170_vm13 = vweird.f32 %v6207_v25 }
 0x392   : > { %v2178_v40 = vmul.f32 %v6205_v38, %v2177_v22  ;;  %v2194_v61 = vmul.f32 %v6209_v5, %v8113_v52  ;;  %6210 = vrsqrt.f32 %v8121_v55  ;;  %vm2200_vm14 = vweird.f32 %v6209_v5  ;;  %vm2171_vm0 = vmor %vm2169_vm15, %vm2170_vm13 }
 0x393   : > { %v2165_v39 = vmul.f32 %v6207_v25, %v2164_v4  ;;  %v2336_v63 = vpack.c.bf16 %v2246_v62, %v8008_v24  ;;  %v2262_v41 = vmul.f32 %v7968_v32, %v2246_v62  ;;  %vm2201_vm2 = vmor %vm2199_vm1, %vm2200_vm14  ;;  %vm2189_vm5 = vweird.f32 %v8121_v55 }
 0x394   : > { %v2182_v51 = vsel %vm2181_vm12, %v6205_v38, %v2178_v40  ;;  %v2195_v21 = vmul.f32 %v6209_v5, %v2194_v61  ;;  %v1547_v38 = vrot.slane %v1546_v27, 2 }
 0x395   : > { %v2216_v18 = vmul.f32 %v2182_v51, %v7927_v0  ;;  %v2166_v7 = vmul.f32 0.5, %v2165_v39  ;;  %2474 = vmatmul.bf16.gmra.mxu2 %v2336_v63  ;;  %2523 = vmatmul.bf16.gmra.mxu3 %v2336_v63  ;;  %v2268_v9 = vpop.xlane.xlu2 %2267 }
 0x396   : > { %v2196_v47 = vmul.f32 0.5, %v2195_v21  ;;  %2289 = vadd.xlane.f32.xlu1 %v2262_v41  ;;  %v2299_v30 = vadd.f32 %v2268_v9, %v7940_v54  ;;  %v2274_v10 = vpop.xlane.xlu1 %2273  ;;  %v1548_v57 = vmax.f32 %v1546_v27, %v1547_v38 }
 0x397   : > { %v2232_v44 = vmul.f32 %v7923_v15, %v2216_v18  ;;  %v2167_v53 = vsub.f32 1.5, %v2166_v7  ;;  %v2302_v24 = vadd.f32 %v2274_v10, %v7940_v54 }
 0x398   : > { %v6211_v19 = vpop.eup %6210  ;;  %v2197_v28 = vsub.f32 1.5, %v2196_v47  ;;  %2315 = vst.msk [vmem:[#allocation5 + $0x80] sm:$0xff] %vm1225_vm3, %v2299_v30  ;;  %v1549_v33 = vrot.slane %v1548_v57, 1 }
 0x399   : > { %v2248_v0 = vadd.f32 %v7929_v36, %v2232_v44  ;;  %v2168_v2 = vmul.f32 %v6207_v25, %v2167_v53  ;;  %v2184_v50 = vmul.f32 %v6211_v19, %v8121_v55  ;;  %2318 = vst.msk [vmem:[#allocation5 + $0x98] sm:$0xff] %vm1225_vm3, %v2302_v24  ;;  %vm2190_vm4 = vweird.f32 %v6211_v19 }
 0x39a   : > { %v2198_v60 = vmul.f32 %v6209_v5, %v2197_v28  ;;  %v8144_v63 = vmax.f32 %v1548_v57, %v1549_v33  ;;  %vm2191_vm6 = vmor %vm2189_vm5, %vm2190_vm4 }
 0x39b   : > { %v2264_v22 = vmul.f32 %v7968_v32, %v2248_v0  ;;  %v2185_v14 = vmul.f32 %v6211_v19, %v2184_v50  ;;  %v2172_v62 = vsel %vm2171_vm0, %v6207_v25, %v2168_v2 }
 0x39c   : > { %v2215_v40 = vmul.f32 %v2172_v62, %v7943_v46  ;;  %v2202_v4 = vsel %vm2201_vm2, %v6209_v5, %v2198_v60  ;;  %v1551_v27 = vsub.f32 %v8036_v37, %v8144_v63  ;;  %v1552_v55 = vsub.f32 %v8039_v42, %v8144_v63 }
 0x39d   : > { %v2186_v61 = vmul.f32 0.5, %v2185_v14  ;;  %v2272_v34 = vpop.xlane.xlu2 %2271  ;;  %v2218_v39 = vmul.f32 %v2202_v4, %v7946_v45  ;;  %v1553_v44 = vsub.f32 %v8051_v23, %v8144_v63  ;;  %v1554_v37 = vsub.f32 %v8053_v11, %v8144_v63 }
 0x39e   : > { %2293 = vadd.xlane.f32.xlu1 %v2264_v22  ;;  %v2301_v41 = vadd.f32 %v2272_v34, %v7940_v54  ;;  %v2278_v51 = vpop.xlane.xlu1 %2277  ;;  %v2231_v52 = vmul.f32 %v7923_v15, %v2215_v40  ;;  %v1567_v24 = vmul.f32 1.442695, %v1551_v27  ;;  %v1556_v11 = vsub.f32 %v8044_v48, %v8144_v63 }
 0x39f   : > { %v2187_v21 = vsub.f32 1.5, %v2186_v61  ;;  %v2304_v25 = vadd.f32 %v2278_v51, %v7940_v54  ;;  %v2234_v18 = vmul.f32 %v7923_v15, %v2218_v39  ;;  %v1571_v2 = vmul.f32 1.442695, %v1553_v44 }
 0x3a0   : > { %2317 = vst.msk [vmem:[#allocation5 + $0x90] sm:$0xff] %vm1225_vm3, %v2301_v41  ;;  %v2247_v46 = vadd.f32 %v7929_v36, %v2231_v52  ;;  %6212 = vpow2.f32 %v1567_v24  ;;  %v1573_v50 = vmul.f32 1.442695, %v1554_v37  ;;  %v1577_v60 = vmul.f32 1.442695, %v1556_v11 }
 0x3a1   : > { %v2188_v5 = vmul.f32 %v6211_v19, %v2187_v21  ;;  %2320 = vst.msk [vmem:[#allocation5 + $0xa8] sm:$0xff] %vm1225_vm3, %v2304_v25  ;;  %v2250_v45 = vadd.f32 %v7929_v36, %v2234_v18  ;;  %v1561_v41 = vsub.f32 %v8063_v1, %v8144_v63  ;;  %v1562_v18 = vsub.f32 %v8077_v49, %v8144_v63 }
 0x3a2   : > { %v2263_v7 = vmul.f32 %v7968_v32, %v2247_v46  ;;  %v2337_v9 = vpack.c.bf16 %v2248_v0, %v2247_v46  ;;  %v1569_v0 = vmul.f32 1.442695, %v1552_v55  ;;  %v1563_v1 = vsub.f32 %v8087_v59, %v8144_v63 }
 0x3a3   : > { %v2266_v47 = vmul.f32 %v7968_v32, %v2250_v45  ;;  %v2192_v30 = vsel %vm2191_vm6, %v6211_v19, %v2188_v5  ;;  %v1564_v59 = vsub.f32 %v8079_v29, %v8144_v63  ;;  %v1589_v55 = vmul.f32 1.442695, %v1562_v18 }
 0x3a4   : > { %2291 = vadd.xlane.f32.xlu2 %v2263_v7  ;;  %v2217_v10 = vmul.f32 %v2192_v30, %v7962_v13  ;;  %v1555_v13 = vsub.f32 %v8041_v56, %v8144_v63  ;;  %v1557_v56 = vsub.f32 %v8046_v3, %v8144_v63  ;;  %6214 = vpow2.f32 %v1569_v0 }
 0x3a5   : > { %2479 = vmatmul.bf16.gmra.mxu2 %v2337_v9  ;;  %2528 = vmatmul.bf16.gmra.mxu3 %v2337_v9  ;;  %v2276_v53 = vpop.xlane.xlu2 %2275  ;;  %6216 = vpow2.f32 %v1571_v2  ;;  %v1565_v24 = vsub.f32 %v8093_v31, %v8144_v63  ;;  %v1566_v29 = vsub.f32 %v8100_v43, %v8144_v63  ;;  %v6840_v43 = vmov 0  }
 0x3a6   : > { %2297 = vadd.xlane.f32.xlu0 %v2266_v47  ;;  %v2303_v38 = vadd.f32 %v2276_v53, %v7940_v54  ;;  %v2282_v19 = vpop.xlane.xlu1 %2281  ;;  %v2233_v28 = vmul.f32 %v7923_v15, %v2217_v10  ;;  %v1575_v57 = vmul.f32 1.442695, %v1555_v13  ;;  %6218 = vpow2.f32 %v1573_v50  ;;  %v8181_v48 = vpop.eup %6212  ;;  %6135 = vset.pattern.permute.xlu2 %v6840_v43 }
 0x3a7   : > { %v2306_v42 = vadd.f32 %v2282_v19, %v7940_v54  ;;  %v1579_v3 = vmul.f32 1.442695, %v1557_v56  ;;  %v1599_v61 = vsel %vm1225_vm3, %v8181_v48, 0.0  ;;  %v1587_v47 = vmul.f32 1.442695, %v1561_v41  ;;  %6134 = vset.pattern.permute.xlu1 %v6840_v43  ;;  %6136 = vset.pattern.permute.xlu0 %v6840_v43 }
 0x3a8   : > { %2319 = vst.msk [vmem:[#allocation5 + $0xa0] sm:$0xff] %vm1225_vm3, %v2303_v38  ;;  %v2249_v23 = vadd.f32 %v7929_v36, %v2233_v28  ;;  %v1558_v36 = vsub.f32 %v8048_v35, %v8144_v63  ;;  %6220 = vpow2.f32 %v1575_v57  ;;  %v1560_v35 = vsub.f32 %v8061_v26, %v8144_v63 }
 0x3a9   : > { %2322 = vst.msk [vmem:[#allocation5 + $0xb8] sm:$0xff] %vm1225_vm3, %v2306_v42  ;;  %6222 = vpow2.f32 %v1577_v60  ;;  %v1591_v38 = vmul.f32 1.442695, %v1563_v1  ;;  %v1593_v42 = vmul.f32 1.442695, %v1564_v59 }
 0x3aa   : > { %v2265_v15 = vmul.f32 %v7968_v32, %v2249_v23  ;;  %v1559_v32 = vsub.f32 %v8055_v58, %v8144_v63  ;;  %v8187_v40 = vpop.eup %6214  ;;  %v1581_v4 = vmul.f32 1.442695, %v1558_v36  ;;  %6224 = vpow2.f32 %v1579_v3 }
 0x3ab   : > { %v8194_v34 = vpop.eup %6216  ;;  %v1600_v58 = vsel %vm1225_vm3, %v8187_v40, 0.0  ;;  %v2338_v52 = vpack.c.bf16 %v2250_v45, %v2249_v23  ;;  %v1585_v46 = vmul.f32 1.442695, %v1560_v35  ;;  %v1595_v50 = vmul.f32 1.442695, %v1565_v24 }
 0x3ac   : > { %2295 = vadd.xlane.f32.xlu2 %v2265_v15  ;;  %v8199_v39 = vpop.eup %6218  ;;  %v1583_v51 = vmul.f32 1.442695, %v1559_v32  ;;  %v1601_v26 = vadd.f32 %v1600_v58, %v1599_v61  ;;  %v1602_v21 = vsel %vm1225_vm3, %v8194_v34, 0.0  ;;  %6226 = vpow2.f32 %v1581_v4 }
 0x3ad   : > { %v2280_v22 = vpop.xlane.xlu2 %2279  ;;  %v1604_v45 = vsel %vm1225_vm3, %v8199_v39, 0.0  ;;  %v1597_v63 = vmul.f32 1.442695, %v1566_v29 }
 0x3ae   : > { %v2305_v14 = vadd.f32 %v2280_v22, %v7940_v54  ;;  %v2286_v62 = vpop.xlane.xlu1 %2285  ;;  %v8205_v25 = vpop.eup %6220  ;;  %v1603_v5 = vadd.f32 %v1602_v21, %v1601_v26  ;;  %6228 = vpow2.f32 %v1583_v51 }
 0x3af   : > { %v2308_v33 = vadd.f32 %v2286_v62, %v7940_v54  ;;  %v8213_v7 = vpop.eup %6222  ;;  %v1606_v49 = vsel %vm1225_vm3, %v8205_v25, 0.0  ;;  %6230 = vpow2.f32 %v1585_v46 }
 0x3b0   : > { %2321 = vst.msk [vmem:[#allocation5 + $0xb0] sm:$0xff] %vm1225_vm3, %v2305_v14  ;;  %v1605_v30 = vadd.f32 %v1604_v45, %v1603_v5  ;;  %v8218_v10 = vpop.eup %6224  ;;  %v1608_v53 = vsel %vm1225_vm3, %v8213_v7, 0.0  ;;  %6232 = vpow2.f32 %v1587_v47 }
 0x3b1   : > { %2324 = vst.msk [vmem:[#allocation5 + $0xc8] sm:$0xff] %vm1225_vm3, %v2308_v33  ;;  %v1610_v28 = vsel %vm1225_vm3, %v8218_v10, 0.0  ;;  %6234 = vpow2.f32 %v1589_v55 }
 0x3b2   : > { %v1607_v44 = vadd.f32 %v1606_v49, %v1605_v30  ;;  %v8225_v37 = vpop.eup %6226  ;;  %6236 = vpow2.f32 %v1591_v38 }
 0x3b3   : > { %v1612_v0 = vsel %vm1225_vm3, %v8225_v37, 0.0  ;;  %6238 = vpow2.f32 %v1593_v42 }
 0x3b4   : > { %v1609_v19 = vadd.f32 %v1608_v53, %v1607_v44  ;;  %v6229_v13 = vpop.eup %6228  ;;  %6240 = vpow2.f32 %v1595_v50 }
 0x3b5   : > { %2484 = vmatmul.bf16.gmra.mxu2 %v2338_v52  ;;  %2533 = vmatmul.bf16.gmra.mxu3 %v2338_v52  ;;  %v2284_v27 = vpop.xlane.xlu2 %2283  ;;  %v8235_v2 = vpop.eup %6230  ;;  %v1614_v56 = vsel %vm1225_vm3, %v6229_v13, 0.0  ;;  %6242 = vpow2.f32 %v1597_v63  ;;  %v8272_v63 = vld [vmem:[#allocation5 + $0x80] sm:$0xff] }
 0x3b6   : > { %v2307_v9 = vadd.f32 %v2284_v27, %v7940_v54  ;;  %v1611_v23 = vadd.f32 %v1610_v28, %v1609_v19  ;;  %v6233_v57 = vpop.eup %6232  ;;  %v1616_v60 = vsel %vm1225_vm3, %v8235_v2, 0.0 }
 0x3b7   : > { %v6235_v22 = vpop.eup %6234  ;;  %v1618_v62 = vsel %vm1225_vm3, %v6233_v57, 0.0 }
 0x3b8   : > { %2323 = vst.msk [vmem:[#allocation5 + $0xc0] sm:$0xff] %vm1225_vm3, %v2307_v9  ;;  %v1613_v15 = vadd.f32 %v1612_v0, %v1611_v23  ;;  %v6237_v32 = vpop.eup %6236  ;;  %v1620_v33 = vsel %vm1225_vm3, %v6235_v22, 0.0 }
 0x3b9   : > { %v6239_v35 = vpop.eup %6238  ;;  %v1622_v61 = vsel %vm1225_vm3, %v6237_v32, 0.0 }
 0x3ba   : > { %v1615_v36 = vadd.f32 %v1614_v56, %v1613_v15  ;;  %v6241_v58 = vpop.eup %6240  ;;  %v1624_v51 = vsel %vm1225_vm3, %v6239_v35, 0.0 }
 0x3bb   : > { %v6243_v26 = vpop.eup %6242  ;;  %v1626_v21 = vsel %vm1225_vm3, %v6241_v58, 0.0 }
 0x3bc   : > { %v1617_v14 = vadd.f32 %v1616_v60, %v1615_v36  ;;  %v1628_v46 = vsel %vm1225_vm3, %v6243_v26, 0.0  ;;  %v8274_v36 = vld [vmem:[#allocation5 + $0x88] sm:$0xff] }
 0x3bd   : > { %v2288_v11 = vpop.xlane.xlu2 %2287  ;;  %v8276_v60 = vld [vmem:[#allocation5 + $0xa8] sm:$0xff] }
 0x3be   : > { %v2309_v31 = vadd.f32 %v2288_v11, %v7940_v54  ;;  %v1619_v3 = vadd.f32 %v1618_v62, %v1617_v14  ;;  %v8280_v14 = vld [vmem:[#allocation5 + $0xb8] sm:$0xff] }
 0x3bf   : > { %v8282_v62 = vld [vmem:[#allocation5 + $0xc0] sm:$0xff] }
 0x3c0   : > { %2325 = vst.msk [vmem:[#allocation5 + $0xd0] sm:$0xff] %vm1225_vm3, %v2309_v31  ;;  %v1621_v4 = vadd.f32 %v1620_v33, %v1619_v3  ;;  %v2590_v3 = vld [vmem:[#allocation5 + $0x98] sm:$0xff]  ;;  %v8285_v33 = vld [vmem:[#allocation5 + $0xc8] sm:$0xff] }
 0x3c2   : > { %v1623_v41 = vadd.f32 %v1622_v61, %v1621_v4 }
 0x3c4   : > { %v1625_v52 = vadd.f32 %v1624_v51, %v1623_v41  ;;  %v2609_v51 = vsel %vm1225_vm3, %v8276_v60, -inf }
 0x3c6   : > { %v1627_v18 = vadd.f32 %v1626_v21, %v1625_v52  ;;  %v2613_v52 = vsel %vm1225_vm3, %v8280_v14, -inf  ;;  %v2615_v21 = vsel %vm1225_vm3, %v8282_v62, -inf }
 0x3c8   : > { %v1629_v5 = vadd.f32 %v1628_v46, %v1627_v18 }
 0x3ca   : > { %v1630_v27 = vrot.slane %v1629_v5, 4 }
 0x3cc   : > { %v1631_v1 = vadd.f32 %v1630_v27, %v1629_v5  ;;  %v2604_v5 = vsel %vm1225_vm3, %v8274_v36, -inf }
 0x3ce   : > { %v1632_v45 = vrot.slane %v1631_v1, 2 }
 0x3d0   : > { %v1633_v9 = vadd.f32 %v1632_v45, %v1631_v1  ;;  %v2606_v1 = vsel %vm1225_vm3, %v2590_v3, -inf }
 0x3d2   : > { %v1634_v47 = vrot.slane %v1633_v9, 1 }
 0x3d4   : > { %v1635_v30 = vadd.f32 %v1634_v47, %v1633_v9  ;;  %v2617_v9 = vsel %vm1225_vm3, %v8285_v33, -inf }
 0x3d6   : > { %6244 = vrcp.f32 %v1635_v30 }
 0x3dc   : > { %v6245_v49 = vpop.eup %6244 }
 0x3dd   : > { %v1639_v59 = vmul.f32 %v6245_v49, %v8194_v34  ;;  %v1638_v55 = vmul.f32 %v6245_v49, %v8187_v40  ;;  %v1637_v44 = vmul.f32 %v6245_v49, %v8181_v48  ;;  %v1645_v53 = vmul.f32 %v6245_v49, %v6229_v13 }
 0x3de   : > { %v1640_v24 = vmul.f32 %v6245_v49, %v8199_v39  ;;  %v1641_v38 = vmul.f32 %v6245_v49, %v8205_v25  ;;  %v1648_v19 = vmul.f32 %v6245_v49, %v6235_v22  ;;  %v1642_v28 = vmul.f32 %v6245_v49, %v8213_v7  ;;  %v8278_v22 = vld [vmem:[#allocation5 + $0xb0] sm:$0xff] }
 0x3df   : > { %1681 = vperm.xlu0 %6136, %v1639_v59   ;;  %1676 = vperm.xlu2 %6135, %v1638_v55   ;;  %v1643_v34 = vmul.f32 %v6245_v49, %v8218_v10  ;;  %v1651_v48 = vmul.f32 %v6245_v49, %v6241_v58  ;;  %v1644_v40 = vmul.f32 %v6245_v49, %v8225_v37  ;;  %v8259_v37 = vpop.f32.mrf.mxu1  ;;  %v2603_v58 = vsel %vm1225_vm3, %v8272_v63, -inf }
 0x3e0   : > { %1671 = vperm.xlu1 %6134, %v1637_v44   ;;  %v1646_v13 = vmul.f32 %v6245_v49, %v8235_v2  ;;  %v1647_v39 = vmul.f32 %v6245_v49, %v6233_v57  ;;  %v1649_v25 = vmul.f32 %v6245_v49, %v6237_v32  ;;  %v1650_v42 = vmul.f32 %v6245_v49, %v6239_v35  ;;  %v8269_v57 = vld [vmem:[#allocation5 + $0xa0] sm:$0xff]  ;;  %v2589_v32 = vld [vmem:[#allocation5 + $0x90] sm:$0xff] }
 0x3e1   : > { %v1652_v10 = vmul.f32 %v6245_v49, %v6243_v26  ;;  %v8289_v35 = vld [vmem:[#allocation5 + $0xd0] sm:$0xff]  ;;  %v2611_v26 = vsel %vm1225_vm3, %v8278_v22, -inf  ;;  %v2605_v27 = vsel %vm1225_vm3, %v2589_v32, -inf  ;;  %v2610_v59 = vmax.f32 %v2604_v5, %v2609_v51 }
 0x3e2   : > { %v2619_v47 = vsel %vm1225_vm3, %v8289_v35, -inf  ;;  %v2612_v55 = vmax.f32 %v2605_v27, %v2611_v26  ;;  %v2614_v44 = vmax.f32 %v2606_v1, %v2613_v52 }
 0x3e7   : > { %1711 = vperm.xlu0 %6136, %v1645_v53   ;;  %1686 = vperm.xlu2 %6135, %v1640_v24   ;;  %v8266_v15 = vpop.f32.mrf.mxu1 }
 0x3e8   : > { %1691 = vperm.xlu1 %6134, %v1641_v38  }
 0x3ef   : > { %1726 = vperm.xlu0 %6136, %v1648_v19   ;;  %1696 = vperm.xlu2 %6135, %v1642_v28   ;;  %v8297_v41 = vpop.f32.mrf.mxu1  ;;  %v2618_v28 = vmax.f32 %v2610_v59, %v2617_v9 }
 0x3f0   : > { %1701 = vperm.xlu1 %6134, %v1643_v34   ;;  %v2620_v34 = vmax.f32 %v2612_v55, %v2619_v47 }
 0x3f7   : > { %1741 = vperm.xlu0 %6136, %v1651_v48   ;;  %1706 = vperm.xlu2 %6135, %v1644_v40  }
 0x3f8   : > { %1716 = vperm.xlu1 %6134, %v1646_v13  }
 0x3ff   : > { %1721 = vperm.xlu2 %6135, %v1647_v39  }
 0x400   : > { %1731 = vperm.xlu1 %6134, %v1649_v25  }
 0x407   : > { %1736 = vperm.xlu2 %6135, %v1650_v42  }
 0x408   : > { %1746 = vperm.xlu1 %6134, %v1652_v10   ;;  %v8331_v10 = vpop.f32.mrf.mxu1 }
 0x409   : > { %v2290_v29 = vpop.xlane.xlu1 %2289 }
 0x40a   : > { %v2310_v7 = vadd.f32 %v2290_v29, %v7940_v54 }
 0x40c   : > { %2326 = vst.msk [vmem:[#allocation5 + $0xd8] sm:$0xff] %vm1225_vm3, %v2310_v7 }
 0x411   : > { %v2294_v23 = vpop.xlane.xlu1 %2293 }
 0x412   : > { %v2312_v11 = vadd.f32 %v2294_v23, %v7940_v54 }
 0x413   : > { %v8291_v4 = vld [vmem:[#allocation5 + $0xd8] sm:$0xff] }
 0x414   : > { %2328 = vst.msk [vmem:[#allocation5 + $0xe8] sm:$0xff] %vm1225_vm3, %v2312_v11  ;;  %v2621_v30 = vsel %vm1225_vm3, %v8291_v4, -inf }
 0x415   : > { %v2622_v48 = vmax.f32 %v2614_v44, %v2621_v30 }
 0x417   : > { %v2292_v0 = vpop.xlane.xlu2 %2291 }
 0x418   : > { %v2311_v2 = vadd.f32 %v2292_v0, %v7940_v54 }
 0x419   : > { %v2298_v31 = vpop.xlane.xlu0 %2297 }
 0x41a   : > { %2327 = vst.msk [vmem:[#allocation5 + $0xe0] sm:$0xff] %vm1225_vm3, %v2311_v2  ;;  %v2314_v50 = vadd.f32 %v2298_v31, %v7940_v54  ;;  %v8333_v2 = vpop.f32.mrf.mxu3 }
 0x41b   : > { %v8307_v18 = vld [vmem:[#allocation5 + $0xe8] sm:$0xff] }
 0x41c   : > { %2330 = vst.msk [vmem:[#allocation5 + $0xf8] sm:$0xff] %vm1225_vm3, %v2314_v50  ;;  %v2625_v24 = vsel %vm1225_vm3, %v8307_v18, -inf }
 0x41d   : > { %v2626_v39 = vmax.f32 %v2618_v28, %v2625_v24 }
 0x41f   : > { %v2296_v56 = vpop.xlane.xlu2 %2295 }
 0x420   : > { %v2313_v43 = vadd.f32 %v2296_v56, %v7940_v54  ;;  %v2607_v54 = vsel %vm1225_vm3, %v8269_v57, -inf  ;;  %v8335_v56 = vpop.f32.mrf.mxu1 }
 0x421   : > { %v8293_v61 = vld [vmem:[#allocation5 + $0xe0] sm:$0xff]  ;;  %v2608_v45 = vmax.f32 %v2603_v58, %v2607_v54 }
 0x422   : > { %2329 = vst.msk [vmem:[#allocation5 + $0xf0] sm:$0xff] %vm1225_vm3, %v2313_v43  ;;  %v2623_v49 = vsel %vm1225_vm3, %v8293_v61, -inf }
 0x423   : > { %v8309_v46 = vld [vmem:[#allocation5 + $0xf8] sm:$0xff]  ;;  %v2616_v53 = vmax.f32 %v2608_v45, %v2615_v21  ;;  %v8345_v21 = vpop.f32.mrf.mxu3 }
 0x424   : > { %v2629_v38 = vsel %vm1225_vm3, %v8309_v46, -inf }
 0x425   : > { %v2624_v40 = vmax.f32 %v2616_v53, %v2623_v49  ;;  %v2630_v29 = vmax.f32 %v2622_v48, %v2629_v38 }
 0x427   : > { %v2631_v7 = vmax.f32 %v2624_v40, %v2626_v39 }
 0x428   : > { %v8349_v1 = vpop.f32.mrf.mxu1 }
 0x429   : > { %v8327_v19 = vld [vmem:[#allocation5 + $0xf0] sm:$0xff] }
 0x42a   : > { %v2627_v13 = vsel %vm1225_vm3, %v8327_v19, -inf }
 0x42b   : > { %v2628_v25 = vmax.f32 %v2620_v34, %v2627_v13  ;;  %v8363_v55 = vpop.f32.mrf.mxu3 }
 0x42d   : > { %v2632_v42 = vmax.f32 %v2628_v25, %v2630_v29 }
 0x42f   : > { %v2633_v23 = vmax.f32 %v2631_v7, %v2632_v42 }
 0x430   : > { %v8377_v28 = vpop.f32.mrf.mxu1 }
 0x431   : > { %v2634_v11 = vrot.slane %v2633_v23, 4 }
 0x433   : > { %v2635_v0 = vmax.f32 %v2633_v23, %v2634_v11 }
 0x435   : > { %v2636_v31 = vrot.slane %v2635_v0, 2 }
 0x437   : > { %v2637_v50 = vmax.f32 %v2635_v0, %v2636_v31 }
 0x439   : > { %v2638_v43 = vrot.slane %v2637_v50, 1 }
 0x43b   : > { %v8337_v54 = vmax.f32 %v2637_v50, %v2638_v43 }
 0x43d   : > { %v2640_v58 = vsub.f32 %v8272_v63, %v8337_v54  ;;  %v2641_v51 = vsub.f32 %v8274_v36, %v8337_v54  ;;  %v2642_v26 = vsub.f32 %v2589_v32, %v8337_v54  ;;  %v2643_v52 = vsub.f32 %v2590_v3, %v8337_v54  ;;  %v8355_v3 = vpop.permute.xlu2 %1676 }
 0x43e   : > { %v2644_v5 = vsub.f32 %v8269_v57, %v8337_v54  ;;  %v2645_v45 = vsub.f32 %v8276_v60, %v8337_v54  ;;  %v2646_v36 = vsub.f32 %v8278_v22, %v8337_v54  ;;  %v2647_v57 = vsub.f32 %v8280_v14, %v8337_v54 }
 0x43f   : > { %v2656_v27 = vmul.f32 1.442695, %v2640_v58  ;;  %v2658_v9 = vmul.f32 1.442695, %v2641_v51  ;;  %v2660_v63 = vmul.f32 1.442695, %v2642_v26  ;;  %v2648_v60 = vsub.f32 %v8282_v62, %v8337_v54 }
 0x440   : > { %v2662_v47 = vmul.f32 1.442695, %v2643_v52  ;;  %v2664_v32 = vmul.f32 1.442695, %v2644_v5  ;;  %v2666_v30 = vmul.f32 1.442695, %v2645_v45  ;;  %v2649_v44 = vsub.f32 %v8285_v33, %v8337_v54  ;;  %v8409_v52 = vpop.f32.mrf.mxu3 }
 0x441   : > { %6246 = vpow2.f32 %v2656_v27  ;;  %v2668_v49 = vmul.f32 1.442695, %v2646_v36  ;;  %v2670_v53 = vmul.f32 1.442695, %v2647_v57  ;;  %v2650_v34 = vsub.f32 %v8289_v35, %v8337_v54  ;;  %v8394_v35 = vld [vmem:[%s10298_s5] sm:$0x3]  ;;  %v8421_v36 = vpop.f32.mrf.mxu1 }
 0x442   : > { %6248 = vpow2.f32 %v2658_v9  ;;  %v2672_v48 = vmul.f32 1.442695, %v2648_v60  ;;  %v2651_v39 = vsub.f32 %v8291_v4, %v8337_v54  ;;  %v2674_v25 = vmul.f32 1.442695, %v2649_v44 }
 0x443   : > { %6250 = vpow2.f32 %v2660_v63  ;;  %v2652_v11 = vsub.f32 %v8293_v61, %v8337_v54  ;;  %v2676_v4 = vmul.f32 1.442695, %v2650_v34  ;;  %v2653_v43 = vsub.f32 %v8307_v18, %v8337_v54  ;;  %v5943_v18 = vld [vmem:[#allocation16 + $0x38] sm:$0xff] }
 0x444   : > { %6252 = vpow2.f32 %v2662_v47  ;;  %v2678_v58 = vmul.f32 1.442695, %v2651_v39  ;;  %v8407_v26 = vperm.slane %v8394_v35, 0  ;;  %v2654_v27 = vsub.f32 %v8327_v19, %v8337_v54  ;;  %3039 = vmatpush.bf16.msra.mxu0 %v5943_v18  ;;  %5986 = vmatpush.bf16.msrb.mxu2 %v5943_v18 }
 0x445   : > { %6254 = vpow2.f32 %v2664_v32  ;;  %v8396_v23 = vpop.permute.xlu2 %1686  ;;  %v2680_v45 = vmul.f32 1.442695, %v2652_v11  ;;  %v2655_v32 = vsub.f32 %v8309_v46, %v8337_v54  ;;  %v2682_v57 = vmul.f32 1.442695, %v2653_v43 }
 0x446   : > { %6256 = vpow2.f32 %v2666_v30  ;;  %v1362_v19 = vadd.f32 %v8259_v37, %v8407_v26  ;;  %v1364_v60 = vadd.f32 %v8266_v15, %v8407_v26  ;;  %v1367_v39 = vadd.f32 %v8297_v41, %v8407_v26 }
 0x447   : > { %v8361_v59 = vpop.eup %6246  ;;  %6258 = vpow2.f32 %v2668_v49  ;;  %v1369_v41 = vadd.f32 %v8331_v10, %v8407_v26 }
 0x448   : > { %v8365_v22 = vpop.eup %6248  ;;  %v2688_v14 = vsel %vm1225_vm3, %v8361_v59, 0.0  ;;  %6260 = vpow2.f32 %v2670_v53  ;;  %v1750_v54 = vmul.f32 %v8355_v3, %v1364_v60  ;;  %v8444_v11 = vpop.f32.mrf.mxu3 }
 0x449   : > { %v8371_v24 = vpop.eup %6250  ;;  %v2689_v62 = vsel %vm1225_vm3, %v8365_v22, 0.0  ;;  %6262 = vpow2.f32 %v2672_v48  ;;  %v8458_v18 = vpop.f32.mrf.mxu1 }
 0x44a   : > { %v8375_v38 = vpop.eup %6252  ;;  %v2690_v33 = vadd.f32 %v2689_v62, %v2688_v14  ;;  %v2691_v40 = vsel %vm1225_vm3, %v8371_v24, 0.0  ;;  %6264 = vpow2.f32 %v2674_v25  ;;  %v2684_v14 = vmul.f32 1.442695, %v2654_v27  ;;  %v5941_v27 = vld [vmem:[#allocation16 + $0x28] sm:$0xff] }
 0x44b   : > { %v8383_v13 = vpop.eup %6254  ;;  %v2693_v7 = vsel %vm1225_vm3, %v8375_v38, 0.0  ;;  %6266 = vpow2.f32 %v2676_v4 }
 0x44c   : > { %v2692_v29 = vadd.f32 %v2691_v40, %v2690_v33  ;;  %v8389_v42 = vpop.eup %6256  ;;  %v2695_v31 = vsel %vm1225_vm3, %v8383_v13, 0.0  ;;  %6268 = vpow2.f32 %v2678_v58  ;;  %v2686_v33 = vmul.f32 1.442695, %v2655_v32 }
 0x44d   : > { %v8402_v50 = vpop.eup %6258  ;;  %v2697_v61 = vsel %vm1225_vm3, %v8389_v42, 0.0  ;;  %6270 = vpow2.f32 %v2680_v45  ;;  %v1697_v15 = vpop.permute.xlu2 %1696 }
 0x44e   : > { %v2694_v0 = vadd.f32 %v2693_v7, %v2692_v29  ;;  %v8413_v5 = vpop.eup %6260  ;;  %v2699_v63 = vsel %vm1225_vm3, %v8402_v50, 0.0  ;;  %6272 = vpow2.f32 %v2682_v57  ;;  %v1752_v57 = vmul.f32 %v8396_v23, %v1369_v41 }
 0x44f   : > { %v8419_v47 = vpop.eup %6262  ;;  %v2701_v49 = vsel %vm1225_vm3, %v8413_v5, 0.0  ;;  %6274 = vpow2.f32 %v2684_v14  ;;  %v1374_v23 = vadd.f32 %v8349_v1, %v8407_v26 }
 0x450   : > { %v2696_v51 = vadd.f32 %v2695_v31, %v2694_v0  ;;  %v8431_v44 = vpop.eup %6264  ;;  %v2703_v37 = vsel %vm1225_vm3, %v8419_v47, 0.0  ;;  %v5942_v0 = vld [vmem:[#allocation16 + $0x30] sm:$0xff]  ;;  %6276 = vpow2.f32 %v2686_v33  ;;  %v1393_v33 = vpop.f32.mrf.mxu3 }
 0x451   : > { %v8436_v34 = vpop.eup %6266  ;;  %v1682_v48 = vpop.permute.xlu0 %1681  ;;  %v2705_v29 = vsel %vm1225_vm3, %v8431_v44, 0.0  ;;  %3040 = vmatpush.bf16.msra.mxu0 %v5942_v0  ;;  %5987 = vmatpush.bf16.msrb.mxu2 %v5942_v0 }
 0x452   : > { %v2698_v9 = vadd.f32 %v2697_v61, %v2696_v51  ;;  %v1672_v53 = vpop.permute.xlu1 %1671  ;;  %v8442_v7 = vpop.eup %6268  ;;  %v1751_v4 = vmul.f32 %v1682_v48, %v1367_v39  ;;  %v2707_v31 = vsel %vm1225_vm3, %v8436_v34, 0.0  ;;  %v1372_v51 = vadd.f32 %v8335_v56, %v8407_v26 }
 0x453   : > { %v1749_v62 = vmul.f32 %v1672_v53, %v1362_v19  ;;  %v8448_v43 = vpop.eup %6270  ;;  %v2709_v45 = vsel %vm1225_vm3, %v8442_v7, 0.0  ;;  %v1377_v48 = vadd.f32 %v8377_v28, %v8407_v26  ;;  %v1382_v28 = vadd.f32 %v8333_v2, %v8407_v26 }
 0x454   : > { %v2700_v30 = vadd.f32 %v2699_v63, %v2698_v9  ;;  %v8456_v9 = vpop.eup %6272  ;;  %v2711_v10 = vsel %vm1225_vm3, %v8448_v43, 0.0 }
 0x455   : > { %v1765_v25 = vadd.f32 %v1750_v54, %v1749_v62  ;;  %v8463_v56 = vpop.eup %6274  ;;  %3041 = vmatpush.bf16.msra.mxu0 %v5941_v27  ;;  %5988 = vmatpush.bf16.msrb.mxu2 %v5941_v27  ;;  %v1707_v14 = vpop.permute.xlu2 %1706  ;;  %v5940_v27 = vld [vmem:[#allocation16 + $0x20] sm:$0xff] }
 0x456   : > { %v2702_v46 = vadd.f32 %v2701_v49, %v2700_v30  ;;  %v2713_v49 = vsel %vm1225_vm3, %v8456_v9, 0.0  ;;  %v8467_v53 = vpop.eup %6276  ;;  %v2715_v62 = vsel %vm1225_vm3, %v8463_v56, 0.0 }
 0x457   : > { %v1766_v61 = vadd.f32 %v1765_v25, %v1751_v4  ;;  %v2717_v39 = vsel %vm1225_vm3, %v8467_v53, 0.0  ;;  %v1379_v4 = vadd.f32 %v8421_v36, %v8407_v26  ;;  %v5939_v36 = vld [vmem:[#allocation16 + $0x18] sm:$0xff] }
 0x458   : > { %v2704_v40 = vadd.f32 %v2703_v37, %v2702_v46 }
 0x459   : > { %v1767_v60 = vadd.f32 %v1766_v61, %v1752_v57  ;;  %v1712_v25 = vpop.permute.xlu0 %1711  ;;  %v1756_v41 = vmul.f32 %v1707_v14, %v1379_v4  ;;  %3042 = vmatpush.bf16.msra.mxu0 %v5940_v27  ;;  %5989 = vmatpush.bf16.msrb.mxu2 %v5940_v27  ;;  %v1396_v14 = vpop.f32.mrf.mxu3  ;;  %v1394_v4 = vadd.f32 %v1393_v33, %v8407_v26 }
 0x45a   : > { %v2706_v3 = vadd.f32 %v2705_v29, %v2704_v40  ;;  %v1692_v63 = vpop.permute.xlu1 %1691  ;;  %v1754_v40 = vmul.f32 %v1697_v15, %v1374_v23  ;;  %v1757_v57 = vmul.f32 %v1712_v25, %v1382_v28  ;;  %v5937_v25 = vld [vmem:[#allocation16 + $0x8] sm:$0xff]  ;;  %v5936_v28 = vld [vmem:[#allocation16] sm:$0xff] }
 0x45b   : > { %v1753_v30 = vmul.f32 %v1692_v63, %v1372_v51 }
 0x45c   : > { %v2708_v58 = vadd.f32 %v2707_v31, %v2706_v3  ;;  %v8479_v31 = vpop.f32.mrf.mxu1 }
 0x45d   : > { %v1768_v54 = vadd.f32 %v1767_v60, %v1753_v30  ;;  %3043 = vmatpush.bf16.msra.mxu0 %v5939_v36  ;;  %5990 = vmatpush.bf16.msrb.mxu2 %v5939_v36 }
 0x45e   : > { %v2710_v32 = vadd.f32 %v2709_v45, %v2708_v58  ;;  %v1722_v45 = vpop.permute.xlu2 %1721 }
 0x45f   : > { %v1769_v1 = vadd.f32 %v1768_v54, %v1754_v40 }
 0x460   : > { %v2712_v19 = vadd.f32 %v2711_v10, %v2710_v32  ;;  %v1384_v32 = vadd.f32 %v8345_v21, %v8407_v26 }
 0x461   : > { %v1727_v2 = vpop.permute.xlu0 %1726 }
 0x462   : > { %v2714_v46 = vadd.f32 %v2713_v49, %v2712_v19  ;;  %v1702_v29 = vpop.permute.xlu1 %1701  ;;  %v1387_v19 = vadd.f32 %v8363_v55, %v8407_v26  ;;  %v1392_v55 = vadd.f32 %v8444_v11, %v8407_v26 }
 0x463   : > { %v1755_v0 = vmul.f32 %v1702_v29, %v1377_v48  ;;  %v1389_v48 = vadd.f32 %v8409_v52, %v8407_v26 }
 0x464   : > { %v2716_v37 = vadd.f32 %v2715_v62, %v2714_v46  ;;  %v1759_v23 = vmul.f32 %v1722_v45, %v1387_v19  ;;  %v5938_v62 = vld [vmem:[#allocation16 + $0x10] sm:$0xff]  ;;  %v8487_v21 = vpop.f32.mrf.mxu1 }
 0x465   : > { %v1770_v51 = vadd.f32 %v1769_v1, %v1755_v0  ;;  %3044 = vmatpush.bf16.msra.mxu0 %v5938_v62  ;;  %5991 = vmatpush.bf16.msrb.mxu2 %v5938_v62 }
 0x466   : > { %v2718_v3 = vadd.f32 %v2717_v39, %v2716_v37  ;;  %v1760_v39 = vmul.f32 %v1727_v2, %v1389_v48  ;;  %v1737_v29 = vpop.permute.xlu2 %1736 }
 0x467   : > { %v1771_v15 = vadd.f32 %v1770_v51, %v1756_v41  ;;  %v1397_v51 = vadd.f32 %v1396_v14, %v8407_v26 }
 0x468   : > { %v2719_v58 = vrot.slane %v2718_v3, 4 }
 0x469   : > { %v1772_v60 = vadd.f32 %v1771_v15, %v1757_v57  ;;  %3045 = vmatpush.bf16.msra.mxu0 %v5937_v25  ;;  %5992 = vmatpush.bf16.msrb.mxu2 %v5937_v25  ;;  %v1742_v11 = vpop.permute.xlu0 %1741 }
 0x46a   : > { %v2720_v61 = vadd.f32 %v2719_v58, %v2718_v3  ;;  %v1717_v30 = vpop.permute.xlu1 %1716  ;;  %v1762_v58 = vmul.f32 %v1737_v29, %v1394_v4  ;;  %v1763_v36 = vmul.f32 %v1742_v11, %v1397_v51 }
 0x46b   : > { %v1758_v49 = vmul.f32 %v1717_v30, %v1384_v32  ;;  %v8503_v32 = vpop.f32.mrf.mxu2 }
 0x46c   : > { %v2721_v63 = vrot.slane %v2720_v61, 2 }
 0x46d   : > { %v1773_v54 = vadd.f32 %v1772_v60, %v1758_v49  ;;  %3046 = vmatpush.bf16.msra.mxu0 %v5936_v28  ;;  %5993 = vmatpush.bf16.msrb.mxu2 %v5936_v28  ;;  %v8513_v49 = vperm.slane %v8394_v35, 1 }
 0x46e   : > { %v2722_v10 = vadd.f32 %v2721_v63, %v2720_v61  ;;  %v1398_v61 = vpop.f32.mrf.mxu3  ;;  %v1417_v63 = vpop.f32.mrf.mxu1 }
 0x46f   : > { %v1774_v40 = vadd.f32 %v1773_v54, %v1759_v23  ;;  %v1399_v57 = vadd.f32 %v1398_v61, %v8407_v26  ;;  %v1418_v4 = vadd.f32 %v1417_v63, %v8513_v49 }
 0x470   : > { %v2723_v46 = vrot.slane %v2722_v10, 1 }
 0x471   : > { %v1775_v1 = vadd.f32 %v1774_v40, %v1760_v39 }
 0x472   : > { %v2724_v37 = vadd.f32 %v2723_v46, %v2722_v10  ;;  %v1732_v3 = vpop.permute.xlu1 %1731 }
 0x473   : > { %v1761_v0 = vmul.f32 %v1732_v3, %v1392_v55  ;;  %v8515_v46 = vpop.f32.mrf.mxu2  ;;  %v1416_v3 = vadd.f32 %v8487_v21, %v8513_v49 }
 0x474   : > { %6278 = vrcp.f32 %v2724_v37 }
 0x475   : > { %v1776_v41 = vadd.f32 %v1775_v1, %v1761_v0 }
 0x476   : > { %v1420_v2 = vpop.f32.mrf.mxu1 }
 0x477   : > { %v1777_v15 = vadd.f32 %v1776_v41, %v1762_v58  ;;  %v1468_v58 = vmax.f32 %v1416_v3, 0.0  ;;  %v1469_v41 = vmax.f32 %v1418_v4, 0.0 }
 0x479   : > { %v1778_v10 = vadd.f32 %v1777_v15, %v1763_v36 }
 0x47a   : > { %v8494_v52 = vpop.eup %6278  ;;  %v1747_v30 = vpop.permute.xlu1 %1746 }
 0x47b   : > { %v2727_v27 = vmul.f32 %v8494_v52, %v8365_v22  ;;  %v2726_v33 = vmul.f32 %v8494_v52, %v8361_v59  ;;  %v2728_v45 = vmul.f32 %v8494_v52, %v8371_v24  ;;  %v1764_v19 = vmul.f32 %v1747_v30, %v1399_v57  ;;  %v8531_v25 = vpop.f32.mrf.mxu2  ;;  %v8570_v57 = vpop.f32.mrf.mxu3 }
 0x47c   : > { %v2730_v59 = vmul.f32 %v8494_v52, %v8383_v13  ;;  %v2729_v24 = vmul.f32 %v8494_v52, %v8375_v38  ;;  %v2731_v26 = vmul.f32 %v8494_v52, %v8389_v42  ;;  %v1411_v13 = vadd.f32 %v8458_v18, %v8513_v49 }
 0x47d   : > { %2765 = vperm.xlu0 %6136, %v2727_v27   ;;  %2760 = vperm.xlu2 %6135, %v2726_v33   ;;  %v1779_v22 = vadd.f32 %v1778_v10, %v1764_v19  ;;  %v1413_v38 = vadd.f32 %v8479_v31, %v8513_v49  ;;  %v2733_v42 = vmul.f32 %v8494_v52, %v8413_v5  ;;  %v689_v19 = vstv %s688_s26  ;;  %s10478_s26 = sld [smem:[#allocation67_spill]] }
 0x47e   : > { %2770 = vperm.xlu1 %6134, %v2728_v45   ;;  %v2732_v35 = vmul.f32 %v8494_v52, %v8402_v50  ;;  %v2734_v37 = vmul.f32 %v8494_v52, %v8419_v47  ;;  %v1466_v48 = vmax.f32 %v1411_v13, 0.0  ;;  %v1422_v39 = vpop.f32.mrf.mxu1  ;;  %v2736_v50 = vmul.f32 %v8494_v52, %v8436_v34 }
 0x47f   : > { %v1780_v60 = vrot.slane %v1779_v22, 4  ;;  %v1467_v40 = vmax.f32 %v1413_v38, 0.0  ;;  %v2735_v47 = vmul.f32 %v8494_v52, %v8431_v44  ;;  %v2737_v29 = vmul.f32 %v8494_v52, %v8442_v7 }
 0x480   : > { %v2739_v34 = vmul.f32 %v8494_v52, %v8456_v9  ;;  %v2738_v44 = vmul.f32 %v8494_v52, %v8448_v43  ;;  %v2740_v7 = vmul.f32 %v8494_v52, %v8463_v56  ;;  %v2741_v11 = vmul.f32 %v8494_v52, %v8467_v53 }
 0x481   : > { %v1781_v14 = vadd.f32 %v1780_v60, %v1779_v22  ;;  %v1421_v43 = vadd.f32 %v1420_v2, %v8513_v49  ;;  %v1423_v56 = vadd.f32 %v1422_v39, %v8513_v49  ;;  %6280 = vrcp.f32 %v689_v19 }
 0x482   : > { %v701_v38 = vand.u32 2147483648, %v689_v19  ;;  %vm695_vm3 = vweird.f32 %v689_v19 }
 0x483   : > { %v1782_v23 = vrot.slane %v1781_v14, 2  ;;  %v8542_v0 = vpop.f32.mrf.mxu2  ;;  %v1470_v15 = vmax.f32 %v1421_v43, 0.0  ;;  %v1471_v27 = vmax.f32 %v1423_v56, 0.0 }
 0x485   : > { %2780 = vperm.xlu0 %6136, %v2730_v59   ;;  %2775 = vperm.xlu2 %6135, %v2729_v24   ;;  %v1783_v54 = vadd.f32 %v1782_v23, %v1781_v14  ;;  %v8578_v14 = vpop.f32.mrf.mxu3 }
 0x486   : > { %2785 = vperm.xlu1 %6134, %v2731_v26   ;;  %v1425_v1 = vpop.f32.mrf.mxu1 }
 0x487   : > { %v1784_v62 = vrot.slane %v1783_v54, 1  ;;  %v1426_v36 = vadd.f32 %v1425_v1, %v8513_v49  ;;  %v6281_v2 = vpop.eup %6280 }
 0x488   : > { %v691_v23 = vmul.f32 %v6281_v2, %v689_v19  ;;  %vm696_vm7 = vweird.f32 %v6281_v2 }
 0x489   : > { %v8527_v55 = vadd.f32 %v1784_v62, %v1783_v54  ;;  %v1472_v60 = vmax.f32 %v1426_v36, 0.0  ;;  %vm697_vm8 = vmor %vm695_vm3, %vm696_vm7 }
 0x48a   : > { %v692_v62 = vsub.f32 1.0, %v691_v23 }
 0x48b   : > { %v1802_v18 = vmul.f32 %v8527_v55, %v1466_v48  ;;  %v1803_v31 = vmul.f32 %v8527_v55, %v1467_v40  ;;  %v1804_v51 = vmul.f32 %v8527_v55, %v1468_v58  ;;  %v1805_v21 = vmul.f32 %v8527_v55, %v1469_v41  ;;  %v8554_v9 = vpop.f32.mrf.mxu2 }
 0x48c   : > { %v1806_v33 = vmul.f32 %v8527_v55, %v1470_v15  ;;  %v1807_v45 = vmul.f32 %v8527_v55, %v1471_v27  ;;  %v1808_v24 = vmul.f32 %v8527_v55, %v1472_v60  ;;  %v702_v48 = vor.u32 1.1754944e-38, %v701_v38 }
 0x48d   : > { %2795 = vperm.xlu0 %6136, %v2733_v42   ;;  %2790 = vperm.xlu2 %6135, %v2732_v35   ;;  %v2955_v5 = vpack.c.bf16 %v1803_v31, %v1802_v18  ;;  %v2956_v61 = vpack.c.bf16 %v1805_v21, %v1804_v51  ;;  %v699_v42 = vand.u32 2147483647, %v689_v19  ;;  %v8584_v39 = vpop.f32.mrf.mxu3 }
 0x48e   : > { %2800 = vperm.xlu1 %6134, %v2734_v37   ;;  %v1427_v28 = vpop.f32.mrf.mxu1  ;;  %v2957_v63 = vpack.c.bf16 %v1807_v45, %v1806_v33  ;;  %v693_v37 = vmul.f32 %v6281_v2, %v692_v62 }
 0x48f   : > { %3047 = vmatmul.bf16.vlgmr.msra.gmra.mxu0 %v2955_v5  ;;  %v1428_v30 = vadd.f32 %v1427_v28, %v8513_v49  ;;  %vm700_vm9 = vcmp.eq.f32.partialorder %v699_v42, 8.507059e+37 }
 0x490   : > { %v694_v40 = vadd.f32 %v6281_v2, %v693_v37 }
 0x491   : > { %v1473_v59 = vmax.f32 %v1428_v30, 0.0 }
 0x492   : > { %v698_v5 = vsel %vm697_vm8, %v6281_v2, %v694_v40 }
 0x493   : > { %v8566_v52 = vpop.f32.mrf.mxu2  ;;  %v1809_v26 = vmul.f32 %v8527_v55, %v1473_v59 }
 0x495   : > { %2810 = vperm.xlu0 %6136, %v2736_v50   ;;  %2805 = vperm.xlu2 %6135, %v2735_v47   ;;  %v2958_v13 = vpack.c.bf16 %v1809_v26, %v1808_v24  ;;  %v703_v50 = vsel %vm700_vm9, %v702_v48, %v698_v5 }
 0x496   : > { %2815 = vperm.xlu1 %6134, %v2737_v29   ;;  %v1430_v53 = vpop.f32.mrf.mxu1  ;;  %5996 = vpush %v703_v50 }
 0x497   : > { %v1431_v18 = vadd.f32 %v1430_v53, %v8513_v49 }
 0x499   : > { %v1474_v29 = vmax.f32 %v1431_v18, 0.0 }
 0x49b   : > { %v8574_v22 = vpop.f32.mrf.mxu2  ;;  %v1810_v1 = vmul.f32 %v8527_v55, %v1474_v29 }
 0x49d   : > { %2825 = vperm.xlu0 %6136, %v2739_v34   ;;  %2820 = vperm.xlu2 %6135, %v2738_v44   ;;  %v8590_v34 = vpop.f32.mrf.mxu3 }
 0x49e   : > { %2830 = vperm.xlu1 %6134, %v2740_v7   ;;  %v1432_v10 = vpop.f32.mrf.mxu1 }
 0x49f   : > { %3052 = vmatmul.bf16.gmra.mxu0 %v2956_v61  ;;  %v1433_v31 = vadd.f32 %v1432_v10, %v8513_v49 }
 0x4a1   : > { %v1475_v3 = vmax.f32 %v1433_v31, 0.0 }
 0x4a3   : > { %v8580_v35 = vpop.f32.mrf.mxu2  ;;  %v1811_v58 = vmul.f32 %v8527_v55, %v1475_v3 }
 0x4a5   : > { %2835 = vperm.xlu2 %6135, %v2741_v11   ;;  %v2959_v41 = vpack.c.bf16 %v1811_v58, %v1810_v1  ;;  %v8596_v28 = vpop.f32.mrf.mxu3 }
 0x4a6   : > { %v1435_v54 = vpop.f32.mrf.mxu1 }
 0x4a7   : > { %v1436_v51 = vadd.f32 %v1435_v54, %v8513_v49 }
 0x4a9   : > { %v1476_v61 = vmax.f32 %v1436_v51, 0.0 }
 0x4ab   : > { %v8586_v47 = vpop.f32.mrf.mxu2  ;;  %v1812_v56 = vmul.f32 %v8527_v55, %v1476_v61 }
 0x4ad   : > { %v8602_v53 = vpop.f32.mrf.mxu3 }
 0x4ae   : > { %v1437_v4 = vpop.f32.mrf.mxu1 }
 0x4af   : > { %3057 = vmatmul.bf16.gmra.mxu0 %v2957_v63  ;;  %v1438_v21 = vadd.f32 %v1437_v4, %v8513_v49  ;;  %v8607_v63 = vld [vmem:[%s10298_s5] sm:$0x3] }
 0x4b0   : > { %v8614_v60 = vperm.slane %v8607_v63, 0 }
 0x4b1   : > { %v1477_v11 = vmax.f32 %v1438_v21, 0.0 }
 0x4b2   : > { %v2453_v38 = vadd.f32 %v8515_v46, %v8614_v60  ;;  %v2456_v62 = vadd.f32 %v8531_v25, %v8614_v60  ;;  %v2461_v4 = vadd.f32 %v8554_v9, %v8614_v60  ;;  %v2466_v9 = vadd.f32 %v8574_v22, %v8614_v60 }
 0x4b3   : > { %v8592_v44 = vpop.f32.mrf.mxu2  ;;  %v1813_v15 = vmul.f32 %v8527_v55, %v1477_v11 }
 0x4b5   : > { %v2960_v45 = vpack.c.bf16 %v1813_v15, %v1812_v56  ;;  %v8624_v42 = vpop.f32.mrf.mxu3 }
 0x4b6   : > { %v1440_v7 = vpop.f32.mrf.mxu1 }
 0x4b7   : > { %v1441_v36 = vadd.f32 %v1440_v7, %v8513_v49  ;;  %v2463_v7 = vadd.f32 %v8566_v52, %v8614_v60  ;;  %v2468_v52 = vadd.f32 %v8580_v35, %v8614_v60 }
 0x4b9   : > { %v1478_v24 = vmax.f32 %v1441_v36, 0.0 }
 0x4bb   : > { %v8598_v43 = vpop.f32.mrf.mxu2  ;;  %v1814_v2 = vmul.f32 %v8527_v55, %v1478_v24  ;;  %v2471_v24 = vadd.f32 %v8586_v47, %v8614_v60 }
 0x4bd   : > { %v8634_v11 = vpop.f32.mrf.mxu3 }
 0x4be   : > { %v1442_v33 = vpop.f32.mrf.mxu1 }
 0x4bf   : > { %3062 = vmatmul.bf16.gmra.mxu0 %v2958_v13  ;;  %v1443_v30 = vadd.f32 %v1442_v33, %v8513_v49  ;;  %v2451_v13 = vadd.f32 %v8503_v32, %v8614_v60  ;;  %v2458_v32 = vadd.f32 %v8542_v0, %v8614_v60 }
 0x4c1   : > { %v1479_v26 = vmax.f32 %v1443_v30, 0.0 }
 0x4c3   : > { %v8611_v10 = vpop.f32.mrf.mxu2  ;;  %v1815_v23 = vmul.f32 %v8527_v55, %v1479_v26 }
 0x4c5   : > { %v2961_v31 = vpack.c.bf16 %v1815_v23, %v1814_v2 }
 0x4c6   : > { %v1445_v59 = vpop.f32.mrf.mxu1 }
 0x4c7   : > { %v1446_v1 = vadd.f32 %v1445_v59, %v8513_v49  ;;  %s5997_s11 = spop %5996 }
 0x4c8   : > { %s705_s27 = smul.f32 %s5997_s11, %s8561_s10 }
 0x4c9   : > { %v1480_v15 = vmax.f32 %v1446_v1, 0.0  ;;  %v8659_v1 = vstv %s665_s29  ;;  %s722_s29 = smul.f32 %s5997_s11, %s8564_s13  ;;  %s10546_s11 = sld [smem:[#allocation71_spill]] }
 0x4ca   : > { %s5378_s13 = scalar_lea.sflag [#allocation8], %s7076_s28 }
 0x4cb   : > { %v2480_v18 = vpop.f32.mrf.mxu2 }
 0x4ce   : > { %v1447_v3 = vpop.f32.mrf.mxu1 }
 0x4cf   : > { %3067 = vmatmul.bf16.gmra.mxu0 %v2959_v41  ;;  %v1448_v58 = vadd.f32 %v1447_v3, %v8513_v49  ;;  %v1816_v49 = vmul.f32 %v8527_v55, %v1480_v15  ;;  %s6758_s30 = scalar_lea.hbm %s10546_s11, 512 }
 0x4d3   : > { %v2482_v33 = vpop.f32.mrf.mxu2 }
 0x4d7   : > { %v2761_v27 = vpop.permute.xlu2 %2760 }
 0x4d8   : > { %v2838_v37 = vmul.f32 %v2761_v27, %v2451_v13  ;;  %v1481_v27 = vmax.f32 %v1448_v58, 0.0 }
 0x4da   : > { %v1817_v30 = vmul.f32 %v8527_v55, %v1481_v27  ;;  %v2519_v55 = vpop.f32.mrf.mxu3 }
 0x4db   : > { %v2485_v35 = vpop.f32.mrf.mxu2 }
 0x4dc   : > { %v2962_v13 = vpack.c.bf16 %v1817_v30, %v1816_v49 }
 0x4df   : > { %3072 = vmatmul.bf16.gmra.mxu0 %v2960_v45  ;;  %v2776_v19 = vpop.permute.xlu2 %2775 }
 0x4e0   : > { %v2841_v25 = vmul.f32 %v2776_v19, %v2458_v32 }
 0x4e3   : > { %v2487_v58 = vpop.f32.mrf.mxu2 }
 0x4e4   : > { %v2488_v27 = vadd.f32 %v2487_v58, %v8614_v60 }
 0x4e7   : > { %v2791_v29 = vpop.permute.xlu2 %2790 }
 0x4e8   : > { %v2844_v19 = vmul.f32 %v2791_v29, %v2466_v9 }
 0x4ef   : > { %v2766_v54 = vpop.permute.xlu0 %2765  ;;  %3077 = vmatmul.bf16.gmra.mxu0 %v2961_v31  ;;  %v2806_v36 = vpop.permute.xlu2 %2805  ;;  %v2478_v31 = vadd.f32 %v8611_v10, %v8614_v60 }
 0x4f0   : > { %v2839_v48 = vmul.f32 %v2766_v54, %v2453_v38  ;;  %v2771_v40 = vpop.permute.xlu1 %2770  ;;  %v2473_v54 = vadd.f32 %v8592_v44, %v8614_v60  ;;  %v2481_v44 = vadd.f32 %v2480_v18, %v8614_v60 }
 0x4f1   : > { %v2840_v50 = vmul.f32 %v2771_v40, %v2456_v62 }
 0x4f2   : > { %v2854_v5 = vadd.f32 %v2839_v48, %v2838_v37  ;;  %v2476_v37 = vadd.f32 %v8598_v43, %v8614_v60  ;;  %v2847_v48 = vmul.f32 %v2806_v36, %v2473_v54  ;;  %v8656_v43 = vld [vmem:[%s10300_s7] ss:$0 sm:$0xff] }
 0x4f4   : > { %v2855_v46 = vadd.f32 %v2854_v5, %v2840_v50 }
 0x4f6   : > { %v2856_v21 = vadd.f32 %v2855_v46, %v2841_v25  ;;  %v2483_v25 = vadd.f32 %v2482_v33, %v8614_v60 }
 0x4f7   : > { %v2781_v41 = vpop.permute.xlu0 %2780  ;;  %v2821_v47 = vpop.permute.xlu2 %2820 }
 0x4f8   : > { %v2842_v51 = vmul.f32 %v2781_v41, %v2461_v4  ;;  %v2786_v61 = vpop.permute.xlu1 %2785  ;;  %v2521_v4 = vpop.f32.mrf.mxu3  ;;  %v2850_v10 = vmul.f32 %v2821_v47, %v2481_v44 }
 0x4f9   : > { %v2843_v56 = vmul.f32 %v2786_v61, %v2463_v7  ;;  %v8661_v7 = vstv %s682_s2  ;;  %s10491_s2 = sld [smem:[#allocation69_spill]] }
 0x4fa   : > { %v2857_v0 = vadd.f32 %v2856_v21, %v2842_v51  ;;  %v2486_v51 = vadd.f32 %v2485_v35, %v8614_v60 }
 0x4fc   : > { %v2858_v45 = vadd.f32 %v2857_v0, %v2843_v56 }
 0x4fe   : > { %v2859_v2 = vadd.f32 %v2858_v45, %v2844_v19  ;;  %v10446_v45 = vld [vmem:[#allocation30_spill] sm:$0xff] }
 0x4ff   : > { %v2796_v59 = vpop.permute.xlu0 %2795  ;;  %3082 = vmatmul.bf16.gmra.mxu0 %v2962_v13  ;;  %v2836_v56 = vpop.permute.xlu2 %2835  ;;  %v3194_v36 = vmul.f32 %v8661_v7, %v10446_v45 }
 0x500   : > { %v2845_v26 = vmul.f32 %v2796_v59, %v2468_v52  ;;  %v2801_v23 = vpop.permute.xlu1 %2800  ;;  %v2853_v30 = vmul.f32 %v2836_v56, %v2488_v27 }
 0x501   : > { %v2846_v22 = vmul.f32 %v2801_v23, %v2471_v24  ;;  %v8671_v24 = vpop.f32.mrf.mxu3 }
 0x502   : > { %v2860_v38 = vadd.f32 %v2859_v2, %v2845_v26  ;;  %v8675_v26 = vperm.slane %v8607_v63, 1 }
 0x504   : > { %v2861_v62 = vadd.f32 %v2860_v38, %v2846_v22  ;;  %v10448_v38 = vld [vmem:[#allocation31_spill] sm:$0xff]  ;;  %v2505_v63 = vadd.f32 %v8584_v39, %v8675_v26  ;;  %v2520_v47 = vadd.f32 %v2519_v55, %v8675_v26 }
 0x505   : > { %v3195_v22 = vmul.f32 %v8661_v7, %v10448_v38  ;;  %v10452_v38 = vld [vmem:[#allocation33_spill] sm:$0xff] }
 0x506   : > { %v2862_v50 = vadd.f32 %v2861_v62, %v2847_v48  ;;  %v2500_v62 = vadd.f32 %v8570_v57, %v8675_v26  ;;  %v2510_v57 = vadd.f32 %v8596_v28, %v8675_v26  ;;  %v2557_v44 = vmax.f32 %v2505_v63, 0.0 }
 0x507   : > { %v2811_v40 = vpop.permute.xlu0 %2810  ;;  %v2517_v28 = vadd.f32 %v8634_v11, %v8675_v26 }
 0x508   : > { %v2848_v5 = vmul.f32 %v2811_v40, %v2476_v37  ;;  %v2816_v29 = vpop.permute.xlu1 %2815  ;;  %v2502_v37 = vadd.f32 %v8578_v14, %v8675_v26  ;;  %v2522_v40 = vadd.f32 %v2521_v4, %v8675_v26  ;;  %v10450_v14 = vld [vmem:[#allocation32_spill] sm:$0xff] }
 0x509   : > { %v2849_v3 = vmul.f32 %v2816_v29, %v2478_v31  ;;  %v3196_v39 = vmul.f32 %v8661_v7, %v10450_v14  ;;  %v2555_v29 = vmax.f32 %v2500_v62, 0.0  ;;  %v10454_v14 = vld [vmem:[#allocation34_spill] sm:$0xff] }
 0x50a   : > { %v2863_v32 = vadd.f32 %v2862_v50, %v2848_v5  ;;  %v2507_v5 = vadd.f32 %v8590_v34, %v8675_v26  ;;  %v2512_v50 = vadd.f32 %v8602_v53, %v8675_v26  ;;  %v2526_v34 = vpop.f32.mrf.mxu3  ;;  %v2563_v53 = vmax.f32 %v2520_v47, 0.0 }
 0x50c   : > { %v2864_v46 = vadd.f32 %v2863_v32, %v2849_v3  ;;  %v3048_v21 = vpop.f32.mrf.mxu0  ;;  %v2556_v3 = vmax.f32 %v2502_v37, 0.0  ;;  %v2558_v58 = vmax.f32 %v2507_v5, 0.0  ;;  %v2527_v37 = vadd.f32 %v2526_v34, %v8675_v26 }
 0x50d   : > { %v3049_v15 = vadd.f32 %v8656_v43, %v3048_v21 }
 0x50e   : > { %v2865_v61 = vadd.f32 %v2864_v46, %v2850_v10  ;;  %v2515_v46 = vadd.f32 %v8624_v42, %v8675_v26 }
 0x50f   : > { %v2826_v41 = vpop.permute.xlu0 %2825  ;;  %v3161_v49 = vmul.f32 %v8659_v1, %v3049_v15 }
 0x510   : > { %v2851_v18 = vmul.f32 %v2826_v41, %v2483_v25  ;;  %v2831_v0 = vpop.permute.xlu1 %2830  ;;  %v2564_v25 = vmax.f32 %v2522_v40, 0.0  ;;  %v2559_v41 = vmax.f32 %v2510_v57, 0.0  ;;  %v2561_v56 = vmax.f32 %v2515_v46, 0.0  ;;  %v10456_v46 = vld [vmem:[#allocation35_spill] sm:$0xff] }
 0x511   : > { %v2852_v33 = vmul.f32 %v2831_v0, %v2486_v51  ;;  %v8669_v19 = vadd.f32 %v3194_v36, %v3161_v49  ;;  %v2560_v51 = vmax.f32 %v2512_v50, 0.0  ;;  %v2566_v40 = vmax.f32 %v2527_v37, 0.0 }
 0x512   : > { %v2866_v9 = vadd.f32 %v2865_v61, %v2851_v18  ;;  %v3199_v34 = vmul.f32 %v8661_v7, %v10456_v46 }
 0x513   : > { %10447 = vst [vmem:[#allocation59_spill] sm:$0xff] %v8669_v19  ;;  %3258 = vadd.xlane.f32.xlu0 %v8669_v19 }
 0x514   : > { %v2867_v52 = vadd.f32 %v2866_v9, %v2852_v33  ;;  %v3050_v60 = vpop.f32.mrf.mxu0  ;;  %v2562_v9 = vmax.f32 %v2517_v28, 0.0 }
 0x515   : > { %v3051_v23 = vadd.f32 %v8656_v43, %v3050_v60 }
 0x516   : > { %v2868_v59 = vadd.f32 %v2867_v52, %v2853_v30 }
 0x517   : > { %v3162_v54 = vmul.f32 %v8659_v1, %v3051_v23 }
 0x518   : > { %v2869_v2 = vrot.slane %v2868_v59, 4 }
 0x519   : > { %v8687_v48 = vadd.f32 %v3195_v22, %v3162_v54  ;;  %v3197_v22 = vmul.f32 %v8661_v7, %v10452_v38  ;;  %v2529_v54 = vpop.f32.mrf.mxu3 }
 0x51a   : > { %v2870_v13 = vadd.f32 %v2869_v2, %v2868_v59  ;;  %v2530_v28 = vadd.f32 %v2529_v54, %v8675_v26 }
 0x51b   : > { %10449 = vst [vmem:[#allocation58_spill] sm:$0xff] %v8687_v48  ;;  %3260 = vadd.xlane.f32.xlu1 %v8687_v48 }
 0x51c   : > { %v2871_v35 = vrot.slane %v2870_v13, 2  ;;  %v3053_v55 = vpop.f32.mrf.mxu0 }
 0x51d   : > { %v3054_v4 = vadd.f32 %v8656_v43, %v3053_v55 }
 0x51e   : > { %v2872_v31 = vadd.f32 %v2871_v35, %v2870_v13  ;;  %v2525_v35 = vadd.f32 %v8671_v24, %v8675_v26 }
 0x51f   : > { %v3163_v21 = vmul.f32 %v8659_v1, %v3054_v4 }
 0x520   : > { %v2873_v32 = vrot.slane %v2872_v31, 1  ;;  %v2565_v47 = vmax.f32 %v2525_v35, 0.0 }
 0x521   : > { %v8712_v15 = vadd.f32 %v3196_v39, %v3163_v21  ;;  %v3198_v39 = vmul.f32 %v8661_v7, %v10454_v14 }
 0x522   : > { %v8705_v10 = vadd.f32 %v2873_v32, %v2872_v31 }
 0x523   : > { %10451 = vst [vmem:[#allocation60_spill] sm:$0xff] %v8712_v15  ;;  %3262 = vadd.xlane.f32.xlu2 %v8712_v15 }
 0x524   : > { %v2891_v18 = vmul.f32 %v8705_v10, %v2555_v29  ;;  %v2892_v61 = vmul.f32 %v8705_v10, %v2556_v3  ;;  %v2899_v42 = vmul.f32 %v8705_v10, %v2563_v53  ;;  %v2900_v0 = vmul.f32 %v8705_v10, %v2564_v25  ;;  %v3055_v52 = vpop.f32.mrf.mxu0  ;;  %v2531_v29 = vpop.f32.mrf.mxu3 }
 0x525   : > { %v2893_v11 = vmul.f32 %v8705_v10, %v2557_v44  ;;  %v2894_v27 = vmul.f32 %v8705_v10, %v2558_v58  ;;  %v2895_v36 = vmul.f32 %v8705_v10, %v2559_v41  ;;  %v2896_v30 = vmul.f32 %v8705_v10, %v2560_v51 }
 0x526   : > { %v2963_v33 = vpack.c.bf16 %v2892_v61, %v2891_v18  ;;  %v2967_v45 = vpack.c.bf16 %v2900_v0, %v2899_v42  ;;  %v2897_v59 = vmul.f32 %v8705_v10, %v2561_v56  ;;  %v2898_v60 = vmul.f32 %v8705_v10, %v2562_v9  ;;  %v10458_v0 = vld [vmem:[#allocation36_spill] sm:$0xff] }
 0x527   : > { %v2964_v49 = vpack.c.bf16 %v2894_v27, %v2893_v11  ;;  %v3056_v2 = vadd.f32 %v8656_v43, %v3055_v52  ;;  %v2965_v23 = vpack.c.bf16 %v2896_v30, %v2895_v36  ;;  %v2901_v57 = vmul.f32 %v8705_v10, %v2565_v47  ;;  %v10460_v47 = vld [vmem:[#allocation37_spill] sm:$0xff] }
 0x528   : > { %3087 = vmatmul.bf16.gmra.mxu0 %v2963_v33  ;;  %3107 = vmatmul.bf16.vlgmr.msrb.gmra.mxu2 %v2967_v45  ;;  %v2966_v13 = vpack.c.bf16 %v2898_v60, %v2897_v59  ;;  %v2902_v50 = vmul.f32 %v8705_v10, %v2566_v40  ;;  %v2532_v53 = vadd.f32 %v2531_v29, %v8675_v26  ;;  %v2567_v41 = vmax.f32 %v2530_v28, 0.0 }
 0x529   : > { %v3164_v62 = vmul.f32 %v8659_v1, %v3056_v2  ;;  %v3200_v56 = vmul.f32 %v8661_v7, %v10458_v0  ;;  %v3201_v40 = vmul.f32 %v8661_v7, %v10460_v47 }
 0x52a   : > { %v2968_v55 = vpack.c.bf16 %v2902_v50, %v2901_v57  ;;  %v2568_v51 = vmax.f32 %v2532_v53, 0.0  ;;  %v2903_v61 = vmul.f32 %v8705_v10, %v2567_v41  ;;  %v10464_v41 = vld [vmem:[#allocation39_spill] sm:$0xff] }
 0x52b   : > { %v8728_v63 = vadd.f32 %v3197_v22, %v3164_v62 }
 0x52c   : > { %v3058_v31 = vpop.f32.mrf.mxu0  ;;  %v2534_v58 = vpop.f32.mrf.mxu3  ;;  %v2904_v42 = vmul.f32 %v8705_v10, %v2568_v51  ;;  %v3203_v51 = vmul.f32 %v8661_v7, %v10464_v41  ;;  %v10474_v41 = vld [vmem:[#allocation44_spill] sm:$0xff] }
 0x52d   : > { %10453 = vst [vmem:[#allocation61_spill] sm:$0xff] %v8728_v63  ;;  %3264 = vadd.xlane.f32.xlu0 %v8728_v63  ;;  %v3059_v5 = vadd.f32 %v8656_v43, %v3058_v31  ;;  %v2535_v45 = vadd.f32 %v2534_v58, %v8675_v26 }
 0x52e   : > { %v2969_v9 = vpack.c.bf16 %v2904_v42, %v2903_v61 }
 0x52f   : > { %v3165_v24 = vmul.f32 %v8659_v1, %v3059_v5 }
 0x531   : > { %v8737_v32 = vadd.f32 %v3198_v39, %v3165_v24 }
 0x533   : > { %10455 = vst [vmem:[#allocation57_spill] sm:$0xff] %v8737_v32  ;;  %3266 = vadd.xlane.f32.xlu1 %v8737_v32 }
 0x534   : > { %v3060_v3 = vpop.f32.mrf.mxu0  ;;  %v2536_v33 = vpop.f32.mrf.mxu3 }
 0x535   : > { %v3061_v44 = vadd.f32 %v8656_v43, %v3060_v3  ;;  %v2537_v36 = vadd.f32 %v2536_v33, %v8675_v26  ;;  %v10466_v33 = vld [vmem:[#allocation40_spill] sm:$0xff] }
 0x537   : > { %v3166_v4 = vmul.f32 %v8659_v1, %v3061_v44  ;;  %v2570_v30 = vmax.f32 %v2537_v36, 0.0 }
 0x538   : > { %3092 = vmatmul.bf16.gmra.mxu0 %v2964_v49  ;;  %3112 = vmatmul.bf16.gmra.mxu2 %v2968_v55  ;;  %v2569_v49 = vmax.f32 %v2535_v45, 0.0  ;;  %v10462_v55 = vld [vmem:[#allocation38_spill] sm:$0xff]  ;;  %v3204_v45 = vmul.f32 %v8661_v7, %v10466_v33 }
 0x539   : > { %v8746_v25 = vadd.f32 %v3199_v34, %v3166_v4  ;;  %v2906_v59 = vmul.f32 %v8705_v10, %v2570_v30  ;;  %v3202_v3 = vmul.f32 %v8661_v7, %v10462_v55 }
 0x53a   : > { %v2905_v52 = vmul.f32 %v8705_v10, %v2569_v49 }
 0x53b   : > { %10457 = vst [vmem:[#allocation30_spill] sm:$0xff] %v8746_v25  ;;  %3268 = vadd.xlane.f32.xlu2 %v8746_v25 }
 0x53c   : > { %v3063_v21 = vpop.f32.mrf.mxu0  ;;  %v2970_v60 = vpack.c.bf16 %v2906_v59, %v2905_v52 }
 0x53d   : > { %v3064_v18 = vadd.f32 %v8656_v43, %v3063_v21 }
 0x53f   : > { %v3167_v11 = vmul.f32 %v8659_v1, %v3064_v18 }
 0x541   : > { %v8755_v27 = vadd.f32 %v3200_v56, %v3167_v11 }
 0x543   : > { %10459 = vst [vmem:[#allocation31_spill] sm:$0xff] %v8755_v27  ;;  %3270 = vadd.xlane.f32.xlu2 %v8755_v27 }
 0x544   : > { %v3065_v2 = vpop.f32.mrf.mxu0 }
 0x545   : > { %v3066_v62 = vadd.f32 %v8656_v43, %v3065_v2 }
 0x547   : > { %v3168_v10 = vmul.f32 %v8659_v1, %v3066_v62 }
 0x548   : > { %3097 = vmatmul.bf16.gmra.mxu0 %v2965_v23  ;;  %3117 = vmatmul.bf16.gmra.mxu2 %v2969_v9 }
 0x549   : > { %v8777_v57 = vadd.f32 %v3201_v40, %v3168_v10 }
 0x54b   : > { %10461 = vst [vmem:[#allocation32_spill] sm:$0xff] %v8777_v57 }
 0x54c   : > { %v3068_v38 = vpop.f32.mrf.mxu0 }
 0x54d   : > { %v3069_v5 = vadd.f32 %v8656_v43, %v3068_v38 }
 0x54f   : > { %v3169_v39 = vmul.f32 %v8659_v1, %v3069_v5  ;;  %v10470_v5 = vld [vmem:[#allocation42_spill] sm:$0xff] }
 0x551   : > { %v8790_v34 = vadd.f32 %v3202_v3, %v3169_v39 }
 0x553   : > { %10463 = vst [vmem:[#allocation33_spill] sm:$0xff] %v8790_v34 }
 0x554   : > { %v3070_v35 = vpop.f32.mrf.mxu0 }
 0x555   : > { %v3071_v46 = vadd.f32 %v8656_v43, %v3070_v35 }
 0x557   : > { %v3170_v53 = vmul.f32 %v8659_v1, %v3071_v46  ;;  %v10472_v46 = vld [vmem:[#allocation43_spill] sm:$0xff] }
 0x558   : > { %3102 = vmatmul.bf16.gmra.mxu0 %v2966_v13  ;;  %3122 = vmatmul.bf16.gmra.mxu2 %v2970_v60 }
 0x559   : > { %v8805_v0 = vadd.f32 %v3203_v51, %v3170_v53  ;;  %v3208_v51 = vmul.f32 %v8661_v7, %v10474_v41  ;;  %v5780_v41 = vld [vmem:[#allocation18 + $0x38] sm:$0xf0] }
 0x55b   : > { %10465 = vst [vmem:[#allocation34_spill] sm:$0xff] %v8805_v0 }
 0x55c   : > { %v3073_v29 = vpop.f32.mrf.mxu0 }
 0x55d   : > { %v3074_v61 = vadd.f32 %v8656_v43, %v3073_v29 }
 0x55f   : > { %v3171_v11 = vmul.f32 %v8659_v1, %v3074_v61  ;;  %v5810_v61 = vld [vmem:[#allocation18 + $0x70] sm:$0xf] }
 0x561   : > { %v8816_v30 = vadd.f32 %v3204_v45, %v3171_v11  ;;  %v5802_v45 = vld [vmem:[#allocation18 + $0x60] sm:$0xf] }
 0x563   : > { %10467 = vst [vmem:[#allocation35_spill] sm:$0xff] %v8816_v30 }
 0x564   : > { %v3075_v18 = vpop.f32.mrf.mxu0 }
 0x565   : > { %v3076_v49 = vadd.f32 %v8656_v43, %v3075_v18 }
 0x567   : > { %v3172_v2 = vmul.f32 %v8659_v1, %v3076_v49  ;;  %v5957_v49 = vld [vmem:[#allocation18 + $0x64] sm:$0xf0] }
 0x56c   : > { %v3078_v59 = vpop.f32.mrf.mxu0 }
 0x574   : > { %v3080_v10 = vpop.f32.mrf.mxu0 }
 0x575   : > { %v3081_v39 = vadd.f32 %v8656_v43, %v3080_v10 }
 0x577   : > { %v3174_v55 = vmul.f32 %v8659_v1, %v3081_v39 }
 0x57c   : > { %v3083_v3 = vpop.f32.mrf.mxu0 }
 0x586   : > { %v3259_v22 = vpop.xlane.xlu0 %3258 }
 0x587   : > { %v3322_v23 = vmul.f32 %v3259_v22, %v7240_v17  ;;  %v10468_v22 = vld [vmem:[#allocation41_spill] sm:$0xff] }
 0x589   : > { %v8764_v54 = vsub.f32 %v8669_v19, %v3322_v23  ;;  %v3205_v23 = vmul.f32 %v8661_v7, %v10468_v22  ;;  %v5955_v22 = vld [vmem:[#allocation18 + $0x54] sm:$0xf0] }
 0x58b   : > { %v3386_v26 = vmul.f32 %v8764_v54, %v8764_v54 }
 0x58d   : > { %3418 = vadd.xlane.f32.xlu0 %v3386_v26  ;;  %v3079_v26 = vadd.f32 %v8656_v43, %v3078_v59  ;;  %v5803_v59 = vor.u32 %v5957_v49, %v5802_v45 }
 0x58e   : > { %v3261_v37 = vpop.xlane.xlu1 %3260 }
 0x58f   : > { %v3323_v13 = vmul.f32 %v3261_v37, %v7240_v17  ;;  %v8831_v37 = vadd.f32 %v3205_v23, %v3172_v2  ;;  %v3173_v47 = vmul.f32 %v8659_v1, %v3079_v26  ;;  %v5954_v23 = vld [vmem:[#allocation18 + $0x54] sm:$0xf] }
 0x591   : > { %v8774_v31 = vsub.f32 %v8687_v48, %v3323_v13  ;;  %10469 = vst [vmem:[#allocation36_spill] sm:$0xff] %v8831_v37 }
 0x593   : > { %v3387_v50 = vmul.f32 %v8774_v31, %v8774_v31 }
 0x595   : > { %3272 = vadd.xlane.f32.xlu0 %v8777_v57  ;;  %3420 = vadd.xlane.f32.xlu1 %v3387_v50  ;;  %v3206_v50 = vmul.f32 %v8661_v7, %v10470_v5 }
 0x596   : > { %v3263_v14 = vpop.xlane.xlu2 %3262 }
 0x597   : > { %v3324_v24 = vmul.f32 %v3263_v14, %v7240_v17  ;;  %v8844_v29 = vadd.f32 %v3206_v50, %v3173_v47  ;;  %v5953_v47 = vld [vmem:[#allocation18 + $0x44] sm:$0xf0]  ;;  %v5788_v50 = vld [vmem:[#allocation18 + $0x48] sm:$0xf0] }
 0x599   : > { %v8787_v44 = vsub.f32 %v8712_v15, %v3324_v24  ;;  %10471 = vst [vmem:[#allocation37_spill] sm:$0xff] %v8844_v29 }
 0x59b   : > { %v3388_v4 = vmul.f32 %v8787_v44, %v8787_v44 }
 0x59d   : > { %3274 = vadd.xlane.f32.xlu0 %v8790_v34  ;;  %3422 = vadd.xlane.f32.xlu1 %v3388_v4  ;;  %v3207_v4 = vmul.f32 %v8661_v7, %v10472_v46  ;;  %v5951_v46 = vld [vmem:[#allocation18 + $0x34] sm:$0xf0] }
 0x59f   : > { %v8851_v53 = vadd.f32 %v3207_v4, %v3174_v55  ;;  %v5950_v4 = vld [vmem:[#allocation18 + $0x34] sm:$0xf] }
 0x5a0   : > { %v3265_v28 = vpop.xlane.xlu0 %3264 }
 0x5a1   : > { %v3325_v58 = vmul.f32 %v3265_v28, %v7240_v17  ;;  %v3084_v28 = vadd.f32 %v8656_v43, %v3083_v3  ;;  %10473 = vst [vmem:[#allocation38_spill] sm:$0xff] %v8851_v53  ;;  %v5778_v3 = vld [vmem:[#allocation18 + $0x30] sm:$0xf] }
 0x5a3   : > { %v8800_v21 = vsub.f32 %v8728_v63, %v3325_v58  ;;  %v3175_v58 = vmul.f32 %v8659_v1, %v3084_v28 }
 0x5a5   : > { %v3389_v42 = vmul.f32 %v8800_v21, %v8800_v21  ;;  %3276 = vadd.xlane.f32.xlu1 %v8805_v0  ;;  %v8857_v18 = vadd.f32 %v3208_v51, %v3175_v58  ;;  %v5779_v58 = vor.u32 %v5951_v46, %v5778_v3  ;;  %v5783_v51 = vor.u32 %v5950_v4, %v5780_v41  ;;  %v5944_v3 = vld [vmem:[#allocation18 + $0x4] sm:$0xf]  ;;  %v5756_v4 = vld [vmem:[#allocation18 + $0x8] sm:$0xf0] }
 0x5a6   : > { %v3267_v56 = vpop.xlane.xlu1 %3266 }
 0x5a7   : > { %3424 = vadd.xlane.f32.xlu2 %v3389_v42  ;;  %v3326_v9 = vmul.f32 %v3267_v56, %v7240_v17  ;;  %10475 = vst [vmem:[#allocation39_spill] sm:$0xff] %v8857_v18  ;;  %v5959_v42 = vld [vmem:[#allocation18 + $0x74] sm:$0xf0]  ;;  %v5958_v56 = vld [vmem:[#allocation18 + $0x74] sm:$0xf] }
 0x5a8   : > { %v5811_v11 = vor.u32 %v5959_v42, %v5810_v61  ;;  %v3085_v61 = vpop.f32.mrf.mxu0  ;;  %v5770_v42 = vld [vmem:[#allocation18 + $0x20] sm:$0xf] }
 0x5a9   : > { %v8813_v36 = vsub.f32 %v8737_v32, %v3326_v9  ;;  %v5812_v9 = vld [vmem:[#allocation18 + $0x78] sm:$0xf0] }
 0x5aa   : > { %v5815_v33 = vor.u32 %v5958_v56, %v5812_v9  ;;  %4086 = vmatpush.bf16.msra.mxu1 %v5811_v11  ;;  %v5949_v56 = vld [vmem:[#allocation18 + $0x24] sm:$0xf0]  ;;  %v5948_v11 = vld [vmem:[#allocation18 + $0x24] sm:$0xf] }
 0x5ab   : > { %v3390_v52 = vmul.f32 %v8813_v36, %v8813_v36  ;;  %v5771_v9 = vor.u32 %v5949_v56, %v5770_v42  ;;  %v5759_v42 = vor.u32 %v5944_v3, %v5756_v4  ;;  %v10476_v3 = vld [vmem:[#allocation45_spill] sm:$0xff] }
 0x5ac   : > { %4175 = vmatpush.bf16.msra.mxu2 %v5815_v33  ;;  %v5772_v33 = vld [vmem:[#allocation18 + $0x28] sm:$0xf0] }
 0x5ad   : > { %3278 = vadd.xlane.f32.xlu1 %v8816_v30 }
 0x5ae   : > { %v3269_v60 = vpop.xlane.xlu2 %3268  ;;  %4087 = vmatpush.bf16.msra.mxu1 %v5803_v59 }
 0x5af   : > { %3426 = vadd.xlane.f32.xlu2 %v3390_v52  ;;  %v3327_v38 = vmul.f32 %v3269_v60, %v7240_v17  ;;  %v5956_v52 = vld [vmem:[#allocation18 + $0x64] sm:$0xf]  ;;  %v5804_v60 = vld [vmem:[#allocation18 + $0x68] sm:$0xf0] }
 0x5b0   : > { %v5807_v2 = vor.u32 %v5956_v52, %v5804_v60  ;;  %v5775_v52 = vor.u32 %v5948_v11, %v5772_v33 }
 0x5b1   : > { %v8826_v62 = vsub.f32 %v8746_v25, %v3327_v38  ;;  %v5794_v38 = vld [vmem:[#allocation18 + $0x50] sm:$0xf] }
 0x5b2   : > { %4176 = vmatpush.bf16.msra.mxu2 %v5807_v2  ;;  %v5795_v26 = vor.u32 %v5955_v22, %v5794_v38  ;;  %v5762_v2 = vld [vmem:[#allocation18 + $0x10] sm:$0xf]  ;;  %v5947_v38 = vld [vmem:[#allocation18 + $0x14] sm:$0xf0]  ;;  %v5946_v22 = vld [vmem:[#allocation18 + $0x14] sm:$0xf] }
 0x5b3   : > { %v3391_v35 = vmul.f32 %v8826_v62, %v8826_v62 }
 0x5b4   : > { %4088 = vmatpush.bf16.msra.mxu1 %v5795_v26 }
 0x5b5   : > { %3428 = vadd.xlane.f32.xlu0 %v3391_v35  ;;  %v5796_v35 = vld [vmem:[#allocation18 + $0x58] sm:$0xf0] }
 0x5b6   : > { %v3271_v13 = vpop.xlane.xlu2 %3270  ;;  %v5799_v10 = vor.u32 %v5954_v23, %v5796_v35 }
 0x5b7   : > { %3280 = vadd.xlane.f32.xlu2 %v8831_v37  ;;  %v3328_v40 = vmul.f32 %v3271_v13, %v7240_v17  ;;  %v5786_v13 = vld [vmem:[#allocation18 + $0x40] sm:$0xf] }
 0x5b8   : > { %4177 = vmatpush.bf16.msra.mxu2 %v5799_v10  ;;  %v5787_v5 = vor.u32 %v5953_v47, %v5786_v13  ;;  %v5763_v10 = vor.u32 %v5947_v38, %v5762_v2  ;;  %v5764_v13 = vld [vmem:[#allocation18 + $0x18] sm:$0xf0] }
 0x5b9   : > { %v8839_v14 = vsub.f32 %v8755_v27, %v3328_v40  ;;  %v5952_v40 = vld [vmem:[#allocation18 + $0x44] sm:$0xf] }
 0x5ba   : > { %4089 = vmatpush.bf16.msra.mxu1 %v5787_v5  ;;  %v3088_v5 = vpop.f32.mrf.mxu0 }
 0x5bb   : > { %v3392_v24 = vmul.f32 %v8839_v14, %v8839_v14 }
 0x5bd   : > { %3430 = vadd.xlane.f32.xlu0 %v3392_v24  ;;  %v5791_v24 = vor.u32 %v5952_v40, %v5788_v50  ;;  %v5767_v40 = vor.u32 %v5946_v22, %v5764_v13 }
 0x5be   : > { %4090 = vmatpush.bf16.msra.mxu1 %v5779_v58 }
 0x5bf   : > { %3282 = vadd.xlane.f32.xlu2 %v8844_v29  ;;  %4178 = vmatpush.bf16.msra.mxu2 %v5791_v24  ;;  %v5754_v24 = vld [vmem:[#allocation18] sm:$0xf] }
 0x5c2   : > { %4091 = vmatpush.bf16.msra.mxu1 %v5771_v9  ;;  %v3090_v22 = vpop.f32.mrf.mxu0 }
 0x5c3   : > { %4179 = vmatpush.bf16.msra.mxu2 %v5783_v51 }
 0x5c5   : > { %3284 = vadd.xlane.f32.xlu0 %v8851_v53 }
 0x5c6   : > { %4092 = vmatpush.bf16.msra.mxu1 %v5763_v10 }
 0x5c7   : > { %4180 = vmatpush.bf16.msra.mxu2 %v5775_v52 }
 0x5cb   : > { %4181 = vmatpush.bf16.msra.mxu2 %v5767_v40 }
 0x5cd   : > { %3286 = vadd.xlane.f32.xlu0 %v8857_v18 }
 0x5cf   : > { %4182 = vmatpush.bf16.msra.mxu2 %v5759_v42  ;;  %v3089_v42 = vadd.f32 %v8656_v43, %v3088_v5 }
 0x600   : > { %v3419_v39 = vpop.xlane.xlu0 %3418 }
 0x601   : > { %v3482_v55 = vmul.f32 %v3419_v39, %v7240_v17 }
 0x603   : > { %v8861_v28 = vadd.f32 1e-05, %v3482_v55  ;;  %v5945_v55 = vld [vmem:[#allocation18 + $0x4] sm:$0xf0] }
 0x604   : > { %v5755_v46 = vor.u32 %v5945_v55, %v5754_v24 }
 0x605   : > { %6282 = vrsqrt.f32 %v8861_v28  ;;  %vm3552_vm11 = vweird.f32 %v8861_v28 }
 0x606   : > { %4093 = vmatpush.bf16.msra.mxu1 %v5755_v46  ;;  %v8892_v46 = vld [vmem:[%s10301_s8] ss:$0 sm:$0xff] }
 0x608   : > { %v3273_v45 = vpop.xlane.xlu0 %3272  ;;  %v3421_v49 = vpop.xlane.xlu1 %3420 }
 0x609   : > { %v3329_v59 = vmul.f32 %v3273_v45, %v7240_v17  ;;  %v3483_v60 = vmul.f32 %v3421_v49, %v7240_v17 }
 0x60b   : > { %v6283_v23 = vpop.eup %6282  ;;  %v8867_v26 = vsub.f32 %v8777_v57, %v3329_v59  ;;  %v3515_v35 = vadd.f32 1e-05, %v3483_v60  ;;  %v3086_v60 = vadd.f32 %v8656_v43, %v3085_v61 }
 0x60c   : > { %v3547_v47 = vmul.f32 %v6283_v23, %v8861_v28  ;;  %vm3553_vm10 = vweird.f32 %v6283_v23  ;;  %v3209_v28 = vmul.f32 %v8661_v7, %v10476_v3 }
 0x60d   : > { %6284 = vrsqrt.f32 %v3515_v35  ;;  %v3393_v50 = vmul.f32 %v8867_v26, %v8867_v26  ;;  %vm3554_vm12 = vmor %vm3552_vm11, %vm3553_vm10  ;;  %vm3562_vm14 = vweird.f32 %v3515_v35 }
 0x60e   : > { %v3548_v39 = vmul.f32 %v6283_v23, %v3547_v47 }
 0x60f   : > { %3432 = vadd.xlane.f32.xlu1 %v3393_v50  ;;  %v3176_v50 = vmul.f32 %v8659_v1, %v3086_v60 }
 0x610   : > { %v3549_v58 = vmul.f32 0.5, %v3548_v39  ;;  %v3275_v41 = vpop.xlane.xlu0 %3274  ;;  %v3423_v51 = vpop.xlane.xlu1 %3422 }
 0x611   : > { %v3330_v56 = vmul.f32 %v3275_v41, %v7240_v17  ;;  %v3484_v11 = vmul.f32 %v3423_v51, %v7240_v17 }
 0x612   : > { %v3550_v9 = vsub.f32 1.5, %v3549_v58 }
 0x613   : > { %v6285_v33 = vpop.eup %6284  ;;  %v8875_v45 = vsub.f32 %v8790_v34, %v3330_v56  ;;  %v8877_v49 = vadd.f32 1e-05, %v3484_v11  ;;  %v8903_v56 = vadd.f32 %v3209_v28, %v3176_v50  ;;  %v3093_v50 = vpop.f32.mrf.mxu0 }
 0x614   : > { %v3551_v52 = vmul.f32 %v6283_v23, %v3550_v9  ;;  %v3557_v59 = vmul.f32 %v6285_v33, %v3515_v35  ;;  %vm3563_vm13 = vweird.f32 %v6285_v33 }
 0x615   : > { %6286 = vrsqrt.f32 %v8877_v49  ;;  %v3394_v2 = vmul.f32 %v8875_v45, %v8875_v45  ;;  %vm3564_vm15 = vmor %vm3562_vm14, %vm3563_vm13  ;;  %10477 = vst [vmem:[#allocation40_spill] sm:$0xff] %v8903_v56  ;;  %vm3572_vm1 = vweird.f32 %v8877_v49 }
 0x616   : > { %v3558_v38 = vmul.f32 %v6285_v33, %v3557_v59  ;;  %v3555_v10 = vsel %vm3554_vm12, %v6283_v23, %v3551_v52  ;;  %v8910_v52 = vld [vmem:[%s10478_s26] ss:$0 sm:$0xff] }
 0x617   : > { %3434 = vadd.xlane.f32.xlu1 %v3394_v2  ;;  %v3866_v23 = vmul.f32 %v3555_v10, %v8764_v54 }
 0x618   : > { %v3559_v13 = vmul.f32 0.5, %v3558_v38  ;;  %v3277_v40 = vpop.xlane.xlu1 %3276  ;;  %v3177_v38 = vmul.f32 %v8659_v1, %v3089_v42 }
 0x619   : > { %v3331_v61 = vmul.f32 %v3277_v40, %v7240_v17  ;;  %v3901_v35 = vmul.f32 %v8892_v46, %v3866_v23 }
 0x61a   : > { %v3425_v47 = vpop.xlane.xlu2 %3424  ;;  %v3560_v24 = vsub.f32 1.5, %v3559_v13 }
 0x61b   : > { %v3485_v39 = vmul.f32 %v3425_v47, %v7240_v17  ;;  %v6287_v55 = vpop.eup %6286  ;;  %v8898_v58 = vsub.f32 %v8805_v0, %v3331_v61  ;;  %v10479_v47 = vld [vmem:[#allocation46_spill] sm:$0xff]  ;;  %v3936_v61 = vadd.f32 %v8910_v52, %v3901_v35  ;;  %v10494_v0 = vld [vmem:[#allocation53_spill] sm:$0xff] }
 0x61c   : > { %v3561_v41 = vmul.f32 %v6285_v33, %v3560_v24  ;;  %v3567_v51 = vmul.f32 %v6287_v55, %v8877_v49  ;;  %v3210_v40 = vmul.f32 %v8661_v7, %v10479_v47  ;;  %vm3573_vm0 = vweird.f32 %v6287_v55 }
 0x61d   : > { %v8895_v4 = vadd.f32 1e-05, %v3485_v39  ;;  %v3395_v11 = vmul.f32 %v8898_v58, %v8898_v58  ;;  %vm3574_vm2 = vmor %vm3572_vm1, %vm3573_vm0 }
 0x61e   : > { %v3565_v54 = vsel %vm3564_vm15, %v6285_v33, %v3561_v41  ;;  %v3568_v9 = vmul.f32 %v6287_v55, %v3567_v51  ;;  %v8930_v51 = vadd.f32 %v3210_v40, %v3177_v38 }
 0x61f   : > { %6288 = vrsqrt.f32 %v8895_v4  ;;  %v3867_v59 = vmul.f32 %v3565_v54, %v8774_v31  ;;  %3288 = vadd.xlane.f32.xlu1 %v8903_v56  ;;  %3436 = vadd.xlane.f32.xlu2 %v3395_v11  ;;  %v3091_v54 = vadd.f32 %v8656_v43, %v3090_v22  ;;  %vm3582_vm5 = vweird.f32 %v8895_v4 }
 0x620   : > { %v3569_v5 = vmul.f32 0.5, %v3568_v9  ;;  %v3279_v2 = vpop.xlane.xlu1 %3278  ;;  %10480 = vst [vmem:[#allocation41_spill] sm:$0xff] %v8930_v51 }
 0x621   : > { %v3902_v33 = vmul.f32 %v8892_v46, %v3867_v59  ;;  %v3332_v13 = vmul.f32 %v3279_v2, %v7240_v17 }
 0x622   : > { %v3427_v60 = vpop.xlane.xlu2 %3426  ;;  %v3570_v39 = vsub.f32 1.5, %v3569_v5 }
 0x623   : > { %v3486_v10 = vmul.f32 %v3427_v60, %v7240_v17  ;;  %v3937_v24 = vadd.f32 %v8910_v52, %v3902_v33  ;;  %v8926_v28 = vsub.f32 %v8816_v30, %v3332_v13  ;;  %v3178_v33 = vmul.f32 %v8659_v1, %v3091_v54 }
 0x624   : > { %v3571_v23 = vmul.f32 %v6287_v55, %v3570_v39  ;;  %v3095_v39 = vpop.f32.mrf.mxu0 }
 0x625   : > { %v6289_v31 = vpop.eup %6288  ;;  %v8923_v3 = vadd.f32 1e-05, %v3486_v10  ;;  %v3968_v42 = vpack.c.bf16 %v3937_v24, %v3936_v61  ;;  %v3396_v11 = vmul.f32 %v8926_v28, %v8926_v28 }
 0x626   : > { %v3577_v41 = vmul.f32 %v6289_v31, %v8895_v4  ;;  %v3575_v35 = vsel %vm3574_vm2, %v6287_v55, %v3571_v23  ;;  %vm3583_vm4 = vweird.f32 %v6289_v31  ;;  %v10481_v55 = vld [vmem:[#allocation47_spill] sm:$0xff] }
 0x627   : > { %6290 = vrsqrt.f32 %v8923_v3  ;;  %3290 = vadd.xlane.f32.xlu1 %v8930_v51  ;;  %4094 = vmatmul.bf16.vlgmr.msra.gmra.mxu1 %v3968_v42  ;;  %v3868_v10 = vmul.f32 %v3575_v35, %v8787_v44  ;;  %v3211_v40 = vmul.f32 %v8661_v7, %v10481_v55  ;;  %vm3584_vm6 = vmor %vm3582_vm5, %vm3583_vm4  ;;  %v3094_v44 = vadd.f32 %v8656_v43, %v3093_v50 }
 0x628   : > { %v3578_v9 = vmul.f32 %v6289_v31, %v3577_v41  ;;  %4183 = vmatmul.bf16.vlgmr.msra.gmra.mxu2 %v3968_v42  ;;  %3438 = vadd.xlane.f32.xlu2 %v3396_v11  ;;  %v3429_v5 = vpop.xlane.xlu0 %3428  ;;  %vm3592_vm7 = vweird.f32 %v8923_v3 }
 0x629   : > { %v3487_v2 = vmul.f32 %v3429_v5, %v7240_v17  ;;  %v8951_v11 = vadd.f32 %v3211_v40, %v3178_v33  ;;  %v3179_v50 = vmul.f32 %v8659_v1, %v3094_v44 }
 0x62a   : > { %v3579_v59 = vmul.f32 0.5, %v3578_v9  ;;  %v3281_v60 = vpop.xlane.xlu2 %3280  ;;  %v3903_v9 = vmul.f32 %v8892_v46, %v3868_v10 }
 0x62b   : > { %v3333_v38 = vmul.f32 %v3281_v60, %v7240_v17  ;;  %v3519_v13 = vadd.f32 1e-05, %v3487_v2  ;;  %10482 = vst [vmem:[#allocation42_spill] sm:$0xff] %v8951_v11 }
 0x62c   : > { %v3580_v22 = vsub.f32 1.5, %v3579_v59  ;;  %v3098_v44 = vpop.f32.mrf.mxu0 }
 0x62d   : > { %v6291_v49 = vpop.eup %6290  ;;  %v8942_v47 = vsub.f32 %v8831_v37, %v3333_v38  ;;  %6292 = vrsqrt.f32 %v3519_v13  ;;  %vm3602_vm10 = vweird.f32 %v3519_v13  ;;  %v5965_v37 = vld [vmem:[#allocation19 + $0x28] sm:$0xff] }
 0x62e   : > { %v3581_v61 = vmul.f32 %v6289_v31, %v3580_v22  ;;  %v3587_v24 = vmul.f32 %v6291_v49, %v8923_v3  ;;  %v10483_v22 = vld [vmem:[#allocation48_spill] sm:$0xff]  ;;  %vm3593_vm3 = vweird.f32 %v6291_v49 }
 0x62f   : > { %v3397_v23 = vmul.f32 %v8942_v47, %v8942_v47  ;;  %v3212_v10 = vmul.f32 %v8661_v7, %v10483_v22  ;;  %vm3594_vm8 = vmor %vm3592_vm7, %vm3593_vm3 }
 0x630   : > { %v3585_v41 = vsel %vm3584_vm6, %v6289_v31, %v3581_v61  ;;  %v3588_v42 = vmul.f32 %v6291_v49, %v3587_v24  ;;  %3292 = vadd.xlane.f32.xlu2 %v8951_v11  ;;  %v8956_v4 = vpop.xlane.xlu0 %3430  ;;  %v3096_v61 = vadd.f32 %v8656_v43, %v3095_v39 }
 0x631   : > { %v3869_v54 = vmul.f32 %v3585_v41, %v8800_v21  ;;  %3440 = vadd.xlane.f32.xlu0 %v3397_v23  ;;  %v3938_v21 = vadd.f32 %v8910_v52, %v3903_v9 }
 0x632   : > { %v3589_v35 = vmul.f32 0.5, %v3588_v42  ;;  %v3283_v59 = vpop.xlane.xlu2 %3282  ;;  %v8972_v42 = vadd.f32 %v3212_v10, %v3179_v50  ;;  %v3180_v39 = vmul.f32 %v8659_v1, %v3096_v61 }
 0x633   : > { %v3334_v5 = vmul.f32 %v3283_v59, %v7240_v17  ;;  %v3904_v60 = vmul.f32 %v8892_v46, %v3869_v54  ;;  %v6293_v2 = vpop.eup %6292 }
 0x634   : > { %v3590_v31 = vsub.f32 1.5, %v3589_v35  ;;  %v3597_v40 = vmul.f32 %v6293_v2, %v3519_v13  ;;  %10484 = vst [vmem:[#allocation43_spill] sm:$0xff] %v8972_v42  ;;  %vm3603_vm9 = vweird.f32 %v6293_v2 }
 0x635   : > { %v8962_v38 = vsub.f32 %v8844_v29, %v3334_v5  ;;  %v3939_v33 = vadd.f32 %v8910_v52, %v3904_v60  ;;  %v10485_v60 = vld [vmem:[#allocation49_spill] sm:$0xff]  ;;  %vm3604_vm11 = vmor %vm3602_vm10, %vm3603_vm9 }
 0x636   : > { %v3591_v55 = vmul.f32 %v6291_v49, %v3590_v31  ;;  %v3598_v41 = vmul.f32 %v6293_v2, %v3597_v40  ;;  %v3213_v3 = vmul.f32 %v8661_v7, %v10485_v60  ;;  %v3100_v40 = vpop.f32.mrf.mxu0 }
 0x637   : > { %v3398_v24 = vmul.f32 %v8962_v38, %v8962_v38  ;;  %v3969_v23 = vpack.c.bf16 %v3939_v33, %v3938_v21  ;;  %v3099_v21 = vadd.f32 %v8656_v43, %v3098_v44  ;;  %v10487_v44 = vld [vmem:[#allocation50_spill] sm:$0xff] }
 0x638   : > { %v3595_v54 = vsel %vm3594_vm8, %v6291_v49, %v3591_v55  ;;  %v3599_v9 = vmul.f32 0.5, %v3598_v41  ;;  %3294 = vadd.xlane.f32.xlu2 %v8972_v42  ;;  %v3285_v35 = vpop.xlane.xlu0 %3284  ;;  %v8986_v22 = vadd.f32 %v3213_v3, %v3180_v39  ;;  %v3214_v41 = vmul.f32 %v8661_v7, %v10487_v44  ;;  %v10489_v3 = vld [vmem:[#allocation51_spill] sm:$0xff] }
 0x639   : > { %3442 = vadd.xlane.f32.xlu0 %v3398_v24  ;;  %4099 = vmatmul.bf16.gmra.mxu1 %v3969_v23  ;;  %v3335_v59 = vmul.f32 %v3285_v35, %v7240_v17  ;;  %v3870_v50 = vmul.f32 %v3595_v54, %v8813_v36  ;;  %v3181_v13 = vmul.f32 %v8659_v1, %v3099_v21 }
 0x63a   : > { %4188 = vmatmul.bf16.gmra.mxu2 %v3969_v23  ;;  %v3600_v5 = vsub.f32 1.5, %v3599_v9  ;;  %10486 = vst [vmem:[#allocation44_spill] sm:$0xff] %v8986_v22  ;;  %v3101_v9 = vadd.f32 %v8656_v43, %v3100_v40  ;;  %v9020_v40 = vpop.f32.mrf.mxu2 }
 0x63b   : > { %v8981_v31 = vsub.f32 %v8851_v53, %v3335_v59  ;;  %v3905_v36 = vmul.f32 %v8892_v46, %v3870_v50  ;;  %v9004_v39 = vadd.f32 %v3214_v41, %v3181_v13  ;;  %v3215_v50 = vmul.f32 %v8661_v7, %v10489_v3 }
 0x63c   : > { %v3601_v49 = vmul.f32 %v6293_v2, %v3600_v5  ;;  %v3182_v5 = vmul.f32 %v8659_v1, %v3101_v9 }
 0x63d   : > { %v3399_v33 = vmul.f32 %v8981_v31, %v8981_v31  ;;  %10488 = vst [vmem:[#allocation45_spill] sm:$0xff] %v9004_v39 }
 0x63e   : > { %v3605_v10 = vsel %vm3604_vm11, %v6293_v2, %v3601_v49  ;;  %v3103_v60 = vpop.f32.mrf.mxu0  ;;  %v9011_v21 = vadd.f32 %v3215_v50, %v3182_v5 }
 0x63f   : > { %v3871_v55 = vmul.f32 %v3605_v10, %v8826_v62  ;;  %3444 = vadd.xlane.f32.xlu1 %v3399_v33  ;;  %v3940_v62 = vadd.f32 %v8910_v52, %v3905_v36  ;;  %v3104_v49 = vadd.f32 %v8656_v43, %v3103_v60  ;;  %v10490_v10 = vld [vmem:[#allocation52_spill] sm:$0xff]  ;;  %v3488_v43 = vmul.f32 %v8956_v4, %v7240_v17 }
 0x640   : > { %v3287_v61 = vpop.xlane.xlu0 %3286 }
 0x641   : > { %3296 = vadd.xlane.f32.xlu0 %v8986_v22  ;;  %v3336_v24 = vmul.f32 %v3287_v61, %v7240_v17  ;;  %v3906_v23 = vmul.f32 %v8892_v46, %v3871_v55  ;;  %v3183_v33 = vmul.f32 %v8659_v1, %v3104_v49  ;;  %v3216_v55 = vmul.f32 %v8661_v7, %v10490_v10 }
 0x642   : > { %v9022_v61 = vpop.f32.mrf.mxu2 }
 0x643   : > { %v8997_v2 = vsub.f32 %v8857_v18, %v3336_v24  ;;  %v3941_v54 = vadd.f32 %v8910_v52, %v3906_v23  ;;  %v9017_v36 = vadd.f32 %v3216_v55, %v3183_v33  ;;  %v3520_v24 = vadd.f32 1e-05, %v3488_v43 }
 0x645   : > { %v3400_v35 = vmul.f32 %v8997_v2, %v8997_v2  ;;  %v3970_v59 = vpack.c.bf16 %v3941_v54, %v3940_v62  ;;  %6294 = vrsqrt.f32 %v3520_v24  ;;  %vm3612_vm13 = vweird.f32 %v3520_v24 }
 0x647   : > { %3446 = vadd.xlane.f32.xlu1 %v3400_v35 }
 0x649   : > { %3298 = vadd.xlane.f32.xlu0 %v9004_v39  ;;  %4104 = vmatmul.bf16.gmra.mxu1 %v3970_v59 }
 0x64a   : > { %4193 = vmatmul.bf16.gmra.mxu2 %v3970_v59  ;;  %v9026_v13 = vpop.f32.mrf.mxu2 }
 0x64b   : > { %v6295_v23 = vpop.eup %6294 }
 0x64c   : > { %v3607_v41 = vmul.f32 %v6295_v23, %v3520_v24  ;;  %vm3613_vm12 = vweird.f32 %v6295_v23 }
 0x64d   : > { %vm3614_vm14 = vmor %vm3612_vm13, %vm3613_vm12 }
 0x64e   : > { %v3608_v62 = vmul.f32 %v6295_v23, %v3607_v41 }
 0x64f   : > { %3300 = vadd.xlane.f32.xlu1 %v9011_v21 }
 0x650   : > { %v3609_v5 = vmul.f32 0.5, %v3608_v62 }
 0x652   : > { %v9028_v44 = vpop.f32.mrf.mxu2  ;;  %v3610_v60 = vsub.f32 1.5, %v3609_v5 }
 0x654   : > { %v3611_v33 = vmul.f32 %v6295_v23, %v3610_v60  ;;  %v5967_v60 = vld [vmem:[#allocation19 + $0x38] sm:$0xff] }
 0x655   : > { %5004 = vmatpush.bf16.msra.mxu3 %v5967_v60 }
 0x656   : > { %v3615_v41 = vsel %vm3614_vm14, %v6295_v23, %v3611_v33 }
 0x657   : > { %3302 = vadd.xlane.f32.xlu1 %v9017_v36  ;;  %v3872_v53 = vmul.f32 %v3615_v41, %v8839_v14  ;;  %v5966_v41 = vld [vmem:[#allocation19 + $0x30] sm:$0xff] }
 0x659   : > { %5005 = vmatpush.bf16.msra.mxu3 %v5966_v41 }
 0x65a   : > { %v9031_v35 = vpop.f32.mrf.mxu2 }
 0x65d   : > { %5006 = vmatpush.bf16.msra.mxu3 %v5965_v37 }
 0x662   : > { %v9036_v55 = vpop.f32.mrf.mxu2 }
 0x682   : > { %v3433_v54 = vpop.xlane.xlu1 %3432 }
 0x683   : > { %v3489_v9 = vmul.f32 %v3433_v54, %v7240_v17 }
 0x685   : > { %v3521_v59 = vadd.f32 1e-05, %v3489_v9 }
 0x687   : > { %6296 = vrsqrt.f32 %v3521_v59  ;;  %vm3622_vm0 = vweird.f32 %v3521_v59 }
 0x68a   : > { %v3435_v3 = vpop.xlane.xlu1 %3434 }
 0x68b   : > { %v3490_v4 = vmul.f32 %v3435_v3, %v7240_v17 }
 0x68d   : > { %v6297_v50 = vpop.eup %6296  ;;  %v9034_v49 = vadd.f32 1e-05, %v3490_v4 }
 0x68e   : > { %v3617_v10 = vmul.f32 %v6297_v50, %v3521_v59  ;;  %vm3623_vm15 = vweird.f32 %v6297_v50  ;;  %v3907_v59 = vmul.f32 %v8892_v46, %v3872_v53 }
 0x68f   : > { %6298 = vrsqrt.f32 %v9034_v49  ;;  %vm3624_vm1 = vmor %vm3622_vm0, %vm3623_vm15  ;;  %vm3632_vm4 = vweird.f32 %v9034_v49 }
 0x690   : > { %v3618_v43 = vmul.f32 %v6297_v50, %v3617_v10  ;;  %v3942_v53 = vadd.f32 %v8910_v52, %v3907_v59  ;;  %v5974_v59 = vld [vmem:[#allocation19 + $0x70] sm:$0xff] }
 0x692   : > { %v3619_v62 = vmul.f32 0.5, %v3618_v43  ;;  %v3437_v54 = vpop.xlane.xlu2 %3436  ;;  %v3289_v9 = vpop.xlane.xlu1 %3288 }
 0x693   : > { %v3491_v5 = vmul.f32 %v3437_v54, %v7240_v17  ;;  %v3337_v3 = vmul.f32 %v3289_v9, %v7240_v17 }
 0x694   : > { %v3620_v4 = vsub.f32 1.5, %v3619_v62  ;;  %v9055_v62 = vpop.f32.mrf.mxu2 }
 0x695   : > { %v9041_v18 = vpop.eup %6298  ;;  %v9044_v29 = vadd.f32 1e-05, %v3491_v5  ;;  %v9047_v24 = vsub.f32 %v8903_v56, %v3337_v3  ;;  %v5975_v3 = vld [vmem:[#allocation19 + $0x78] sm:$0xff] }
 0x696   : > { %v3621_v23 = vmul.f32 %v6297_v50, %v3620_v4  ;;  %v3627_v33 = vmul.f32 %v9041_v18, %v9034_v49  ;;  %v3105_v4 = vpop.f32.mrf.mxu0  ;;  %5093 = vmatpush.bf16.msrb.mxu0 %v5975_v3  ;;  %vm3633_vm2 = vweird.f32 %v9041_v18 }
 0x697   : > { %6300 = vrsqrt.f32 %v9044_v29  ;;  %v3401_v10 = vmul.f32 %v9047_v24, %v9047_v24  ;;  %vm9093_vm5 = vmor %vm3632_vm4, %vm3633_vm2  ;;  %vm3642_vm3 = vweird.f32 %v9044_v29 }
 0x698   : > { %v3625_v43 = vsel %vm3624_vm1, %v6297_v50, %v3621_v23  ;;  %v3628_v14 = vmul.f32 %v9041_v18, %v3627_v33 }
 0x699   : > { %v3873_v54 = vmul.f32 %v3625_v43, %v8867_v26  ;;  %3448 = vadd.xlane.f32.xlu2 %v3401_v10  ;;  %v9072_v43 = vld [vmem:[%s10300_s7] ss:$0 sm:$0xff] }
 0x69a   : > { %v3629_v9 = vmul.f32 0.5, %v3628_v14  ;;  %v3291_v5 = vpop.xlane.xlu1 %3290  ;;  %v3106_v14 = vadd.f32 %v9072_v43, %v3105_v4  ;;  %5094 = vmatpush.bf16.msrb.mxu0 %v5974_v59 }
 0x69b   : > { %v3439_v60 = vpop.xlane.xlu2 %3438  ;;  %v3338_v56 = vmul.f32 %v3291_v5, %v7240_v17  ;;  %v3908_v50 = vmul.f32 %v8892_v46, %v3873_v54 }
 0x69c   : > { %v3630_v23 = vsub.f32 1.5, %v3629_v9  ;;  %v3492_v33 = vmul.f32 %v3439_v60, %v7240_v17  ;;  %v5964_v60 = vld [vmem:[#allocation19 + $0x20] sm:$0xff]  ;;  %v9098_v59 = vpop.f32.mrf.mxu2 }
 0x69d   : > { %v9062_v30 = vpop.eup %6300  ;;  %v9065_v26 = vsub.f32 %v8930_v51, %v3338_v56  ;;  %v3943_v10 = vadd.f32 %v8910_v52, %v3908_v50  ;;  %v4000_v56 = vld [vmem:[%s10491_s2] sm:$0x3]  ;;  %v3109_v50 = vadd.f32 %v9072_v43, %v9020_v40  ;;  %5007 = vmatpush.bf16.msra.mxu3 %v5964_v60 }
 0x69e   : > { %v3637_v41 = vmul.f32 %v9062_v30, %v9044_v29  ;;  %v9077_v54 = vadd.f32 1e-05, %v3492_v33  ;;  %v3631_v9 = vmul.f32 %v9041_v18, %v3630_v23  ;;  %v9091_v37 = vperm.slane %v4000_v56, 0  ;;  %v5963_v60 = vld [vmem:[#allocation19 + $0x18] sm:$0xff] }
 0x69f   : > { %v3971_v5 = vpack.c.bf16 %v3943_v10, %v3942_v53  ;;  %v3402_v3 = vmul.f32 %v9065_v26, %v9065_v26  ;;  %v5973_v10 = vld [vmem:[#allocation19 + $0x68] sm:$0xff]  ;;  %vm3643_vm6 = vweird.f32 %v9062_v30  ;;  %v3185_v34 = vmul.f32 %v8659_v1, %v3109_v50 }
 0x6a0   : > { %v3638_v4 = vmul.f32 %v9062_v30, %v3637_v41  ;;  %6302 = vrsqrt.f32 %v9077_v54  ;;  %v3184_v41 = vmul.f32 %v8659_v1, %v3106_v14  ;;  %v3635_v40 = vsel %vm9093_vm5, %v9041_v18, %v3631_v9  ;;  %5095 = vmatpush.bf16.msrb.mxu0 %v5973_v10  ;;  %vm3644_vm7 = vmor %vm3642_vm3, %vm3643_vm6 }
 0x6a1   : > { %4109 = vmatmul.bf16.gmra.mxu1 %v3971_v5  ;;  %4198 = vmatmul.bf16.gmra.mxu2 %v3971_v5  ;;  %v3217_v14 = vmul.f32 %v8661_v7, %v10494_v0  ;;  %v3874_v23 = vmul.f32 %v3635_v40, %v8875_v45  ;;  %v5972_v0 = vld [vmem:[#allocation19 + $0x60] sm:$0xff]  ;;  %v3111_v50 = vadd.f32 %v9072_v43, %v9022_v61  ;;  %v5962_v61 = vld [vmem:[#allocation19 + $0x10] sm:$0xff]  ;;  %vm3652_vm9 = vweird.f32 %v9077_v54 }
 0x6a2   : > { %v3639_v33 = vmul.f32 0.5, %v3638_v4  ;;  %3450 = vadd.xlane.f32.xlu2 %v3402_v3  ;;  %5008 = vmatpush.bf16.msra.mxu3 %v5963_v60 }
 0x6a3   : > { %v3293_v5 = vpop.xlane.xlu2 %3292  ;;  %v9129_v45 = vadd.f32 %v3217_v14, %v3184_v41  ;;  %v10498_v14 = vld [vmem:[#allocation56_spill] sm:$0xff] }
 0x6a4   : > { %v3441_v53 = vpop.xlane.xlu0 %3440  ;;  %v3640_v51 = vsub.f32 1.5, %v3639_v33  ;;  %v3339_v4 = vmul.f32 %v3293_v5, %v7240_v17  ;;  %v4095_v3 = vpop.f32.mrf.mxu1  ;;  %5096 = vmatpush.bf16.msrb.mxu0 %v5972_v0  ;;  %v10496_v5 = vld [vmem:[#allocation54_spill] sm:$0xff]  ;;  %v3909_v0 = vmul.f32 %v8892_v46, %v3874_v23 }
 0x6a5   : > { %v3493_v49 = vmul.f32 %v3441_v53, %v7240_v17  ;;  %v9112_v18 = vadd.f32 %v4095_v3, %v9091_v37  ;;  %v10497_v3 = vld [vmem:[#allocation55_spill] sm:$0xff] }
 0x6a6   : > { %v9114_v9 = vpop.eup %6302  ;;  %v3641_v33 = vmul.f32 %v9062_v30, %v3640_v51  ;;  %v9120_v53 = vsub.f32 %v8951_v11, %v3339_v4  ;;  %v3218_v4 = vmul.f32 %v8661_v7, %v10496_v5  ;;  %v3219_v60 = vmul.f32 %v8661_v7, %v10497_v3  ;;  %v5971_v5 = vld [vmem:[#allocation19 + $0x58] sm:$0xff]  ;;  %5009 = vmatpush.bf16.msra.mxu3 %v5962_v61 }
 0x6a7   : > { %v9109_v57 = vadd.f32 1e-05, %v3493_v49  ;;  %v3647_v10 = vmul.f32 %v9114_v9, %v9077_v54  ;;  %v4264_v51 = vmul.f32 %v9112_v18, %v9112_v18  ;;  %v9136_v49 = vperm.slane %v4000_v56, 1 }
 0x6a8   : > { %10495 = vst [vmem:[#allocation46_spill] sm:$0xff] %v9120_v53  ;;  %v3645_v29 = vsel %vm3644_vm7, %v9062_v30, %v3641_v33  ;;  %v3403_v40 = vmul.f32 %v9120_v53, %v9120_v53  ;;  %v9146_v33 = vmul.f32 %v8661_v7, %v10498_v14  ;;  %v3186_v14 = vmul.f32 %v8659_v1, %v3111_v50 }
 0x6a9   : > { %6304 = vrsqrt.f32 %v9109_v57  ;;  %v3875_v41 = vmul.f32 %v3645_v29, %v8898_v58  ;;  %v3648_v30 = vmul.f32 %v9114_v9, %v3647_v10  ;;  %v4328_v11 = vmul.f32 %v4264_v51, %v9112_v18  ;;  %5097 = vmatpush.bf16.msrb.mxu0 %v5971_v5 }
 0x6aa   : > { %3452 = vadd.xlane.f32.xlu0 %v3403_v40  ;;  %3304 = vadd.xlane.f32.xlu2 %v9129_v45  ;;  %v9153_v29 = vadd.f32 %v3218_v4, %v3185_v34  ;;  %v3944_v4 = vadd.f32 %v8910_v52, %v3909_v0  ;;  %vm3653_vm8 = vweird.f32 %v9114_v9  ;;  %v5960_v0 = vld [vmem:[#allocation19] sm:$0xff]  ;;  %vm3662_vm12 = vweird.f32 %v9109_v57 }
 0x6ab   : > { %v3649_v27 = vmul.f32 0.5, %v3648_v30  ;;  %v4184_v25 = vpop.f32.mrf.mxu2  ;;  %v3295_v58 = vpop.xlane.xlu2 %3294  ;;  %v3910_v10 = vmul.f32 %v8892_v46, %v3875_v41  ;;  %v4392_v51 = vmul.f32 0.044715, %v4328_v11  ;;  %v5961_v30 = vld [vmem:[#allocation19 + $0x8] sm:$0xff]  ;;  %v5970_v41 = vld [vmem:[#allocation19 + $0x50] sm:$0xff]  ;;  %vm9194_vm10 = vmor %vm3652_vm9, %vm3653_vm8 }
 0x6ac   : > { %v3443_v56 = vpop.xlane.xlu0 %3442  ;;  %v9157_v40 = vadd.f32 %v4184_v25, %v9136_v49  ;;  %v3340_v32 = vmul.f32 %v3295_v58, %v7240_v17  ;;  %v4097_v23 = vpop.f32.mrf.mxu1  ;;  %5010 = vmatpush.bf16.msra.mxu3 %v5961_v30 }
 0x6ad   : > { %v3494_v3 = vmul.f32 %v3443_v56, %v7240_v17  ;;  %v3650_v56 = vsub.f32 1.5, %v3649_v27  ;;  %v9165_v34 = vadd.f32 %v4097_v23, %v9091_v37  ;;  %v3945_v61 = vadd.f32 %v8910_v52, %v3910_v10  ;;  %5098 = vmatpush.bf16.msrb.mxu0 %v5970_v41  ;;  %v5969_v41 = vld [vmem:[#allocation19 + $0x48] sm:$0xff] }
 0x6ae   : > { %v4456_v25 = vadd.f32 %v4392_v51, %v9112_v18  ;;  %v4265_v50 = vmul.f32 %v9157_v40, %v9157_v40  ;;  %v9178_v5 = vsub.f32 %v8972_v42, %v3340_v32  ;;  %v3114_v23 = vadd.f32 %v9072_v43, %v9026_v13 }
 0x6af   : > { %v9160_v63 = vpop.eup %6304  ;;  %v9162_v15 = vadd.f32 1e-05, %v3494_v3  ;;  %v3651_v27 = vmul.f32 %v9114_v9, %v3650_v56  ;;  %v4266_v51 = vmul.f32 %v9165_v34, %v9165_v34  ;;  %v3972_v48 = vpack.c.bf16 %v3945_v61, %v3944_v4 }
 0x6b0   : > { %v3657_v11 = vmul.f32 %v9160_v63, %v9109_v57  ;;  %10499 = vst [vmem:[#allocation47_spill] sm:$0xff] %v9178_v5  ;;  %v4520_v58 = vmul.f32 0.7978846, %v4456_v25  ;;  %v4329_v10 = vmul.f32 %v4265_v50, %v9157_v40  ;;  %v3404_v56 = vmul.f32 %v9178_v5, %v9178_v5  ;;  %5011 = vmatpush.bf16.msra.mxu3 %v5960_v0 }
 0x6b1   : > { %6306 = vrsqrt.f32 %v9162_v15  ;;  %v9188_v32 = vadd.f32 %v3219_v60, %v3186_v14  ;;  %v4330_v61 = vmul.f32 %v4266_v51, %v9165_v34  ;;  %4114 = vmatmul.bf16.gmra.mxu1 %v3972_v48  ;;  %v3655_v4 = vsel %vm9194_vm10, %v9114_v9, %v3651_v27  ;;  %4203 = vmatmul.bf16.gmra.mxu2 %v3972_v48 }
 0x6b2   : > { %v3658_v3 = vmul.f32 %v9160_v63, %v3657_v11  ;;  %6308 = vtanh.f32 %v4520_v58  ;;  %v4393_v11 = vmul.f32 0.044715, %v4329_v10  ;;  %3306 = vadd.xlane.f32.xlu2 %v9153_v29  ;;  %v3445_v50 = vpop.xlane.xlu1 %3444  ;;  %3454 = vadd.xlane.f32.xlu0 %v3404_v56  ;;  %v3187_v56 = vmul.f32 %v8659_v1, %v3114_v23 }
 0x6b3   : > { %v4186_v60 = vpop.f32.mrf.mxu2  ;;  %v3495_v14 = vmul.f32 %v3445_v50, %v7240_v17  ;;  %5099 = vmatpush.bf16.msrb.mxu0 %v5969_v41  ;;  %v3116_v9 = vadd.f32 %v9072_v43, %v9028_v44  ;;  %v3876_v23 = vmul.f32 %v3655_v4, %v8926_v28  ;;  %vm3663_vm11 = vweird.f32 %v9160_v63 }
 0x6b4   : > { %v3659_v30 = vmul.f32 0.5, %v3658_v3  ;;  %v3297_v25 = vpop.xlane.xlu0 %3296  ;;  %v4457_v58 = vadd.f32 %v4393_v11, %v9157_v40  ;;  %v9206_v10 = vadd.f32 %v4186_v60, %v9136_v49  ;;  %vm9246_vm13 = vmor %vm3662_vm12, %vm3663_vm11  ;;  %vm3672_vm15 = vweird.f32 %v9162_v15 }
 0x6b5   : > { %v3341_v54 = vmul.f32 %v3297_v25, %v7240_v17  ;;  %v4394_v25 = vmul.f32 0.044715, %v4330_v61  ;;  %v9211_v19 = vadd.f32 1e-05, %v3495_v14  ;;  %v3188_v57 = vmul.f32 %v8659_v1, %v3116_v9 }
 0x6b6   : > { %v3660_v3 = vsub.f32 1.5, %v3659_v30  ;;  %v4100_v42 = vpop.f32.mrf.mxu1  ;;  %v4521_v27 = vmul.f32 0.7978846, %v4457_v58  ;;  %v5968_v30 = vld [vmem:[#allocation19 + $0x40] sm:$0xff] }
 0x6b7   : > { %v9208_v51 = vpop.eup %6306  ;;  %v9214_v50 = vadd.f32 %v4100_v42, %v9091_v37  ;;  %v9221_v0 = vsub.f32 %v8986_v22, %v3341_v54  ;;  %v4458_v11 = vadd.f32 %v4394_v25, %v9165_v34  ;;  %v4267_v42 = vmul.f32 %v9206_v10, %v9206_v10  ;;  %5100 = vmatpush.bf16.msrb.mxu0 %v5968_v30 }
 0x6b8   : > { %v3667_v48 = vmul.f32 %v9208_v51, %v9162_v15  ;;  %6310 = vrsqrt.f32 %v9211_v19  ;;  %v6309_v41 = vpop.eup %6308  ;;  %v3661_v44 = vmul.f32 %v9160_v63, %v3660_v3  ;;  %vm3673_vm14 = vweird.f32 %v9208_v51 }
 0x6b9   : > { %10502 = vst [vmem:[#allocation48_spill] sm:$0xff] %v9221_v0  ;;  %v4268_v61 = vmul.f32 %v9214_v50, %v9214_v50  ;;  %v4648_v28 = vadd.f32 1.0, %v6309_v41  ;;  %v4522_v54 = vmul.f32 0.7978846, %v4458_v11  ;;  %v4331_v60 = vmul.f32 %v4267_v42, %v9206_v10  ;;  %vm9319_vm4 = vmor %vm3672_vm15, %vm3673_vm14 }
 0x6ba   : > { %v3668_v13 = vmul.f32 %v9208_v51, %v3667_v48  ;;  %6312 = vtanh.f32 %v4521_v27  ;;  %v3405_v3 = vmul.f32 %v9221_v0, %v9221_v0  ;;  %v9238_v25 = vpop.xlane.xlu1 %3446  ;;  %v9242_v48 = vmul.f32 %v8661_v7, %v7224_v6  ;;  %3308 = vadd.xlane.f32.xlu0 %v9188_v32 }
 0x6bb   : > { %v4332_v4 = vmul.f32 %v4268_v61, %v9214_v50  ;;  %6314 = vtanh.f32 %v4522_v54  ;;  %v4395_v27 = vmul.f32 0.044715, %v4331_v60  ;;  %v3911_v11 = vmul.f32 %v8892_v46, %v3876_v23 }
 0x6bc   : > { %v3669_v14 = vmul.f32 0.5, %v3668_v13  ;;  %v3299_v58 = vpop.xlane.xlu0 %3298  ;;  %v3665_v42 = vsel %vm9246_vm13, %v9160_v63, %v3661_v44  ;;  %3456 = vadd.xlane.f32.xlu1 %v3405_v3  ;;  %v4712_v54 = vmul.f32 0.5, %v4648_v28  ;;  %v9270_v44 = vadd.f32 %v9146_v33, %v3187_v56 }
 0x6bd   : > { %v4189_v30 = vpop.f32.mrf.mxu2  ;;  %v4396_v41 = vmul.f32 0.044715, %v4332_v4  ;;  %v3342_v6 = vmul.f32 %v3299_v58, %v7240_v17  ;;  %v4459_v0 = vadd.f32 %v4395_v27, %v9206_v10  ;;  %vm3682_vm0 = vweird.f32 %v9211_v19 }
 0x6be   : > { %v9257_v13 = vadd.f32 %v4189_v30, %v9136_v49  ;;  %v4102_v61 = vpop.f32.mrf.mxu1  ;;  %v9259_v22 = vpop.eup %6310  ;;  %v3670_v60 = vsub.f32 1.5, %v3669_v14  ;;  %v3877_v9 = vmul.f32 %v3665_v42, %v8942_v47 }
 0x6bf   : > { %v9263_v23 = vadd.f32 %v4102_v61, %v9091_v37  ;;  %v3677_v63 = vmul.f32 %v9259_v22, %v9211_v19  ;;  %v4523_v4 = vmul.f32 0.7978846, %v4459_v0  ;;  %v4460_v28 = vadd.f32 %v4396_v41, %v9214_v50 }
 0x6c0   : > { %v4269_v14 = vmul.f32 %v9257_v13, %v9257_v13  ;;  %v6313_v3 = vpop.eup %6312  ;;  %v9280_v27 = vsub.f32 %v9004_v39, %v3342_v6  ;;  %v4776_v0 = vmul.f32 %v4712_v54, %v9112_v18  ;;  %v3671_v30 = vmul.f32 %v9208_v51, %v3670_v60 }
 0x6c1   : > { %v3678_v58 = vmul.f32 %v9259_v22, %v3677_v63  ;;  %v4270_v33 = vmul.f32 %v9263_v23, %v9263_v23  ;;  %v6315_v56 = vpop.eup %6314  ;;  %v3946_v61 = vadd.f32 %v8910_v52, %v3911_v11  ;;  %6316 = vtanh.f32 %v4523_v4 }
 0x6c2   : > { %v4333_v41 = vmul.f32 %v4269_v14, %v9257_v13  ;;  %v4650_v5 = vadd.f32 1.0, %v6315_v56  ;;  %vm3683_vm1 = vweird.f32 %v9259_v22  ;;  %v3301_v42 = vpop.xlane.xlu1 %3300  ;;  %v4649_v6 = vadd.f32 1.0, %v6313_v3  ;;  %3310 = vadd.xlane.f32.xlu0 %v9270_v44 }
 0x6c3   : > { %v3679_v47 = vmul.f32 0.5, %v3678_v58  ;;  %v4524_v63 = vmul.f32 0.7978846, %v4460_v28  ;;  %v4334_v53 = vmul.f32 %v4270_v33, %v9263_v23  ;;  %v3406_v14 = vmul.f32 %v9280_v27, %v9280_v27  ;;  %vm3684_vm2 = vmor %vm3682_vm0, %vm3683_vm1 }
 0x6c4   : > { %v4397_v39 = vmul.f32 0.044715, %v4333_v41  ;;  %v4714_v54 = vmul.f32 0.5, %v4650_v5  ;;  %v3912_v11 = vmul.f32 %v8892_v46, %v3877_v9  ;;  %v3343_v28 = vmul.f32 %v3301_v42, %v7240_v17 }
 0x6c5   : > { %v4191_v18 = vpop.f32.mrf.mxu2  ;;  %v3680_v60 = vsub.f32 1.5, %v3679_v47  ;;  %v4398_v58 = vmul.f32 0.044715, %v4334_v53  ;;  %3458 = vadd.xlane.f32.xlu1 %v3406_v14  ;;  %6318 = vtanh.f32 %v4524_v63 }
 0x6c6   : > { %v4461_v4 = vadd.f32 %v4397_v39, %v9257_v13  ;;  %v9296_v56 = vadd.f32 %v4191_v18, %v9136_v49  ;;  %v4105_v3 = vpop.f32.mrf.mxu1  ;;  %v4778_v33 = vmul.f32 %v4714_v54, %v9165_v34  ;;  %v3947_v5 = vadd.f32 %v8910_v52, %v3912_v11 }
 0x6c7   : > { %v3681_v41 = vmul.f32 %v9259_v22, %v3680_v60  ;;  %v9303_v47 = vadd.f32 %v4105_v3, %v9091_v37  ;;  %v4462_v53 = vadd.f32 %v4398_v58, %v9263_v23  ;;  %v9313_v34 = vsub.f32 %v9011_v21, %v3343_v28  ;;  %v6317_v42 = vpop.eup %6316 }
 0x6c8   : > { %v4525_v39 = vmul.f32 0.7978846, %v4461_v4  ;;  %v4271_v9 = vmul.f32 %v9296_v56, %v9296_v56  ;;  %v4840_v19 = vpack.c.bf16 %v4778_v33, %v4776_v0  ;;  %v3973_v60 = vpack.c.bf16 %v3947_v5, %v3946_v61 }
 0x6c9   : > { %v3685_v54 = vsel %vm3684_vm2, %v9259_v22, %v3681_v41  ;;  %v4272_v14 = vmul.f32 %v9303_v47, %v9303_v47  ;;  %v3119_v11 = vadd.f32 %v9072_v43, %v9031_v35  ;;  %v3675_v4 = vsel %vm9319_vm4, %v9208_v51, %v3671_v30 }
 0x6ca   : > { %v4335_v15 = vmul.f32 %v4271_v9, %v9296_v56  ;;  %v9333_v58 = vadd.f32 %v9242_v48, %v3188_v57  ;;  %v3879_v0 = vmul.f32 %v3685_v54, %v8981_v31  ;;  %4119 = vmatmul.bf16.gmra.mxu1 %v3973_v60  ;;  %4208 = vmatmul.bf16.gmra.mxu2 %v3973_v60  ;;  %v3303_v35 = vpop.xlane.xlu1 %3302  ;;  %v4713_v28 = vmul.f32 0.5, %v4649_v6 }
 0x6cb   : > { %v4336_v22 = vmul.f32 %v4272_v14, %v9303_v47  ;;  %v3407_v61 = vmul.f32 %v9313_v34, %v9313_v34  ;;  %5012 = vmatmul.bf16.vlgmr.msra.gmra.mxu3 %v4840_v19  ;;  %v3344_v30 = vmul.f32 %v3303_v35, %v7240_v17  ;;  %v4651_v33 = vadd.f32 1.0, %v6317_v42  ;;  %v6319_v14 = vpop.eup %6318 }
 0x6cc   : > { %v4399_v3 = vmul.f32 0.044715, %v4335_v15  ;;  %v3878_v48 = vmul.f32 %v3675_v4, %v8962_v38  ;;  %6320 = vtanh.f32 %v4525_v39  ;;  %v4526_v31 = vmul.f32 0.7978846, %v4462_v53 }
 0x6cd   : > { %v4194_v51 = vpop.f32.mrf.mxu2  ;;  %3460 = vadd.xlane.f32.xlu2 %v3407_v61  ;;  %v4400_v41 = vmul.f32 0.044715, %v4336_v22  ;;  %v9346_v5 = vsub.f32 %v9017_v36, %v3344_v30  ;;  %v4715_v9 = vmul.f32 0.5, %v4651_v33  ;;  %v3222_v18 = vmul.f32 %v8661_v7, %v7228_v8  ;;  %3312 = vadd.xlane.f32.xlu1 %v9333_v58 }
 0x6ce   : > { %v9342_v57 = vadd.f32 %v4194_v51, %v9136_v49  ;;  %v4463_v63 = vadd.f32 %v4399_v3, %v9296_v56  ;;  %v4107_v6 = vpop.f32.mrf.mxu1  ;;  %v3914_v53 = vmul.f32 %v8892_v46, %v3879_v0  ;;  %v3189_v42 = vmul.f32 %v8659_v1, %v3119_v11 }
 0x6cf   : > { %v9354_v39 = vadd.f32 %v4107_v6, %v9091_v37  ;;  %v4777_v19 = vmul.f32 %v4713_v28, %v9157_v40  ;;  %v4779_v60 = vmul.f32 %v4715_v9, %v9206_v10  ;;  %v3913_v15 = vmul.f32 %v8892_v46, %v3878_v48 }
 0x6d0   : > { %v4273_v38 = vmul.f32 %v9342_v57, %v9342_v57  ;;  %v4527_v54 = vmul.f32 0.7978846, %v4463_v63  ;;  %v3408_v22 = vmul.f32 %v9346_v5, %v9346_v5  ;;  %v3121_v0 = vadd.f32 %v9072_v43, %v9036_v55 }
 0x6d1   : > { %v4274_v4 = vmul.f32 %v9354_v39, %v9354_v39  ;;  %v4464_v11 = vadd.f32 %v4400_v41, %v9303_v47  ;;  %v4841_v40 = vpack.c.bf16 %v4779_v60, %v4777_v19  ;;  %6322 = vtanh.f32 %v4526_v31 }
 0x6d2   : > { %v4337_v8 = vmul.f32 %v4273_v38, %v9342_v57  ;;  %v6321_v61 = vpop.eup %6320  ;;  %v3949_v28 = vadd.f32 %v8910_v52, %v3914_v53  ;;  %v9371_v3 = vadd.f32 %v3222_v18, %v3189_v42  ;;  %v4652_v51 = vadd.f32 1.0, %v6319_v14 }
 0x6d3   : > { %v4338_v35 = vmul.f32 %v4274_v4, %v9354_v39  ;;  %5101 = vmatmul.bf16.vlgmr.msrb.gmra.mxu0 %v4841_v40  ;;  %6324 = vtanh.f32 %v4527_v54  ;;  %v3948_v55 = vadd.f32 %v8910_v52, %v3913_v15  ;;  %v3190_v31 = vmul.f32 %v8659_v1, %v3121_v0 }
 0x6d4   : > { %v4401_v10 = vmul.f32 0.044715, %v4337_v8  ;;  %v4528_v63 = vmul.f32 0.7978846, %v4464_v11  ;;  %v4653_v41 = vadd.f32 1.0, %v6321_v61  ;;  %v3223_v53 = vmul.f32 %v8661_v7, %v7232_v12 }
 0x6d5   : > { %v4196_v46 = vpop.f32.mrf.mxu2  ;;  %v4402_v33 = vmul.f32 0.044715, %v4338_v35  ;;  %3462 = vadd.xlane.f32.xlu2 %v3408_v22  ;;  %3314 = vadd.xlane.f32.xlu1 %v9371_v3  ;;  %v3974_v9 = vpack.c.bf16 %v3949_v28, %v3948_v55  ;;  %v4716_v42 = vmul.f32 0.5, %v4652_v51  ;;  %v3124_v8 = vadd.f32 %v9072_v43, %v9055_v62 }
 0x6d6   : > { %v4465_v30 = vadd.f32 %v4401_v10, %v9342_v57  ;;  %v4197_v48 = vadd.f32 %v4196_v46, %v9136_v49  ;;  %6326 = vtanh.f32 %v4528_v63  ;;  %v9383_v4 = vadd.f32 %v3223_v53, %v3190_v31 }
 0x6d7   : > { %v4466_v6 = vadd.f32 %v4402_v33, %v9354_v39  ;;  %v6323_v38 = vpop.eup %6322  ;;  %v4717_v15 = vmul.f32 0.5, %v4653_v41  ;;  %v4780_v12 = vmul.f32 %v4716_v42, %v9214_v50  ;;  %v3191_v62 = vmul.f32 %v8659_v1, %v3124_v8 }
 0x6d8   : > { %v4275_v18 = vmul.f32 %v4197_v48, %v4197_v48  ;;  %v4529_v19 = vmul.f32 0.7978846, %v4465_v30  ;;  %v4654_v60 = vadd.f32 1.0, %v6323_v38  ;;  %v3224_v50 = vmul.f32 %v8661_v7, %v7236_v16 }
 0x6d9   : > { %v4530_v52 = vmul.f32 0.7978846, %v4466_v6  ;;  %v6325_v14 = vpop.eup %6324  ;;  %v4781_v46 = vmul.f32 %v4717_v15, %v9257_v13 }
 0x6da   : > { %v4339_v54 = vmul.f32 %v4275_v18, %v4197_v48  ;;  %4124 = vmatmul.bf16.gmra.mxu1 %v3974_v9  ;;  %4213 = vmatmul.bf16.gmra.mxu2 %v3974_v9  ;;  %v4718_v0 = vmul.f32 0.5, %v4654_v60  ;;  %v4655_v11 = vadd.f32 1.0, %v6325_v14  ;;  %v9393_v63 = vadd.f32 %v3224_v50, %v3191_v62 }
 0x6db   : > { %6328 = vtanh.f32 %v4530_v52  ;;  %v3496_v14 = vmul.f32 %v9238_v25, %v7240_v17 }
 0x6dc   : > { %v4403_v22 = vmul.f32 0.044715, %v4339_v54  ;;  %6330 = vtanh.f32 %v4529_v19  ;;  %v4782_v61 = vmul.f32 %v4718_v0, %v9263_v23  ;;  %v4719_v10 = vmul.f32 0.5, %v4655_v11  ;;  %v6327_v30 = vpop.eup %6326 }
 0x6dd   : > { %3316 = vadd.xlane.f32.xlu2 %v9383_v4  ;;  %v4656_v41 = vadd.f32 1.0, %v6327_v30  ;;  %v3528_v8 = vadd.f32 1e-05, %v3496_v14 }
 0x6de   : > { %v4467_v40 = vadd.f32 %v4403_v22, %v4197_v48  ;;  %v4842_v28 = vpack.c.bf16 %v4782_v61, %v4780_v12  ;;  %v4783_v51 = vmul.f32 %v4719_v10, %v9296_v56 }
 0x6df   : > { %v4720_v56 = vmul.f32 0.5, %v4656_v41  ;;  %vm3692_vm6 = vweird.f32 %v3528_v8 }
 0x6e0   : > { %v4531_v35 = vmul.f32 0.7978846, %v4467_v40  ;;  %5017 = vmatmul.bf16.gmra.mxu3 %v4842_v28  ;;  %v4843_v55 = vpack.c.bf16 %v4783_v51, %v4781_v46 }
 0x6e1   : > { %v6329_v33 = vpop.eup %6328  ;;  %v4784_v42 = vmul.f32 %v4720_v56, %v9303_v47 }
 0x6e2   : > { %6332 = vtanh.f32 %v4531_v35  ;;  %v4658_v23 = vadd.f32 1.0, %v6329_v33  ;;  %v6331_v31 = vpop.eup %6330 }
 0x6e3   : > { %5106 = vmatmul.bf16.gmra.mxu0 %v4843_v55  ;;  %v4657_v13 = vadd.f32 1.0, %v6331_v31  ;;  %6334 = vrsqrt.f32 %v3528_v8 }
 0x6e4   : > { %v4722_v6 = vmul.f32 0.5, %v4658_v23 }
 0x6e5   : > { %3318 = vadd.xlane.f32.xlu2 %v9393_v63  ;;  %v4721_v53 = vmul.f32 0.5, %v4657_v13 }
 0x6e6   : > { %v4786_v38 = vmul.f32 %v4722_v6, %v9354_v39 }
 0x6e7   : > { %v4785_v54 = vmul.f32 %v4721_v53, %v9342_v57 }
 0x6e8   : > { %v6333_v9 = vpop.eup %6332  ;;  %v4844_v52 = vpack.c.bf16 %v4786_v38, %v4784_v42 }
 0x6e9   : > { %v4659_v18 = vadd.f32 1.0, %v6333_v9  ;;  %v6335_v15 = vpop.eup %6334 }
 0x6ea   : > { %v3687_v22 = vmul.f32 %v6335_v15, %v3528_v8  ;;  %vm3693_vm5 = vweird.f32 %v6335_v15 }
 0x6eb   : > { %v4723_v16 = vmul.f32 0.5, %v4659_v18  ;;  %vm3694_vm3 = vmor %vm3692_vm6, %vm3693_vm5 }
 0x6ec   : > { %v3688_v0 = vmul.f32 %v6335_v15, %v3687_v22 }
 0x6ed   : > { %v4787_v19 = vmul.f32 %v4723_v16, %v4197_v48 }
 0x6ee   : > { %v3689_v47 = vmul.f32 0.5, %v3688_v0  ;;  %v3126_v0 = vadd.f32 %v9072_v43, %v9098_v59  ;;  %v9447_v43 = vld [vmem:[%s10478_s26] ss:$0 sm:$0xff] }
 0x6ef   : > { %v4845_v60 = vpack.c.bf16 %v4787_v19, %v4785_v54  ;;  %v9424_v54 = vld [vmem:[%s10301_s8] ss:$0 sm:$0xff] }
 0x6f0   : > { %5022 = vmatmul.bf16.gmra.mxu3 %v4844_v52  ;;  %v3690_v48 = vsub.f32 1.5, %v3689_v47 }
 0x6f2   : > { %v3691_v10 = vmul.f32 %v6335_v15, %v3690_v48 }
 0x6f3   : > { %5111 = vmatmul.bf16.gmra.mxu0 %v4845_v60 }
 0x6f4   : > { %v3695_v28 = vsel %vm3694_vm3, %v6335_v15, %v3691_v10 }
 0x6f5   : > { %v3880_v31 = vmul.f32 %v3695_v28, %v8997_v2 }
 0x6f7   : > { %v3915_v60 = vmul.f32 %v9424_v54, %v3880_v31 }
 0x6f9   : > { %v3950_v59 = vadd.f32 %v9447_v43, %v3915_v60 }
 0x70c   : > { %v3449_v39 = vpop.xlane.xlu2 %3448 }
 0x70d   : > { %v3497_v11 = vmul.f32 %v3449_v39, %v7240_v17 }
 0x70f   : > { %v3529_v12 = vadd.f32 1e-05, %v3497_v11 }
 0x711   : > { %6336 = vrsqrt.f32 %v3529_v12  ;;  %vm3702_vm8 = vweird.f32 %v3529_v12 }
 0x715   : > { %v3451_v40 = vpop.xlane.xlu2 %3450 }
 0x716   : > { %v3498_v57 = vmul.f32 %v3451_v40, %v7240_v17 }
 0x717   : > { %v6337_v61 = vpop.eup %6336 }
 0x718   : > { %v3697_v62 = vmul.f32 %v6337_v61, %v3529_v12  ;;  %v3530_v25 = vadd.f32 1e-05, %v3498_v57  ;;  %vm3703_vm7 = vweird.f32 %v6337_v61 }
 0x719   : > { %vm3704_vm9 = vmor %vm3702_vm8, %vm3703_vm7 }
 0x71a   : > { %v3698_v35 = vmul.f32 %v6337_v61, %v3697_v62  ;;  %6338 = vrsqrt.f32 %v3530_v25  ;;  %vm3712_vm11 = vweird.f32 %v3530_v25 }
 0x71c   : > { %v3699_v46 = vmul.f32 0.5, %v3698_v35 }
 0x71d   : > { %v3453_v51 = vpop.xlane.xlu0 %3452  ;;  %v3305_v30 = vpop.xlane.xlu2 %3304 }
 0x71e   : > { %v3700_v33 = vsub.f32 1.5, %v3699_v46  ;;  %v3499_v50 = vmul.f32 %v3453_v51, %v7240_v17  ;;  %v3345_v55 = vmul.f32 %v3305_v30, %v7240_v17  ;;  %v4110_v23 = vpop.f32.mrf.mxu1 }
 0x71f   : > { %v9407_v41 = vadd.f32 %v4110_v23, %v9091_v37 }
 0x720   : > { %v6339_v6 = vpop.eup %6338  ;;  %v3701_v13 = vmul.f32 %v6337_v61, %v3700_v33  ;;  %v9409_v9 = vadd.f32 1e-05, %v3499_v50  ;;  %v9412_v56 = vsub.f32 %v9129_v45, %v3345_v55 }
 0x721   : > { %v3707_v18 = vmul.f32 %v6339_v6, %v3530_v25  ;;  %v4276_v38 = vmul.f32 %v9407_v41, %v9407_v41  ;;  %vm3713_vm10 = vweird.f32 %v6339_v6 }
 0x722   : > { %v3705_v53 = vsel %vm3704_vm9, %v6337_v61, %v3701_v13  ;;  %6340 = vrsqrt.f32 %v9409_v9  ;;  %v3409_v2 = vmul.f32 %v9412_v56, %v9412_v56  ;;  %vm9453_vm12 = vmor %vm3712_vm11, %vm3713_vm10  ;;  %vm3722_vm14 = vweird.f32 %v9409_v9 }
 0x723   : > { %v3881_v16 = vmul.f32 %v3705_v53, %v9047_v24  ;;  %v3708_v42 = vmul.f32 %v6339_v6, %v3707_v18  ;;  %v4340_v19 = vmul.f32 %v4276_v38, %v9407_v41 }
 0x724   : > { %3464 = vadd.xlane.f32.xlu0 %v3409_v2  ;;  %v4199_v52 = vpop.f32.mrf.mxu2 }
 0x725   : > { %v3709_v14 = vmul.f32 0.5, %v3708_v42  ;;  %v4404_v8 = vmul.f32 0.044715, %v4340_v19  ;;  %v9428_v15 = vadd.f32 %v4199_v52, %v9136_v49  ;;  %v3307_v22 = vpop.xlane.xlu2 %3306  ;;  %v3916_v24 = vmul.f32 %v9424_v54, %v3881_v16  ;;  %v3455_v39 = vpop.xlane.xlu0 %3454 }
 0x726   : > { %v3346_v11 = vmul.f32 %v3307_v22, %v7240_v17  ;;  %v4112_v12 = vpop.f32.mrf.mxu1  ;;  %v3500_v40 = vmul.f32 %v3455_v39, %v7240_v17  ;;  %v3192_v42 = vmul.f32 %v8659_v1, %v3126_v0 }
 0x727   : > { %v3710_v47 = vsub.f32 1.5, %v3709_v14  ;;  %v4468_v48 = vadd.f32 %v4404_v8, %v9407_v41  ;;  %v4277_v57 = vmul.f32 %v9428_v15, %v9428_v15  ;;  %v9442_v62 = vadd.f32 %v4112_v12, %v9091_v37 }
 0x728   : > { %v6341_v61 = vpop.eup %6340  ;;  %v9439_v10 = vsub.f32 %v9153_v29, %v3346_v11  ;;  %v3951_v35 = vadd.f32 %v9447_v43, %v3916_v24  ;;  %v9457_v33 = vadd.f32 1e-05, %v3500_v40  ;;  %v3225_v24 = vmul.f32 %v8661_v7, %v7243_v20 }
 0x729   : > { %v3711_v28 = vmul.f32 %v6339_v6, %v3710_v47  ;;  %v3717_v46 = vmul.f32 %v6341_v61, %v9409_v9  ;;  %v4532_v51 = vmul.f32 0.7978846, %v4468_v48  ;;  %v4341_v50 = vmul.f32 %v4277_v57, %v9428_v15 }
 0x72a   : > { %v4278_v55 = vmul.f32 %v9442_v62, %v9442_v62  ;;  %v3410_v23 = vmul.f32 %v9439_v10, %v9439_v10  ;;  %v3975_v13 = vpack.c.bf16 %v3951_v35, %v3950_v59  ;;  %6342 = vrsqrt.f32 %v9457_v33 }
 0x72b   : > { %v3715_v25 = vsel %vm9453_vm12, %v6339_v6, %v3711_v28  ;;  %v3718_v31 = vmul.f32 %v6341_v61, %v3717_v46  ;;  %v4405_v18 = vmul.f32 0.044715, %v4341_v50  ;;  %6344 = vtanh.f32 %v4532_v51  ;;  %v10509_v46 = vld [vmem:[#allocation46_spill] sm:$0xff] }
 0x72c   : > { %3466 = vadd.xlane.f32.xlu0 %v3410_v23  ;;  %v4201_v38 = vpop.f32.mrf.mxu2  ;;  %v4342_v2 = vmul.f32 %v4278_v55, %v9442_v62  ;;  %4129 = vmatmul.bf16.gmra.mxu1 %v3975_v13  ;;  %v3882_v6 = vmul.f32 %v3715_v25, %v9065_v26  ;;  %vm3723_vm13 = vweird.f32 %v6341_v61  ;;  %v9494_v9 = vadd.f32 %v3225_v24, %v3192_v42 }
 0x72d   : > { %v3719_v53 = vmul.f32 0.5, %v3718_v31  ;;  %4218 = vmatmul.bf16.gmra.mxu2 %v3975_v13  ;;  %v9469_v16 = vadd.f32 %v4201_v38, %v9136_v49  ;;  %v3309_v19 = vpop.xlane.xlu0 %3308  ;;  %v4469_v39 = vadd.f32 %v4405_v18, %v9428_v15  ;;  %vm3724_vm15 = vmor %vm3722_vm14, %vm3723_vm13  ;;  %vm3732_vm1 = vweird.f32 %v9457_v33 }
 0x72e   : > { %v4406_v60 = vmul.f32 0.044715, %v4342_v2  ;;  %v3347_v14 = vmul.f32 %v3309_v19, %v7240_v17  ;;  %v4115_v26 = vpop.f32.mrf.mxu1  ;;  %v3917_v28 = vmul.f32 %v9424_v54, %v3882_v6 }
 0x72f   : > { %v3720_v52 = vsub.f32 1.5, %v3719_v53  ;;  %v4279_v8 = vmul.f32 %v9469_v16, %v9469_v16  ;;  %v3457_v22 = vpop.xlane.xlu1 %3456  ;;  %v9492_v7 = vadd.f32 %v4115_v26, %v9091_v37  ;;  %v4533_v30 = vmul.f32 0.7978846, %v4469_v39 }
 0x730   : > { %v3501_v1 = vmul.f32 %v3457_v22, %v7240_v17  ;;  %v4470_v11 = vadd.f32 %v4406_v60, %v9442_v62  ;;  %v9483_v12 = vsub.f32 %v9188_v32, %v3347_v14  ;;  %v9486_v48 = vpop.eup %6342  ;;  %v3952_v6 = vadd.f32 %v9447_v43, %v3917_v28 }
 0x731   : > { %v3721_v0 = vmul.f32 %v6341_v61, %v3720_v52  ;;  %v4343_v47 = vmul.f32 %v4279_v8, %v9469_v16  ;;  %v6345_v40 = vpop.eup %6344  ;;  %v3727_v59 = vmul.f32 %v9486_v48, %v9457_v33  ;;  %v4280_v23 = vmul.f32 %v9492_v7, %v9492_v7 }
 0x732   : > { %v9489_v20 = vadd.f32 1e-05, %v3501_v1  ;;  %v4534_v35 = vmul.f32 0.7978846, %v4470_v11  ;;  %v4660_v18 = vadd.f32 1.0, %v6345_v40  ;;  %vm3733_vm0 = vweird.f32 %v9486_v48 }
 0x733   : > { %v3725_v57 = vsel %vm3724_vm15, %v6341_v61, %v3721_v0  ;;  %v4407_v50 = vmul.f32 0.044715, %v4343_v47  ;;  %v3728_v55 = vmul.f32 %v9486_v48, %v3727_v59  ;;  %v3411_v61 = vmul.f32 %v9483_v12, %v9483_v12  ;;  %vm9536_vm2 = vmor %vm3732_vm1, %vm3733_vm0 }
 0x734   : > { %v3883_v51 = vmul.f32 %v3725_v57, %v10509_v46  ;;  %6346 = vrsqrt.f32 %v9489_v20  ;;  %3320 = vadd.xlane.f32.xlu0 %v9494_v9  ;;  %v4344_v53 = vmul.f32 %v4280_v23, %v9492_v7  ;;  %v4204_v42 = vpop.f32.mrf.mxu2  ;;  %v4724_v47 = vmul.f32 0.5, %v4660_v18 }
 0x735   : > { %6348 = vtanh.f32 %v4534_v35  ;;  %v4471_v25 = vadd.f32 %v4407_v50, %v9469_v16  ;;  %v3311_v31 = vpop.xlane.xlu0 %3310  ;;  %v3729_v38 = vmul.f32 0.5, %v3728_v55  ;;  %3468 = vadd.xlane.f32.xlu1 %v3411_v61  ;;  %v9513_v52 = vadd.f32 %v4204_v42, %v9136_v49 }
 0x736   : > { %v3918_v13 = vmul.f32 %v9424_v54, %v3883_v51  ;;  %v3348_v2 = vmul.f32 %v3311_v31, %v7240_v17  ;;  %6350 = vtanh.f32 %v4533_v30  ;;  %v4117_v60 = vpop.f32.mrf.mxu1  ;;  %v4408_v22 = vmul.f32 0.044715, %v4344_v53 }
 0x737   : > { %v4535_v19 = vmul.f32 0.7978846, %v4471_v25  ;;  %v3730_v8 = vsub.f32 1.5, %v3729_v38  ;;  %v9520_v1 = vadd.f32 %v4117_v60, %v9091_v37  ;;  %v4281_v35 = vmul.f32 %v9513_v52, %v9513_v52 }
 0x738   : > { %v3953_v14 = vadd.f32 %v9447_v43, %v3918_v13  ;;  %v9517_v24 = vsub.f32 %v9270_v44, %v3348_v2  ;;  %v3459_v39 = vpop.xlane.xlu1 %3458  ;;  %v4472_v28 = vadd.f32 %v4408_v22, %v9492_v7  ;;  %vm3742_vm4 = vweird.f32 %v9489_v20 }
 0x739   : > { %v3502_v0 = vmul.f32 %v3459_v39, %v7240_v17  ;;  %6352 = vtanh.f32 %v4535_v19  ;;  %v3731_v57 = vmul.f32 %v9486_v48, %v3730_v8  ;;  %v4282_v51 = vmul.f32 %v9520_v1, %v9520_v1  ;;  %v10512_v39 = vld [vmem:[#allocation47_spill] sm:$0xff] }
 0x73a   : > { %v6347_v26 = vpop.eup %6346  ;;  %v3976_v11 = vpack.c.bf16 %v3953_v14, %v3952_v6  ;;  %v3412_v30 = vmul.f32 %v9517_v24, %v9517_v24  ;;  %v4788_v25 = vmul.f32 %v4724_v47, %v9407_v41  ;;  %v4536_v42 = vmul.f32 0.7978846, %v4472_v28 }
 0x73b   : > { %v6349_v40 = vpop.eup %6348  ;;  %v3737_v59 = vmul.f32 %v6347_v26, %v9489_v20  ;;  %v9529_v46 = vadd.f32 1e-05, %v3502_v0  ;;  %vm3743_vm5 = vweird.f32 %v6347_v26  ;;  %v3735_v33 = vsel %vm9536_vm2, %v9486_v48, %v3731_v57 }
 0x73c   : > { %4134 = vmatmul.bf16.gmra.mxu1 %v3976_v11  ;;  %v4662_v55 = vadd.f32 1.0, %v6349_v40  ;;  %v6351_v23 = vpop.eup %6350  ;;  %v4346_v13 = vmul.f32 %v4282_v51, %v9520_v1  ;;  %v4206_v18 = vpop.f32.mrf.mxu2  ;;  %v4345_v6 = vmul.f32 %v4281_v35, %v9513_v52  ;;  %v3884_v0 = vmul.f32 %v3735_v33, %v10512_v39  ;;  %vm3744_vm6 = vmor %vm3742_vm4, %vm3743_vm5  ;;  %v10513_v33 = vld [vmem:[#allocation48_spill] sm:$0xff] }
 0x73d   : > { %v3738_v50 = vmul.f32 %v6347_v26, %v3737_v59  ;;  %4223 = vmatmul.bf16.gmra.mxu2 %v3976_v11  ;;  %6354 = vrsqrt.f32 %v9529_v46  ;;  %3470 = vadd.xlane.f32.xlu1 %v3412_v30  ;;  %v9549_v19 = vadd.f32 %v4206_v18, %v9136_v49  ;;  %v4661_v22 = vadd.f32 1.0, %v6351_v23 }
 0x73e   : > { %v4726_v53 = vmul.f32 0.5, %v4662_v55  ;;  %v4410_v14 = vmul.f32 0.044715, %v4346_v13  ;;  %6356 = vtanh.f32 %v4536_v42  ;;  %vm3752_vm3 = vweird.f32 %v9529_v46 }
 0x73f   : > { %v3739_v31 = vmul.f32 0.5, %v3738_v50  ;;  %v6353_v2 = vpop.eup %6352  ;;  %v4283_v11 = vmul.f32 %v9549_v19, %v9549_v19 }
 0x740   : > { %v3461_v38 = vpop.xlane.xlu2 %3460  ;;  %v3313_v8 = vpop.xlane.xlu1 %3312  ;;  %v4790_v48 = vmul.f32 %v4726_v53, %v9442_v62  ;;  %v4474_v59 = vadd.f32 %v4410_v14, %v9520_v1  ;;  %v4663_v28 = vadd.f32 1.0, %v6353_v2  ;;  %v4409_v62 = vmul.f32 0.044715, %v4345_v6 }
 0x741   : > { %v3503_v41 = vmul.f32 %v3461_v38, %v7240_v17  ;;  %v3740_v60 = vsub.f32 1.5, %v3739_v31  ;;  %v3349_v40 = vmul.f32 %v3313_v8, %v7240_v17  ;;  %v4347_v30 = vmul.f32 %v4283_v11, %v9549_v19 }
 0x742   : > { %v4846_v35 = vpack.c.bf16 %v4790_v48, %v4788_v25  ;;  %v4538_v61 = vmul.f32 0.7978846, %v4474_v59  ;;  %v4725_v25 = vmul.f32 0.5, %v4661_v22  ;;  %v4473_v2 = vadd.f32 %v4409_v62, %v9513_v52 }
 0x743   : > { %v9556_v47 = vadd.f32 1e-05, %v3503_v41  ;;  %v3741_v57 = vmul.f32 %v6347_v26, %v3740_v60  ;;  %v9560_v51 = vpop.eup %6354  ;;  %v9567_v50 = vsub.f32 %v9333_v58, %v3349_v40  ;;  %v4411_v18 = vmul.f32 0.044715, %v4347_v30 }
 0x744   : > { %v3747_v23 = vmul.f32 %v9560_v51, %v9529_v46  ;;  %5027 = vmatmul.bf16.gmra.mxu3 %v4846_v35  ;;  %v3919_v6 = vmul.f32 %v9424_v54, %v3884_v0  ;;  %v4789_v14 = vmul.f32 %v4725_v25, %v9428_v15  ;;  %v6357_v22 = vpop.eup %6356  ;;  %v4537_v30 = vmul.f32 0.7978846, %v4473_v2 }
 0x745   : > { %v3745_v55 = vsel %vm3744_vm6, %v6347_v26, %v3741_v57  ;;  %6358 = vrsqrt.f32 %v9556_v47  ;;  %v3413_v20 = vmul.f32 %v9567_v50, %v9567_v50  ;;  %v4727_v26 = vmul.f32 0.5, %v4663_v28 }
 0x746   : > { %v3885_v31 = vmul.f32 %v3745_v55, %v10513_v33  ;;  %v3748_v13 = vmul.f32 %v9560_v51, %v3747_v23  ;;  %6360 = vtanh.f32 %v4538_v61  ;;  %v4475_v40 = vadd.f32 %v4411_v18, %v9549_v19 }
 0x747   : > { %v4120_v38 = vpop.f32.mrf.mxu1  ;;  %3472 = vadd.xlane.f32.xlu2 %v3413_v20  ;;  %v4791_v8 = vmul.f32 %v4727_v26, %v9469_v16  ;;  %v3954_v28 = vadd.f32 %v9447_v43, %v3919_v6  ;;  %v4664_v61 = vadd.f32 1.0, %v6357_v22  ;;  %vm3753_vm7 = vweird.f32 %v9560_v51 }
 0x748   : > { %v9576_v53 = vpop.xlane.xlu2 %3462  ;;  %v9580_v42 = vadd.f32 %v4120_v38, %v9091_v37  ;;  %v3749_v41 = vmul.f32 0.5, %v3748_v13  ;;  %v3315_v60 = vpop.xlane.xlu1 %3314  ;;  %v3920_v48 = vmul.f32 %v9424_v54, %v3885_v31  ;;  %v4539_v13 = vmul.f32 0.7978846, %v4475_v40  ;;  %vm9621_vm8 = vmor %vm3752_vm3, %vm3753_vm7 }
 0x749   : > { %v3350_v11 = vmul.f32 %v3315_v60, %v7240_v17  ;;  %v4847_v57 = vpack.c.bf16 %v4791_v8, %v4789_v14  ;;  %6362 = vtanh.f32 %v4537_v30  ;;  %vm3762_vm9 = vweird.f32 %v9556_v47 }
 0x74a   : > { %v4284_v39 = vmul.f32 %v9580_v42, %v9580_v42  ;;  %v3955_v59 = vadd.f32 %v9447_v43, %v3920_v48  ;;  %v3750_v35 = vsub.f32 1.5, %v3749_v41  ;;  %v4728_v48 = vmul.f32 0.5, %v4664_v61 }
 0x74b   : > { %v9591_v0 = vpop.eup %6358  ;;  %v9595_v16 = vsub.f32 %v9371_v3, %v3350_v11  ;;  %5116 = vmatmul.bf16.gmra.mxu0 %v4847_v57  ;;  %6364 = vtanh.f32 %v4539_v13 }
 0x74c   : > { %v4348_v15 = vmul.f32 %v4284_v39, %v9580_v42  ;;  %v6361_v62 = vpop.eup %6360  ;;  %v3757_v55 = vmul.f32 %v9591_v0, %v9556_v47  ;;  %v3977_v31 = vpack.c.bf16 %v3955_v59, %v3954_v28  ;;  %v3751_v6 = vmul.f32 %v9560_v51, %v3750_v35 }
 0x74d   : > { %v4209_v23 = vpop.f32.mrf.mxu2  ;;  %v3414_v20 = vmul.f32 %v9595_v16, %v9595_v16  ;;  %v4666_v2 = vadd.f32 1.0, %v6361_v62  ;;  %vm3763_vm10 = vweird.f32 %v9591_v0 }
 0x74e   : > { %v4412_v25 = vmul.f32 0.044715, %v4348_v15  ;;  %v9601_v33 = vadd.f32 %v4209_v23, %v9136_v49  ;;  %v3758_v18 = vmul.f32 %v9591_v0, %v3757_v55  ;;  %4139 = vmatmul.bf16.gmra.mxu1 %v3977_v31  ;;  %4228 = vmatmul.bf16.gmra.mxu2 %v3977_v31  ;;  %v3755_v15 = vsel %vm9621_vm8, %v9560_v51, %v3751_v6  ;;  %vm9643_vm11 = vmor %vm3762_vm9, %vm3763_vm10 }
 0x74f   : > { %v4122_v38 = vpop.f32.mrf.mxu1  ;;  %3474 = vadd.xlane.f32.xlu0 %v3414_v20  ;;  %v4730_v40 = vmul.f32 0.5, %v4666_v2  ;;  %v4792_v55 = vmul.f32 %v4728_v48, %v9492_v7  ;;  %v6363_v51 = vpop.eup %6362 }
 0x750   : > { %v3317_v26 = vpop.xlane.xlu2 %3316  ;;  %v4285_v41 = vmul.f32 %v9601_v33, %v9601_v33  ;;  %v9612_v60 = vadd.f32 %v4122_v38, %v9091_v37  ;;  %v3759_v14 = vmul.f32 0.5, %v3758_v18  ;;  %v4476_v22 = vadd.f32 %v4412_v25, %v9580_v42 }
 0x751   : > { %v3351_v8 = vmul.f32 %v3317_v26, %v7240_v17  ;;  %v4794_v23 = vmul.f32 %v4730_v40, %v9520_v1  ;;  %v6365_v6 = vpop.eup %6364 }
 0x752   : > { %v4349_v39 = vmul.f32 %v4285_v41, %v9601_v33  ;;  %v4286_v11 = vmul.f32 %v9612_v60, %v9612_v60  ;;  %v3760_v59 = vsub.f32 1.5, %v3759_v14  ;;  %v4540_v61 = vmul.f32 0.7978846, %v4476_v22 }
 0x753   : > { %v9626_v35 = vsub.f32 %v9383_v4, %v3351_v8  ;;  %v4848_v38 = vpack.c.bf16 %v4794_v23, %v4792_v55  ;;  %v3886_v41 = vmul.f32 %v3755_v15, %v9280_v27  ;;  %v4667_v57 = vadd.f32 1.0, %v6365_v6 }
 0x754   : > { %v4413_v28 = vmul.f32 0.044715, %v4349_v39  ;;  %v3761_v46 = vmul.f32 %v9591_v0, %v3760_v59  ;;  %v4350_v62 = vmul.f32 %v4286_v11, %v9612_v60  ;;  %6366 = vtanh.f32 %v4540_v61 }
 0x755   : > { %v4211_v30 = vpop.f32.mrf.mxu2  ;;  %v3415_v47 = vmul.f32 %v9626_v35, %v9626_v35  ;;  %5032 = vmatmul.bf16.gmra.mxu3 %v4848_v38  ;;  %v4731_v55 = vmul.f32 0.5, %v4667_v57 }
 0x756   : > { %v4477_v25 = vadd.f32 %v4413_v28, %v9601_v33  ;;  %v9639_v31 = vadd.f32 %v4211_v30, %v9136_v49  ;;  %v4414_v13 = vmul.f32 0.044715, %v4350_v62  ;;  %v3765_v1 = vsel %vm9643_vm11, %v9591_v0, %v3761_v46 }
 0x757   : > { %v4125_v18 = vpop.f32.mrf.mxu1  ;;  %3476 = vadd.xlane.f32.xlu1 %v3415_v47  ;;  %v4665_v0 = vadd.f32 1.0, %v6363_v51  ;;  %v3887_v39 = vmul.f32 %v3765_v1, %v9313_v34  ;;  %v3921_v62 = vmul.f32 %v9424_v54, %v3886_v41  ;;  %v4795_v38 = vmul.f32 %v4731_v55, %v9549_v19 }
 0x758   : > { %v3319_v7 = vpop.xlane.xlu2 %3318  ;;  %v4541_v26 = vmul.f32 0.7978846, %v4477_v25  ;;  %v4287_v2 = vmul.f32 %v9639_v31, %v9639_v31  ;;  %v4478_v14 = vadd.f32 %v4414_v13, %v9612_v60  ;;  %v9655_v8 = vadd.f32 %v4125_v18, %v9091_v37 }
 0x759   : > { %v3352_v48 = vmul.f32 %v3319_v7, %v7240_v17  ;;  %v4729_v59 = vmul.f32 0.5, %v4665_v0  ;;  %v3922_v47 = vmul.f32 %v9424_v54, %v3887_v39  ;;  %v3956_v1 = vadd.f32 %v9447_v43, %v3921_v62 }
 0x75a   : > { %v4351_v22 = vmul.f32 %v4287_v2, %v9639_v31  ;;  %v4542_v11 = vmul.f32 0.7978846, %v4478_v14  ;;  %v4288_v40 = vmul.f32 %v9655_v8, %v9655_v8  ;;  %6368 = vtanh.f32 %v4541_v26  ;;  %v6367_v51 = vpop.eup %6366 }
 0x75b   : > { %v9664_v46 = vsub.f32 %v9393_v63, %v3352_v48  ;;  %v4793_v25 = vmul.f32 %v4729_v59, %v9513_v52  ;;  %v3957_v26 = vadd.f32 %v9447_v43, %v3922_v47  ;;  %v4668_v0 = vadd.f32 1.0, %v6367_v51 }
 0x75c   : > { %v4415_v27 = vmul.f32 0.044715, %v4351_v22  ;;  %6370 = vtanh.f32 %v4542_v11  ;;  %v4352_v15 = vmul.f32 %v4288_v40, %v9655_v8 }
 0x75d   : > { %v4214_v28 = vpop.f32.mrf.mxu2  ;;  %v3416_v52 = vmul.f32 %v9664_v46, %v9664_v46  ;;  %v4849_v14 = vpack.c.bf16 %v4795_v38, %v4793_v25  ;;  %v3978_v19 = vpack.c.bf16 %v3957_v26, %v3956_v1  ;;  %v4732_v57 = vmul.f32 0.5, %v4668_v0 }
 0x75e   : > { %v4479_v30 = vadd.f32 %v4415_v27, %v9639_v31  ;;  %v9669_v34 = vadd.f32 %v4214_v28, %v9136_v49  ;;  %v4416_v23 = vmul.f32 0.044715, %v4352_v15 }
 0x75f   : > { %v4127_v61 = vpop.f32.mrf.mxu1  ;;  %3478 = vadd.xlane.f32.xlu2 %v3416_v52  ;;  %5121 = vmatmul.bf16.gmra.mxu0 %v4849_v14  ;;  %v4796_v47 = vmul.f32 %v4732_v57, %v9580_v42 }
 0x760   : > { %v4543_v20 = vmul.f32 0.7978846, %v4479_v30  ;;  %v4289_v13 = vmul.f32 %v9669_v34, %v9669_v34  ;;  %v9676_v18 = vadd.f32 %v4127_v61, %v9091_v37  ;;  %v4480_v7 = vadd.f32 %v4416_v23, %v9655_v8  ;;  %v6369_v2 = vpop.eup %6368  ;;  %4144 = vmatmul.bf16.gmra.mxu1 %v3978_v19  ;;  %4233 = vmatmul.bf16.gmra.mxu2 %v3978_v19 }
 0x761   : > { %v4669_v59 = vadd.f32 1.0, %v6369_v2 }
 0x762   : > { %6372 = vtanh.f32 %v4543_v20  ;;  %v4353_v6 = vmul.f32 %v4289_v13, %v9669_v34  ;;  %v4290_v41 = vmul.f32 %v9676_v18, %v9676_v18  ;;  %v6371_v48 = vpop.eup %6370  ;;  %v4544_v22 = vmul.f32 0.7978846, %v4480_v7 }
 0x763   : > { %v4670_v40 = vadd.f32 1.0, %v6371_v48  ;;  %v4733_v7 = vmul.f32 0.5, %v4669_v59 }
 0x764   : > { %v4417_v39 = vmul.f32 0.044715, %v4353_v6  ;;  %v4354_v11 = vmul.f32 %v4290_v41, %v9676_v18  ;;  %6374 = vtanh.f32 %v4544_v22 }
 0x765   : > { %v4216_v27 = vpop.f32.mrf.mxu2  ;;  %v4734_v30 = vmul.f32 0.5, %v4670_v40  ;;  %v4797_v14 = vmul.f32 %v4733_v7, %v9601_v33 }
 0x766   : > { %v4481_v15 = vadd.f32 %v4417_v39, %v9669_v34  ;;  %v4418_v28 = vmul.f32 0.044715, %v4354_v11  ;;  %v4217_v62 = vadd.f32 %v4216_v27, %v9136_v49  ;;  %v5013_v27 = vpop.f32.mrf.mxu3 }
 0x767   : > { %v4798_v51 = vmul.f32 %v4734_v30, %v9612_v60 }
 0x768   : > { %v6373_v55 = vpop.eup %6372  ;;  %v4482_v23 = vadd.f32 %v4418_v28, %v9676_v18  ;;  %v4291_v61 = vmul.f32 %v4217_v62, %v4217_v62  ;;  %v4545_v25 = vmul.f32 0.7978846, %v4481_v15 }
 0x769   : > { %v4671_v20 = vadd.f32 1.0, %v6373_v55  ;;  %v4850_v1 = vpack.c.bf16 %v4798_v51, %v4796_v47  ;;  %v5102_v55 = vpop.f32.mrf.mxu0 }
 0x76a   : > { %v4546_v13 = vmul.f32 0.7978846, %v4482_v23  ;;  %v4355_v38 = vmul.f32 %v4291_v61, %v4217_v62  ;;  %v6375_v52 = vpop.eup %6374 }
 0x76b   : > { %v4735_v26 = vmul.f32 0.5, %v4671_v20  ;;  %5037 = vmatmul.bf16.gmra.mxu3 %v4850_v1  ;;  %v4672_v48 = vadd.f32 1.0, %v6375_v52 }
 0x76c   : > { %6376 = vtanh.f32 %v4546_v13  ;;  %v4419_v2 = vmul.f32 0.044715, %v4355_v38  ;;  %v9710_v38 = vstv %s722_s29  ;;  %s5391_s29 = sshll.u32 %s10225_s17, 4  ;;  %s5392_s29 = int_to_ptr.vmem [resolvable:$true] %s5391_s29 }
 0x76d   : > { %6378 = vtanh.f32 %v4545_v25  ;;  %v4799_v6 = vmul.f32 %v4735_v26, %v9639_v31  ;;  %v4736_v39 = vmul.f32 0.5, %v4672_v48  ;;  %v9701_v25 = vld [vmem:[%s10518_s15] ss:$0 sm:$0xff] }
 0x76e   : > { %v4483_v41 = vadd.f32 %v4419_v2, %v4217_v62  ;;  %v5015_v47 = vpop.f32.mrf.mxu3  ;;  %v5014_v51 = vadd.f32 %v9701_v25, %v5013_v27 }
 0x76f   : > { %v4851_v22 = vpack.c.bf16 %v4799_v6, %v4797_v14  ;;  %v4800_v57 = vmul.f32 %v4736_v39, %v9655_v8  ;;  %v5016_v26 = vadd.f32 %v9701_v25, %v5015_v47 }
 0x770   : > { %v4547_v42 = vmul.f32 0.7978846, %v4483_v41  ;;  %v5103_v13 = vadd.f32 %v5102_v55, %v5014_v51 }
 0x771   : > { %5126 = vmatmul.bf16.gmra.mxu0 %v4851_v22 }
 0x772   : > { %v6377_v60 = vpop.eup %6376  ;;  %6380 = vtanh.f32 %v4547_v42 }
 0x773   : > { %v6379_v19 = vpop.eup %6378  ;;  %v4674_v0 = vadd.f32 1.0, %v6377_v60 }
 0x774   : > { %v4673_v40 = vadd.f32 1.0, %v6379_v19  ;;  %v10520_v19 = vld [vmem:[#allocation58_spill] sm:$0xff] }
 0x775   : > { %v4738_v11 = vmul.f32 0.5, %v4674_v0  ;;  %v5217_v0 = vmul.f32 %v9710_v38, %v10520_v19 }
 0x776   : > { %v4737_v28 = vmul.f32 0.5, %v4673_v40  ;;  %v5018_v7 = vpop.f32.mrf.mxu3 }
 0x777   : > { %v4802_v59 = vmul.f32 %v4738_v11, %v9676_v18  ;;  %v3504_v18 = vmul.f32 %v9576_v53, %v7240_v17  ;;  %v10519_v53 = vld [vmem:[#allocation59_spill] sm:$0xff]  ;;  %v5019_v22 = vadd.f32 %v9701_v25, %v5018_v7 }
 0x778   : > { %v6381_v31 = vpop.eup %6380  ;;  %v4801_v61 = vmul.f32 %v4737_v28, %v9669_v34  ;;  %v9708_v34 = vstv %s705_s27  ;;  %v5216_v52 = vmul.f32 %v9710_v38, %v10519_v53  ;;  %s5390_s27 = scalar_lea.hbm %s10546_s11, %s5977_s6 }
 0x779   : > { %v4852_v15 = vpack.c.bf16 %v4802_v59, %v4800_v57  ;;  %v4675_v33 = vadd.f32 1.0, %v6381_v31  ;;  %v3536_v20 = vadd.f32 1e-05, %v3504_v18  ;;  %v5183_v1 = vmul.f32 %v9708_v34, %v5103_v13  ;;  %s5393_s10 = sshll.u32 %s5390_s27, 4  ;;  %s5394_s10 = int_to_ptr.hbm [resolvable:$true] %s5393_s10 }
 0x77a   : > { %s6752_s2 = sshra.s32 %s5394_s10, 4  ;;  %s6753_s2 = int_to_ptr.hbm [resolvable:$true] %s6752_s2 }
 0x77b   : > { %v4739_v30 = vmul.f32 0.5, %v4675_v33  ;;  %5042 = vmatmul.bf16.gmra.mxu3 %v4852_v15  ;;  %6382 = vrsqrt.f32 %v3536_v20  ;;  %v5248_v6 = vadd.f32 %v5216_v52, %v5183_v1  ;;  %vm3772_vm13 = vweird.f32 %v3536_v20  ;;  %s6754_s9 = scalar_lea.hbm %s6753_s2, 256  ;;  %p6759_p12 = scmp.lt.s32.totalorder %s6753_s2, %s10546_s11 }
 0x77c   : > { %p6755_p1 = scmp.ne.s32.totalorder %s6753_s2, %s6754_s9  ;;  %p6760_p7 = scmp.lt.s32.totalorder %s6758_s30, %s6754_s9 }
 0x77d   : > { %v4803_v23 = vmul.f32 %v4739_v30, %v4217_v62  ;;  %v5104_v62 = vpop.f32.mrf.mxu0  ;;  %v10521_v30 = vld [vmem:[#allocation60_spill] sm:$0xff] }
 0x77e   : > { %v5105_v41 = vadd.f32 %v5104_v62, %v5016_v26  ;;  %v5020_v60 = vpop.f32.mrf.mxu3  ;;  %v5218_v55 = vmul.f32 %v9710_v38, %v10521_v30  ;;  %p6756_p3 = pnand %p6755_p1, %p7042_p5  ;;  %p6761_p8 = por %p6760_p7, %p6759_p12 }
 0x77f   : > { %v4853_v8 = vpack.c.bf16 %v4803_v23, %v4801_v61  ;;  %v5021_v28 = vadd.f32 %v9701_v25, %v5020_v60 }
 0x780   : > { %v5184_v42 = vmul.f32 %v9708_v34, %v5105_v41  ;;  %v10522_v41 = vld [vmem:[#allocation61_spill] sm:$0xff]  ;;  %p6757_p4 = pneg %p6756_p3 }
 0x781   : > { %5131 = vmatmul.bf16.gmra.mxu0 %v4853_v8  ;;  %v6383_v2 = vpop.eup %6382 }
 0x782   : > { %v3767_v48 = vmul.f32 %v6383_v2, %v3536_v20  ;;  %v5249_v40 = vadd.f32 %v5217_v0, %v5184_v42  ;;  %vm3773_vm12 = vweird.f32 %v6383_v2  ;;  %p6762_p9 = pnand %p6761_p8, %p6757_p4 }
 0x783   : > { %vm3774_vm14 = vmor %vm3772_vm13, %vm3773_vm12 }
 0x784   : > { %v3768_v39 = vmul.f32 %v6383_v2, %v3767_v48 }
 0x785   : > { %v5107_v14 = vpop.f32.mrf.mxu0 }
 0x786   : > { %v5108_v27 = vadd.f32 %v5107_v14, %v5019_v22  ;;  %v3769_v31 = vmul.f32 0.5, %v3768_v39  ;;  %v5023_v61 = vpop.f32.mrf.mxu3  ;;  %v5219_v14 = vmul.f32 %v9710_v38, %v10522_v41 }
 0x787   : > { %v5024_v53 = vadd.f32 %v9701_v25, %v5023_v61 }
 0x788   : > { %v5185_v33 = vmul.f32 %v9708_v34, %v5108_v27  ;;  %v3770_v23 = vsub.f32 1.5, %v3769_v31 }
 0x78a   : > { %v5250_v47 = vadd.f32 %v5218_v55, %v5185_v33  ;;  %v3771_v7 = vmul.f32 %v6383_v2, %v3770_v23 }
 0x78c   : > { %v3775_v48 = vsel %vm3774_vm14, %v6383_v2, %v3771_v7 }
 0x78d   : > { %v5109_v15 = vpop.f32.mrf.mxu0  ;;  %v3888_v20 = vmul.f32 %v3775_v48, %v9346_v5 }
 0x78e   : > { %v5110_v18 = vadd.f32 %v5109_v15, %v5021_v28  ;;  %v5025_v39 = vpop.f32.mrf.mxu3 }
 0x78f   : > { %v5026_v30 = vadd.f32 %v9701_v25, %v5025_v39  ;;  %v3923_v7 = vmul.f32 %v9424_v54, %v3888_v20 }
 0x790   : > { %v5186_v26 = vmul.f32 %v9708_v34, %v5110_v18 }
 0x791   : > { %5280 = vxpose.xlu1.b32.start [1/16] %v5248_v6, 128 }
 0x792   : > { %v5251_v60 = vadd.f32 %v5219_v14, %v5186_v26 }
 0x795   : > { %v5112_v52 = vpop.f32.mrf.mxu0 }
 0x796   : > { %v5113_v19 = vadd.f32 %v5112_v52, %v5024_v53 }
 0x797   : > { %v3465_v11 = vpop.xlane.xlu0 %3464 }
 0x798   : > { %v3505_v57 = vmul.f32 %v3465_v11, %v7240_v17  ;;  %v5187_v28 = vmul.f32 %v9708_v34, %v5113_v19 }
 0x799   : > { %5281 = vxpose.xlu1.b32.cont [2/16] %v5249_v40, 128 }
 0x79a   : > { %v3537_v59 = vadd.f32 1e-05, %v3505_v57 }
 0x79c   : > { %6384 = vrsqrt.f32 %v3537_v59  ;;  %vm3782_vm0 = vweird.f32 %v3537_v59 }
 0x79f   : > { %v3467_v8 = vpop.xlane.xlu0 %3466 }
 0x7a0   : > { %v3506_v51 = vmul.f32 %v3467_v8, %v7240_v17  ;;  %v10523_v8 = vld [vmem:[#allocation57_spill] sm:$0xff] }
 0x7a1   : > { %5282 = vxpose.xlu1.b32.cont [3/16] %v5250_v47, 128  ;;  %v5220_v47 = vmul.f32 %v9710_v38, %v10523_v8 }
 0x7a2   : > { %v6385_v62 = vpop.eup %6384  ;;  %v9726_v13 = vadd.f32 1e-05, %v3506_v51 }
 0x7a3   : > { %v3777_v1 = vmul.f32 %v6385_v62, %v3537_v59  ;;  %vm3783_vm15 = vweird.f32 %v6385_v62 }
 0x7a4   : > { %6386 = vrsqrt.f32 %v9726_v13  ;;  %vm3784_vm1 = vmor %vm3782_vm0, %vm3783_vm15  ;;  %vm3792_vm4 = vweird.f32 %v9726_v13 }
 0x7a5   : > { %v3778_v6 = vmul.f32 %v6385_v62, %v3777_v1  ;;  %v5114_v1 = vpop.f32.mrf.mxu0 }
 0x7a6   : > { %v5115_v53 = vadd.f32 %v5114_v1, %v5026_v30 }
 0x7a7   : > { %v3779_v42 = vmul.f32 0.5, %v3778_v6  ;;  %v3321_v22 = vpop.xlane.xlu0 %3320 }
 0x7a8   : > { %v3353_v0 = vmul.f32 %v3321_v22, %v7240_v17  ;;  %v3469_v57 = vpop.xlane.xlu1 %3468 }
 0x7a9   : > { %v3780_v11 = vsub.f32 1.5, %v3779_v42  ;;  %5283 = vxpose.xlu1.b32.cont [4/16] %v5251_v60, 128  ;;  %v4130_v31 = vpop.f32.mrf.mxu1  ;;  %v3507_v33 = vmul.f32 %v3469_v57, %v7240_v17  ;;  %v3958_v60 = vadd.f32 %v9447_v43, %v3923_v7 }
 0x7aa   : > { %v9734_v40 = vpop.eup %6386  ;;  %v9738_v27 = vsub.f32 %v9494_v9, %v3353_v0  ;;  %v9746_v5 = vadd.f32 %v4130_v31, %v9091_v37 }
 0x7ab   : > { %v3781_v2 = vmul.f32 %v6385_v62, %v3780_v11  ;;  %v3787_v15 = vmul.f32 %v9734_v40, %v9726_v13  ;;  %v9751_v59 = vadd.f32 1e-05, %v3507_v33  ;;  %vm3793_vm2 = vweird.f32 %v9734_v40 }
 0x7ac   : > { %v3417_v55 = vmul.f32 %v9738_v27, %v9738_v27  ;;  %v4292_v51 = vmul.f32 %v9746_v5, %v9746_v5  ;;  %vm9790_vm5 = vmor %vm3792_vm4, %vm3793_vm2 }
 0x7ad   : > { %v3785_v23 = vsel %vm3784_vm1, %v6385_v62, %v3781_v2  ;;  %v3788_v61 = vmul.f32 %v9734_v40, %v3787_v15  ;;  %6388 = vrsqrt.f32 %v9751_v59  ;;  %v5252_v62 = vadd.f32 %v5220_v47, %v5187_v28  ;;  %v10524_v28 = vld [vmem:[#allocation30_spill] sm:$0xff] }
 0x7ae   : > { %v3889_v18 = vmul.f32 %v3785_v23, %v9412_v56  ;;  %3480 = vadd.xlane.f32.xlu0 %v3417_v55  ;;  %v4356_v52 = vmul.f32 %v4292_v51, %v9746_v5  ;;  %v5221_v30 = vmul.f32 %v9710_v38, %v10524_v28  ;;  %vm3802_vm3 = vweird.f32 %v9751_v59 }
 0x7af   : > { %v3789_v26 = vmul.f32 0.5, %v3788_v61 }
 0x7b0   : > { %v4219_v6 = vpop.f32.mrf.mxu2  ;;  %v3924_v41 = vmul.f32 %v9424_v54, %v3889_v18  ;;  %v4420_v48 = vmul.f32 0.044715, %v4356_v52  ;;  %v3471_v42 = vpop.xlane.xlu1 %3470  ;;  %v5188_v54 = vmul.f32 %v9708_v34, %v5115_v53 }
 0x7b1   : > { %v3790_v14 = vsub.f32 1.5, %v3789_v26  ;;  %v9763_v56 = vadd.f32 %v4219_v6, %v9136_v49  ;;  %5284 = vxpose.xlu1.b32.cont [5/16] %v5252_v62, 128  ;;  %v4132_v22 = vpop.f32.mrf.mxu1  ;;  %v3508_v39 = vmul.f32 %v3471_v42, %v7240_v17 }
 0x7b2   : > { %v3959_v19 = vadd.f32 %v9447_v43, %v3924_v41  ;;  %v9771_v11 = vadd.f32 %v4132_v22, %v9091_v37  ;;  %v4484_v20 = vadd.f32 %v4420_v48, %v9746_v5  ;;  %v5253_v47 = vadd.f32 %v5221_v30, %v5188_v54 }
 0x7b3   : > { %v4293_v0 = vmul.f32 %v9763_v56, %v9763_v56  ;;  %v6389_v31 = vpop.eup %6388  ;;  %v3791_v2 = vmul.f32 %v9734_v40, %v3790_v14  ;;  %v9778_v15 = vadd.f32 1e-05, %v3508_v39 }
 0x7b4   : > { %v3979_v57 = vpack.c.bf16 %v3959_v19, %v3958_v60  ;;  %v4294_v33 = vmul.f32 %v9771_v11, %v9771_v11  ;;  %v3797_v55 = vmul.f32 %v6389_v31, %v9751_v59  ;;  %v4548_v23 = vmul.f32 0.7978846, %v4484_v20 }
 0x7b5   : > { %v4357_v43 = vmul.f32 %v4293_v0, %v9763_v56  ;;  %6390 = vrsqrt.f32 %v9778_v15  ;;  %v3795_v1 = vsel %vm9790_vm5, %v9734_v40, %v3791_v2  ;;  %vm3803_vm6 = vweird.f32 %v6389_v31 }
 0x7b6   : > { %4149 = vmatmul.bf16.gmra.mxu1 %v3979_v57  ;;  %4238 = vmatmul.bf16.gmra.mxu2 %v3979_v57  ;;  %v4358_v8 = vmul.f32 %v4294_v33, %v9771_v11  ;;  %v3798_v51 = vmul.f32 %v6389_v31, %v3797_v55  ;;  %6392 = vtanh.f32 %v4548_v23  ;;  %v3890_v40 = vmul.f32 %v3795_v1, %v9439_v10  ;;  %vm3804_vm7 = vmor %vm3802_vm3, %vm3803_vm6  ;;  %v9825_v23 = vld [vmem:[%s10301_s8] ss:$0 sm:$0xff]  ;;  %v10527_v1 = vld [vmem:[#allocation31_spill] sm:$0xff] }
 0x7b7   : > { %v4421_v61 = vmul.f32 0.044715, %v4357_v43  ;;  %vm3812_vm8 = vweird.f32 %v9778_v15 }
 0x7b8   : > { %v4221_v7 = vpop.f32.mrf.mxu2  ;;  %v4422_v26 = vmul.f32 0.044715, %v4358_v8  ;;  %v3799_v53 = vmul.f32 0.5, %v3798_v51 }
 0x7b9   : > { %v4485_v13 = vadd.f32 %v4421_v61, %v9763_v56  ;;  %v9799_v62 = vadd.f32 %v4221_v7, %v9136_v49  ;;  %5285 = vxpose.xlu1.b32.cont [6/16] %v5253_v47, 128  ;;  %v4135_v52 = vpop.f32.mrf.mxu1  ;;  %v3925_v61 = vmul.f32 %v9825_v23, %v3890_v40 }
 0x7ba   : > { %v4486_v41 = vadd.f32 %v4422_v26, %v9771_v11  ;;  %v3473_v48 = vpop.xlane.xlu2 %3472  ;;  %v9805_v42 = vadd.f32 %v4135_v52, %v9091_v37  ;;  %v3800_v22 = vsub.f32 1.5, %v3799_v53 }
 0x7bb   : > { %v4549_v6 = vmul.f32 0.7978846, %v4485_v13  ;;  %v4295_v14 = vmul.f32 %v9799_v62, %v9799_v62  ;;  %v3509_v60 = vmul.f32 %v3473_v48, %v7240_v17  ;;  %v9809_v19 = vpop.eup %6390  ;;  %v9835_v13 = vmul.f32 %v9710_v38, %v10527_v1 }
 0x7bc   : > { %v4550_v0 = vmul.f32 0.7978846, %v4486_v41  ;;  %v4296_v54 = vmul.f32 %v9805_v42, %v9805_v42  ;;  %v6393_v20 = vpop.eup %6392  ;;  %v3801_v57 = vmul.f32 %v6389_v31, %v3800_v22  ;;  %v3807_v10 = vmul.f32 %v9809_v19, %v9778_v15  ;;  %v9848_v22 = vld [vmem:[%s10478_s26] ss:$0 sm:$0xff] }
 0x7bd   : > { %v4359_v39 = vmul.f32 %v4295_v14, %v9799_v62  ;;  %6394 = vtanh.f32 %v4549_v6  ;;  %v9817_v2 = vadd.f32 1e-05, %v3509_v60  ;;  %v4676_v59 = vadd.f32 1.0, %v6393_v20 }
 0x7be   : > { %6396 = vtanh.f32 %v4550_v0  ;;  %v4360_v33 = vmul.f32 %v4296_v54, %v9805_v42  ;;  %v3805_v28 = vsel %vm3804_vm7, %v6389_v31, %v3801_v57  ;;  %v3808_v30 = vmul.f32 %v9809_v19, %v3807_v10 }
 0x7bf   : > { %v4423_v43 = vmul.f32 0.044715, %v4359_v39  ;;  %6398 = vrsqrt.f32 %v9817_v2  ;;  %v3891_v8 = vmul.f32 %v3805_v28, %v9483_v12  ;;  %v4740_v26 = vmul.f32 0.5, %v4676_v59 }
 0x7c0   : > { %v4224_v55 = vpop.f32.mrf.mxu2  ;;  %v4424_v18 = vmul.f32 0.044715, %v4360_v33  ;;  %v3809_v31 = vmul.f32 0.5, %v3808_v30  ;;  %v3960_v60 = vadd.f32 %v9848_v22, %v3925_v61  ;;  %vm3813_vm9 = vweird.f32 %v9809_v19 }
 0x7c1   : > { %v4487_v47 = vadd.f32 %v4423_v43, %v9799_v62  ;;  %v9831_v51 = vadd.f32 %v4224_v55, %v9136_v49  ;;  %v4137_v7 = vpop.f32.mrf.mxu1  ;;  %v3926_v40 = vmul.f32 %v9825_v23, %v3891_v8  ;;  %v4804_v33 = vmul.f32 %v4740_v26, %v9746_v5  ;;  %vm9874_vm11 = vmor %vm3812_vm8, %vm3813_vm9 }
 0x7c2   : > { %v4488_v52 = vadd.f32 %v4424_v18, %v9805_v42  ;;  %v9841_v12 = vadd.f32 %v4137_v7, %v9091_v37  ;;  %v3810_v14 = vsub.f32 1.5, %v3809_v31  ;;  %v3475_v48 = vpop.xlane.xlu0 %3474  ;;  %vm3822_vm10 = vweird.f32 %v9817_v2 }
 0x7c3   : > { %v4551_v53 = vmul.f32 0.7978846, %v4487_v47  ;;  %v4297_v6 = vmul.f32 %v9831_v51, %v9831_v51  ;;  %v6395_v41 = vpop.eup %6394  ;;  %v3510_v20 = vmul.f32 %v3475_v48, %v7240_v17  ;;  %v3961_v43 = vadd.f32 %v9848_v22, %v3926_v40 }
 0x7c4   : > { %v6397_v0 = vpop.eup %6396  ;;  %v4552_v39 = vmul.f32 0.7978846, %v4488_v52  ;;  %v4298_v10 = vmul.f32 %v9841_v12, %v9841_v12  ;;  %v3811_v59 = vmul.f32 %v9809_v19, %v3810_v14  ;;  %v4677_v7 = vadd.f32 1.0, %v6395_v41 }
 0x7c5   : > { %6400 = vtanh.f32 %v4551_v53  ;;  %v4361_v54 = vmul.f32 %v4297_v6, %v9831_v51  ;;  %v9853_v57 = vpop.eup %6398  ;;  %v4678_v55 = vadd.f32 1.0, %v6397_v0  ;;  %v9864_v61 = vadd.f32 1e-05, %v3510_v20 }
 0x7c6   : > { %v3817_v28 = vmul.f32 %v9853_v57, %v9817_v2  ;;  %v4362_v8 = vmul.f32 %v4298_v10, %v9841_v12  ;;  %v3980_v47 = vpack.c.bf16 %v3961_v43, %v3960_v60  ;;  %6402 = vtanh.f32 %v4552_v39 }
 0x7c7   : > { %v4425_v30 = vmul.f32 0.044715, %v4361_v54  ;;  %v5028_v18 = vpop.f32.mrf.mxu3  ;;  %vm3823_vm12 = vweird.f32 %v9853_v57  ;;  %6404 = vrsqrt.f32 %v9864_v61  ;;  %v3815_v15 = vsel %vm9874_vm11, %v9809_v19, %v3811_v59 }
 0x7c8   : > { %v4226_v31 = vpop.f32.mrf.mxu2  ;;  %v3818_v1 = vmul.f32 %v9853_v57, %v3817_v28  ;;  %v5029_v26 = vadd.f32 %v9701_v25, %v5028_v18  ;;  %v4426_v52 = vmul.f32 0.044715, %v4362_v8  ;;  %4154 = vmatmul.bf16.gmra.mxu1 %v3980_v47  ;;  %4243 = vmatmul.bf16.gmra.mxu2 %v3980_v47  ;;  %v5117_v6 = vpop.f32.mrf.mxu0  ;;  %v4742_v0 = vmul.f32 0.5, %v4678_v55  ;;  %vm3824_vm13 = vmor %vm3822_vm10, %vm3823_vm12 }
 0x7c9   : > { %v4489_v5 = vadd.f32 %v4425_v30, %v9831_v51  ;;  %v9881_v41 = vadd.f32 %v4226_v31, %v9136_v49  ;;  %v4741_v53 = vmul.f32 0.5, %v4677_v7  ;;  %vm3832_vm15 = vweird.f32 %v9864_v61 }
 0x7ca   : > { %v3819_v48 = vmul.f32 0.5, %v3818_v1  ;;  %v5118_v40 = vadd.f32 %v5117_v6, %v5029_v26  ;;  %v3477_v60 = vpop.xlane.xlu1 %3476  ;;  %v4490_v54 = vadd.f32 %v4426_v52, %v9841_v12  ;;  %v4806_v8 = vmul.f32 %v4742_v0, %v9771_v11 }
 0x7cb   : > { %v6401_v14 = vpop.eup %6400  ;;  %v4553_v39 = vmul.f32 0.7978846, %v4489_v5  ;;  %v4299_v20 = vmul.f32 %v9881_v41, %v9881_v41  ;;  %v3511_v10 = vmul.f32 %v3477_v60, %v7240_v17  ;;  %v4140_v30 = vpop.f32.mrf.mxu1  ;;  %v3892_v11 = vmul.f32 %v3815_v15, %v9517_v24  ;;  %v10530_v24 = vld [vmem:[#allocation32_spill] sm:$0xff] }
 0x7cc   : > { %v3820_v43 = vsub.f32 1.5, %v3819_v48  ;;  %v5189_v28 = vmul.f32 %v9708_v34, %v5118_v40  ;;  %v4679_v47 = vadd.f32 1.0, %v6401_v14  ;;  %v4554_v19 = vmul.f32 0.7978846, %v4490_v54  ;;  %v6403_v31 = vpop.eup %6402 }
 0x7cd   : > { %v4363_v59 = vmul.f32 %v4299_v20, %v9881_v41  ;;  %v9893_v18 = vadd.f32 1e-05, %v3511_v10  ;;  %v9896_v55 = vadd.f32 %v4140_v30, %v9091_v37  ;;  %v4854_v26 = vpack.c.bf16 %v4806_v8, %v4804_v33  ;;  %v9900_v52 = vpop.eup %6404 }
 0x7ce   : > { %v3821_v1 = vmul.f32 %v9853_v57, %v3820_v43  ;;  %v5254_v5 = vadd.f32 %v9835_v13, %v5189_v28  ;;  %6406 = vtanh.f32 %v4553_v39  ;;  %v3827_v13 = vmul.f32 %v9900_v52, %v9864_v61 }
 0x7cf   : > { %v4427_v6 = vmul.f32 0.044715, %v4363_v59  ;;  %v4300_v14 = vmul.f32 %v9896_v55, %v9896_v55  ;;  %v5030_v48 = vpop.f32.mrf.mxu3  ;;  %6408 = vrsqrt.f32 %v9893_v18  ;;  %5047 = vmatmul.bf16.gmra.mxu3 %v4854_v26  ;;  %v5223_v33 = vmul.f32 %v9710_v38, %v10530_v24 }
 0x7d0   : > { %v3825_v40 = vsel %vm3824_vm13, %v9853_v57, %v3821_v1  ;;  %5286 = vxpose.xlu1.b32.cont [7/16] %v5254_v5, 128  ;;  %v5031_v60 = vadd.f32 %v9701_v25, %v5030_v48  ;;  %v3828_v57 = vmul.f32 %v9900_v52, %v3827_v13  ;;  %6410 = vtanh.f32 %v4554_v19  ;;  %v5119_v0 = vpop.f32.mrf.mxu0 }
 0x7d1   : > { %v3893_v2 = vmul.f32 %v3825_v40, %v9567_v50  ;;  %v4491_v7 = vadd.f32 %v4427_v6, %v9881_v41  ;;  %v4364_v15 = vmul.f32 %v4300_v14, %v9896_v55  ;;  %v4743_v39 = vmul.f32 0.5, %v4679_v47  ;;  %v4229_v28 = vpop.f32.mrf.mxu2 }
 0x7d2   : > { %v4805_v54 = vmul.f32 %v4741_v53, %v9763_v56  ;;  %v5120_v43 = vadd.f32 %v5119_v0, %v5031_v60  ;;  %v3927_v30 = vmul.f32 %v9825_v23, %v3892_v11  ;;  %v3829_v50 = vmul.f32 0.5, %v3828_v57 }
 0x7d3   : > { %v4555_v20 = vmul.f32 0.7978846, %v4491_v7  ;;  %v4428_v10 = vmul.f32 0.044715, %v4364_v15  ;;  %v9923_v8 = vadd.f32 %v4229_v28, %v9136_v49  ;;  %v4142_v59 = vpop.f32.mrf.mxu1  ;;  %v4807_v1 = vmul.f32 %v4743_v39, %v9799_v62 }
 0x7d4   : > { %v3928_v5 = vmul.f32 %v9825_v23, %v3893_v2  ;;  %v6407_v19 = vpop.eup %6406  ;;  %v5190_v56 = vmul.f32 %v9708_v34, %v5120_v43  ;;  %v9930_v26 = vadd.f32 %v4142_v59, %v9091_v37  ;;  %v3830_v11 = vsub.f32 1.5, %v3829_v50 }
 0x7d5   : > { %6412 = vtanh.f32 %v4555_v20  ;;  %v4492_v47 = vadd.f32 %v4428_v10, %v9896_v55  ;;  %v6409_v53 = vpop.eup %6408  ;;  %v4301_v6 = vmul.f32 %v9923_v8, %v9923_v8  ;;  %v4855_v14 = vpack.c.bf16 %v4807_v1, %v4805_v54 }
 0x7d6   : > { %vm3833_vm14 = vweird.f32 %v9900_v52  ;;  %v3837_v62 = vmul.f32 %v6409_v53, %v9893_v18  ;;  %v5255_v40 = vadd.f32 %v5223_v33, %v5190_v56  ;;  %v6411_v13 = vpop.eup %6410  ;;  %v3831_v24 = vmul.f32 %v9900_v52, %v3830_v11 }
 0x7d7   : > { %v4556_v48 = vmul.f32 0.7978846, %v4492_v47  ;;  %v4365_v2 = vmul.f32 %v4301_v6, %v9923_v8  ;;  %v4302_v7 = vmul.f32 %v9930_v26, %v9930_v26  ;;  %5136 = vmatmul.bf16.gmra.mxu0 %v4855_v14  ;;  %v3962_v60 = vadd.f32 %v9848_v22, %v3927_v30  ;;  %vm9945_vm0 = vmor %vm3832_vm15, %vm3833_vm14 }
 0x7d8   : > { %v3838_v15 = vmul.f32 %v6409_v53, %v3837_v62  ;;  %v3963_v57 = vadd.f32 %v9848_v22, %v3928_v5  ;;  %5287 = vxpose.xlu1.b32.cont [8/16] %v5255_v40, 128  ;;  %v4680_v0 = vadd.f32 1.0, %v6403_v31  ;;  %vm3843_vm1 = vweird.f32 %v6409_v53  ;;  %v5033_v28 = vpop.f32.mrf.mxu3 }
 0x7d9   : > { %6414 = vtanh.f32 %v4556_v48  ;;  %v4429_v61 = vmul.f32 0.044715, %v4365_v2  ;;  %v3835_v54 = vsel %vm9945_vm0, %v9900_v52, %v3831_v24  ;;  %v4366_v10 = vmul.f32 %v4302_v7, %v9930_v26  ;;  %v4231_v31 = vpop.f32.mrf.mxu2 }
 0x7da   : > { %v3839_v20 = vmul.f32 0.5, %v3838_v15  ;;  %v3981_v43 = vpack.c.bf16 %v3963_v57, %v3962_v60  ;;  %v5034_v50 = vadd.f32 %v9701_v25, %v5033_v28  ;;  %v9956_v59 = vadd.f32 %v4231_v31, %v9136_v49 }
 0x7db   : > { %v6413_v39 = vpop.eup %6412  ;;  %v4493_v30 = vadd.f32 %v4429_v61, %v9923_v8  ;;  %v4682_v1 = vadd.f32 1.0, %v6411_v13  ;;  %v4430_v47 = vmul.f32 0.044715, %v4366_v10  ;;  %v4744_v56 = vmul.f32 0.5, %v4680_v0 }
 0x7dc   : > { %v3840_v5 = vsub.f32 1.5, %v3839_v20  ;;  %4159 = vmatmul.bf16.gmra.mxu1 %v3981_v43  ;;  %4248 = vmatmul.bf16.gmra.mxu2 %v3981_v43  ;;  %v4681_v52 = vadd.f32 1.0, %v6407_v19  ;;  %v4303_v6 = vmul.f32 %v9956_v59, %v9956_v59  ;;  %v4683_v62 = vadd.f32 1.0, %v6413_v39  ;;  %v5122_v2 = vpop.f32.mrf.mxu0  ;;  %v10533_v20 = vld [vmem:[#allocation33_spill] sm:$0xff] }
 0x7dd   : > { %v4557_v11 = vmul.f32 0.7978846, %v4493_v30  ;;  %v4746_v14 = vmul.f32 0.5, %v4682_v1  ;;  %v3894_v48 = vmul.f32 %v3835_v54, %v9595_v16  ;;  %vm3842_vm2 = vweird.f32 %v9893_v18  ;;  %v4145_v16 = vpop.f32.mrf.mxu1 }
 0x7de   : > { %v3841_v40 = vmul.f32 %v6409_v53, %v3840_v5  ;;  %v4494_v24 = vadd.f32 %v4430_v47, %v9930_v26  ;;  %vm3844_vm4 = vmor %vm3842_vm2, %vm3843_vm1  ;;  %v4367_v7 = vmul.f32 %v4303_v6, %v9956_v59  ;;  %v4808_v19 = vmul.f32 %v4744_v56, %v9805_v42 }
 0x7df   : > { %v6415_v13 = vpop.eup %6414  ;;  %v4810_v15 = vmul.f32 %v4746_v14, %v9841_v12  ;;  %v4745_v60 = vmul.f32 0.5, %v4681_v52  ;;  %6416 = vtanh.f32 %v4557_v11  ;;  %v4747_v33 = vmul.f32 0.5, %v4683_v62 }
 0x7e0   : > { %v3845_v57 = vsel %vm3844_vm4, %v6409_v53, %v3841_v40  ;;  %v4558_v0 = vmul.f32 0.7978846, %v4494_v24  ;;  %v5123_v61 = vadd.f32 %v5122_v2, %v5034_v50  ;;  %v4431_v39 = vmul.f32 0.044715, %v4367_v7  ;;  %v5035_v43 = vpop.f32.mrf.mxu3 }
 0x7e1   : > { %v3895_v18 = vmul.f32 %v3845_v57, %v9626_v35  ;;  %v9969_v54 = vadd.f32 %v4145_v16, %v9091_v37  ;;  %v5224_v10 = vmul.f32 %v9710_v38, %v10533_v20  ;;  %v4856_v42 = vpack.c.bf16 %v4810_v15, %v4808_v19 }
 0x7e2   : > { %6418 = vtanh.f32 %v4558_v0  ;;  %v5191_v12 = vmul.f32 %v9708_v34, %v5123_v61  ;;  %v4495_v53 = vadd.f32 %v4431_v39, %v9956_v59  ;;  %v4809_v35 = vmul.f32 %v4745_v60, %v9831_v51 }
 0x7e3   : > { %v4304_v28 = vmul.f32 %v9969_v54, %v9969_v54  ;;  %5052 = vmatmul.bf16.gmra.mxu3 %v4856_v42  ;;  %v5036_v31 = vadd.f32 %v9701_v25, %v5035_v43  ;;  %v4811_v30 = vmul.f32 %v4747_v33, %v9881_v41  ;;  %v3929_v50 = vmul.f32 %v9825_v23, %v3894_v48  ;;  %v4234_v6 = vpop.f32.mrf.mxu2  ;;  %v10534_v33 = vld [vmem:[#allocation34_spill] sm:$0xff] }
 0x7e4   : > { %v3930_v1 = vmul.f32 %v9825_v23, %v3895_v18  ;;  %v5256_v5 = vadd.f32 %v5224_v10, %v5191_v12  ;;  %v4559_v47 = vmul.f32 0.7978846, %v4495_v53  ;;  %v4684_v52 = vadd.f32 1.0, %v6415_v13  ;;  %v5124_v24 = vpop.f32.mrf.mxu0 }
 0x7e5   : > { %v4368_v56 = vmul.f32 %v4304_v28, %v9969_v54  ;;  %v6417_v11 = vpop.eup %6416  ;;  %v4857_v14 = vpack.c.bf16 %v4811_v30, %v4809_v35  ;;  %v3964_v62 = vadd.f32 %v9848_v22, %v3929_v50  ;;  %v9986_v41 = vadd.f32 %v4234_v6, %v9136_v49  ;;  %v4147_v7 = vpop.f32.mrf.mxu1 }
 0x7e6   : > { %v3965_v51 = vadd.f32 %v9848_v22, %v3930_v1  ;;  %6420 = vtanh.f32 %v4559_v47  ;;  %5288 = vxpose.xlu1.b32.cont [9/16] %v5256_v5, 128  ;;  %v5125_v2 = vadd.f32 %v5124_v24, %v5036_v31  ;;  %v4748_v13 = vmul.f32 0.5, %v4684_v52 }
 0x7e7   : > { %v4432_v40 = vmul.f32 0.044715, %v4368_v56  ;;  %5141 = vmatmul.bf16.gmra.mxu0 %v4857_v14  ;;  %v4305_v60 = vmul.f32 %v9986_v41, %v9986_v41  ;;  %v9992_v57 = vadd.f32 %v4147_v7, %v9091_v37  ;;  %v5225_v18 = vmul.f32 %v9710_v38, %v10534_v33 }
 0x7e8   : > { %v6419_v48 = vpop.eup %6418  ;;  %v3982_v19 = vpack.c.bf16 %v3965_v51, %v3964_v62  ;;  %v5192_v16 = vmul.f32 %v9708_v34, %v5125_v2  ;;  %v4685_v61 = vadd.f32 1.0, %v6417_v11  ;;  %v4812_v35 = vmul.f32 %v4748_v13, %v9896_v55 }
 0x7e9   : > { %v4496_v15 = vadd.f32 %v4432_v40, %v9969_v54  ;;  %v4686_v0 = vadd.f32 1.0, %v6419_v48  ;;  %v4369_v20 = vmul.f32 %v4305_v60, %v9986_v41  ;;  %v4306_v10 = vmul.f32 %v9992_v57, %v9992_v57 }
 0x7ea   : > { %v5257_v42 = vadd.f32 %v5225_v18, %v5192_v16  ;;  %v4749_v5 = vmul.f32 0.5, %v4685_v61 }
 0x7eb   : > { %v4560_v39 = vmul.f32 0.7978846, %v4496_v15  ;;  %v4750_v43 = vmul.f32 0.5, %v4686_v0  ;;  %v4433_v53 = vmul.f32 0.044715, %v4369_v20  ;;  %v4370_v28 = vmul.f32 %v4306_v10, %v9992_v57  ;;  %v4236_v30 = vpop.f32.mrf.mxu2 }
 0x7ec   : > { %4164 = vmatmul.bf16.gmra.mxu1 %v3982_v19  ;;  %4253 = vmatmul.bf16.gmra.mxu2 %v3982_v19  ;;  %v6421_v12 = vpop.eup %6420  ;;  %v4237_v6 = vadd.f32 %v4236_v30, %v9136_v49  ;;  %v10535_v19 = vld [vmem:[#allocation35_spill] sm:$0xff] }
 0x7ed   : > { %6422 = vtanh.f32 %v4560_v39  ;;  %v4814_v50 = vmul.f32 %v4750_v43, %v9930_v26  ;;  %v4687_v1 = vadd.f32 1.0, %v6421_v12  ;;  %v4497_v47 = vadd.f32 %v4433_v53, %v9986_v41  ;;  %v10536_v53 = vld [vmem:[#allocation36_spill] sm:$0xff] }
 0x7ee   : > { %v5038_v31 = vpop.f32.mrf.mxu3  ;;  %v4434_v56 = vmul.f32 0.044715, %v4370_v28  ;;  %v5127_v11 = vpop.f32.mrf.mxu0  ;;  %5289 = vxpose.xlu1.b32.cont [10/16] %v5257_v42, 128  ;;  %v4307_v24 = vmul.f32 %v4237_v6, %v4237_v6  ;;  %v4813_v26 = vmul.f32 %v4749_v5, %v9923_v8  ;;  %v5226_v13 = vmul.f32 %v9710_v38, %v10535_v19 }
 0x7ef   : > { %v5039_v52 = vadd.f32 %v9701_v25, %v5038_v31  ;;  %v4858_v14 = vpack.c.bf16 %v4814_v50, %v4812_v35  ;;  %v4751_v62 = vmul.f32 0.5, %v4687_v1  ;;  %v4561_v51 = vmul.f32 0.7978846, %v4497_v47  ;;  %v3479_v19 = vpop.xlane.xlu2 %3478 }
 0x7f0   : > { %v4498_v55 = vadd.f32 %v4434_v56, %v9992_v57  ;;  %v4371_v15 = vmul.f32 %v4307_v24, %v4237_v6  ;;  %v5227_v28 = vmul.f32 %v9710_v38, %v10536_v53 }
 0x7f1   : > { %v5128_v40 = vadd.f32 %v5127_v11, %v5039_v52  ;;  %v4815_v48 = vmul.f32 %v4751_v62, %v9956_v59  ;;  %6424 = vtanh.f32 %v4561_v51 }
 0x7f2   : > { %v4562_v2 = vmul.f32 0.7978846, %v4498_v55  ;;  %v4435_v33 = vmul.f32 0.044715, %v4371_v15 }
 0x7f3   : > { %v5193_v7 = vmul.f32 %v9708_v34, %v5128_v40  ;;  %v6423_v60 = vpop.eup %6422  ;;  %5057 = vmatmul.bf16.gmra.mxu3 %v4858_v14  ;;  %v4859_v0 = vpack.c.bf16 %v4815_v48, %v4813_v26  ;;  %v10537_v26 = vld [vmem:[#allocation37_spill] sm:$0xff] }
 0x7f4   : > { %6426 = vtanh.f32 %v4562_v2  ;;  %v4499_v61 = vadd.f32 %v4435_v33, %v4237_v6  ;;  %v4688_v59 = vadd.f32 1.0, %v6423_v60  ;;  %v5228_v48 = vmul.f32 %v9710_v38, %v10537_v26 }
 0x7f5   : > { %v5258_v16 = vadd.f32 %v5226_v13, %v5193_v7 }
 0x7f6   : > { %v5040_v18 = vpop.f32.mrf.mxu3  ;;  %v5129_v39 = vpop.f32.mrf.mxu0  ;;  %v4563_v20 = vmul.f32 0.7978846, %v4499_v61  ;;  %v4752_v31 = vmul.f32 0.5, %v4688_v59  ;;  %v10538_v61 = vld [vmem:[#allocation38_spill] sm:$0xff] }
 0x7f7   : > { %v5041_v8 = vadd.f32 %v9701_v25, %v5040_v18  ;;  %5290 = vxpose.xlu1.b32.cont [11/16] %v5258_v16, 128  ;;  %5146 = vmatmul.bf16.gmra.mxu0 %v4859_v0  ;;  %v6425_v42 = vpop.eup %6424  ;;  %v3512_v16 = vmul.f32 %v3479_v19, %v7240_v17 }
 0x7f8   : > { %6428 = vtanh.f32 %v4563_v20  ;;  %v4689_v5 = vadd.f32 1.0, %v6425_v42  ;;  %v4816_v52 = vmul.f32 %v4752_v31, %v9969_v54 }
 0x7f9   : > { %v5130_v10 = vadd.f32 %v5129_v39, %v5041_v8  ;;  %v5229_v8 = vmul.f32 %v9710_v38, %v10538_v61  ;;  %v3544_v39 = vadd.f32 1e-05, %v3512_v16 }
 0x7fa   : > { %v6427_v43 = vpop.eup %6426  ;;  %v4753_v40 = vmul.f32 0.5, %v4689_v5 }
 0x7fb   : > { %v5194_v12 = vmul.f32 %v9708_v34, %v5130_v10  ;;  %v4690_v35 = vadd.f32 1.0, %v6427_v43  ;;  %6430 = vrsqrt.f32 %v3544_v39  ;;  %vm3852_vm6 = vweird.f32 %v3544_v39 }
 0x7fc   : > { %v4817_v15 = vmul.f32 %v4753_v40, %v9986_v41 }
 0x7fd   : > { %v5259_v30 = vadd.f32 %v5227_v28, %v5194_v12  ;;  %v4754_v1 = vmul.f32 0.5, %v4690_v35 }
 0x7fe   : > { %v5043_v50 = vpop.f32.mrf.mxu3  ;;  %v5132_v56 = vpop.f32.mrf.mxu0 }
 0x7ff   : > { %v5044_v47 = vadd.f32 %v9701_v25, %v5043_v50  ;;  %5291 = vxpose.xlu1.b32.cont [12/16] %v5259_v30, 128  ;;  %v4818_v11 = vmul.f32 %v4754_v1, %v9992_v57  ;;  %v6429_v14 = vpop.eup %6428 }
 0x800   : > { %v4691_v55 = vadd.f32 1.0, %v6429_v14 }
 0x801   : > { %v5133_v62 = vadd.f32 %v5132_v56, %v5044_v47  ;;  %v4860_v51 = vpack.c.bf16 %v4818_v11, %v4816_v52  ;;  %v6431_v41 = vpop.eup %6430 }
 0x802   : > { %v4755_v2 = vmul.f32 0.5, %v4691_v55  ;;  %vm3853_vm5 = vweird.f32 %v6431_v41 }
 0x803   : > { %v5195_v24 = vmul.f32 %v9708_v34, %v5133_v62  ;;  %5062 = vmatmul.bf16.gmra.mxu3 %v4860_v51  ;;  %vm3854_vm3 = vmor %vm3852_vm6, %vm3853_vm5 }
 0x804   : > { %v4819_v54 = vmul.f32 %v4755_v2, %v4237_v6  ;;  %v3847_v6 = vmul.f32 %v6431_v41, %v3544_v39 }
 0x805   : > { %v5260_v7 = vadd.f32 %v5228_v48, %v5195_v24 }
 0x806   : > { %v5045_v13 = vpop.f32.mrf.mxu3  ;;  %v5134_v60 = vpop.f32.mrf.mxu0  ;;  %v4861_v0 = vpack.c.bf16 %v4819_v54, %v4817_v15  ;;  %v3848_v20 = vmul.f32 %v6431_v41, %v3847_v6 }
 0x807   : > { %v5046_v57 = vadd.f32 %v9701_v25, %v5045_v13  ;;  %5292 = vxpose.xlu1.b32.cont [13/16] %v5260_v7, 128 }
 0x808   : > { %5151 = vmatmul.bf16.gmra.mxu0 %v4861_v0  ;;  %v3849_v42 = vmul.f32 0.5, %v3848_v20 }
 0x809   : > { %v5135_v33 = vadd.f32 %v5134_v60, %v5046_v57 }
 0x80a   : > { %v3850_v12 = vsub.f32 1.5, %v3849_v42 }
 0x80b   : > { %v5196_v18 = vmul.f32 %v9708_v34, %v5135_v33 }
 0x80c   : > { %v3851_v28 = vmul.f32 %v6431_v41, %v3850_v12 }
 0x80d   : > { %v5261_v59 = vadd.f32 %v5229_v8, %v5196_v18 }
 0x80e   : > { %v3855_v30 = vsel %vm3854_vm3, %v6431_v41, %v3851_v28 }
 0x80f   : > { %5293 = vxpose.xlu1.b32.cont [14/16] %v5261_v59, 128  ;;  %v3896_v1 = vmul.f32 %v3855_v30, %v9664_v46 }
 0x811   : > { %v3931_v14 = vmul.f32 %v9825_v23, %v3896_v1 }
 0x813   : > { %v3966_v48 = vadd.f32 %v9848_v22, %v3931_v14 }
 0x821   : > { %v3481_v25 = vpop.xlane.xlu0 %3480 }
 0x822   : > { %v3513_v10 = vmul.f32 %v3481_v25, %v7240_v17 }
 0x824   : > { %v3545_v43 = vadd.f32 1e-05, %v3513_v10 }
 0x826   : > { %6432 = vrsqrt.f32 %v3545_v43  ;;  %vm3862_vm8 = vweird.f32 %v3545_v43 }
 0x82c   : > { %v6433_v53 = vpop.eup %6432 }
 0x82d   : > { %v3857_v35 = vmul.f32 %v6433_v53, %v3545_v43  ;;  %vm3863_vm7 = vweird.f32 %v6433_v53 }
 0x82e   : > { %vm3864_vm9 = vmor %vm3862_vm8, %vm3863_vm7 }
 0x82f   : > { %v3858_v31 = vmul.f32 %v6433_v53, %v3857_v35 }
 0x831   : > { %v3859_v50 = vmul.f32 0.5, %v3858_v31 }
 0x833   : > { %v3860_v5 = vsub.f32 1.5, %v3859_v50  ;;  %v4150_v47 = vpop.f32.mrf.mxu1 }
 0x834   : > { %v10031_v17 = vadd.f32 %v4150_v47, %v9091_v37 }
 0x835   : > { %v3861_v56 = vmul.f32 %v6433_v53, %v3860_v5 }
 0x836   : > { %v4308_v52 = vmul.f32 %v10031_v17, %v10031_v17 }
 0x837   : > { %v3865_v11 = vsel %vm3864_vm9, %v6433_v53, %v3861_v56 }
 0x838   : > { %v3897_v62 = vmul.f32 %v3865_v11, %v9738_v27  ;;  %v4372_v51 = vmul.f32 %v4308_v52, %v10031_v17 }
 0x839   : > { %v4239_v46 = vpop.f32.mrf.mxu2 }
 0x83a   : > { %v4436_v55 = vmul.f32 0.044715, %v4372_v51  ;;  %v10039_v40 = vadd.f32 %v4239_v46, %v9136_v49  ;;  %v3932_v24 = vmul.f32 %v9825_v23, %v3897_v62 }
 0x83b   : > { %v4152_v26 = vpop.f32.mrf.mxu1 }
 0x83c   : > { %v4500_v2 = vadd.f32 %v4436_v55, %v10031_v17  ;;  %v4309_v7 = vmul.f32 %v10039_v40, %v10039_v40  ;;  %v4153_v19 = vadd.f32 %v4152_v26, %v9091_v37  ;;  %v3967_v27 = vadd.f32 %v9848_v22, %v3932_v24 }
 0x83e   : > { %v4564_v13 = vmul.f32 0.7978846, %v4500_v2  ;;  %v4373_v15 = vmul.f32 %v4309_v7, %v10039_v40  ;;  %v4310_v54 = vmul.f32 %v4153_v19, %v4153_v19  ;;  %v3983_v57 = vpack.c.bf16 %v3967_v27, %v3966_v48 }
 0x840   : > { %v4437_v60 = vmul.f32 0.044715, %v4373_v15  ;;  %v4374_v0 = vmul.f32 %v4310_v54, %v4153_v19  ;;  %4169 = vmatmul.bf16.gmra.mxu1 %v3983_v57  ;;  %4258 = vmatmul.bf16.gmra.mxu2 %v3983_v57  ;;  %6434 = vtanh.f32 %v4564_v13  ;;  %v10074_v13 = vld [vmem:[%s10518_s15] ss:$0 sm:$0xff] }
 0x841   : > { %v4241_v23 = vpop.f32.mrf.mxu2 }
 0x842   : > { %v4501_v16 = vadd.f32 %v4437_v60, %v10039_v40  ;;  %v4438_v33 = vmul.f32 0.044715, %v4374_v0  ;;  %v4242_v18 = vadd.f32 %v4241_v23, %v9136_v49 }
 0x844   : > { %v4565_v61 = vmul.f32 0.7978846, %v4501_v16  ;;  %v4502_v8 = vadd.f32 %v4438_v33, %v4153_v19  ;;  %v4311_v39 = vmul.f32 %v4242_v18, %v4242_v18 }
 0x845   : > { %v4155_v41 = vpop.f32.mrf.mxu1 }
 0x846   : > { %v4566_v22 = vmul.f32 0.7978846, %v4502_v8  ;;  %v4375_v59 = vmul.f32 %v4311_v39, %v4242_v18  ;;  %6436 = vtanh.f32 %v4565_v61  ;;  %v6435_v6 = vpop.eup %6434  ;;  %v10052_v25 = vadd.f32 %v4155_v41, %v9091_v37  ;;  %v10539_v41 = vld [vmem:[#allocation39_spill] sm:$0xff] }
 0x847   : > { %v4692_v43 = vadd.f32 1.0, %v6435_v6  ;;  %v5230_v6 = vmul.f32 %v9710_v38, %v10539_v41 }
 0x848   : > { %6438 = vtanh.f32 %v4566_v22  ;;  %v4439_v20 = vmul.f32 0.044715, %v4375_v59  ;;  %v4312_v42 = vmul.f32 %v10052_v25, %v10052_v25 }
 0x849   : > { %v4756_v47 = vmul.f32 0.5, %v4692_v43 }
 0x84a   : > { %v4503_v10 = vadd.f32 %v4439_v20, %v4242_v18  ;;  %v4376_v53 = vmul.f32 %v4312_v42, %v10052_v25 }
 0x84b   : > { %v4244_v35 = vpop.f32.mrf.mxu2  ;;  %v4820_v24 = vmul.f32 %v4756_v47, %v10031_v17 }
 0x84c   : > { %v4567_v12 = vmul.f32 0.7978846, %v4503_v10  ;;  %v6437_v28 = vpop.eup %6436  ;;  %v4440_v30 = vmul.f32 0.044715, %v4376_v53  ;;  %v10058_v50 = vadd.f32 %v4244_v35, %v9136_v49 }
 0x84d   : > { %v4157_v1 = vpop.f32.mrf.mxu1  ;;  %v4693_v62 = vadd.f32 1.0, %v6437_v28 }
 0x84e   : > { %v6439_v31 = vpop.eup %6438  ;;  %6440 = vtanh.f32 %v4567_v12  ;;  %v4504_v56 = vadd.f32 %v4440_v30, %v10052_v25  ;;  %v4313_v52 = vmul.f32 %v10058_v50, %v10058_v50  ;;  %v10064_v11 = vadd.f32 %v4157_v1, %v9091_v37 }
 0x84f   : > { %v4694_v5 = vadd.f32 1.0, %v6439_v31  ;;  %v4757_v0 = vmul.f32 0.5, %v4693_v62 }
 0x850   : > { %v4568_v51 = vmul.f32 0.7978846, %v4504_v56  ;;  %v4377_v46 = vmul.f32 %v4313_v52, %v10058_v50  ;;  %v4314_v55 = vmul.f32 %v10064_v11, %v10064_v11 }
 0x851   : > { %v4758_v14 = vmul.f32 0.5, %v4694_v5  ;;  %v4821_v20 = vmul.f32 %v4757_v0, %v10039_v40 }
 0x852   : > { %v4441_v2 = vmul.f32 0.044715, %v4377_v46  ;;  %v4378_v7 = vmul.f32 %v4314_v55, %v10064_v11  ;;  %v5048_v27 = vpop.f32.mrf.mxu3  ;;  %6442 = vtanh.f32 %v4568_v51  ;;  %v10540_v55 = vld [vmem:[#allocation40_spill] sm:$0xff] }
 0x853   : > { %v4822_v26 = vmul.f32 %v4758_v14, %v4153_v19  ;;  %v5049_v15 = vadd.f32 %v10074_v13, %v5048_v27  ;;  %v4246_v54 = vpop.f32.mrf.mxu2 }
 0x854   : > { %v6441_v48 = vpop.eup %6440  ;;  %v4505_v17 = vadd.f32 %v4441_v2, %v10058_v50  ;;  %v4442_v19 = vmul.f32 0.044715, %v4378_v7  ;;  %v5137_v23 = vpop.f32.mrf.mxu0  ;;  %v10079_v16 = vadd.f32 %v4246_v54, %v9136_v49 }
 0x855   : > { %v4862_v57 = vpack.c.bf16 %v4822_v26, %v4820_v24  ;;  %v4695_v60 = vadd.f32 1.0, %v6441_v48  ;;  %v5138_v33 = vadd.f32 %v5137_v23, %v5049_v15  ;;  %v5231_v24 = vmul.f32 %v9710_v38, %v10540_v55 }
 0x856   : > { %v4569_v8 = vmul.f32 0.7978846, %v4505_v17  ;;  %v4506_v39 = vadd.f32 %v4442_v19, %v10064_v11  ;;  %v4315_v22 = vmul.f32 %v10079_v16, %v10079_v16 }
 0x857   : > { %5067 = vmatmul.bf16.gmra.mxu3 %v4862_v57  ;;  %v4759_v61 = vmul.f32 0.5, %v4695_v60  ;;  %v5197_v59 = vmul.f32 %v9708_v34, %v5138_v33 }
 0x858   : > { %v4570_v42 = vmul.f32 0.7978846, %v4506_v39  ;;  %v4379_v43 = vmul.f32 %v4315_v22, %v10079_v16  ;;  %6444 = vtanh.f32 %v4569_v8  ;;  %v6443_v35 = vpop.eup %6442 }
 0x859   : > { %v4823_v10 = vmul.f32 %v4759_v61, %v4242_v18  ;;  %v5262_v12 = vadd.f32 %v5230_v6, %v5197_v59  ;;  %v4160_v53 = vpop.f32.mrf.mxu1  ;;  %v4696_v52 = vadd.f32 1.0, %v6443_v35 }
 0x85a   : > { %6446 = vtanh.f32 %v4570_v42  ;;  %v4443_v31 = vmul.f32 0.044715, %v4379_v43  ;;  %v10090_v30 = vadd.f32 %v4160_v53, %v9091_v37  ;;  %v5050_v1 = vpop.f32.mrf.mxu3 }
 0x85b   : > { %v4863_v28 = vpack.c.bf16 %v4823_v10, %v4821_v20  ;;  %v5051_v5 = vadd.f32 %v10074_v13, %v5050_v1  ;;  %5294 = vxpose.xlu1.b32.cont [15/16] %v5262_v12, 128  ;;  %v4760_v57 = vmul.f32 0.5, %v4696_v52 }
 0x85c   : > { %v4507_v40 = vadd.f32 %v4443_v31, %v10079_v16  ;;  %v4316_v18 = vmul.f32 %v10090_v30, %v10090_v30  ;;  %v5139_v47 = vpop.f32.mrf.mxu0 }
 0x85d   : > { %5156 = vmatmul.bf16.gmra.mxu0 %v4863_v28  ;;  %v5140_v56 = vadd.f32 %v5139_v47, %v5051_v5  ;;  %v4824_v22 = vmul.f32 %v4760_v57, %v10052_v25 }
 0x85e   : > { %v4571_v14 = vmul.f32 0.7978846, %v4507_v40  ;;  %v4380_v62 = vmul.f32 %v4316_v18, %v10090_v30  ;;  %v6445_v51 = vpop.eup %6444 }
 0x85f   : > { %v5198_v46 = vmul.f32 %v9708_v34, %v5140_v56  ;;  %v4249_v26 = vpop.f32.mrf.mxu2  ;;  %v4697_v23 = vadd.f32 1.0, %v6445_v51 }
 0x860   : > { %v6447_v48 = vpop.eup %6446  ;;  %6448 = vtanh.f32 %v4571_v14  ;;  %v4444_v2 = vmul.f32 0.044715, %v4380_v62  ;;  %v10101_v7 = vadd.f32 %v4249_v26, %v9136_v49 }
 0x861   : > { %v5263_v27 = vadd.f32 %v5231_v24, %v5198_v46  ;;  %v4162_v15 = vpop.f32.mrf.mxu1  ;;  %v4698_v54 = vadd.f32 1.0, %v6447_v48  ;;  %v4761_v53 = vmul.f32 0.5, %v4697_v23  ;;  %v10541_v46 = vld [vmem:[#allocation41_spill] sm:$0xff] }
 0x862   : > { %v4508_v60 = vadd.f32 %v4444_v2, %v10090_v30  ;;  %v4317_v0 = vmul.f32 %v10101_v7, %v10101_v7  ;;  %v10107_v17 = vadd.f32 %v4162_v15, %v9091_v37  ;;  %v5232_v55 = vmul.f32 %v9710_v38, %v10541_v46 }
 0x863   : > { %5295 = vxpose.xlu1.b32.end [16/16] %v5263_v27, 128  ;;  %v4762_v19 = vmul.f32 0.5, %v4698_v54  ;;  %v4825_v52 = vmul.f32 %v4761_v53, %v10058_v50 }
 0x864   : > { %v4572_v33 = vmul.f32 0.7978846, %v4508_v60  ;;  %v4381_v61 = vmul.f32 %v4317_v0, %v10101_v7  ;;  %v4318_v8 = vmul.f32 %v10107_v17, %v10107_v17  ;;  %v5142_v39 = vpop.f32.mrf.mxu0 }
 0x865   : > { %v4826_v59 = vmul.f32 %v4762_v19, %v10064_v11 }
 0x866   : > { %v6449_v41 = vpop.eup %6448  ;;  %v4445_v6 = vmul.f32 0.044715, %v4381_v61  ;;  %v4382_v20 = vmul.f32 %v4318_v8, %v10107_v17  ;;  %6450 = vtanh.f32 %v4572_v33  ;;  %v5053_v10 = vpop.f32.mrf.mxu3 }
 0x867   : > { %v4251_v42 = vpop.f32.mrf.mxu2  ;;  %v4864_v43 = vpack.c.bf16 %v4826_v59, %v4824_v22  ;;  %v4699_v12 = vadd.f32 1.0, %v6449_v41  ;;  %v5054_v31 = vadd.f32 %v10074_v13, %v5053_v10 }
 0x868   : > { %v4509_v28 = vadd.f32 %v4445_v6, %v10101_v7  ;;  %v4446_v35 = vmul.f32 0.044715, %v4382_v20  ;;  %v10118_v1 = vadd.f32 %v4251_v42, %v9136_v49  ;;  %v10542_v20 = vld [vmem:[#allocation42_spill] sm:$0xff] }
 0x869   : > { %v4165_v25 = vpop.f32.mrf.mxu1  ;;  %5072 = vmatmul.bf16.gmra.mxu3 %v4864_v43  ;;  %v4763_v11 = vmul.f32 0.5, %v4699_v12  ;;  %v5143_v18 = vadd.f32 %v5142_v39, %v5054_v31  ;;  %v5233_v10 = vmul.f32 %v9710_v38, %v10542_v20 }
 0x86a   : > { %v4573_v5 = vmul.f32 0.7978846, %v4509_v28  ;;  %v4510_v40 = vadd.f32 %v4446_v35, %v10107_v17  ;;  %v4319_v47 = vmul.f32 %v10118_v1, %v10118_v1  ;;  %v10124_v56 = vadd.f32 %v4165_v25, %v9091_v37 }
 0x86b   : > { %v4827_v14 = vmul.f32 %v4763_v11, %v10079_v16  ;;  %v5199_v51 = vmul.f32 %v9708_v34, %v5143_v18 }
 0x86c   : > { %v4574_v62 = vmul.f32 0.7978846, %v4510_v40  ;;  %v4383_v24 = vmul.f32 %v4319_v47, %v10118_v1  ;;  %v6451_v26 = vpop.eup %6450  ;;  %6452 = vtanh.f32 %v4573_v5  ;;  %v4320_v48 = vmul.f32 %v10124_v56, %v10124_v56  ;;  %v5144_v2 = vpop.f32.mrf.mxu0 }
 0x86d   : > { %v4865_v27 = vpack.c.bf16 %v4827_v14, %v4825_v52  ;;  %v5264_v15 = vadd.f32 %v5232_v55, %v5199_v51  ;;  %v4700_v61 = vadd.f32 1.0, %v6451_v26 }
 0x86e   : > { %6454 = vtanh.f32 %v4574_v62  ;;  %v4447_v50 = vmul.f32 0.044715, %v4383_v24  ;;  %v4384_v16 = vmul.f32 %v4320_v48, %v10124_v56  ;;  %v5055_v54 = vpop.f32.mrf.mxu3 }
 0x86f   : > { %v4254_v57 = vpop.f32.mrf.mxu2  ;;  %5161 = vmatmul.bf16.gmra.mxu0 %v4865_v27  ;;  %v5056_v0 = vadd.f32 %v10074_v13, %v5055_v54  ;;  %5328 = vxpose.xlu2.b32.start [1/16] %v5264_v15, 128  ;;  %v4764_v25 = vmul.f32 0.5, %v4700_v61 }
 0x870   : > { %v4511_v60 = vadd.f32 %v4447_v50, %v10118_v1  ;;  %v10138_v19 = vadd.f32 %v4254_v57, %v9136_v49  ;;  %v4448_v23 = vmul.f32 0.044715, %v4384_v16 }
 0x871   : > { %v4167_v33 = vpop.f32.mrf.mxu1  ;;  %v5145_v39 = vadd.f32 %v5144_v2, %v5056_v0  ;;  %v4828_v24 = vmul.f32 %v4764_v25, %v10090_v30 }
 0x872   : > { %v4575_v8 = vmul.f32 0.7978846, %v4511_v60  ;;  %v4321_v22 = vmul.f32 %v10138_v19, %v10138_v19  ;;  %v10143_v59 = vadd.f32 %v4167_v33, %v9091_v37  ;;  %v6453_v41 = vpop.eup %6452  ;;  %v4512_v6 = vadd.f32 %v4448_v23, %v10124_v56  ;;  %v10543_v23 = vld [vmem:[#allocation43_spill] sm:$0xff] }
 0x873   : > { %v5200_v43 = vmul.f32 %v9708_v34, %v5145_v39  ;;  %v4701_v14 = vadd.f32 1.0, %v6453_v41  ;;  %v5234_v33 = vmul.f32 %v9710_v38, %v10543_v23 }
 0x874   : > { %v6455_v42 = vpop.eup %6454  ;;  %6456 = vtanh.f32 %v4575_v8  ;;  %v4385_v12 = vmul.f32 %v4321_v22, %v10138_v19  ;;  %v4322_v53 = vmul.f32 %v10143_v59, %v10143_v59  ;;  %v4576_v28 = vmul.f32 0.7978846, %v4512_v6  ;;  %v5147_v35 = vpop.f32.mrf.mxu0 }
 0x875   : > { %v4702_v31 = vadd.f32 1.0, %v6455_v42  ;;  %v5265_v11 = vadd.f32 %v5233_v10, %v5200_v43  ;;  %v4765_v57 = vmul.f32 0.5, %v4701_v14 }
 0x876   : > { %v4449_v5 = vmul.f32 0.044715, %v4385_v12  ;;  %v4386_v40 = vmul.f32 %v4322_v53, %v10143_v59  ;;  %6458 = vtanh.f32 %v4576_v28  ;;  %v5058_v18 = vpop.f32.mrf.mxu3 }
 0x877   : > { %v4256_v47 = vpop.f32.mrf.mxu2  ;;  %v4766_v52 = vmul.f32 0.5, %v4702_v31  ;;  %v5059_v46 = vadd.f32 %v10074_v13, %v5058_v18  ;;  %5329 = vxpose.xlu2.b32.cont [2/16] %v5265_v11, 128  ;;  %v4829_v6 = vmul.f32 %v4765_v57, %v10101_v7  ;;  %v10544_v11 = vld [vmem:[#allocation44_spill] sm:$0xff] }
 0x878   : > { %v4513_v62 = vadd.f32 %v4449_v5, %v10138_v19  ;;  %v4450_v51 = vmul.f32 0.044715, %v4386_v40  ;;  %v4257_v55 = vadd.f32 %v4256_v47, %v9136_v49  ;;  %v5235_v5 = vmul.f32 %v9710_v38, %v10544_v11 }
 0x879   : > { %v4830_v26 = vmul.f32 %v4766_v52, %v10107_v17  ;;  %v5148_v15 = vadd.f32 %v5147_v35, %v5059_v46 }
 0x87a   : > { %v6457_v48 = vpop.eup %6456  ;;  %v4577_v2 = vmul.f32 0.7978846, %v4513_v62  ;;  %v4514_v27 = vadd.f32 %v4450_v51, %v10143_v59  ;;  %v4323_v50 = vmul.f32 %v4257_v55, %v4257_v55 }
 0x87b   : > { %v4866_v16 = vpack.c.bf16 %v4830_v26, %v4828_v24  ;;  %v4703_v54 = vadd.f32 1.0, %v6457_v48  ;;  %v5201_v0 = vmul.f32 %v9708_v34, %v5148_v15 }
 0x87c   : > { %v4578_v60 = vmul.f32 0.7978846, %v4514_v27  ;;  %v4387_v61 = vmul.f32 %v4323_v50, %v4257_v55  ;;  %v6459_v8 = vpop.eup %6458  ;;  %6460 = vtanh.f32 %v4577_v2  ;;  %v5149_v30 = vpop.f32.mrf.mxu0  ;;  %v10545_v50 = vld [vmem:[#allocation45_spill] sm:$0xff] }
 0x87d   : > { %5077 = vmatmul.bf16.gmra.mxu3 %v4866_v16  ;;  %v4767_v17 = vmul.f32 0.5, %v4703_v54  ;;  %v5266_v39 = vadd.f32 %v5234_v33, %v5201_v0  ;;  %v4704_v12 = vadd.f32 1.0, %v6459_v8  ;;  %v5236_v16 = vmul.f32 %v9710_v38, %v10545_v50 }
 0x87e   : > { %6462 = vtanh.f32 %v4578_v60  ;;  %v4451_v22 = vmul.f32 0.044715, %v4387_v61  ;;  %v5060_v41 = vpop.f32.mrf.mxu3 }
 0x87f   : > { %v4831_v20 = vmul.f32 %v4767_v17, %v10118_v1  ;;  %v5061_v42 = vadd.f32 %v10074_v13, %v5060_v41  ;;  %5330 = vxpose.xlu2.b32.cont [3/16] %v5266_v39, 128  ;;  %v4768_v40 = vmul.f32 0.5, %v4704_v12 }
 0x880   : > { %v4515_v10 = vadd.f32 %v4451_v22, %v4257_v55 }
 0x881   : > { %v4867_v43 = vpack.c.bf16 %v4831_v20, %v4829_v6  ;;  %v5150_v28 = vadd.f32 %v5149_v30, %v5061_v42  ;;  %v4832_v51 = vmul.f32 %v4768_v40, %v10124_v56  ;;  %v5237_v30 = vmul.f32 %v9710_v38, %v9011_v21 }
 0x882   : > { %v4579_v53 = vmul.f32 0.7978846, %v4515_v10  ;;  %v6461_v35 = vpop.eup %6460 }
 0x883   : > { %5166 = vmatmul.bf16.gmra.mxu0 %v4867_v43  ;;  %v5202_v25 = vmul.f32 %v9708_v34, %v5150_v28  ;;  %v4705_v14 = vadd.f32 1.0, %v6461_v35 }
 0x884   : > { %v6463_v31 = vpop.eup %6462  ;;  %6464 = vtanh.f32 %v4579_v53 }
 0x885   : > { %v4706_v7 = vadd.f32 1.0, %v6463_v31  ;;  %v5267_v1 = vadd.f32 %v5235_v5, %v5202_v25  ;;  %v5152_v47 = vpop.f32.mrf.mxu0  ;;  %v4769_v27 = vmul.f32 0.5, %v4705_v14 }
 0x886   : > { %v5063_v18 = vpop.f32.mrf.mxu3 }
 0x887   : > { %v4770_v52 = vmul.f32 0.5, %v4706_v7  ;;  %v5064_v62 = vadd.f32 %v10074_v13, %v5063_v18  ;;  %5331 = vxpose.xlu2.b32.cont [4/16] %v5267_v1, 128  ;;  %v4833_v0 = vmul.f32 %v4769_v27, %v10138_v19 }
 0x889   : > { %v4834_v46 = vmul.f32 %v4770_v52, %v10143_v59  ;;  %v5153_v26 = vadd.f32 %v5152_v47, %v5064_v62 }
 0x88a   : > { %v6465_v24 = vpop.eup %6464 }
 0x88b   : > { %v4868_v48 = vpack.c.bf16 %v4834_v46, %v4832_v51  ;;  %v4707_v2 = vadd.f32 1.0, %v6465_v24  ;;  %v5203_v15 = vmul.f32 %v9708_v34, %v5153_v26 }
 0x88d   : > { %5082 = vmatmul.bf16.gmra.mxu3 %v4868_v48  ;;  %v4771_v54 = vmul.f32 0.5, %v4707_v2  ;;  %v5268_v57 = vadd.f32 %v5236_v16, %v5203_v15  ;;  %v5154_v59 = vpop.f32.mrf.mxu0 }
 0x88e   : > { %v5065_v60 = vpop.f32.mrf.mxu3 }
 0x88f   : > { %v4835_v23 = vmul.f32 %v4771_v54, %v4257_v55  ;;  %v5066_v56 = vadd.f32 %v10074_v13, %v5065_v60  ;;  %5332 = vxpose.xlu2.b32.cont [5/16] %v5268_v57, 128 }
 0x891   : > { %v4869_v33 = vpack.c.bf16 %v4835_v23, %v4833_v0  ;;  %v5155_v61 = vadd.f32 %v5154_v59, %v5066_v56  ;;  %v5238_v23 = vmul.f32 %v9710_v38, %v9017_v36  ;;  %v5239_v36 = vmul.f32 %v9710_v38, %v9129_v45 }
 0x893   : > { %5171 = vmatmul.bf16.gmra.mxu0 %v4869_v33  ;;  %v5204_v8 = vmul.f32 %v9708_v34, %v5155_v61 }
 0x895   : > { %v5269_v17 = vadd.f32 %v5237_v30, %v5204_v8 }
 0x897   : > { %5333 = vxpose.xlu2.b32.cont [6/16] %v5269_v17, 128 }
 0x8bd   : > { %v4170_v39 = vpop.f32.mrf.mxu1 }
 0x8be   : > { %v4171_v22 = vadd.f32 %v4170_v39, %v9091_v37 }
 0x8c0   : > { %v4324_v41 = vmul.f32 %v4171_v22, %v4171_v22 }
 0x8c2   : > { %v4388_v19 = vmul.f32 %v4324_v41, %v4171_v22 }
 0x8c3   : > { %v4259_v55 = vpop.f32.mrf.mxu2 }
 0x8c4   : > { %v4452_v6 = vmul.f32 0.044715, %v4388_v19  ;;  %v4260_v20 = vadd.f32 %v4259_v55, %v9136_v49 }
 0x8c5   : > { %v4172_v10 = vpop.f32.mrf.mxu1 }
 0x8c6   : > { %v4516_v42 = vadd.f32 %v4452_v6, %v4171_v22  ;;  %v4325_v43 = vmul.f32 %v4260_v20, %v4260_v20  ;;  %v4173_v12 = vadd.f32 %v4172_v10, %v9091_v37 }
 0x8c8   : > { %v4580_v53 = vmul.f32 0.7978846, %v4516_v42  ;;  %v4389_v28 = vmul.f32 %v4325_v43, %v4260_v20  ;;  %v4326_v35 = vmul.f32 %v4173_v12, %v4173_v12 }
 0x8ca   : > { %v4453_v21 = vmul.f32 0.044715, %v4389_v28  ;;  %v4390_v31 = vmul.f32 %v4326_v35, %v4173_v12  ;;  %6466 = vtanh.f32 %v4580_v53 }
 0x8cb   : > { %v4261_v25 = vpop.f32.mrf.mxu2 }
 0x8cc   : > { %v4517_v11 = vadd.f32 %v4453_v21, %v4260_v20  ;;  %v4454_v5 = vmul.f32 0.044715, %v4390_v31  ;;  %v4262_v7 = vadd.f32 %v4261_v25, %v9136_v49 }
 0x8ce   : > { %v4581_v40 = vmul.f32 0.7978846, %v4517_v11  ;;  %v4518_v1 = vadd.f32 %v4454_v5, %v4173_v12  ;;  %v4327_v18 = vmul.f32 %v4262_v7, %v4262_v7 }
 0x8d0   : > { %v4582_v47 = vmul.f32 0.7978846, %v4518_v1  ;;  %v4391_v52 = vmul.f32 %v4327_v18, %v4262_v7  ;;  %6468 = vtanh.f32 %v4581_v40  ;;  %v6467_v14 = vpop.eup %6466 }
 0x8d1   : > { %v4708_v51 = vadd.f32 1.0, %v6467_v14  ;;  %v5242_v14 = vmul.f32 %v9710_v38, %v9270_v44 }
 0x8d2   : > { %6470 = vtanh.f32 %v4582_v47  ;;  %v4455_v37 = vmul.f32 0.044715, %v4391_v52 }
 0x8d3   : > { %v4772_v2 = vmul.f32 0.5, %v4708_v51 }
 0x8d4   : > { %v4519_v62 = vadd.f32 %v4455_v37, %v4262_v7 }
 0x8d5   : > { %v4836_v57 = vmul.f32 %v4772_v2, %v4171_v22 }
 0x8d6   : > { %v4583_v46 = vmul.f32 0.7978846, %v4519_v62  ;;  %v6469_v24 = vpop.eup %6468 }
 0x8d7   : > { %v4709_v16 = vadd.f32 1.0, %v6469_v24 }
 0x8d8   : > { %v6471_v26 = vpop.eup %6470  ;;  %6472 = vtanh.f32 %v4583_v46 }
 0x8d9   : > { %v4710_v48 = vadd.f32 1.0, %v6471_v26  ;;  %v4773_v61 = vmul.f32 0.5, %v4709_v16  ;;  %v5243_v26 = vmul.f32 %v9710_v38, %v9333_v58 }
 0x8da   : > { %v5068_v27 = vpop.f32.mrf.mxu3  ;;  %v5157_v15 = vpop.f32.mrf.mxu0 }
 0x8db   : > { %v5069_v49 = vadd.f32 %v10074_v13, %v5068_v27  ;;  %v4774_v50 = vmul.f32 0.5, %v4710_v48  ;;  %v4837_v41 = vmul.f32 %v4773_v61, %v4260_v20  ;;  %v5240_v20 = vmul.f32 %v9710_v38, %v9153_v29 }
 0x8dd   : > { %v5158_v54 = vadd.f32 %v5157_v15, %v5069_v49  ;;  %v4838_v60 = vmul.f32 %v4774_v50, %v4173_v12  ;;  %v5244_v50 = vmul.f32 %v9710_v38, %v9371_v3 }
 0x8de   : > { %v6473_v0 = vpop.eup %6472 }
 0x8df   : > { %v5205_v56 = vmul.f32 %v9708_v34, %v5158_v54  ;;  %v4870_v59 = vpack.c.bf16 %v4838_v60, %v4836_v57  ;;  %v4711_v33 = vadd.f32 1.0, %v6473_v0 }
 0x8e1   : > { %v5270_v8 = vadd.f32 %v5238_v23, %v5205_v56  ;;  %5087 = vmatmul.bf16.gmra.mxu3 %v4870_v59  ;;  %v4775_v30 = vmul.f32 0.5, %v4711_v33  ;;  %v5245_v23 = vmul.f32 %v9710_v38, %v9383_v4 }
 0x8e2   : > { %v5070_v17 = vpop.f32.mrf.mxu3  ;;  %v5159_v22 = vpop.f32.mrf.mxu0 }
 0x8e3   : > { %v5071_v39 = vadd.f32 %v10074_v13, %v5070_v17  ;;  %5334 = vxpose.xlu2.b32.cont [7/16] %v5270_v8, 128  ;;  %v4839_v19 = vmul.f32 %v4775_v30, %v4262_v7  ;;  %v5241_v7 = vmul.f32 %v9710_v38, %v9188_v32  ;;  %v5246_v30 = vmul.f32 %v9710_v38, %v9393_v63 }
 0x8e5   : > { %v5160_v55 = vadd.f32 %v5159_v22, %v5071_v39  ;;  %v4871_v6 = vpack.c.bf16 %v4839_v19, %v4837_v41 }
 0x8e7   : > { %v5206_v10 = vmul.f32 %v9708_v34, %v5160_v55  ;;  %5176 = vmatmul.bf16.gmra.mxu0 %v4871_v6  ;;  %v5247_v55 = vmul.f32 %v9710_v38, %v9494_v9 }
 0x8e9   : > { %v5271_v42 = vadd.f32 %v5239_v36, %v5206_v10  ;;  %v5296_v10 = vpop.trf.xlu1 }
 0x8ea   : > { %5312 = vst [vmem:[%s10225_s17] sm:$0xff] %v5296_v10 }
 0x8eb   : > { %5335 = vxpose.xlu2.b32.cont [8/16] %v5271_v42, 128 }
 0x8ec   : > { %v5073_v43 = vpop.f32.mrf.mxu3  ;;  %v5162_v12 = vpop.f32.mrf.mxu0 }
 0x8ed   : > { %v5074_v53 = vadd.f32 %v10074_v13, %v5073_v43 }
 0x8ef   : > { %v5163_v28 = vadd.f32 %v5162_v12, %v5074_v53 }
 0x8f1   : > { %v5207_v35 = vmul.f32 %v9708_v34, %v5163_v28  ;;  %v5297_v63 = vpop.trf.xlu1 }
 0x8f2   : > { %5313 = vst [vmem:[%s10225_s17 + $0x8] sm:$0xff] %v5297_v63 }
 0x8f3   : > { %v5272_v21 = vadd.f32 %v5240_v20, %v5207_v35 }
 0x8f4   : > { %v5075_v31 = vpop.f32.mrf.mxu3  ;;  %v5164_v11 = vpop.f32.mrf.mxu0 }
 0x8f5   : > { %v5076_v25 = vadd.f32 %v10074_v13, %v5075_v31  ;;  %5336 = vxpose.xlu2.b32.cont [9/16] %v5272_v21, 128 }
 0x8f7   : > { %v5165_v45 = vadd.f32 %v5164_v11, %v5076_v25 }
 0x8f9   : > { %v5208_v5 = vmul.f32 %v9708_v34, %v5165_v45  ;;  %v5298_v9 = vpop.trf.xlu1 }
 0x8fa   : > { %5314 = vst [vmem:[%s10225_s17 + $0x10] sm:$0xff] %v5298_v9 }
 0x8fb   : > { %v5273_v40 = vadd.f32 %v5241_v7, %v5208_v5 }
 0x8fd   : > { %5337 = vxpose.xlu2.b32.cont [10/16] %v5273_v40, 128 }
 0x900   : > { %v5078_v1 = vpop.f32.mrf.mxu3  ;;  %v5167_v18 = vpop.f32.mrf.mxu0 }
 0x901   : > { %v5079_v47 = vadd.f32 %v10074_v13, %v5078_v1 }
 0x903   : > { %v5168_v52 = vadd.f32 %v5167_v18, %v5079_v47 }
 0x905   : > { %v5209_v29 = vmul.f32 %v9708_v34, %v5168_v52 }
 0x907   : > { %v5274_v37 = vadd.f32 %v5242_v14, %v5209_v29 }
 0x908   : > { %v5080_v62 = vpop.f32.mrf.mxu3  ;;  %v5169_v51 = vpop.f32.mrf.mxu0 }
 0x909   : > { %v5081_v46 = vadd.f32 %v10074_v13, %v5080_v62  ;;  %5338 = vxpose.xlu2.b32.cont [11/16] %v5274_v37, 128 }
 0x90b   : > { %v5170_v24 = vadd.f32 %v5169_v51, %v5081_v46 }
 0x90d   : > { %v5210_v32 = vmul.f32 %v9708_v34, %v5170_v24 }
 0x90f   : > { %v5275_v48 = vadd.f32 %v5243_v26, %v5210_v32 }
 0x910   : > { %v5083_v2 = vpop.f32.mrf.mxu3  ;;  %v5172_v27 = vpop.f32.mrf.mxu0 }
 0x911   : > { %v5084_v15 = vadd.f32 %v10074_v13, %v5083_v2  ;;  %5339 = vxpose.xlu2.b32.cont [12/16] %v5275_v48, 128 }
 0x913   : > { %v5173_v49 = vadd.f32 %v5172_v27, %v5084_v15 }
 0x915   : > { %v5211_v44 = vmul.f32 %v9708_v34, %v5173_v49 }
 0x917   : > { %v5276_v16 = vadd.f32 %v5244_v50, %v5211_v44 }
 0x918   : > { %v5085_v54 = vpop.f32.mrf.mxu3  ;;  %v5174_v60 = vpop.f32.mrf.mxu0 }
 0x919   : > { %v5086_v57 = vadd.f32 %v10074_v13, %v5085_v54  ;;  %5340 = vxpose.xlu2.b32.cont [13/16] %v5276_v16, 128 }
 0x91b   : > { %v5175_v0 = vadd.f32 %v5174_v60, %v5086_v57 }
 0x91d   : > { %v5212_v58 = vmul.f32 %v9708_v34, %v5175_v0 }
 0x91f   : > { %v5277_v56 = vadd.f32 %v5245_v23, %v5212_v58 }
 0x921   : > { %5341 = vxpose.xlu2.b32.cont [14/16] %v5277_v56, 128 }
 0x964   : > { %v5088_v59 = vpop.f32.mrf.mxu3  ;;  %v5177_v33 = vpop.f32.mrf.mxu0 }
 0x965   : > { %v5089_v61 = vadd.f32 %v10074_v13, %v5088_v59 }
 0x967   : > { %v5178_v3 = vadd.f32 %v5177_v33, %v5089_v61 }
 0x969   : > { %v5213_v8 = vmul.f32 %v9708_v34, %v5178_v3 }
 0x96b   : > { %v5278_v17 = vadd.f32 %v5246_v30, %v5213_v8 }
 0x96c   : > { %v5090_v39 = vpop.f32.mrf.mxu3  ;;  %v5179_v19 = vpop.f32.mrf.mxu0 }
 0x96d   : > { %v5091_v41 = vadd.f32 %v10074_v13, %v5090_v39  ;;  %5342 = vxpose.xlu2.b32.cont [15/16] %v5278_v17, 128 }
 0x96f   : > { %v5180_v4 = vadd.f32 %v5179_v19, %v5091_v41 }
 0x971   : > { %v5214_v22 = vmul.f32 %v9708_v34, %v5180_v4  ;;  %v5299_v34 = vpop.trf.xlu1 }
 0x972   : > { %5315 = vst [vmem:[%s10225_s17 + $0x18] sm:$0xff] %v5299_v34 }
 0x973   : > { %v5279_v6 = vadd.f32 %v5247_v55, %v5214_v22 }
 0x975   : > { %5343 = vxpose.xlu2.b32.end [16/16] %v5279_v6, 128 }
 0x979   : > { %v5300_v13 = vpop.trf.xlu1 }
 0x97a   : > { %5316 = vst [vmem:[%s10225_s17 + $0x20] sm:$0xff] %v5300_v13 }
 0x981   : > { %v5301_v42 = vpop.trf.xlu1 }
 0x982   : > { %5317 = vst [vmem:[%s10225_s17 + $0x28] sm:$0xff] %v5301_v42 }
 0x989   : > { %v5302_v12 = vpop.trf.xlu1 }
 0x98a   : > { %5318 = vst [vmem:[%s10225_s17 + $0x30] sm:$0xff] %v5302_v12 }
 0x991   : > { %v5303_v28 = vpop.trf.xlu1 }
 0x992   : > { %5319 = vst [vmem:[%s10225_s17 + $0x38] sm:$0xff] %v5303_v28 }
 0x996   : > { %v5344_v38 = vpop.trf.xlu2 }
 0x997   : > { %5880 = vst [vmem:[%s10225_s17 + $0x80] sm:$0xff] %v5344_v38 }
 0x999   : > { %v5304_v20 = vpop.trf.xlu1 }
 0x99a   : > { %5320 = vst [vmem:[%s10225_s17 + $0x40] sm:$0xff] %v5304_v20 }
 0x99e   : > { %v5345_v36 = vpop.trf.xlu2 }
 0x99f   : > { %5881 = vst [vmem:[%s10225_s17 + $0x88] sm:$0xff] %v5345_v36 }
 0x9a1   : > { %v5305_v31 = vpop.trf.xlu1 }
 0x9a2   : > { %5321 = vst [vmem:[%s10225_s17 + $0x48] sm:$0xff] %v5305_v31 }
 0x9a6   : > { %v5346_v43 = vpop.trf.xlu2 }
 0x9a7   : > { %5882 = vst [vmem:[%s10225_s17 + $0x90] sm:$0xff] %v5346_v43 }
 0x9a9   : > { %v5306_v11 = vpop.trf.xlu1 }
 0x9aa   : > { %5322 = vst [vmem:[%s10225_s17 + $0x50] sm:$0xff] %v5306_v11 }
 0x9ae   : > { %v5347_v53 = vpop.trf.xlu2 }
 0x9af   : > { %5883 = vst [vmem:[%s10225_s17 + $0x98] sm:$0xff] %v5347_v53 }
 0x9b1   : > { %v5307_v5 = vpop.trf.xlu1 }
 0x9b2   : > { %5323 = vst [vmem:[%s10225_s17 + $0x58] sm:$0xff] %v5307_v5 }
 0x9b6   : > { %v5348_v35 = vpop.trf.xlu2 }
 0x9b7   : > { %5884 = vst [vmem:[%s10225_s17 + $0xa0] sm:$0xff] %v5348_v35 }
 0x9b9   : > { %v5308_v40 = vpop.trf.xlu1 }
 0x9ba   : > { %5324 = vst [vmem:[%s10225_s17 + $0x60] sm:$0xff] %v5308_v40 }
 0x9be   : > { %v5349_v21 = vpop.trf.xlu2 }
 0x9bf   : > { %5885 = vst [vmem:[%s10225_s17 + $0xa8] sm:$0xff] %v5349_v21 }
 0x9c1   : > { %v5309_v18 = vpop.trf.xlu1 }
 0x9c2   : > { %5325 = vst [vmem:[%s10225_s17 + $0x68] sm:$0xff] %v5309_v18 }
 0x9c6   : > { %v5350_v25 = vpop.trf.xlu2 }
 0x9c7   : > { %5886 = vst [vmem:[%s10225_s17 + $0xb0] sm:$0xff] %v5350_v25 }
 0x9c9   : > { %v5310_v52 = vpop.trf.xlu1 }
 0x9ca   : > { %5326 = vst [vmem:[%s10225_s17 + $0x70] sm:$0xff] %v5310_v52 }
 0x9ce   : > { %v5351_v45 = vpop.trf.xlu2 }
 0x9cf   : > { %5887 = vst [vmem:[%s10225_s17 + $0xb8] sm:$0xff] %v5351_v45 }
 0x9d1   : > { %v5311_v14 = vpop.trf.xlu1 }
 0x9d2   : > { %5327 = vst [vmem:[%s10225_s17 + $0x78] sm:$0xff] %v5311_v14 }
 0x9d6   : > { %v5352_v7 = vpop.trf.xlu2 }
 0x9d7   : > { %5888 = vst [vmem:[%s10225_s17 + $0xc0] sm:$0xff] %v5352_v7 }
 0x9de   : > { %v5353_v1 = vpop.trf.xlu2 }
 0x9df   : > { %5889 = vst [vmem:[%s10225_s17 + $0xc8] sm:$0xff] %v5353_v1 }
 0x9e6   : > { %v5354_v47 = vpop.trf.xlu2 }
 0x9e7   : > { %5890 = vst [vmem:[%s10225_s17 + $0xd0] sm:$0xff] %v5354_v47 }
 0x9ee   : > { %v5355_v29 = vpop.trf.xlu2 }
 0x9ef   : > { %5891 = vst [vmem:[%s10225_s17 + $0xd8] sm:$0xff] %v5355_v29 }
 0x9f6   : > { %v5356_v37 = vpop.trf.xlu2 }
 0x9f7   : > { %5892 = vst [vmem:[%s10225_s17 + $0xe0] sm:$0xff] %v5356_v37 }
 0x9fe   : > { %v5357_v62 = vpop.trf.xlu2 }
 0x9ff   : > { %5893 = vst [vmem:[%s10225_s17 + $0xe8] sm:$0xff] %v5357_v62 }
 0xa06   : > { %v5358_v51 = vpop.trf.xlu2 }
 0xa07   : > { %5894 = vst [vmem:[%s10225_s17 + $0xf0] sm:$0xff] %v5358_v51 }
 0xa0e   : > { %v5359_v46 = vpop.trf.xlu2 }
 0xa0f   : > { %5895 = vst [vmem:[%s10225_s17 + $0xf8] sm:$0xff] %v5359_v46 }
 0xa10   : > { %6765 = shalt.err (!%p6762_p9)
}
 0xa11   : > { %s6841_s28 = smov 128   ;;  %s6842_s17 = smov 8  }
 0xa12   : > { %6032 = dma.vmem_to_hbm [thread:$0]  (%p7042_p5), %s5392_s29, 4096, %s5394_s10, %s5378_s13, %s6841_s28, %s6841_s28, %s6842_s17  }
 0xa13 PF: > { %s5408_s4 = sand.u32 1, %s6812_s18   ;;  %p10547_p10 = scmp.ge.s32.totalorder %s6824_s21, 2 }
 0xa14   : > { %s5409_s27 = scalar_lea.sflag [#allocation8], %s5408_s4 }
 0xa15   : > { %p6064_p13 = pnand %p10547_p10, %p7046_p6 }
 0xa17   : > { %p6065_p11 = pneg %p6064_p13 }
 0xa19   : > { %6807 = dma.done.wait (%p6065_p11), %s5409_s27, 4096  }
 0xa1a   : > { %6809 = vsyncadd (%p6065_p11), %s5409_s27, 4294963200  ;;  %p33_p0 = scmp.ge.s32.totalorder %s7016_s1, 4   ;;  %s10548_s18 = smov %s6816_s19 }
 0xa1b   : > { %s10549_s19 = smov %s6820_s20  ;;  %s10550_s20 = smov %s7027_s23 }
 0xa1c   : > { %s10551_s21 = smov %s7016_s1  ;;  %35 = sbr.rel (!%p33_p0) target bundleno = 21 (0x15), region = 160 }
 0xa21   :  { %5415 = vsyncpa [#allocation7], 1 }
 0xa22   :  { %5417 = vsyncpa [#allocation7 + $0x1], 1 }
 0xa23   :  { %5418 = vsyncpa [#allocation11], 1 }
 0xa24   :  { %5419 = vsyncpa [#allocation14], 1 }
 0xa25   :  { %5420 = vsyncpa [#allocation17], 1 }
 0xa26   :  { %5421 = vsyncpa [#allocation20], 1 }
 0xa27   :  { %5422 = vsyncpa [#allocation8], 1 }
 0xa28   :  { %5424 = vsyncpa [#allocation8 + $0x1], 1 }
 0xa29   :  { %5425 = vsyncpa [#allocation9], 1 }
 0xa2a   :  { %5427 = vsyncpa [#allocation9 + $0x1], 1 }

</bundles_post_ra>
